<compile_context>
chip_gen: v6e
topology: v6e:2x2x1
jax: 0.10.0
libtpu: 0.0.40
codegen_flags: <defaults>
</compile_context>

<pallas_src>
import functools
import math

import jax
import jax.numpy as jnp
from jax.experimental import pallas as pl
from jax.experimental.pallas import tpu as pltpu


# ----------------------------------------------------------------------------
# Small helpers shared by the kernels
# ----------------------------------------------------------------------------
def _mm(a, b):
    # MXU matmul: bf16 operands, f32 accumulation.
    return jnp.dot(a.astype(jnp.bfloat16), b.astype(jnp.bfloat16),
                   preferred_element_type=jnp.float32)


def _mm_nt(a, b):
    # a @ b.T without materializing the transpose.
    return jax.lax.dot_general(a.astype(jnp.bfloat16), b.astype(jnp.bfloat16),
                               (((1,), (1,)), ((), ())),
                               preferred_element_type=jnp.float32)


def _ln_f32(x, g, b, eps=1e-12):
    mu = jnp.mean(x, axis=-1, keepdims=True)
    var = jnp.mean(jnp.square(x - mu), axis=-1, keepdims=True)
    return (x - mu) * jax.lax.rsqrt(var + eps) * g + b


def _fullblock(shape):
    n = len(shape)
    return pl.BlockSpec(shape, lambda i, _n=n: (0,) * _n)


def _call(kernel, args, out_shape, out_dtype=jnp.float32):
    return pl.pallas_call(
        kernel,
        out_shape=jax.ShapeDtypeStruct(out_shape, out_dtype),
        grid=(1,),
        in_specs=[_fullblock(a.shape) for a in args],
        out_specs=_fullblock(out_shape),
        compiler_params=pltpu.CompilerParams(dimension_semantics=("arbitrary",)),
    )(*args)


# ----------------------------------------------------------------------------
# Pallas kernels
# ----------------------------------------------------------------------------
def _conv_relu_pool_kernel(x_ref, w_ref, b_ref, o_ref):
    # Fused 3x3 conv (matmul over im2col patches) + ReLU + 2x2 maxpool.
    # x_ref: (4, rows, K) -- the 4 pooling-window positions are the leading axis,
    # so the pool is an elementwise max of 4 conv results (no cross-lane work).
    out = None
    for i in range(4):
        h = jnp.maximum(_mm(x_ref[i], w_ref[...]) + b_ref[...], 0.0)
        out = h if out is None else jnp.maximum(out, h)
    o_ref[...] = out


def _conv_relu_gap_kernel(x_ref, w_ref, b_ref, o_ref, *, hw):
    # Fused 3x3 conv (matmul) + ReLU + AdaptiveAvgPool2d((1,1)), whole batch at once.
    h = jnp.maximum(_mm(x_ref[...], w_ref[...]) + b_ref[...], 0.0)   # (B*hw, Cout)
    B = o_ref.shape[0]
    means = [jnp.mean(h[b * hw:(b + 1) * hw, :], axis=0, keepdims=True)
             for b in range(B)]
    o_ref[...] = jnp.concatenate(means, axis=0)


def _lyric_and_head_kernel(x_ref, bias_ref, audio_ref, eg_ref, eb_ref,
                           wq_ref, wk_ref, wv_ref, bq_ref, bk_ref, bv_ref,
                           wo_ref, bo_ref, l1g_ref, l1b_ref,
                           wf1_ref, bf1_ref, wf2_ref, bf2_ref, l2g_ref, l2b_ref,
                           fcw_ref, fcb_ref, w1a_ref, w1l_ref, b1_ref,
                           w2_ref, b2_ref, o_ref, *, B, S, H, Dh, n_layers):
    """bert-tiny encoder + CLS pool + lyric FC + fusion + classifier in one kernel."""
    scale = 1.0 / math.sqrt(Dh)
    bias = bias_ref[...]                                     # (B, S) additive mask
    x = _ln_f32(x_ref[...], eg_ref[...], eb_ref[...])        # embedding LayerNorm

    for l in range(n_layers):
        # --- multi-head self-attention (weights pre-split per head; no lane slicing) ---
        rows = []
        for b in range(B):
            x_b = x[b * S:(b + 1) * S, :]                    # (S, D), sublane-aligned
            bias_b = bias[b:b + 1, :]                        # (1, S) -> broadcast on keys
            acc = None
            for h in range(H):
                i = l * H + h
                q = _mm(x_b, wq_ref[i]) + bq_ref[i]          # (S, Dh)
                k = _mm(x_b, wk_ref[i]) + bk_ref[i]
                v = _mm(x_b, wv_ref[i]) + bv_ref[i]
                s = _mm_nt(q, k) * scale + bias_b            # (S, S)
                s = s - jnp.max(s, axis=-1, keepdims=True)
                p = jnp.exp(s)
                p = p / jnp.sum(p, axis=-1, keepdims=True)
                ctx = _mm(p, v)                              # (S, Dh)
                head_out = _mm(ctx, wo_ref[i])               # (S, D) per-head out-proj
                acc = head_out if acc is None else acc + head_out
            rows.append(acc)
        attn = jnp.concatenate(rows, axis=0) + bo_ref[l]     # (B*S, D)
        x = _ln_f32(x + attn, l1g_ref[l], l1b_ref[l])

        # --- feed-forward ---
        # TODO(synk): HF bert-tiny uses erf-GELU; tanh-approx GELU used here (EUP-friendly).
        ff = jax.nn.gelu(_mm(x, wf1_ref[l]) + bf1_ref[l])    # (B*S, I)
        ff = _mm(ff, wf2_ref[l]) + bf2_ref[l]
        x = _ln_f32(x + ff, l2g_ref[l], l2b_ref[l])

    # --- CLS pooling + lyric FC (Dropout(0.5): inference -> identity) ---
    cls = jnp.concatenate([x[b * S:b * S + 1, :] for b in range(B)], axis=0)   # (B, D)
    lyric = _mm(cls, fcw_ref[...]) + fcb_ref[...]                              # (B, 64)

    # --- fusion ("concatenate" via split W1) + classifier head ---
    # Linear(128,64) -> ReLU -> Dropout(0.3)[identity] -> BatchNorm(eval, folded) -> Linear(64,10)
    audio = audio_ref[...]                                                     # (B, 64)
    hid = jnp.maximum(_mm(audio, w1a_ref[...]) + _mm(lyric, w1l_ref[...])
                      + b1_ref[...], 0.0)
    o_ref[...] = _mm(hid, w2_ref[...]) + b2_ref[...]


# ----------------------------------------------------------------------------
# Glue: im2col, fused-stage wrappers, full model
# ----------------------------------------------------------------------------
def im2col_3x3(x):
    """x: (B, H, W, C) NHWC; 3x3 conv, stride 1, padding 1 -> (B, H, W, 9*C)."""
    B, H, W, C = x.shape
    xp = jnp.pad(x, ((0, 0), (1, 1), (1, 1), (0, 0)))
    cols = [xp[:, dy:dy + H, dx:dx + W, :] for dy in range(3) for dx in range(3)]
    return jnp.concatenate(cols, axis=-1)


def conv_relu_pool(x, w, b):
    """x: (B, H, W, Cin) -> conv3x3(pad=1) + ReLU + maxpool2x2 -> (B, H/2, W/2, Cout)."""
    B, H, W, C = x.shape
    Ho, Wo = H // 2, W // 2
    K = 9 * C
    patches = im2col_3x3(x)                                        # (B, H, W, 9C)
    p = patches.reshape(B, Ho, 2, Wo, 2, K).transpose(2, 4, 0, 1, 3, 5)
    p = p.reshape(4, B * Ho * Wo, K)                               # window-major
    Cout = w.shape[1]
    out = _call(_conv_relu_pool_kernel, [p, w, b], (B * Ho * Wo, Cout))
    return out.reshape(B, Ho, Wo, Cout)


def conv_relu_gap(x, w, b):
    """x: (B, H, W, Cin) -> conv3x3 + ReLU + global average pool -> (B, Cout)."""
    B, H, W, C = x.shape
    hw = H * W
    patches = im2col_3x3(x).reshape(B * hw, 9 * C)
    Cout = w.shape[1]
    return _call(functools.partial(_conv_relu_gap_kernel, hw=hw),
                 [patches, w, b], (B, Cout))


def fused_lyric_and_head(emb, mask_bias, audio_feat, p, *, B, S):
    args = [emb, mask_bias, audio_feat,
            p["emb_ln_g"], p["emb_ln_b"],
            p["wq"], p["wk"], p["wv"], p["bq"], p["bk"], p["bv"],
            p["wo"], p["bo"], p["ln1_g"], p["ln1_b"],
            p["w_ff1"], p["b_ff1"], p["w_ff2"], p["b_ff2"],
            p["ln2_g"], p["ln2_b"],
            p["lyric_fc_w"], p["lyric_fc_b"],
            p["cls_w1a"], p["cls_w1l"], p["cls_b1"],
            p["cls_w2"], p["cls_b2"]]
    kern = functools.partial(_lyric_and_head_kernel, B=B, S=S, H=2, Dh=64, n_layers=2)
    return _call(kern, args, (B, p["cls_w2"].shape[1]))


def light_music_genre_classifier(params, audio_input, input_ids, attention_mask,
                                 fusion_type="concatenate"):
    # fusion_type="sum" is shape-inconsistent with nn.Linear(128,64) in the reference
    # module as well; only the default "concatenate" path is implemented.
    x = jnp.transpose(audio_input, (0, 2, 3, 1)).astype(jnp.float32)   # (B,16,16,1) NHWC
    B = x.shape[0]

    # --- LightAudioCNN: three fused pallas_calls ---
    h1 = conv_relu_pool(x, params["conv1_w"], params["conv1_b"])       # (B, 8, 8, 16)
    h2 = conv_relu_pool(h1, params["conv2_w"], params["conv2_b"])      # (B, 4, 4, 32)
    audio_features = conv_relu_gap(h2, params["conv3_w"], params["conv3_b"])  # (B, 64)

    # --- LightLyricProcessor + fusion + classifier: one fused pallas_call ---
    S = input_ids.shape[1]
    # Embedding table stays in HBM; XLA gathers only the B*S rows.
    emb = (jnp.take(params["word_emb"], input_ids.reshape(-1), axis=0).astype(jnp.float32)
           + jnp.tile(params["pos_emb"][:S], (B, 1))
           + params["type_emb"][0][None, :])                           # (B*S, 128) f32
    mask_bias = (1.0 - attention_mask.astype(jnp.float32)) * (-1e9)    # (B, S)
    return fused_lyric_and_head(emb, mask_bias, audio_features, params, B=B, S=S)


# ----------------------------------------------------------------------------
# Parameters: PyTorch-semantic init + one-time kernel-layout preparation
# ----------------------------------------------------------------------------
def init_params(key):
    keys = iter(jax.random.split(key, 64))

    def normal(shape, scale=0.02):
        return scale * jax.random.normal(next(keys), shape, dtype=jnp.float32)

    p = {}
    p["conv1_w"] = normal((3, 3, 1, 16), 0.1).reshape(9, 16)
    p["conv1_b"] = normal((16,), 0.1)
    p["conv2_w"] = normal((3, 3, 16, 32), 0.05).reshape(144, 32)
    p["conv2_b"] = normal((32,), 0.05)
    p["conv3_w"] = normal((3, 3, 32, 64), 0.05).reshape(288, 64)
    p["conv3_b"] = normal((64,), 0.05)
    p["lyric_fc_w"] = normal((128, 64))
    p["lyric_fc_b"] = jnp.zeros((64,), jnp.float32)
    p["cls_w1"] = normal((128, 64), 0.05)
    p["cls_b1"] = jnp.zeros((64,), jnp.float32)
    p["bn_gamma"] = jnp.ones((64,), jnp.float32)
    p["bn_beta"] = jnp.zeros((64,), jnp.float32)
    p["bn_mean"] = jnp.zeros((64,), jnp.float32)   # BatchNorm1d eval running stats
    p["bn_var"] = jnp.ones((64,), jnp.float32)
    p["cls_w2"] = normal((64, 10), 0.05)
    p["cls_b2"] = jnp.zeros((10,), jnp.float32)

    D, I, V, P, T = 128, 512, 30522, 512, 2
    bert = {
        "word_emb": normal((V, D)),
        "pos_emb": normal((P, D)),
        "type_emb": normal((T, D)),
        "emb_ln_g": jnp.ones((D,), jnp.float32),
        "emb_ln_b": jnp.zeros((D,), jnp.float32),
        "layers": [],
    }
    for _ in range(2):
        bert["layers"].append({
            "wq": normal((D, D)), "bq": jnp.zeros((D,), jnp.float32),
            "wk": normal((D, D)), "bk": jnp.zeros((D,), jnp.float32),
            "wv": normal((D, D)), "bv": jnp.zeros((D,), jnp.float32),
            "wo": normal((D, D)), "bo": jnp.zeros((D,), jnp.float32),
            "ln1_g": jnp.ones((D,), jnp.float32), "ln1_b": jnp.zeros((D,), jnp.float32),
            "w_ff1": normal((D, I)), "b_ff1": jnp.zeros((I,), jnp.float32),
            "w_ff2": normal((I, D)), "b_ff2": jnp.zeros((D,), jnp.float32),
            "ln2_g": jnp.ones((D,), jnp.float32), "ln2_b": jnp.zeros((D,), jnp.float32),
        })
    p["bert"] = bert
    return p


def prepare_params(p):
    """One-time transform into the fused-kernel layout:
      - matmul weights -> bf16 (MXU operands); biases / LN / softmax math stay f32
      - eval-mode BatchNorm folded into the final classifier Linear (exact for inference)
      - classifier Linear(128,64) weight split into audio/lyric halves (no in-kernel concat)
      - BERT layer weights stacked; Q/K/V/O split per attention head (no 64-lane slicing)
    """
    bf = lambda a: a.astype(jnp.bfloat16)
    D, H, Dh = 128, 2, 64
    f = {}

    # audio CNN (conv as matmul over 3x3 im2col patches)
    for i in (1, 2, 3):
        f[f"conv{i}_w"] = bf(p[f"conv{i}_w"])
        f[f"conv{i}_b"] = p[f"conv{i}_b"].reshape(1, -1)

    # lyric FC
    f["lyric_fc_w"] = bf(p["lyric_fc_w"])
    f["lyric_fc_b"] = p["lyric_fc_b"].reshape(1, -1)

    # classifier head: split W1, fold eval-mode BatchNorm into W2/b2
    f["cls_w1a"] = bf(p["cls_w1"][:64])     # audio half of concat
    f["cls_w1l"] = bf(p["cls_w1"][64:])     # lyric half of concat
    f["cls_b1"] = p["cls_b1"].reshape(1, -1)
    inv = p["bn_gamma"] * jax.lax.rsqrt(p["bn_var"] + 1e-5)
    f["cls_w2"] = bf(p["cls_w2"] * inv[:, None])
    f["cls_b2"] = (p["cls_b2"]
                   + (p["bn_beta"] - p["bn_mean"] * inv) @ p["cls_w2"]).reshape(1, -1)

    # bert-tiny
    b = p["bert"]
    f["word_emb"] = bf(b["word_emb"])       # stays in HBM; XLA gathers B*S rows
    f["pos_emb"] = b["pos_emb"]
    f["type_emb"] = b["type_emb"]
    f["emb_ln_g"] = b["emb_ln_g"].reshape(1, D)
    f["emb_ln_b"] = b["emb_ln_b"].reshape(1, D)
    layers = b["layers"]

    def per_head_in(w):   # (D, D) -> (H, D, Dh): head h uses output cols [h*Dh:(h+1)*Dh]
        return w.reshape(D, H, Dh).transpose(1, 0, 2)

    f["wq"] = bf(jnp.concatenate([per_head_in(lp["wq"]) for lp in layers], 0))  # (L*H,D,Dh)
    f["wk"] = bf(jnp.concatenate([per_head_in(lp["wk"]) for lp in layers], 0))
    f["wv"] = bf(jnp.concatenate([per_head_in(lp["wv"]) for lp in layers], 0))
    f["bq"] = jnp.concatenate([lp["bq"].reshape(H, 1, Dh) for lp in layers], 0)  # (L*H,1,Dh)
    f["bk"] = jnp.concatenate([lp["bk"].reshape(H, 1, Dh) for lp in layers], 0)
    f["bv"] = jnp.concatenate([lp["bv"].reshape(H, 1, Dh) for lp in layers], 0)
    f["wo"] = bf(jnp.concatenate([lp["wo"].reshape(H, Dh, D) for lp in layers], 0))  # (L*H,Dh,D)
    f["bo"] = jnp.stack([lp["bo"].reshape(1, D) for lp in layers])                   # (L,1,D)
    f["ln1_g"] = jnp.stack([lp["ln1_g"].reshape(1, D) for lp in layers])
    f["ln1_b"] = jnp.stack([lp["ln1_b"].reshape(1, D) for lp in layers])
    f["w_ff1"] = bf(jnp.stack([lp["w_ff1"] for lp in layers]))                       # (L,D,I)
    f["b_ff1"] = jnp.stack([lp["b_ff1"].reshape(1, -1) for lp in layers])            # (L,1,I)
    f["w_ff2"] = bf(jnp.stack([lp["w_ff2"] for lp in layers]))                       # (L,I,D)
    f["b_ff2"] = jnp.stack([lp["b_ff2"].reshape(1, D) for lp in layers])
    f["ln2_g"] = jnp.stack([lp["ln2_g"].reshape(1, D) for lp in layers])
    f["ln2_b"] = jnp.stack([lp["ln2_b"].reshape(1, D) for lp in layers])
    return f


# ----------------------------------------------------------------------------
if __name__ == "__main__":
    key = jax.random.PRNGKey(0)
    k_audio, k_ids, k_params = jax.random.split(key, 3)

    B, S = 2, 8
    audio_input = jax.random.normal(k_audio, (B, 1, 16, 16), dtype=jnp.float32)  # NCHW
    input_ids = jax.random.randint(k_ids, (B, S), 0, 30522, dtype=jnp.int32)
    attention_mask = jnp.array([[1, 1, 1, 1, 1, 1, 1, 1],
                                [1, 1, 1, 1, 1, 0, 0, 0]], dtype=jnp.int32)

    raw_params = init_params(k_params)
    params = prepare_params(raw_params)        # one-time fold/stack/bf16 cast

    fwd = jax.jit(light_music_genre_classifier)
    logits = fwd(params, audio_input, input_ids, attention_mask)
    logits = jax.block_until_ready(logits)

    assert logits.shape == (B, 10) and logits.dtype == jnp.float32
    assert bool(jnp.all(jnp.isfinite(logits)))
    print("KERNEL_OK")
</pallas_src>

<mosaic_0001>
module attributes {stable_mosaic.version = 11 : i64} {
  func.func @_conv_relu_pool_kernel(%arg0: i32, %arg1: memref<4x128x9xf32, #tpu.memory_space<vmem>>, %arg2: memref<9x16xbf16, #tpu.memory_space<vmem>>, %arg3: memref<1x16xf32, #tpu.memory_space<vmem>>, %arg4: memref<128x16xf32, #tpu.memory_space<vmem>>) attributes {dimension_semantics = [#tpu.dimension_semantics<arbitrary>], iteration_bounds = array<i64: 1>, scalar_prefetch = 0 : i64, scratch_operands = 0 : i64, tpu.core_type = #tpu.core_type<tc>, window_params = [{pipeline_mode = #tpu.pipeline_mode<synchronous>, transform_indices = @transform_0, window_bounds = array<i64: 4, 128, 9>}, {pipeline_mode = #tpu.pipeline_mode<synchronous>, transform_indices = @transform_1, window_bounds = array<i64: 9, 16>}, {pipeline_mode = #tpu.pipeline_mode<synchronous>, transform_indices = @transform_2, window_bounds = array<i64: 1, 16>}, {pipeline_mode = #tpu.pipeline_mode<synchronous>, transform_indices = @transform_3, window_bounds = array<i64: 128, 16>}]} {
    %c0 = arith.constant 0 : index
    %c0_0 = arith.constant 0 : index
    %c0_1 = arith.constant 0 : index
    %0 = vector.load %arg1[%c0, %c0_0, %c0_1] : memref<4x128x9xf32, #tpu.memory_space<vmem>>, vector<1x128x9xf32>
    %1 = vector.shape_cast %0 : vector<1x128x9xf32> to vector<128x9xf32>
    %c0_2 = arith.constant 0 : index
    %c0_3 = arith.constant 0 : index
    %2 = vector.load %arg2[%c0_2, %c0_3] : memref<9x16xbf16, #tpu.memory_space<vmem>>, vector<9x16xbf16>
    %3 = arith.truncf %1 : vector<128x9xf32> to vector<128x9xbf16>
    %cst = arith.constant dense<0.000000e+00> : vector<128x16xf32>
    %4 = tpu.matmul %3, %2, %cst {dimension_numbers = #tpu.dot_dimension_numbers<[1], [0], [0], [1], [0, 0, 1, 1], [], []>} : vector<128x9xbf16>, vector<9x16xbf16>, vector<128x16xf32> -> vector<128x16xf32>
    %c0_4 = arith.constant 0 : index
    %c0_5 = arith.constant 0 : index
    %5 = vector.load %arg3[%c0_4, %c0_5] : memref<1x16xf32, #tpu.memory_space<vmem>>, vector<1x16xf32>
    %6 = vector.broadcast %5 : vector<1x16xf32> to vector<128x16xf32>
    %7 = arith.addf %4, %6 : vector<128x16xf32>
    %cst_6 = arith.constant 0.000000e+00 : f32
    %8 = vector.broadcast %cst_6 : f32 to vector<128x16xf32>
    %9 = arith.maximumf %7, %8 : vector<128x16xf32>
    %c1 = arith.constant 1 : index
    %c0_7 = arith.constant 0 : index
    %c0_8 = arith.constant 0 : index
    %10 = vector.load %arg1[%c1, %c0_7, %c0_8] : memref<4x128x9xf32, #tpu.memory_space<vmem>>, vector<1x128x9xf32>
    %11 = vector.shape_cast %10 : vector<1x128x9xf32> to vector<128x9xf32>
    %c0_9 = arith.constant 0 : index
    %c0_10 = arith.constant 0 : index
    %12 = vector.load %arg2[%c0_9, %c0_10] : memref<9x16xbf16, #tpu.memory_space<vmem>>, vector<9x16xbf16>
    %13 = arith.truncf %11 : vector<128x9xf32> to vector<128x9xbf16>
    %cst_11 = arith.constant dense<0.000000e+00> : vector<128x16xf32>
    %14 = tpu.matmul %13, %12, %cst_11 {dimension_numbers = #tpu.dot_dimension_numbers<[1], [0], [0], [1], [0, 0, 1, 1], [], []>} : vector<128x9xbf16>, vector<9x16xbf16>, vector<128x16xf32> -> vector<128x16xf32>
    %c0_12 = arith.constant 0 : index
    %c0_13 = arith.constant 0 : index
    %15 = vector.load %arg3[%c0_12, %c0_13] : memref<1x16xf32, #tpu.memory_space<vmem>>, vector<1x16xf32>
    %16 = vector.broadcast %15 : vector<1x16xf32> to vector<128x16xf32>
    %17 = arith.addf %14, %16 : vector<128x16xf32>
    %cst_14 = arith.constant 0.000000e+00 : f32
    %18 = vector.broadcast %cst_14 : f32 to vector<128x16xf32>
    %19 = arith.maximumf %17, %18 : vector<128x16xf32>
    %20 = arith.maximumf %9, %19 : vector<128x16xf32>
    %c2 = arith.constant 2 : index
    %c0_15 = arith.constant 0 : index
    %c0_16 = arith.constant 0 : index
    %21 = vector.load %arg1[%c2, %c0_15, %c0_16] : memref<4x128x9xf32, #tpu.memory_space<vmem>>, vector<1x128x9xf32>
    %22 = vector.shape_cast %21 : vector<1x128x9xf32> to vector<128x9xf32>
    %c0_17 = arith.constant 0 : index
    %c0_18 = arith.constant 0 : index
    %23 = vector.load %arg2[%c0_17, %c0_18] : memref<9x16xbf16, #tpu.memory_space<vmem>>, vector<9x16xbf16>
    %24 = arith.truncf %22 : vector<128x9xf32> to vector<128x9xbf16>
    %cst_19 = arith.constant dense<0.000000e+00> : vector<128x16xf32>
    %25 = tpu.matmul %24, %23, %cst_19 {dimension_numbers = #tpu.dot_dimension_numbers<[1], [0], [0], [1], [0, 0, 1, 1], [], []>} : vector<128x9xbf16>, vector<9x16xbf16>, vector<128x16xf32> -> vector<128x16xf32>
    %c0_20 = arith.constant 0 : index
    %c0_21 = arith.constant 0 : index
    %26 = vector.load %arg3[%c0_20, %c0_21] : memref<1x16xf32, #tpu.memory_space<vmem>>, vector<1x16xf32>
    %27 = vector.broadcast %26 : vector<1x16xf32> to vector<128x16xf32>
    %28 = arith.addf %25, %27 : vector<128x16xf32>
    %cst_22 = arith.constant 0.000000e+00 : f32
    %29 = vector.broadcast %cst_22 : f32 to vector<128x16xf32>
    %30 = arith.maximumf %28, %29 : vector<128x16xf32>
    %31 = arith.maximumf %20, %30 : vector<128x16xf32>
    %c3 = arith.constant 3 : index
    %c0_23 = arith.constant 0 : index
    %c0_24 = arith.constant 0 : index
    %32 = vector.load %arg1[%c3, %c0_23, %c0_24] : memref<4x128x9xf32, #tpu.memory_space<vmem>>, vector<1x128x9xf32>
    %33 = vector.shape_cast %32 : vector<1x128x9xf32> to vector<128x9xf32>
    %c0_25 = arith.constant 0 : index
    %c0_26 = arith.constant 0 : index
    %34 = vector.load %arg2[%c0_25, %c0_26] : memref<9x16xbf16, #tpu.memory_space<vmem>>, vector<9x16xbf16>
    %35 = arith.truncf %33 : vector<128x9xf32> to vector<128x9xbf16>
    %cst_27 = arith.constant dense<0.000000e+00> : vector<128x16xf32>
    %36 = tpu.matmul %35, %34, %cst_27 {dimension_numbers = #tpu.dot_dimension_numbers<[1], [0], [0], [1], [0, 0, 1, 1], [], []>} : vector<128x9xbf16>, vector<9x16xbf16>, vector<128x16xf32> -> vector<128x16xf32>
    %c0_28 = arith.constant 0 : index
    %c0_29 = arith.constant 0 : index
    %37 = vector.load %arg3[%c0_28, %c0_29] : memref<1x16xf32, #tpu.memory_space<vmem>>, vector<1x16xf32>
    %38 = vector.broadcast %37 : vector<1x16xf32> to vector<128x16xf32>
    %39 = arith.addf %36, %38 : vector<128x16xf32>
    %cst_30 = arith.constant 0.000000e+00 : f32
    %40 = vector.broadcast %cst_30 : f32 to vector<128x16xf32>
    %41 = arith.maximumf %39, %40 : vector<128x16xf32>
    %42 = arith.maximumf %31, %41 : vector<128x16xf32>
    %c0_31 = arith.constant 0 : index
    %c0_32 = arith.constant 0 : index
    %43 = vector.load %arg4[%c0_31, %c0_32] : memref<128x16xf32, #tpu.memory_space<vmem>>, vector<128x16xf32>
    tpu.vector_store %arg4[%c0_31, %c0_32], %42 {strides = array<i32>} : memref<128x16xf32, #tpu.memory_space<vmem>>, vector<128x16xf32>,
    return
  }
  func.func @transform_0(%arg0: i32) -> (i32, i32, i32) {
    %c0_i32 = arith.constant 0 : i32
    %c0_i32_0 = arith.constant 0 : i32
    %c0_i32_1 = arith.constant 0 : i32
    %c0_i32_2 = arith.constant 0 : i32
    return %c0_i32, %c0_i32_0, %c0_i32_1 : i32, i32, i32
  }
  func.func @transform_1(%arg0: i32) -> (i32, i32) {
    %c0_i32 = arith.constant 0 : i32
    %c0_i32_0 = arith.constant 0 : i32
    %c0_i32_1 = arith.constant 0 : i32
    return %c0_i32, %c0_i32_0 : i32, i32
  }
  func.func @transform_2(%arg0: i32) -> (i32, i32) {
    %c0_i32 = arith.constant 0 : i32
    %c0_i32_0 = arith.constant 0 : i32
    %c0_i32_1 = arith.constant 0 : i32
    return %c0_i32, %c0_i32_0 : i32, i32
  }
  func.func @transform_3(%arg0: i32) -> (i32, i32) {
    %c0_i32 = arith.constant 0 : i32
    %c0_i32_0 = arith.constant 0 : i32
    %c0_i32_1 = arith.constant 0 : i32
    return %c0_i32, %c0_i32_0 : i32, i32
  }
}

module attributes {stable_mosaic.version = 11 : i64} {
  func.func @_conv_relu_pool_kernel(%arg0: i32, %arg1: memref<4x32x144xf32, #tpu.memory_space<vmem>>, %arg2: memref<144x32xbf16, #tpu.memory_space<vmem>>, %arg3: memref<1x32xf32, #tpu.memory_space<vmem>>, %arg4: memref<32x32xf32, #tpu.memory_space<vmem>>) attributes {dimension_semantics = [#tpu.dimension_semantics<arbitrary>], iteration_bounds = array<i64: 1>, scalar_prefetch = 0 : i64, scratch_operands = 0 : i64, tpu.core_type = #tpu.core_type<tc>, window_params = [{pipeline_mode = #tpu.pipeline_mode<synchronous>, transform_indices = @transform_0, window_bounds = array<i64: 4, 32, 144>}, {pipeline_mode = #tpu.pipeline_mode<synchronous>, transform_indices = @transform_1, window_bounds = array<i64: 144, 32>}, {pipeline_mode = #tpu.pipeline_mode<synchronous>, transform_indices = @transform_2, window_bounds = array<i64: 1, 32>}, {pipeline_mode = #tpu.pipeline_mode<synchronous>, transform_indices = @transform_3, window_bounds = array<i64: 32, 32>}]} {
    %c0 = arith.constant 0 : index
    %c0_0 = arith.constant 0 : index
    %c0_1 = arith.constant 0 : index
    %0 = vector.load %arg1[%c0, %c0_0, %c0_1] : memref<4x32x144xf32, #tpu.memory_space<vmem>>, vector<1x32x144xf32>
    %1 = vector.shape_cast %0 : vector<1x32x144xf32> to vector<32x144xf32>
    %c0_2 = arith.constant 0 : index
    %c0_3 = arith.constant 0 : index
    %2 = vector.load %arg2[%c0_2, %c0_3] : memref<144x32xbf16, #tpu.memory_space<vmem>>, vector<144x32xbf16>
    %3 = arith.truncf %1 : vector<32x144xf32> to vector<32x144xbf16>
    %cst = arith.constant dense<0.000000e+00> : vector<32x32xf32>
    %4 = tpu.matmul %3, %2, %cst {dimension_numbers = #tpu.dot_dimension_numbers<[1], [0], [0], [1], [0, 0, 1, 1], [], []>} : vector<32x144xbf16>, vector<144x32xbf16>, vector<32x32xf32> -> vector<32x32xf32>
    %c0_4 = arith.constant 0 : index
    %c0_5 = arith.constant 0 : index
    %5 = vector.load %arg3[%c0_4, %c0_5] : memref<1x32xf32, #tpu.memory_space<vmem>>, vector<1x32xf32>
    %6 = vector.broadcast %5 : vector<1x32xf32> to vector<32x32xf32>
    %7 = arith.addf %4, %6 : vector<32x32xf32>
    %cst_6 = arith.constant 0.000000e+00 : f32
    %8 = vector.broadcast %cst_6 : f32 to vector<32x32xf32>
    %9 = arith.maximumf %7, %8 : vector<32x32xf32>
    %c1 = arith.constant 1 : index
    %c0_7 = arith.constant 0 : index
    %c0_8 = arith.constant 0 : index
    %10 = vector.load %arg1[%c1, %c0_7, %c0_8] : memref<4x32x144xf32, #tpu.memory_space<vmem>>, vector<1x32x144xf32>
    %11 = vector.shape_cast %10 : vector<1x32x144xf32> to vector<32x144xf32>
    %c0_9 = arith.constant 0 : index
    %c0_10 = arith.constant 0 : index
    %12 = vector.load %arg2[%c0_9, %c0_10] : memref<144x32xbf16, #tpu.memory_space<vmem>>, vector<144x32xbf16>
    %13 = arith.truncf %11 : vector<32x144xf32> to vector<32x144xbf16>
    %cst_11 = arith.constant dense<0.000000e+00> : vector<32x32xf32>
    %14 = tpu.matmul %13, %12, %cst_11 {dimension_numbers = #tpu.dot_dimension_numbers<[1], [0], [0], [1], [0, 0, 1, 1], [], []>} : vector<32x144xbf16>, vector<144x32xbf16>, vector<32x32xf32> -> vector<32x32xf32>
    %c0_12 = arith.constant 0 : index
    %c0_13 = arith.constant 0 : index
    %15 = vector.load %arg3[%c0_12, %c0_13] : memref<1x32xf32, #tpu.memory_space<vmem>>, vector<1x32xf32>
    %16 = vector.broadcast %15 : vector<1x32xf32> to vector<32x32xf32>
    %17 = arith.addf %14, %16 : vector<32x32xf32>
    %cst_14 = arith.constant 0.000000e+00 : f32
    %18 = vector.broadcast %cst_14 : f32 to vector<32x32xf32>
    %19 = arith.maximumf %17, %18 : vector<32x32xf32>
    %20 = arith.maximumf %9, %19 : vector<32x32xf32>
    %c2 = arith.constant 2 : index
    %c0_15 = arith.constant 0 : index
    %c0_16 = arith.constant 0 : index
    %21 = vector.load %arg1[%c2, %c0_15, %c0_16] : memref<4x32x144xf32, #tpu.memory_space<vmem>>, vector<1x32x144xf32>
    %22 = vector.shape_cast %21 : vector<1x32x144xf32> to vector<32x144xf32>
    %c0_17 = arith.constant 0 : index
    %c0_18 = arith.constant 0 : index
    %23 = vector.load %arg2[%c0_17, %c0_18] : memref<144x32xbf16, #tpu.memory_space<vmem>>, vector<144x32xbf16>
    %24 = arith.truncf %22 : vector<32x144xf32> to vector<32x144xbf16>
    %cst_19 = arith.constant dense<0.000000e+00> : vector<32x32xf32>
    %25 = tpu.matmul %24, %23, %cst_19 {dimension_numbers = #tpu.dot_dimension_numbers<[1], [0], [0], [1], [0, 0, 1, 1], [], []>} : vector<32x144xbf16>, vector<144x32xbf16>, vector<32x32xf32> -> vector<32x32xf32>
    %c0_20 = arith.constant 0 : index
    %c0_21 = arith.constant 0 : index
    %26 = vector.load %arg3[%c0_20, %c0_21] : memref<1x32xf32, #tpu.memory_space<vmem>>, vector<1x32xf32>
    %27 = vector.broadcast %26 : vector<1x32xf32> to vector<32x32xf32>
    %28 = arith.addf %25, %27 : vector<32x32xf32>
    %cst_22 = arith.constant 0.000000e+00 : f32
    %29 = vector.broadcast %cst_22 : f32 to vector<32x32xf32>
    %30 = arith.maximumf %28, %29 : vector<32x32xf32>
    %31 = arith.maximumf %20, %30 : vector<32x32xf32>
    %c3 = arith.constant 3 : index
    %c0_23 = arith.constant 0 : index
    %c0_24 = arith.constant 0 : index
    %32 = vector.load %arg1[%c3, %c0_23, %c0_24] : memref<4x32x144xf32, #tpu.memory_space<vmem>>, vector<1x32x144xf32>
    %33 = vector.shape_cast %32 : vector<1x32x144xf32> to vector<32x144xf32>
    %c0_25 = arith.constant 0 : index
    %c0_26 = arith.constant 0 : index
    %34 = vector.load %arg2[%c0_25, %c0_26] : memref<144x32xbf16, #tpu.memory_space<vmem>>, vector<144x32xbf16>
    %35 = arith.truncf %33 : vector<32x144xf32> to vector<32x144xbf16>
    %cst_27 = arith.constant dense<0.000000e+00> : vector<32x32xf32>
    %36 = tpu.matmul %35, %34, %cst_27 {dimension_numbers = #tpu.dot_dimension_numbers<[1], [0], [0], [1], [0, 0, 1, 1], [], []>} : vector<32x144xbf16>, vector<144x32xbf16>, vector<32x32xf32> -> vector<32x32xf32>
    %c0_28 = arith.constant 0 : index
    %c0_29 = arith.constant 0 : index
    %37 = vector.load %arg3[%c0_28, %c0_29] : memref<1x32xf32, #tpu.memory_space<vmem>>, vector<1x32xf32>
    %38 = vector.broadcast %37 : vector<1x32xf32> to vector<32x32xf32>
    %39 = arith.addf %36, %38 : vector<32x32xf32>
    %cst_30 = arith.constant 0.000000e+00 : f32
    %40 = vector.broadcast %cst_30 : f32 to vector<32x32xf32>
    %41 = arith.maximumf %39, %40 : vector<32x32xf32>
    %42 = arith.maximumf %31, %41 : vector<32x32xf32>
    %c0_31 = arith.constant 0 : index
    %c0_32 = arith.constant 0 : index
    %43 = vector.load %arg4[%c0_31, %c0_32] : memref<32x32xf32, #tpu.memory_space<vmem>>, vector<32x32xf32>
    tpu.vector_store %arg4[%c0_31, %c0_32], %42 {strides = array<i32>} : memref<32x32xf32, #tpu.memory_space<vmem>>, vector<32x32xf32>,
    return
  }
  func.func @transform_0(%arg0: i32) -> (i32, i32, i32) {
    %c0_i32 = arith.constant 0 : i32
    %c0_i32_0 = arith.constant 0 : i32
    %c0_i32_1 = arith.constant 0 : i32
    %c0_i32_2 = arith.constant 0 : i32
    return %c0_i32, %c0_i32_0, %c0_i32_1 : i32, i32, i32
  }
  func.func @transform_1(%arg0: i32) -> (i32, i32) {
    %c0_i32 = arith.constant 0 : i32
    %c0_i32_0 = arith.constant 0 : i32
    %c0_i32_1 = arith.constant 0 : i32
    return %c0_i32, %c0_i32_0 : i32, i32
  }
  func.func @transform_2(%arg0: i32) -> (i32, i32) {
    %c0_i32 = arith.constant 0 : i32
    %c0_i32_0 = arith.constant 0 : i32
    %c0_i32_1 = arith.constant 0 : i32
    return %c0_i32, %c0_i32_0 : i32, i32
  }
  func.func @transform_3(%arg0: i32) -> (i32, i32) {
    %c0_i32 = arith.constant 0 : i32
    %c0_i32_0 = arith.constant 0 : i32
    %c0_i32_1 = arith.constant 0 : i32
    return %c0_i32, %c0_i32_0 : i32, i32
  }
}

module attributes {stable_mosaic.version = 11 : i64} {
  func.func @_conv_relu_gap_kernel(%arg0: i32, %arg1: memref<32x288xf32, #tpu.memory_space<vmem>>, %arg2: memref<288x64xbf16, #tpu.memory_space<vmem>>, %arg3: memref<1x64xf32, #tpu.memory_space<vmem>>, %arg4: memref<2x64xf32, #tpu.memory_space<vmem>>) attributes {dimension_semantics = [#tpu.dimension_semantics<arbitrary>], iteration_bounds = array<i64: 1>, scalar_prefetch = 0 : i64, scratch_operands = 0 : i64, tpu.core_type = #tpu.core_type<tc>, window_params = [{pipeline_mode = #tpu.pipeline_mode<synchronous>, transform_indices = @transform_0, window_bounds = array<i64: 32, 288>}, {pipeline_mode = #tpu.pipeline_mode<synchronous>, transform_indices = @transform_1, window_bounds = array<i64: 288, 64>}, {pipeline_mode = #tpu.pipeline_mode<synchronous>, transform_indices = @transform_2, window_bounds = array<i64: 1, 64>}, {pipeline_mode = #tpu.pipeline_mode<synchronous>, transform_indices = @transform_3, window_bounds = array<i64: 2, 64>}]} {
    %c0 = arith.constant 0 : index
    %c0_0 = arith.constant 0 : index
    %0 = vector.load %arg1[%c0, %c0_0] : memref<32x288xf32, #tpu.memory_space<vmem>>, vector<32x288xf32>
    %c0_1 = arith.constant 0 : index
    %c0_2 = arith.constant 0 : index
    %1 = vector.load %arg2[%c0_1, %c0_2] : memref<288x64xbf16, #tpu.memory_space<vmem>>, vector<288x64xbf16>
    %2 = arith.truncf %0 : vector<32x288xf32> to vector<32x288xbf16>
    %cst = arith.constant dense<0.000000e+00> : vector<32x64xf32>
    %3 = tpu.matmul %2, %1, %cst {dimension_numbers = #tpu.dot_dimension_numbers<[1], [0], [0], [1], [0, 0, 1, 1], [], []>} : vector<32x288xbf16>, vector<288x64xbf16>, vector<32x64xf32> -> vector<32x64xf32>
    %c0_3 = arith.constant 0 : index
    %c0_4 = arith.constant 0 : index
    %4 = vector.load %arg3[%c0_3, %c0_4] : memref<1x64xf32, #tpu.memory_space<vmem>>, vector<1x64xf32>
    %5 = vector.broadcast %4 : vector<1x64xf32> to vector<32x64xf32>
    %6 = arith.addf %3, %5 : vector<32x64xf32>
    %cst_5 = arith.constant 0.000000e+00 : f32
    %7 = vector.broadcast %cst_5 : f32 to vector<32x64xf32>
    %8 = arith.maximumf %6, %7 : vector<32x64xf32>
    %9 = vector.extract_strided_slice %8 {offsets = [0, 0], sizes = [16, 64], strides = [1, 1]} : vector<32x64xf32> to vector<16x64xf32>
    %cst_6 = arith.constant dense<0.000000e+00> : vector<64xf32>
    %10 = vector.multi_reduction <add>, %9, %cst_6 [0] : vector<16x64xf32> to vector<64xf32>
    %11 = vector.shape_cast %10 : vector<64xf32> to vector<1x64xf32>
    %cst_7 = arith.constant 1.600000e+01 : f32
    %12 = vector.broadcast %cst_7 : f32 to vector<1x64xf32>
    %13 = arith.divf %11, %12 : vector<1x64xf32>
    %14 = vector.extract_strided_slice %8 {offsets = [16, 0], sizes = [16, 64], strides = [1, 1]} : vector<32x64xf32> to vector<16x64xf32>
    %cst_8 = arith.constant dense<0.000000e+00> : vector<64xf32>
    %15 = vector.multi_reduction <add>, %14, %cst_8 [0] : vector<16x64xf32> to vector<64xf32>
    %16 = vector.shape_cast %15 : vector<64xf32> to vector<1x64xf32>
    %cst_9 = arith.constant 1.600000e+01 : f32
    %17 = vector.broadcast %cst_9 : f32 to vector<1x64xf32>
    %18 = arith.divf %16, %17 : vector<1x64xf32>
    %19 = tpu.concatenate %13, %18 in 0 : vector<1x64xf32>, vector<1x64xf32> -> vector<2x64xf32>
    %c0_10 = arith.constant 0 : index
    %c0_11 = arith.constant 0 : index
    %20 = vector.load %arg4[%c0_10, %c0_11] : memref<2x64xf32, #tpu.memory_space<vmem>>, vector<2x64xf32>
    tpu.vector_store %arg4[%c0_10, %c0_11], %19 {strides = array<i32>} : memref<2x64xf32, #tpu.memory_space<vmem>>, vector<2x64xf32>,
    return
  }
  func.func @transform_0(%arg0: i32) -> (i32, i32) {
    %c0_i32 = arith.constant 0 : i32
    %c0_i32_0 = arith.constant 0 : i32
    %c0_i32_1 = arith.constant 0 : i32
    return %c0_i32, %c0_i32_0 : i32, i32
  }
  func.func @transform_1(%arg0: i32) -> (i32, i32) {
    %c0_i32 = arith.constant 0 : i32
    %c0_i32_0 = arith.constant 0 : i32
    %c0_i32_1 = arith.constant 0 : i32
    return %c0_i32, %c0_i32_0 : i32, i32
  }
  func.func @transform_2(%arg0: i32) -> (i32, i32) {
    %c0_i32 = arith.constant 0 : i32
    %c0_i32_0 = arith.constant 0 : i32
    %c0_i32_1 = arith.constant 0 : i32
    return %c0_i32, %c0_i32_0 : i32, i32
  }
  func.func @transform_3(%arg0: i32) -> (i32, i32) {
    %c0_i32 = arith.constant 0 : i32
    %c0_i32_0 = arith.constant 0 : i32
    %c0_i32_1 = arith.constant 0 : i32
    return %c0_i32, %c0_i32_0 : i32, i32
  }
}

module attributes {stable_mosaic.version = 11 : i64} {
  func.func @_lyric_and_head_kernel(%arg0: i32, %arg1: memref<16x128xf32, #tpu.memory_space<vmem>>, %arg2: memref<2x8xf32, #tpu.memory_space<vmem>>, %arg3: memref<2x64xf32, #tpu.memory_space<vmem>>, %arg4: memref<1x128xf32, #tpu.memory_space<vmem>>, %arg5: memref<1x128xf32, #tpu.memory_space<vmem>>, %arg6: memref<4x128x64xbf16, #tpu.memory_space<vmem>>, %arg7: memref<4x128x64xbf16, #tpu.memory_space<vmem>>, %arg8: memref<4x128x64xbf16, #tpu.memory_space<vmem>>, %arg9: memref<4x1x64xf32, #tpu.memory_space<vmem>>, %arg10: memref<4x1x64xf32, #tpu.memory_space<vmem>>, %arg11: memref<4x1x64xf32, #tpu.memory_space<vmem>>, %arg12: memref<4x64x128xbf16, #tpu.memory_space<vmem>>, %arg13: memref<2x1x128xf32, #tpu.memory_space<vmem>>, %arg14: memref<2x1x128xf32, #tpu.memory_space<vmem>>, %arg15: memref<2x1x128xf32, #tpu.memory_space<vmem>>, %arg16: memref<2x128x512xbf16, #tpu.memory_space<vmem>>, %arg17: memref<2x1x512xf32, #tpu.memory_space<vmem>>, %arg18: memref<2x512x128xbf16, #tpu.memory_space<vmem>>, %arg19: memref<2x1x128xf32, #tpu.memory_space<vmem>>, %arg20: memref<2x1x128xf32, #tpu.memory_space<vmem>>, %arg21: memref<2x1x128xf32, #tpu.memory_space<vmem>>, %arg22: memref<128x64xbf16, #tpu.memory_space<vmem>>, %arg23: memref<1x64xf32, #tpu.memory_space<vmem>>, %arg24: memref<64x64xbf16, #tpu.memory_space<vmem>>, %arg25: memref<64x64xbf16, #tpu.memory_space<vmem>>, %arg26: memref<1x64xf32, #tpu.memory_space<vmem>>, %arg27: memref<64x10xbf16, #tpu.memory_space<vmem>>, %arg28: memref<1x10xf32, #tpu.memory_space<vmem>>, %arg29: memref<2x10xf32, #tpu.memory_space<vmem>>) attributes {dimension_semantics = [#tpu.dimension_semantics<arbitrary>], iteration_bounds = array<i64: 1>, scalar_prefetch = 0 : i64, scratch_operands = 0 : i64, tpu.core_type = #tpu.core_type<tc>, window_params = [{pipeline_mode = #tpu.pipeline_mode<synchronous>, transform_indices = @transform_0, window_bounds = array<i64: 16, 128>}, {pipeline_mode = #tpu.pipeline_mode<synchronous>, transform_indices = @transform_1, window_bounds = array<i64: 2, 8>}, {pipeline_mode = #tpu.pipeline_mode<synchronous>, transform_indices = @transform_2, window_bounds = array<i64: 2, 64>}, {pipeline_mode = #tpu.pipeline_mode<synchronous>, transform_indices = @transform_3, window_bounds = array<i64: 1, 128>}, {pipeline_mode = #tpu.pipeline_mode<synchronous>, transform_indices = @transform_4, window_bounds = array<i64: 1, 128>}, {pipeline_mode = #tpu.pipeline_mode<synchronous>, transform_indices = @transform_5, window_bounds = array<i64: 4, 128, 64>}, {pipeline_mode = #tpu.pipeline_mode<synchronous>, transform_indices = @transform_6, window_bounds = array<i64: 4, 128, 64>}, {pipeline_mode = #tpu.pipeline_mode<synchronous>, transform_indices = @transform_7, window_bounds = array<i64: 4, 128, 64>}, {pipeline_mode = #tpu.pipeline_mode<synchronous>, transform_indices = @transform_8, window_bounds = array<i64: 4, 1, 64>}, {pipeline_mode = #tpu.pipeline_mode<synchronous>, transform_indices = @transform_9, window_bounds = array<i64: 4, 1, 64>}, {pipeline_mode = #tpu.pipeline_mode<synchronous>, transform_indices = @transform_10, window_bounds = array<i64: 4, 1, 64>}, {pipeline_mode = #tpu.pipeline_mode<synchronous>, transform_indices = @transform_11, window_bounds = array<i64: 4, 64, 128>}, {pipeline_mode = #tpu.pipeline_mode<synchronous>, transform_indices = @transform_12, window_bounds = array<i64: 2, 1, 128>}, {pipeline_mode = #tpu.pipeline_mode<synchronous>, transform_indices = @transform_13, window_bounds = array<i64: 2, 1, 128>}, {pipeline_mode = #tpu.pipeline_mode<synchronous>, transform_indices = @transform_14, window_bounds = array<i64: 2, 1, 128>}, {pipeline_mode = #tpu.pipeline_mode<synchronous>, transform_indices = @transform_15, window_bounds = array<i64: 2, 128, 512>}, {pipeline_mode = #tpu.pipeline_mode<synchronous>, transform_indices = @transform_16, window_bounds = array<i64: 2, 1, 512>}, {pipeline_mode = #tpu.pipeline_mode<synchronous>, transform_indices = @transform_17, window_bounds = array<i64: 2, 512, 128>}, {pipeline_mode = #tpu.pipeline_mode<synchronous>, transform_indices = @transform_18, window_bounds = array<i64: 2, 1, 128>}, {pipeline_mode = #tpu.pipeline_mode<synchronous>, transform_indices = @transform_19, window_bounds = array<i64: 2, 1, 128>}, {pipeline_mode = #tpu.pipeline_mode<synchronous>, transform_indices = @transform_20, window_bounds = array<i64: 2, 1, 128>}, {pipeline_mode = #tpu.pipeline_mode<synchronous>, transform_indices = @transform_21, window_bounds = array<i64: 128, 64>}, {pipeline_mode = #tpu.pipeline_mode<synchronous>, transform_indices = @transform_22, window_bounds = array<i64: 1, 64>}, {pipeline_mode = #tpu.pipeline_mode<synchronous>, transform_indices = @transform_23, window_bounds = array<i64: 64, 64>}, {pipeline_mode = #tpu.pipeline_mode<synchronous>, transform_indices = @transform_24, window_bounds = array<i64: 64, 64>}, {pipeline_mode = #tpu.pipeline_mode<synchronous>, transform_indices = @transform_25, window_bounds = array<i64: 1, 64>}, {pipeline_mode = #tpu.pipeline_mode<synchronous>, transform_indices = @transform_26, window_bounds = array<i64: 64, 10>}, {pipeline_mode = #tpu.pipeline_mode<synchronous>, transform_indices = @transform_27, window_bounds = array<i64: 1, 10>}, {pipeline_mode = #tpu.pipeline_mode<synchronous>, transform_indices = @transform_28, window_bounds = array<i64: 2, 10>}]} {
    %c0 = arith.constant 0 : index
    %c0_0 = arith.constant 0 : index
    %0 = vector.load %arg2[%c0, %c0_0] : memref<2x8xf32, #tpu.memory_space<vmem>>, vector<2x8xf32>
    %c0_1 = arith.constant 0 : index
    %c0_2 = arith.constant 0 : index
    %1 = vector.load %arg1[%c0_1, %c0_2] : memref<16x128xf32, #tpu.memory_space<vmem>>, vector<16x128xf32>
    %c0_3 = arith.constant 0 : index
    %c0_4 = arith.constant 0 : index
    %2 = vector.load %arg4[%c0_3, %c0_4] : memref<1x128xf32, #tpu.memory_space<vmem>>, vector<1x128xf32>
    %c0_5 = arith.constant 0 : index
    %c0_6 = arith.constant 0 : index
    %3 = vector.load %arg5[%c0_5, %c0_6] : memref<1x128xf32, #tpu.memory_space<vmem>>, vector<1x128xf32>
    %cst = arith.constant dense<0.000000e+00> : vector<16xf32>
    %4 = vector.multi_reduction <add>, %1, %cst [1] : vector<16x128xf32> to vector<16xf32>
    %5 = vector.shape_cast %4 : vector<16xf32> to vector<16x1xf32>
    %cst_7 = arith.constant 1.280000e+02 : f32
    %6 = vector.broadcast %cst_7 : f32 to vector<16x1xf32>
    %7 = arith.divf %5, %6 : vector<16x1xf32>
    %8 = vector.broadcast %7 : vector<16x1xf32> to vector<16x128xf32>
    %9 = arith.subf %1, %8 : vector<16x128xf32>
    %10 = arith.mulf %9, %9 : vector<16x128xf32>
    %cst_8 = arith.constant dense<0.000000e+00> : vector<16xf32>
    %11 = vector.multi_reduction <add>, %10, %cst_8 [1] : vector<16x128xf32> to vector<16xf32>
    %12 = vector.shape_cast %11 : vector<16xf32> to vector<16x1xf32>
    %cst_9 = arith.constant 1.280000e+02 : f32
    %13 = vector.broadcast %cst_9 : f32 to vector<16x1xf32>
    %14 = arith.divf %12, %13 : vector<16x1xf32>
    %15 = vector.broadcast %7 : vector<16x1xf32> to vector<16x128xf32>
    %16 = arith.subf %1, %15 : vector<16x128xf32>
    %cst_10 = arith.constant 9.99999996E-13 : f32
    %17 = vector.broadcast %cst_10 : f32 to vector<16x1xf32>
    %18 = arith.addf %14, %17 : vector<16x1xf32>
    %19 = math.rsqrt %18 : vector<16x1xf32>
    %20 = vector.broadcast %19 : vector<16x1xf32> to vector<16x128xf32>
    %21 = arith.mulf %16, %20 : vector<16x128xf32>
    %22 = vector.broadcast %2 : vector<1x128xf32> to vector<16x128xf32>
    %23 = arith.mulf %21, %22 : vector<16x128xf32>
    %24 = vector.broadcast %3 : vector<1x128xf32> to vector<16x128xf32>
    %25 = arith.addf %23, %24 : vector<16x128xf32>
    %26 = vector.extract_strided_slice %25 {offsets = [0, 0], sizes = [8, 128], strides = [1, 1]} : vector<16x128xf32> to vector<8x128xf32>
    %27 = vector.extract_strided_slice %0 {offsets = [0, 0], sizes = [1, 8], strides = [1, 1]} : vector<2x8xf32> to vector<1x8xf32>
    %c0_11 = arith.constant 0 : index
    %c0_12 = arith.constant 0 : index
    %c0_13 = arith.constant 0 : index
    %28 = vector.load %arg6[%c0_11, %c0_12, %c0_13] : memref<4x128x64xbf16, #tpu.memory_space<vmem>>, vector<1x128x64xbf16>
    %29 = vector.shape_cast %28 : vector<1x128x64xbf16> to vector<128x64xbf16>
    %30 = arith.truncf %26 : vector<8x128xf32> to vector<8x128xbf16>
    %cst_14 = arith.constant dense<0.000000e+00> : vector<8x64xf32>
    %31 = tpu.matmul %30, %29, %cst_14 {dimension_numbers = #tpu.dot_dimension_numbers<[1], [0], [0], [1], [0, 0, 1, 1], [], []>} : vector<8x128xbf16>, vector<128x64xbf16>, vector<8x64xf32> -> vector<8x64xf32>
    %c0_15 = arith.constant 0 : index
    %c0_16 = arith.constant 0 : index
    %c0_17 = arith.constant 0 : index
    %32 = vector.load %arg9[%c0_15, %c0_16, %c0_17] : memref<4x1x64xf32, #tpu.memory_space<vmem>>, vector<1x1x64xf32>
    %33 = vector.shape_cast %32 : vector<1x1x64xf32> to vector<1x64xf32>
    %34 = vector.broadcast %33 : vector<1x64xf32> to vector<8x64xf32>
    %35 = arith.addf %31, %34 : vector<8x64xf32>
    %c0_18 = arith.constant 0 : index
    %c0_19 = arith.constant 0 : index
    %c0_20 = arith.constant 0 : index
    %36 = vector.load %arg7[%c0_18, %c0_19, %c0_20] : memref<4x128x64xbf16, #tpu.memory_space<vmem>>, vector<1x128x64xbf16>
    %37 = vector.shape_cast %36 : vector<1x128x64xbf16> to vector<128x64xbf16>
    %38 = arith.truncf %26 : vector<8x128xf32> to vector<8x128xbf16>
    %cst_21 = arith.constant dense<0.000000e+00> : vector<8x64xf32>
    %39 = tpu.matmul %38, %37, %cst_21 {dimension_numbers = #tpu.dot_dimension_numbers<[1], [0], [0], [1], [0, 0, 1, 1], [], []>} : vector<8x128xbf16>, vector<128x64xbf16>, vector<8x64xf32> -> vector<8x64xf32>
    %c0_22 = arith.constant 0 : index
    %c0_23 = arith.constant 0 : index
    %c0_24 = arith.constant 0 : index
    %40 = vector.load %arg10[%c0_22, %c0_23, %c0_24] : memref<4x1x64xf32, #tpu.memory_space<vmem>>, vector<1x1x64xf32>
    %41 = vector.shape_cast %40 : vector<1x1x64xf32> to vector<1x64xf32>
    %42 = vector.broadcast %41 : vector<1x64xf32> to vector<8x64xf32>
    %43 = arith.addf %39, %42 : vector<8x64xf32>
    %c0_25 = arith.constant 0 : index
    %c0_26 = arith.constant 0 : index
    %c0_27 = arith.constant 0 : index
    %44 = vector.load %arg8[%c0_25, %c0_26, %c0_27] : memref<4x128x64xbf16, #tpu.memory_space<vmem>>, vector<1x128x64xbf16>
    %45 = vector.shape_cast %44 : vector<1x128x64xbf16> to vector<128x64xbf16>
    %46 = arith.truncf %26 : vector<8x128xf32> to vector<8x128xbf16>
    %cst_28 = arith.constant dense<0.000000e+00> : vector<8x64xf32>
    %47 = tpu.matmul %46, %45, %cst_28 {dimension_numbers = #tpu.dot_dimension_numbers<[1], [0], [0], [1], [0, 0, 1, 1], [], []>} : vector<8x128xbf16>, vector<128x64xbf16>, vector<8x64xf32> -> vector<8x64xf32>
    %c0_29 = arith.constant 0 : index
    %c0_30 = arith.constant 0 : index
    %c0_31 = arith.constant 0 : index
    %48 = vector.load %arg11[%c0_29, %c0_30, %c0_31] : memref<4x1x64xf32, #tpu.memory_space<vmem>>, vector<1x1x64xf32>
    %49 = vector.shape_cast %48 : vector<1x1x64xf32> to vector<1x64xf32>
    %50 = vector.broadcast %49 : vector<1x64xf32> to vector<8x64xf32>
    %51 = arith.addf %47, %50 : vector<8x64xf32>
    %52 = arith.truncf %35 : vector<8x64xf32> to vector<8x64xbf16>
    %53 = arith.truncf %43 : vector<8x64xf32> to vector<8x64xbf16>
    %cst_32 = arith.constant dense<0.000000e+00> : vector<8x8xf32>
    %54 = tpu.matmul %52, %53, %cst_32 {dimension_numbers = #tpu.dot_dimension_numbers<[1], [1], [0], [0], [0, 0, 1, 0], [], []>} : vector<8x64xbf16>, vector<8x64xbf16>, vector<8x8xf32> -> vector<8x8xf32>
    %cst_33 = arith.constant 1.250000e-01 : f32
    %55 = vector.broadcast %cst_33 : f32 to vector<8x8xf32>
    %56 = arith.mulf %54, %55 : vector<8x8xf32>
    %57 = vector.broadcast %27 : vector<1x8xf32> to vector<8x8xf32>
    %58 = arith.addf %56, %57 : vector<8x8xf32>
    %cst_34 = arith.constant dense<0xFF800000> : vector<8xf32>
    %59 = vector.multi_reduction <maximumf>, %58, %cst_34 [1] : vector<8x8xf32> to vector<8xf32>
    %60 = vector.shape_cast %59 : vector<8xf32> to vector<8x1xf32>
    %61 = vector.broadcast %60 : vector<8x1xf32> to vector<8x8xf32>
    %62 = arith.subf %58, %61 : vector<8x8xf32>
    %63 = math.exp %62 : vector<8x8xf32>
    %cst_35 = arith.constant dense<0.000000e+00> : vector<8xf32>
    %64 = vector.multi_reduction <add>, %63, %cst_35 [1] : vector<8x8xf32> to vector<8xf32>
    %65 = vector.shape_cast %64 : vector<8xf32> to vector<8x1xf32>
    %66 = vector.broadcast %65 : vector<8x1xf32> to vector<8x8xf32>
    %67 = arith.divf %63, %66 : vector<8x8xf32>
    %68 = arith.truncf %67 : vector<8x8xf32> to vector<8x8xbf16>
    %69 = arith.truncf %51 : vector<8x64xf32> to vector<8x64xbf16>
    %cst_36 = arith.constant dense<0.000000e+00> : vector<8x64xf32>
    %70 = tpu.matmul %68, %69, %cst_36 {dimension_numbers = #tpu.dot_dimension_numbers<[1], [0], [0], [1], [0, 0, 1, 1], [], []>} : vector<8x8xbf16>, vector<8x64xbf16>, vector<8x64xf32> -> vector<8x64xf32>
    %c0_37 = arith.constant 0 : index
    %c0_38 = arith.constant 0 : index
    %c0_39 = arith.constant 0 : index
    %71 = vector.load %arg12[%c0_37, %c0_38, %c0_39] : memref<4x64x128xbf16, #tpu.memory_space<vmem>>, vector<1x64x128xbf16>
    %72 = vector.shape_cast %71 : vector<1x64x128xbf16> to vector<64x128xbf16>
    %73 = arith.truncf %70 : vector<8x64xf32> to vector<8x64xbf16>
    %cst_40 = arith.constant dense<0.000000e+00> : vector<8x128xf32>
    %74 = tpu.matmul %73, %72, %cst_40 {dimension_numbers = #tpu.dot_dimension_numbers<[1], [0], [0], [1], [0, 0, 1, 1], [], []>} : vector<8x64xbf16>, vector<64x128xbf16>, vector<8x128xf32> -> vector<8x128xf32>
    %c1 = arith.constant 1 : index
    %c0_41 = arith.constant 0 : index
    %c0_42 = arith.constant 0 : index
    %75 = vector.load %arg6[%c1, %c0_41, %c0_42] : memref<4x128x64xbf16, #tpu.memory_space<vmem>>, vector<1x128x64xbf16>
    %76 = vector.shape_cast %75 : vector<1x128x64xbf16> to vector<128x64xbf16>
    %77 = arith.truncf %26 : vector<8x128xf32> to vector<8x128xbf16>
    %cst_43 = arith.constant dense<0.000000e+00> : vector<8x64xf32>
    %78 = tpu.matmul %77, %76, %cst_43 {dimension_numbers = #tpu.dot_dimension_numbers<[1], [0], [0], [1], [0, 0, 1, 1], [], []>} : vector<8x128xbf16>, vector<128x64xbf16>, vector<8x64xf32> -> vector<8x64xf32>
    %c1_44 = arith.constant 1 : index
    %c0_45 = arith.constant 0 : index
    %c0_46 = arith.constant 0 : index
    %79 = vector.load %arg9[%c1_44, %c0_45, %c0_46] : memref<4x1x64xf32, #tpu.memory_space<vmem>>, vector<1x1x64xf32>
    %80 = vector.shape_cast %79 : vector<1x1x64xf32> to vector<1x64xf32>
    %81 = vector.broadcast %80 : vector<1x64xf32> to vector<8x64xf32>
    %82 = arith.addf %78, %81 : vector<8x64xf32>
    %c1_47 = arith.constant 1 : index
    %c0_48 = arith.constant 0 : index
    %c0_49 = arith.constant 0 : index
    %83 = vector.load %arg7[%c1_47, %c0_48, %c0_49] : memref<4x128x64xbf16, #tpu.memory_space<vmem>>, vector<1x128x64xbf16>
    %84 = vector.shape_cast %83 : vector<1x128x64xbf16> to vector<128x64xbf16>
    %85 = arith.truncf %26 : vector<8x128xf32> to vector<8x128xbf16>
    %cst_50 = arith.constant dense<0.000000e+00> : vector<8x64xf32>
    %86 = tpu.matmul %85, %84, %cst_50 {dimension_numbers = #tpu.dot_dimension_numbers<[1], [0], [0], [1], [0, 0, 1, 1], [], []>} : vector<8x128xbf16>, vector<128x64xbf16>, vector<8x64xf32> -> vector<8x64xf32>
    %c1_51 = arith.constant 1 : index
    %c0_52 = arith.constant 0 : index
    %c0_53 = arith.constant 0 : index
    %87 = vector.load %arg10[%c1_51, %c0_52, %c0_53] : memref<4x1x64xf32, #tpu.memory_space<vmem>>, vector<1x1x64xf32>
    %88 = vector.shape_cast %87 : vector<1x1x64xf32> to vector<1x64xf32>
    %89 = vector.broadcast %88 : vector<1x64xf32> to vector<8x64xf32>
    %90 = arith.addf %86, %89 : vector<8x64xf32>
    %c1_54 = arith.constant 1 : index
    %c0_55 = arith.constant 0 : index
    %c0_56 = arith.constant 0 : index
    %91 = vector.load %arg8[%c1_54, %c0_55, %c0_56] : memref<4x128x64xbf16, #tpu.memory_space<vmem>>, vector<1x128x64xbf16>
    %92 = vector.shape_cast %91 : vector<1x128x64xbf16> to vector<128x64xbf16>
    %93 = arith.truncf %26 : vector<8x128xf32> to vector<8x128xbf16>
    %cst_57 = arith.constant dense<0.000000e+00> : vector<8x64xf32>
    %94 = tpu.matmul %93, %92, %cst_57 {dimension_numbers = #tpu.dot_dimension_numbers<[1], [0], [0], [1], [0, 0, 1, 1], [], []>} : vector<8x128xbf16>, vector<128x64xbf16>, vector<8x64xf32> -> vector<8x64xf32>
    %c1_58 = arith.constant 1 : index
    %c0_59 = arith.constant 0 : index
    %c0_60 = arith.constant 0 : index
    %95 = vector.load %arg11[%c1_58, %c0_59, %c0_60] : memref<4x1x64xf32, #tpu.memory_space<vmem>>, vector<1x1x64xf32>
    %96 = vector.shape_cast %95 : vector<1x1x64xf32> to vector<1x64xf32>
    %97 = vector.broadcast %96 : vector<1x64xf32> to vector<8x64xf32>
    %98 = arith.addf %94, %97 : vector<8x64xf32>
    %99 = arith.truncf %82 : vector<8x64xf32> to vector<8x64xbf16>
    %100 = arith.truncf %90 : vector<8x64xf32> to vector<8x64xbf16>
    %cst_61 = arith.constant dense<0.000000e+00> : vector<8x8xf32>
    %101 = tpu.matmul %99, %100, %cst_61 {dimension_numbers = #tpu.dot_dimension_numbers<[1], [1], [0], [0], [0, 0, 1, 0], [], []>} : vector<8x64xbf16>, vector<8x64xbf16>, vector<8x8xf32> -> vector<8x8xf32>
    %cst_62 = arith.constant 1.250000e-01 : f32
    %102 = vector.broadcast %cst_62 : f32 to vector<8x8xf32>
    %103 = arith.mulf %101, %102 : vector<8x8xf32>
    %104 = vector.broadcast %27 : vector<1x8xf32> to vector<8x8xf32>
    %105 = arith.addf %103, %104 : vector<8x8xf32>
    %cst_63 = arith.constant dense<0xFF800000> : vector<8xf32>
    %106 = vector.multi_reduction <maximumf>, %105, %cst_63 [1] : vector<8x8xf32> to vector<8xf32>
    %107 = vector.shape_cast %106 : vector<8xf32> to vector<8x1xf32>
    %108 = vector.broadcast %107 : vector<8x1xf32> to vector<8x8xf32>
    %109 = arith.subf %105, %108 : vector<8x8xf32>
    %110 = math.exp %109 : vector<8x8xf32>
    %cst_64 = arith.constant dense<0.000000e+00> : vector<8xf32>
    %111 = vector.multi_reduction <add>, %110, %cst_64 [1] : vector<8x8xf32> to vector<8xf32>
    %112 = vector.shape_cast %111 : vector<8xf32> to vector<8x1xf32>
    %113 = vector.broadcast %112 : vector<8x1xf32> to vector<8x8xf32>
    %114 = arith.divf %110, %113 : vector<8x8xf32>
    %115 = arith.truncf %114 : vector<8x8xf32> to vector<8x8xbf16>
    %116 = arith.truncf %98 : vector<8x64xf32> to vector<8x64xbf16>
    %cst_65 = arith.constant dense<0.000000e+00> : vector<8x64xf32>
    %117 = tpu.matmul %115, %116, %cst_65 {dimension_numbers = #tpu.dot_dimension_numbers<[1], [0], [0], [1], [0, 0, 1, 1], [], []>} : vector<8x8xbf16>, vector<8x64xbf16>, vector<8x64xf32> -> vector<8x64xf32>
    %c1_66 = arith.constant 1 : index
    %c0_67 = arith.constant 0 : index
    %c0_68 = arith.constant 0 : index
    %118 = vector.load %arg12[%c1_66, %c0_67, %c0_68] : memref<4x64x128xbf16, #tpu.memory_space<vmem>>, vector<1x64x128xbf16>
    %119 = vector.shape_cast %118 : vector<1x64x128xbf16> to vector<64x128xbf16>
    %120 = arith.truncf %117 : vector<8x64xf32> to vector<8x64xbf16>
    %cst_69 = arith.constant dense<0.000000e+00> : vector<8x128xf32>
    %121 = tpu.matmul %120, %119, %cst_69 {dimension_numbers = #tpu.dot_dimension_numbers<[1], [0], [0], [1], [0, 0, 1, 1], [], []>} : vector<8x64xbf16>, vector<64x128xbf16>, vector<8x128xf32> -> vector<8x128xf32>
    %122 = arith.addf %74, %121 : vector<8x128xf32>
    %123 = vector.extract_strided_slice %25 {offsets = [8, 0], sizes = [8, 128], strides = [1, 1]} : vector<16x128xf32> to vector<8x128xf32>
    %124 = vector.extract_strided_slice %0 {offsets = [1, 0], sizes = [1, 8], strides = [1, 1]} : vector<2x8xf32> to vector<1x8xf32>
    %c0_70 = arith.constant 0 : index
    %c0_71 = arith.constant 0 : index
    %c0_72 = arith.constant 0 : index
    %125 = vector.load %arg6[%c0_70, %c0_71, %c0_72] : memref<4x128x64xbf16, #tpu.memory_space<vmem>>, vector<1x128x64xbf16>
    %126 = vector.shape_cast %125 : vector<1x128x64xbf16> to vector<128x64xbf16>
    %127 = arith.truncf %123 : vector<8x128xf32> to vector<8x128xbf16>
    %cst_73 = arith.constant dense<0.000000e+00> : vector<8x64xf32>
    %128 = tpu.matmul %127, %126, %cst_73 {dimension_numbers = #tpu.dot_dimension_numbers<[1], [0], [0], [1], [0, 0, 1, 1], [], []>} : vector<8x128xbf16>, vector<128x64xbf16>, vector<8x64xf32> -> vector<8x64xf32>
    %c0_74 = arith.constant 0 : index
    %c0_75 = arith.constant 0 : index
    %c0_76 = arith.constant 0 : index
    %129 = vector.load %arg9[%c0_74, %c0_75, %c0_76] : memref<4x1x64xf32, #tpu.memory_space<vmem>>, vector<1x1x64xf32>
    %130 = vector.shape_cast %129 : vector<1x1x64xf32> to vector<1x64xf32>
    %131 = vector.broadcast %130 : vector<1x64xf32> to vector<8x64xf32>
    %132 = arith.addf %128, %131 : vector<8x64xf32>
    %c0_77 = arith.constant 0 : index
    %c0_78 = arith.constant 0 : index
    %c0_79 = arith.constant 0 : index
    %133 = vector.load %arg7[%c0_77, %c0_78, %c0_79] : memref<4x128x64xbf16, #tpu.memory_space<vmem>>, vector<1x128x64xbf16>
    %134 = vector.shape_cast %133 : vector<1x128x64xbf16> to vector<128x64xbf16>
    %135 = arith.truncf %123 : vector<8x128xf32> to vector<8x128xbf16>
    %cst_80 = arith.constant dense<0.000000e+00> : vector<8x64xf32>
    %136 = tpu.matmul %135, %134, %cst_80 {dimension_numbers = #tpu.dot_dimension_numbers<[1], [0], [0], [1], [0, 0, 1, 1], [], []>} : vector<8x128xbf16>, vector<128x64xbf16>, vector<8x64xf32> -> vector<8x64xf32>
    %c0_81 = arith.constant 0 : index
    %c0_82 = arith.constant 0 : index
    %c0_83 = arith.constant 0 : index
    %137 = vector.load %arg10[%c0_81, %c0_82, %c0_83] : memref<4x1x64xf32, #tpu.memory_space<vmem>>, vector<1x1x64xf32>
    %138 = vector.shape_cast %137 : vector<1x1x64xf32> to vector<1x64xf32>
    %139 = vector.broadcast %138 : vector<1x64xf32> to vector<8x64xf32>
    %140 = arith.addf %136, %139 : vector<8x64xf32>
    %c0_84 = arith.constant 0 : index
    %c0_85 = arith.constant 0 : index
    %c0_86 = arith.constant 0 : index
    %141 = vector.load %arg8[%c0_84, %c0_85, %c0_86] : memref<4x128x64xbf16, #tpu.memory_space<vmem>>, vector<1x128x64xbf16>
    %142 = vector.shape_cast %141 : vector<1x128x64xbf16> to vector<128x64xbf16>
    %143 = arith.truncf %123 : vector<8x128xf32> to vector<8x128xbf16>
    %cst_87 = arith.constant dense<0.000000e+00> : vector<8x64xf32>
    %144 = tpu.matmul %143, %142, %cst_87 {dimension_numbers = #tpu.dot_dimension_numbers<[1], [0], [0], [1], [0, 0, 1, 1], [], []>} : vector<8x128xbf16>, vector<128x64xbf16>, vector<8x64xf32> -> vector<8x64xf32>
    %c0_88 = arith.constant 0 : index
    %c0_89 = arith.constant 0 : index
    %c0_90 = arith.constant 0 : index
    %145 = vector.load %arg11[%c0_88, %c0_89, %c0_90] : memref<4x1x64xf32, #tpu.memory_space<vmem>>, vector<1x1x64xf32>
    %146 = vector.shape_cast %145 : vector<1x1x64xf32> to vector<1x64xf32>
    %147 = vector.broadcast %146 : vector<1x64xf32> to vector<8x64xf32>
    %148 = arith.addf %144, %147 : vector<8x64xf32>
    %149 = arith.truncf %132 : vector<8x64xf32> to vector<8x64xbf16>
    %150 = arith.truncf %140 : vector<8x64xf32> to vector<8x64xbf16>
    %cst_91 = arith.constant dense<0.000000e+00> : vector<8x8xf32>
    %151 = tpu.matmul %149, %150, %cst_91 {dimension_numbers = #tpu.dot_dimension_numbers<[1], [1], [0], [0], [0, 0, 1, 0], [], []>} : vector<8x64xbf16>, vector<8x64xbf16>, vector<8x8xf32> -> vector<8x8xf32>
    %cst_92 = arith.constant 1.250000e-01 : f32
    %152 = vector.broadcast %cst_92 : f32 to vector<8x8xf32>
    %153 = arith.mulf %151, %152 : vector<8x8xf32>
    %154 = vector.broadcast %124 : vector<1x8xf32> to vector<8x8xf32>
    %155 = arith.addf %153, %154 : vector<8x8xf32>
    %cst_93 = arith.constant dense<0xFF800000> : vector<8xf32>
    %156 = vector.multi_reduction <maximumf>, %155, %cst_93 [1] : vector<8x8xf32> to vector<8xf32>
    %157 = vector.shape_cast %156 : vector<8xf32> to vector<8x1xf32>
    %158 = vector.broadcast %157 : vector<8x1xf32> to vector<8x8xf32>
    %159 = arith.subf %155, %158 : vector<8x8xf32>
    %160 = math.exp %159 : vector<8x8xf32>
    %cst_94 = arith.constant dense<0.000000e+00> : vector<8xf32>
    %161 = vector.multi_reduction <add>, %160, %cst_94 [1] : vector<8x8xf32> to vector<8xf32>
    %162 = vector.shape_cast %161 : vector<8xf32> to vector<8x1xf32>
    %163 = vector.broadcast %162 : vector<8x1xf32> to vector<8x8xf32>
    %164 = arith.divf %160, %163 : vector<8x8xf32>
    %165 = arith.truncf %164 : vector<8x8xf32> to vector<8x8xbf16>
    %166 = arith.truncf %148 : vector<8x64xf32> to vector<8x64xbf16>
    %cst_95 = arith.constant dense<0.000000e+00> : vector<8x64xf32>
    %167 = tpu.matmul %165, %166, %cst_95 {dimension_numbers = #tpu.dot_dimension_numbers<[1], [0], [0], [1], [0, 0, 1, 1], [], []>} : vector<8x8xbf16>, vector<8x64xbf16>, vector<8x64xf32> -> vector<8x64xf32>
    %c0_96 = arith.constant 0 : index
    %c0_97 = arith.constant 0 : index
    %c0_98 = arith.constant 0 : index
    %168 = vector.load %arg12[%c0_96, %c0_97, %c0_98] : memref<4x64x128xbf16, #tpu.memory_space<vmem>>, vector<1x64x128xbf16>
    %169 = vector.shape_cast %168 : vector<1x64x128xbf16> to vector<64x128xbf16>
    %170 = arith.truncf %167 : vector<8x64xf32> to vector<8x64xbf16>
    %cst_99 = arith.constant dense<0.000000e+00> : vector<8x128xf32>
    %171 = tpu.matmul %170, %169, %cst_99 {dimension_numbers = #tpu.dot_dimension_numbers<[1], [0], [0], [1], [0, 0, 1, 1], [], []>} : vector<8x64xbf16>, vector<64x128xbf16>, vector<8x128xf32> -> vector<8x128xf32>
    %c1_100 = arith.constant 1 : index
    %c0_101 = arith.constant 0 : index
    %c0_102 = arith.constant 0 : index
    %172 = vector.load %arg6[%c1_100, %c0_101, %c0_102] : memref<4x128x64xbf16, #tpu.memory_space<vmem>>, vector<1x128x64xbf16>
    %173 = vector.shape_cast %172 : vector<1x128x64xbf16> to vector<128x64xbf16>
    %174 = arith.truncf %123 : vector<8x128xf32> to vector<8x128xbf16>
    %cst_103 = arith.constant dense<0.000000e+00> : vector<8x64xf32>
    %175 = tpu.matmul %174, %173, %cst_103 {dimension_numbers = #tpu.dot_dimension_numbers<[1], [0], [0], [1], [0, 0, 1, 1], [], []>} : vector<8x128xbf16>, vector<128x64xbf16>, vector<8x64xf32> -> vector<8x64xf32>
    %c1_104 = arith.constant 1 : index
    %c0_105 = arith.constant 0 : index
    %c0_106 = arith.constant 0 : index
    %176 = vector.load %arg9[%c1_104, %c0_105, %c0_106] : memref<4x1x64xf32, #tpu.memory_space<vmem>>, vector<1x1x64xf32>
    %177 = vector.shape_cast %176 : vector<1x1x64xf32> to vector<1x64xf32>
    %178 = vector.broadcast %177 : vector<1x64xf32> to vector<8x64xf32>
    %179 = arith.addf %175, %178 : vector<8x64xf32>
    %c1_107 = arith.constant 1 : index
    %c0_108 = arith.constant 0 : index
    %c0_109 = arith.constant 0 : index
    %180 = vector.load %arg7[%c1_107, %c0_108, %c0_109] : memref<4x128x64xbf16, #tpu.memory_space<vmem>>, vector<1x128x64xbf16>
    %181 = vector.shape_cast %180 : vector<1x128x64xbf16> to vector<128x64xbf16>
    %182 = arith.truncf %123 : vector<8x128xf32> to vector<8x128xbf16>
    %cst_110 = arith.constant dense<0.000000e+00> : vector<8x64xf32>
    %183 = tpu.matmul %182, %181, %cst_110 {dimension_numbers = #tpu.dot_dimension_numbers<[1], [0], [0], [1], [0, 0, 1, 1], [], []>} : vector<8x128xbf16>, vector<128x64xbf16>, vector<8x64xf32> -> vector<8x64xf32>
    %c1_111 = arith.constant 1 : index
    %c0_112 = arith.constant 0 : index
    %c0_113 = arith.constant 0 : index
    %184 = vector.load %arg10[%c1_111, %c0_112, %c0_113] : memref<4x1x64xf32, #tpu.memory_space<vmem>>, vector<1x1x64xf32>
    %185 = vector.shape_cast %184 : vector<1x1x64xf32> to vector<1x64xf32>
    %186 = vector.broadcast %185 : vector<1x64xf32> to vector<8x64xf32>
    %187 = arith.addf %183, %186 : vector<8x64xf32>
    %c1_114 = arith.constant 1 : index
    %c0_115 = arith.constant 0 : index
    %c0_116 = arith.constant 0 : index
    %188 = vector.load %arg8[%c1_114, %c0_115, %c0_116] : memref<4x128x64xbf16, #tpu.memory_space<vmem>>, vector<1x128x64xbf16>
    %189 = vector.shape_cast %188 : vector<1x128x64xbf16> to vector<128x64xbf16>
    %190 = arith.truncf %123 : vector<8x128xf32> to vector<8x128xbf16>
    %cst_117 = arith.constant dense<0.000000e+00> : vector<8x64xf32>
    %191 = tpu.matmul %190, %189, %cst_117 {dimension_numbers = #tpu.dot_dimension_numbers<[1], [0], [0], [1], [0, 0, 1, 1], [], []>} : vector<8x128xbf16>, vector<128x64xbf16>, vector<8x64xf32> -> vector<8x64xf32>
    %c1_118 = arith.constant 1 : index
    %c0_119 = arith.constant 0 : index
    %c0_120 = arith.constant 0 : index
    %192 = vector.load %arg11[%c1_118, %c0_119, %c0_120] : memref<4x1x64xf32, #tpu.memory_space<vmem>>, vector<1x1x64xf32>
    %193 = vector.shape_cast %192 : vector<1x1x64xf32> to vector<1x64xf32>
    %194 = vector.broadcast %193 : vector<1x64xf32> to vector<8x64xf32>
    %195 = arith.addf %191, %194 : vector<8x64xf32>
    %196 = arith.truncf %179 : vector<8x64xf32> to vector<8x64xbf16>
    %197 = arith.truncf %187 : vector<8x64xf32> to vector<8x64xbf16>
    %cst_121 = arith.constant dense<0.000000e+00> : vector<8x8xf32>
    %198 = tpu.matmul %196, %197, %cst_121 {dimension_numbers = #tpu.dot_dimension_numbers<[1], [1], [0], [0], [0, 0, 1, 0], [], []>} : vector<8x64xbf16>, vector<8x64xbf16>, vector<8x8xf32> -> vector<8x8xf32>
    %cst_122 = arith.constant 1.250000e-01 : f32
    %199 = vector.broadcast %cst_122 : f32 to vector<8x8xf32>
    %200 = arith.mulf %198, %199 : vector<8x8xf32>
    %201 = vector.broadcast %124 : vector<1x8xf32> to vector<8x8xf32>
    %202 = arith.addf %200, %201 : vector<8x8xf32>
    %cst_123 = arith.constant dense<0xFF800000> : vector<8xf32>
    %203 = vector.multi_reduction <maximumf>, %202, %cst_123 [1] : vector<8x8xf32> to vector<8xf32>
    %204 = vector.shape_cast %203 : vector<8xf32> to vector<8x1xf32>
    %205 = vector.broadcast %204 : vector<8x1xf32> to vector<8x8xf32>
    %206 = arith.subf %202, %205 : vector<8x8xf32>
    %207 = math.exp %206 : vector<8x8xf32>
    %cst_124 = arith.constant dense<0.000000e+00> : vector<8xf32>
    %208 = vector.multi_reduction <add>, %207, %cst_124 [1] : vector<8x8xf32> to vector<8xf32>
    %209 = vector.shape_cast %208 : vector<8xf32> to vector<8x1xf32>
    %210 = vector.broadcast %209 : vector<8x1xf32> to vector<8x8xf32>
    %211 = arith.divf %207, %210 : vector<8x8xf32>
    %212 = arith.truncf %211 : vector<8x8xf32> to vector<8x8xbf16>
    %213 = arith.truncf %195 : vector<8x64xf32> to vector<8x64xbf16>
    %cst_125 = arith.constant dense<0.000000e+00> : vector<8x64xf32>
    %214 = tpu.matmul %212, %213, %cst_125 {dimension_numbers = #tpu.dot_dimension_numbers<[1], [0], [0], [1], [0, 0, 1, 1], [], []>} : vector<8x8xbf16>, vector<8x64xbf16>, vector<8x64xf32> -> vector<8x64xf32>
    %c1_126 = arith.constant 1 : index
    %c0_127 = arith.constant 0 : index
    %c0_128 = arith.constant 0 : index
    %215 = vector.load %arg12[%c1_126, %c0_127, %c0_128] : memref<4x64x128xbf16, #tpu.memory_space<vmem>>, vector<1x64x128xbf16>
    %216 = vector.shape_cast %215 : vector<1x64x128xbf16> to vector<64x128xbf16>
    %217 = arith.truncf %214 : vector<8x64xf32> to vector<8x64xbf16>
    %cst_129 = arith.constant dense<0.000000e+00> : vector<8x128xf32>
    %218 = tpu.matmul %217, %216, %cst_129 {dimension_numbers = #tpu.dot_dimension_numbers<[1], [0], [0], [1], [0, 0, 1, 1], [], []>} : vector<8x64xbf16>, vector<64x128xbf16>, vector<8x128xf32> -> vector<8x128xf32>
    %219 = arith.addf %171, %218 : vector<8x128xf32>
    %220 = tpu.concatenate %122, %219 in 0 : vector<8x128xf32>, vector<8x128xf32> -> vector<16x128xf32>
    %c0_130 = arith.constant 0 : index
    %c0_131 = arith.constant 0 : index
    %c0_132 = arith.constant 0 : index
    %221 = vector.load %arg13[%c0_130, %c0_131, %c0_132] : memref<2x1x128xf32, #tpu.memory_space<vmem>>, vector<1x1x128xf32>
    %222 = vector.shape_cast %221 : vector<1x1x128xf32> to vector<1x128xf32>
    %223 = vector.broadcast %222 : vector<1x128xf32> to vector<16x128xf32>
    %224 = arith.addf %220, %223 : vector<16x128xf32>
    %225 = arith.addf %25, %224 : vector<16x128xf32>
    %c0_133 = arith.constant 0 : index
    %c0_134 = arith.constant 0 : index
    %c0_135 = arith.constant 0 : index
    %226 = vector.load %arg14[%c0_133, %c0_134, %c0_135] : memref<2x1x128xf32, #tpu.memory_space<vmem>>, vector<1x1x128xf32>
    %227 = vector.shape_cast %226 : vector<1x1x128xf32> to vector<1x128xf32>
    %c0_136 = arith.constant 0 : index
    %c0_137 = arith.constant 0 : index
    %c0_138 = arith.constant 0 : index
    %228 = vector.load %arg15[%c0_136, %c0_137, %c0_138] : memref<2x1x128xf32, #tpu.memory_space<vmem>>, vector<1x1x128xf32>
    %229 = vector.shape_cast %228 : vector<1x1x128xf32> to vector<1x128xf32>
    %cst_139 = arith.constant dense<0.000000e+00> : vector<16xf32>
    %230 = vector.multi_reduction <add>, %225, %cst_139 [1] : vector<16x128xf32> to vector<16xf32>
    %231 = vector.shape_cast %230 : vector<16xf32> to vector<16x1xf32>
    %cst_140 = arith.constant 1.280000e+02 : f32
    %232 = vector.broadcast %cst_140 : f32 to vector<16x1xf32>
    %233 = arith.divf %231, %232 : vector<16x1xf32>
    %234 = vector.broadcast %233 : vector<16x1xf32> to vector<16x128xf32>
    %235 = arith.subf %225, %234 : vector<16x128xf32>
    %236 = arith.mulf %235, %235 : vector<16x128xf32>
    %cst_141 = arith.constant dense<0.000000e+00> : vector<16xf32>
    %237 = vector.multi_reduction <add>, %236, %cst_141 [1] : vector<16x128xf32> to vector<16xf32>
    %238 = vector.shape_cast %237 : vector<16xf32> to vector<16x1xf32>
    %cst_142 = arith.constant 1.280000e+02 : f32
    %239 = vector.broadcast %cst_142 : f32 to vector<16x1xf32>
    %240 = arith.divf %238, %239 : vector<16x1xf32>
    %241 = vector.broadcast %233 : vector<16x1xf32> to vector<16x128xf32>
    %242 = arith.subf %225, %241 : vector<16x128xf32>
    %cst_143 = arith.constant 9.99999996E-13 : f32
    %243 = vector.broadcast %cst_143 : f32 to vector<16x1xf32>
    %244 = arith.addf %240, %243 : vector<16x1xf32>
    %245 = math.rsqrt %244 : vector<16x1xf32>
    %246 = vector.broadcast %245 : vector<16x1xf32> to vector<16x128xf32>
    %247 = arith.mulf %242, %246 : vector<16x128xf32>
    %248 = vector.broadcast %227 : vector<1x128xf32> to vector<16x128xf32>
    %249 = arith.mulf %247, %248 : vector<16x128xf32>
    %250 = vector.broadcast %229 : vector<1x128xf32> to vector<16x128xf32>
    %251 = arith.addf %249, %250 : vector<16x128xf32>
    %c0_144 = arith.constant 0 : index
    %c0_145 = arith.constant 0 : index
    %c0_146 = arith.constant 0 : index
    %252 = vector.load %arg16[%c0_144, %c0_145, %c0_146] : memref<2x128x512xbf16, #tpu.memory_space<vmem>>, vector<1x128x512xbf16>
    %253 = vector.shape_cast %252 : vector<1x128x512xbf16> to vector<128x512xbf16>
    %254 = arith.truncf %251 : vector<16x128xf32> to vector<16x128xbf16>
    %cst_147 = arith.constant dense<0.000000e+00> : vector<16x512xf32>
    %255 = tpu.matmul %254, %253, %cst_147 {dimension_numbers = #tpu.dot_dimension_numbers<[1], [0], [0], [1], [0, 0, 1, 1], [], []>} : vector<16x128xbf16>, vector<128x512xbf16>, vector<16x512xf32> -> vector<16x512xf32>
    %c0_148 = arith.constant 0 : index
    %c0_149 = arith.constant 0 : index
    %c0_150 = arith.constant 0 : index
    %256 = vector.load %arg17[%c0_148, %c0_149, %c0_150] : memref<2x1x512xf32, #tpu.memory_space<vmem>>, vector<1x1x512xf32>
    %257 = vector.shape_cast %256 : vector<1x1x512xf32> to vector<1x512xf32>
    %258 = vector.broadcast %257 : vector<1x512xf32> to vector<16x512xf32>
    %259 = arith.addf %255, %258 : vector<16x512xf32>
    %260 = arith.mulf %259, %259 : vector<16x512xf32>
    %261 = arith.mulf %259, %260 : vector<16x512xf32>
    %cst_151 = arith.constant 4.471500e-02 : f32
    %262 = vector.broadcast %cst_151 : f32 to vector<16x512xf32>
    %263 = arith.mulf %262, %261 : vector<16x512xf32>
    %264 = arith.addf %259, %263 : vector<16x512xf32>
    %cst_152 = arith.constant 0.797884583 : f32
    %265 = vector.broadcast %cst_152 : f32 to vector<16x512xf32>
    %266 = arith.mulf %265, %264 : vector<16x512xf32>
    %267 = math.tanh %266 : vector<16x512xf32>
    %cst_153 = arith.constant 1.000000e+00 : f32
    %268 = vector.broadcast %cst_153 : f32 to vector<16x512xf32>
    %269 = arith.addf %268, %267 : vector<16x512xf32>
    %cst_154 = arith.constant 5.000000e-01 : f32
    %270 = vector.broadcast %cst_154 : f32 to vector<16x512xf32>
    %271 = arith.mulf %270, %269 : vector<16x512xf32>
    %272 = arith.mulf %259, %271 : vector<16x512xf32>
    %c0_155 = arith.constant 0 : index
    %c0_156 = arith.constant 0 : index
    %c0_157 = arith.constant 0 : index
    %273 = vector.load %arg18[%c0_155, %c0_156, %c0_157] : memref<2x512x128xbf16, #tpu.memory_space<vmem>>, vector<1x512x128xbf16>
    %274 = vector.shape_cast %273 : vector<1x512x128xbf16> to vector<512x128xbf16>
    %275 = arith.truncf %272 : vector<16x512xf32> to vector<16x512xbf16>
    %cst_158 = arith.constant dense<0.000000e+00> : vector<16x128xf32>
    %276 = tpu.matmul %275, %274, %cst_158 {dimension_numbers = #tpu.dot_dimension_numbers<[1], [0], [0], [1], [0, 0, 1, 1], [], []>} : vector<16x512xbf16>, vector<512x128xbf16>, vector<16x128xf32> -> vector<16x128xf32>
    %c0_159 = arith.constant 0 : index
    %c0_160 = arith.constant 0 : index
    %c0_161 = arith.constant 0 : index
    %277 = vector.load %arg19[%c0_159, %c0_160, %c0_161] : memref<2x1x128xf32, #tpu.memory_space<vmem>>, vector<1x1x128xf32>
    %278 = vector.shape_cast %277 : vector<1x1x128xf32> to vector<1x128xf32>
    %279 = vector.broadcast %278 : vector<1x128xf32> to vector<16x128xf32>
    %280 = arith.addf %276, %279 : vector<16x128xf32>
    %281 = arith.addf %251, %280 : vector<16x128xf32>
    %c0_162 = arith.constant 0 : index
    %c0_163 = arith.constant 0 : index
    %c0_164 = arith.constant 0 : index
    %282 = vector.load %arg20[%c0_162, %c0_163, %c0_164] : memref<2x1x128xf32, #tpu.memory_space<vmem>>, vector<1x1x128xf32>
    %283 = vector.shape_cast %282 : vector<1x1x128xf32> to vector<1x128xf32>
    %c0_165 = arith.constant 0 : index
    %c0_166 = arith.constant 0 : index
    %c0_167 = arith.constant 0 : index
    %284 = vector.load %arg21[%c0_165, %c0_166, %c0_167] : memref<2x1x128xf32, #tpu.memory_space<vmem>>, vector<1x1x128xf32>
    %285 = vector.shape_cast %284 : vector<1x1x128xf32> to vector<1x128xf32>
    %cst_168 = arith.constant dense<0.000000e+00> : vector<16xf32>
    %286 = vector.multi_reduction <add>, %281, %cst_168 [1] : vector<16x128xf32> to vector<16xf32>
    %287 = vector.shape_cast %286 : vector<16xf32> to vector<16x1xf32>
    %cst_169 = arith.constant 1.280000e+02 : f32
    %288 = vector.broadcast %cst_169 : f32 to vector<16x1xf32>
    %289 = arith.divf %287, %288 : vector<16x1xf32>
    %290 = vector.broadcast %289 : vector<16x1xf32> to vector<16x128xf32>
    %291 = arith.subf %281, %290 : vector<16x128xf32>
    %292 = arith.mulf %291, %291 : vector<16x128xf32>
    %cst_170 = arith.constant dense<0.000000e+00> : vector<16xf32>
    %293 = vector.multi_reduction <add>, %292, %cst_170 [1] : vector<16x128xf32> to vector<16xf32>
    %294 = vector.shape_cast %293 : vector<16xf32> to vector<16x1xf32>
    %cst_171 = arith.constant 1.280000e+02 : f32
    %295 = vector.broadcast %cst_171 : f32 to vector<16x1xf32>
    %296 = arith.divf %294, %295 : vector<16x1xf32>
    %297 = vector.broadcast %289 : vector<16x1xf32> to vector<16x128xf32>
    %298 = arith.subf %281, %297 : vector<16x128xf32>
    %cst_172 = arith.constant 9.99999996E-13 : f32
    %299 = vector.broadcast %cst_172 : f32 to vector<16x1xf32>
    %300 = arith.addf %296, %299 : vector<16x1xf32>
    %301 = math.rsqrt %300 : vector<16x1xf32>
    %302 = vector.broadcast %301 : vector<16x1xf32> to vector<16x128xf32>
    %303 = arith.mulf %298, %302 : vector<16x128xf32>
    %304 = vector.broadcast %283 : vector<1x128xf32> to vector<16x128xf32>
    %305 = arith.mulf %303, %304 : vector<16x128xf32>
    %306 = vector.broadcast %285 : vector<1x128xf32> to vector<16x128xf32>
    %307 = arith.addf %305, %306 : vector<16x128xf32>
    %308 = vector.extract_strided_slice %307 {offsets = [0, 0], sizes = [8, 128], strides = [1, 1]} : vector<16x128xf32> to vector<8x128xf32>
    %309 = vector.extract_strided_slice %0 {offsets = [0, 0], sizes = [1, 8], strides = [1, 1]} : vector<2x8xf32> to vector<1x8xf32>
    %c2 = arith.constant 2 : index
    %c0_173 = arith.constant 0 : index
    %c0_174 = arith.constant 0 : index
    %310 = vector.load %arg6[%c2, %c0_173, %c0_174] : memref<4x128x64xbf16, #tpu.memory_space<vmem>>, vector<1x128x64xbf16>
    %311 = vector.shape_cast %310 : vector<1x128x64xbf16> to vector<128x64xbf16>
    %312 = arith.truncf %308 : vector<8x128xf32> to vector<8x128xbf16>
    %cst_175 = arith.constant dense<0.000000e+00> : vector<8x64xf32>
    %313 = tpu.matmul %312, %311, %cst_175 {dimension_numbers = #tpu.dot_dimension_numbers<[1], [0], [0], [1], [0, 0, 1, 1], [], []>} : vector<8x128xbf16>, vector<128x64xbf16>, vector<8x64xf32> -> vector<8x64xf32>
    %c2_176 = arith.constant 2 : index
    %c0_177 = arith.constant 0 : index
    %c0_178 = arith.constant 0 : index
    %314 = vector.load %arg9[%c2_176, %c0_177, %c0_178] : memref<4x1x64xf32, #tpu.memory_space<vmem>>, vector<1x1x64xf32>
    %315 = vector.shape_cast %314 : vector<1x1x64xf32> to vector<1x64xf32>
    %316 = vector.broadcast %315 : vector<1x64xf32> to vector<8x64xf32>
    %317 = arith.addf %313, %316 : vector<8x64xf32>
    %c2_179 = arith.constant 2 : index
    %c0_180 = arith.constant 0 : index
    %c0_181 = arith.constant 0 : index
    %318 = vector.load %arg7[%c2_179, %c0_180, %c0_181] : memref<4x128x64xbf16, #tpu.memory_space<vmem>>, vector<1x128x64xbf16>
    %319 = vector.shape_cast %318 : vector<1x128x64xbf16> to vector<128x64xbf16>
    %320 = arith.truncf %308 : vector<8x128xf32> to vector<8x128xbf16>
    %cst_182 = arith.constant dense<0.000000e+00> : vector<8x64xf32>
    %321 = tpu.matmul %320, %319, %cst_182 {dimension_numbers = #tpu.dot_dimension_numbers<[1], [0], [0], [1], [0, 0, 1, 1], [], []>} : vector<8x128xbf16>, vector<128x64xbf16>, vector<8x64xf32> -> vector<8x64xf32>
    %c2_183 = arith.constant 2 : index
    %c0_184 = arith.constant 0 : index
    %c0_185 = arith.constant 0 : index
    %322 = vector.load %arg10[%c2_183, %c0_184, %c0_185] : memref<4x1x64xf32, #tpu.memory_space<vmem>>, vector<1x1x64xf32>
    %323 = vector.shape_cast %322 : vector<1x1x64xf32> to vector<1x64xf32>
    %324 = vector.broadcast %323 : vector<1x64xf32> to vector<8x64xf32>
    %325 = arith.addf %321, %324 : vector<8x64xf32>
    %c2_186 = arith.constant 2 : index
    %c0_187 = arith.constant 0 : index
    %c0_188 = arith.constant 0 : index
    %326 = vector.load %arg8[%c2_186, %c0_187, %c0_188] : memref<4x128x64xbf16, #tpu.memory_space<vmem>>, vector<1x128x64xbf16>
    %327 = vector.shape_cast %326 : vector<1x128x64xbf16> to vector<128x64xbf16>
    %328 = arith.truncf %308 : vector<8x128xf32> to vector<8x128xbf16>
    %cst_189 = arith.constant dense<0.000000e+00> : vector<8x64xf32>
    %329 = tpu.matmul %328, %327, %cst_189 {dimension_numbers = #tpu.dot_dimension_numbers<[1], [0], [0], [1], [0, 0, 1, 1], [], []>} : vector<8x128xbf16>, vector<128x64xbf16>, vector<8x64xf32> -> vector<8x64xf32>
    %c2_190 = arith.constant 2 : index
    %c0_191 = arith.constant 0 : index
    %c0_192 = arith.constant 0 : index
    %330 = vector.load %arg11[%c2_190, %c0_191, %c0_192] : memref<4x1x64xf32, #tpu.memory_space<vmem>>, vector<1x1x64xf32>
    %331 = vector.shape_cast %330 : vector<1x1x64xf32> to vector<1x64xf32>
    %332 = vector.broadcast %331 : vector<1x64xf32> to vector<8x64xf32>
    %333 = arith.addf %329, %332 : vector<8x64xf32>
    %334 = arith.truncf %317 : vector<8x64xf32> to vector<8x64xbf16>
    %335 = arith.truncf %325 : vector<8x64xf32> to vector<8x64xbf16>
    %cst_193 = arith.constant dense<0.000000e+00> : vector<8x8xf32>
    %336 = tpu.matmul %334, %335, %cst_193 {dimension_numbers = #tpu.dot_dimension_numbers<[1], [1], [0], [0], [0, 0, 1, 0], [], []>} : vector<8x64xbf16>, vector<8x64xbf16>, vector<8x8xf32> -> vector<8x8xf32>
    %cst_194 = arith.constant 1.250000e-01 : f32
    %337 = vector.broadcast %cst_194 : f32 to vector<8x8xf32>
    %338 = arith.mulf %336, %337 : vector<8x8xf32>
    %339 = vector.broadcast %309 : vector<1x8xf32> to vector<8x8xf32>
    %340 = arith.addf %338, %339 : vector<8x8xf32>
    %cst_195 = arith.constant dense<0xFF800000> : vector<8xf32>
    %341 = vector.multi_reduction <maximumf>, %340, %cst_195 [1] : vector<8x8xf32> to vector<8xf32>
    %342 = vector.shape_cast %341 : vector<8xf32> to vector<8x1xf32>
    %343 = vector.broadcast %342 : vector<8x1xf32> to vector<8x8xf32>
    %344 = arith.subf %340, %343 : vector<8x8xf32>
    %345 = math.exp %344 : vector<8x8xf32>
    %cst_196 = arith.constant dense<0.000000e+00> : vector<8xf32>
    %346 = vector.multi_reduction <add>, %345, %cst_196 [1] : vector<8x8xf32> to vector<8xf32>
    %347 = vector.shape_cast %346 : vector<8xf32> to vector<8x1xf32>
    %348 = vector.broadcast %347 : vector<8x1xf32> to vector<8x8xf32>
    %349 = arith.divf %345, %348 : vector<8x8xf32>
    %350 = arith.truncf %349 : vector<8x8xf32> to vector<8x8xbf16>
    %351 = arith.truncf %333 : vector<8x64xf32> to vector<8x64xbf16>
    %cst_197 = arith.constant dense<0.000000e+00> : vector<8x64xf32>
    %352 = tpu.matmul %350, %351, %cst_197 {dimension_numbers = #tpu.dot_dimension_numbers<[1], [0], [0], [1], [0, 0, 1, 1], [], []>} : vector<8x8xbf16>, vector<8x64xbf16>, vector<8x64xf32> -> vector<8x64xf32>
    %c2_198 = arith.constant 2 : index
    %c0_199 = arith.constant 0 : index
    %c0_200 = arith.constant 0 : index
    %353 = vector.load %arg12[%c2_198, %c0_199, %c0_200] : memref<4x64x128xbf16, #tpu.memory_space<vmem>>, vector<1x64x128xbf16>
    %354 = vector.shape_cast %353 : vector<1x64x128xbf16> to vector<64x128xbf16>
    %355 = arith.truncf %352 : vector<8x64xf32> to vector<8x64xbf16>
    %cst_201 = arith.constant dense<0.000000e+00> : vector<8x128xf32>
    %356 = tpu.matmul %355, %354, %cst_201 {dimension_numbers = #tpu.dot_dimension_numbers<[1], [0], [0], [1], [0, 0, 1, 1], [], []>} : vector<8x64xbf16>, vector<64x128xbf16>, vector<8x128xf32> -> vector<8x128xf32>
    %c3 = arith.constant 3 : index
    %c0_202 = arith.constant 0 : index
    %c0_203 = arith.constant 0 : index
    %357 = vector.load %arg6[%c3, %c0_202, %c0_203] : memref<4x128x64xbf16, #tpu.memory_space<vmem>>, vector<1x128x64xbf16>
    %358 = vector.shape_cast %357 : vector<1x128x64xbf16> to vector<128x64xbf16>
    %359 = arith.truncf %308 : vector<8x128xf32> to vector<8x128xbf16>
    %cst_204 = arith.constant dense<0.000000e+00> : vector<8x64xf32>
    %360 = tpu.matmul %359, %358, %cst_204 {dimension_numbers = #tpu.dot_dimension_numbers<[1], [0], [0], [1], [0, 0, 1, 1], [], []>} : vector<8x128xbf16>, vector<128x64xbf16>, vector<8x64xf32> -> vector<8x64xf32>
    %c3_205 = arith.constant 3 : index
    %c0_206 = arith.constant 0 : index
    %c0_207 = arith.constant 0 : index
    %361 = vector.load %arg9[%c3_205, %c0_206, %c0_207] : memref<4x1x64xf32, #tpu.memory_space<vmem>>, vector<1x1x64xf32>
    %362 = vector.shape_cast %361 : vector<1x1x64xf32> to vector<1x64xf32>
    %363 = vector.broadcast %362 : vector<1x64xf32> to vector<8x64xf32>
    %364 = arith.addf %360, %363 : vector<8x64xf32>
    %c3_208 = arith.constant 3 : index
    %c0_209 = arith.constant 0 : index
    %c0_210 = arith.constant 0 : index
    %365 = vector.load %arg7[%c3_208, %c0_209, %c0_210] : memref<4x128x64xbf16, #tpu.memory_space<vmem>>, vector<1x128x64xbf16>
    %366 = vector.shape_cast %365 : vector<1x128x64xbf16> to vector<128x64xbf16>
    %367 = arith.truncf %308 : vector<8x128xf32> to vector<8x128xbf16>
    %cst_211 = arith.constant dense<0.000000e+00> : vector<8x64xf32>
    %368 = tpu.matmul %367, %366, %cst_211 {dimension_numbers = #tpu.dot_dimension_numbers<[1], [0], [0], [1], [0, 0, 1, 1], [], []>} : vector<8x128xbf16>, vector<128x64xbf16>, vector<8x64xf32> -> vector<8x64xf32>
    %c3_212 = arith.constant 3 : index
    %c0_213 = arith.constant 0 : index
    %c0_214 = arith.constant 0 : index
    %369 = vector.load %arg10[%c3_212, %c0_213, %c0_214] : memref<4x1x64xf32, #tpu.memory_space<vmem>>, vector<1x1x64xf32>
    %370 = vector.shape_cast %369 : vector<1x1x64xf32> to vector<1x64xf32>
    %371 = vector.broadcast %370 : vector<1x64xf32> to vector<8x64xf32>
    %372 = arith.addf %368, %371 : vector<8x64xf32>
    %c3_215 = arith.constant 3 : index
    %c0_216 = arith.constant 0 : index
    %c0_217 = arith.constant 0 : index
    %373 = vector.load %arg8[%c3_215, %c0_216, %c0_217] : memref<4x128x64xbf16, #tpu.memory_space<vmem>>, vector<1x128x64xbf16>
    %374 = vector.shape_cast %373 : vector<1x128x64xbf16> to vector<128x64xbf16>
    %375 = arith.truncf %308 : vector<8x128xf32> to vector<8x128xbf16>
    %cst_218 = arith.constant dense<0.000000e+00> : vector<8x64xf32>
    %376 = tpu.matmul %375, %374, %cst_218 {dimension_numbers = #tpu.dot_dimension_numbers<[1], [0], [0], [1], [0, 0, 1, 1], [], []>} : vector<8x128xbf16>, vector<128x64xbf16>, vector<8x64xf32> -> vector<8x64xf32>
    %c3_219 = arith.constant 3 : index
    %c0_220 = arith.constant 0 : index
    %c0_221 = arith.constant 0 : index
    %377 = vector.load %arg11[%c3_219, %c0_220, %c0_221] : memref<4x1x64xf32, #tpu.memory_space<vmem>>, vector<1x1x64xf32>
    %378 = vector.shape_cast %377 : vector<1x1x64xf32> to vector<1x64xf32>
    %379 = vector.broadcast %378 : vector<1x64xf32> to vector<8x64xf32>
    %380 = arith.addf %376, %379 : vector<8x64xf32>
    %381 = arith.truncf %364 : vector<8x64xf32> to vector<8x64xbf16>
    %382 = arith.truncf %372 : vector<8x64xf32> to vector<8x64xbf16>
    %cst_222 = arith.constant dense<0.000000e+00> : vector<8x8xf32>
    %383 = tpu.matmul %381, %382, %cst_222 {dimension_numbers = #tpu.dot_dimension_numbers<[1], [1], [0], [0], [0, 0, 1, 0], [], []>} : vector<8x64xbf16>, vector<8x64xbf16>, vector<8x8xf32> -> vector<8x8xf32>
    %cst_223 = arith.constant 1.250000e-01 : f32
    %384 = vector.broadcast %cst_223 : f32 to vector<8x8xf32>
    %385 = arith.mulf %383, %384 : vector<8x8xf32>
    %386 = vector.broadcast %309 : vector<1x8xf32> to vector<8x8xf32>
    %387 = arith.addf %385, %386 : vector<8x8xf32>
    %cst_224 = arith.constant dense<0xFF800000> : vector<8xf32>
    %388 = vector.multi_reduction <maximumf>, %387, %cst_224 [1] : vector<8x8xf32> to vector<8xf32>
    %389 = vector.shape_cast %388 : vector<8xf32> to vector<8x1xf32>
    %390 = vector.broadcast %389 : vector<8x1xf32> to vector<8x8xf32>
    %391 = arith.subf %387, %390 : vector<8x8xf32>
    %392 = math.exp %391 : vector<8x8xf32>
    %cst_225 = arith.constant dense<0.000000e+00> : vector<8xf32>
    %393 = vector.multi_reduction <add>, %392, %cst_225 [1] : vector<8x8xf32> to vector<8xf32>
    %394 = vector.shape_cast %393 : vector<8xf32> to vector<8x1xf32>
    %395 = vector.broadcast %394 : vector<8x1xf32> to vector<8x8xf32>
    %396 = arith.divf %392, %395 : vector<8x8xf32>
    %397 = arith.truncf %396 : vector<8x8xf32> to vector<8x8xbf16>
    %398 = arith.truncf %380 : vector<8x64xf32> to vector<8x64xbf16>
    %cst_226 = arith.constant dense<0.000000e+00> : vector<8x64xf32>
    %399 = tpu.matmul %397, %398, %cst_226 {dimension_numbers = #tpu.dot_dimension_numbers<[1], [0], [0], [1], [0, 0, 1, 1], [], []>} : vector<8x8xbf16>, vector<8x64xbf16>, vector<8x64xf32> -> vector<8x64xf32>
    %c3_227 = arith.constant 3 : index
    %c0_228 = arith.constant 0 : index
    %c0_229 = arith.constant 0 : index
    %400 = vector.load %arg12[%c3_227, %c0_228, %c0_229] : memref<4x64x128xbf16, #tpu.memory_space<vmem>>, vector<1x64x128xbf16>
    %401 = vector.shape_cast %400 : vector<1x64x128xbf16> to vector<64x128xbf16>
    %402 = arith.truncf %399 : vector<8x64xf32> to vector<8x64xbf16>
    %cst_230 = arith.constant dense<0.000000e+00> : vector<8x128xf32>
    %403 = tpu.matmul %402, %401, %cst_230 {dimension_numbers = #tpu.dot_dimension_numbers<[1], [0], [0], [1], [0, 0, 1, 1], [], []>} : vector<8x64xbf16>, vector<64x128xbf16>, vector<8x128xf32> -> vector<8x128xf32>
    %404 = arith.addf %356, %403 : vector<8x128xf32>
    %405 = vector.extract_strided_slice %307 {offsets = [8, 0], sizes = [8, 128], strides = [1, 1]} : vector<16x128xf32> to vector<8x128xf32>
    %406 = vector.extract_strided_slice %0 {offsets = [1, 0], sizes = [1, 8], strides = [1, 1]} : vector<2x8xf32> to vector<1x8xf32>
    %c2_231 = arith.constant 2 : index
    %c0_232 = arith.constant 0 : index
    %c0_233 = arith.constant 0 : index
    %407 = vector.load %arg6[%c2_231, %c0_232, %c0_233] : memref<4x128x64xbf16, #tpu.memory_space<vmem>>, vector<1x128x64xbf16>
    %408 = vector.shape_cast %407 : vector<1x128x64xbf16> to vector<128x64xbf16>
    %409 = arith.truncf %405 : vector<8x128xf32> to vector<8x128xbf16>
    %cst_234 = arith.constant dense<0.000000e+00> : vector<8x64xf32>
    %410 = tpu.matmul %409, %408, %cst_234 {dimension_numbers = #tpu.dot_dimension_numbers<[1], [0], [0], [1], [0, 0, 1, 1], [], []>} : vector<8x128xbf16>, vector<128x64xbf16>, vector<8x64xf32> -> vector<8x64xf32>
    %c2_235 = arith.constant 2 : index
    %c0_236 = arith.constant 0 : index
    %c0_237 = arith.constant 0 : index
    %411 = vector.load %arg9[%c2_235, %c0_236, %c0_237] : memref<4x1x64xf32, #tpu.memory_space<vmem>>, vector<1x1x64xf32>
    %412 = vector.shape_cast %411 : vector<1x1x64xf32> to vector<1x64xf32>
    %413 = vector.broadcast %412 : vector<1x64xf32> to vector<8x64xf32>
    %414 = arith.addf %410, %413 : vector<8x64xf32>
    %c2_238 = arith.constant 2 : index
    %c0_239 = arith.constant 0 : index
    %c0_240 = arith.constant 0 : index
    %415 = vector.load %arg7[%c2_238, %c0_239, %c0_240] : memref<4x128x64xbf16, #tpu.memory_space<vmem>>, vector<1x128x64xbf16>
    %416 = vector.shape_cast %415 : vector<1x128x64xbf16> to vector<128x64xbf16>
    %417 = arith.truncf %405 : vector<8x128xf32> to vector<8x128xbf16>
    %cst_241 = arith.constant dense<0.000000e+00> : vector<8x64xf32>
    %418 = tpu.matmul %417, %416, %cst_241 {dimension_numbers = #tpu.dot_dimension_numbers<[1], [0], [0], [1], [0, 0, 1, 1], [], []>} : vector<8x128xbf16>, vector<128x64xbf16>, vector<8x64xf32> -> vector<8x64xf32>
    %c2_242 = arith.constant 2 : index
    %c0_243 = arith.constant 0 : index
    %c0_244 = arith.constant 0 : index
    %419 = vector.load %arg10[%c2_242, %c0_243, %c0_244] : memref<4x1x64xf32, #tpu.memory_space<vmem>>, vector<1x1x64xf32>
    %420 = vector.shape_cast %419 : vector<1x1x64xf32> to vector<1x64xf32>
    %421 = vector.broadcast %420 : vector<1x64xf32> to vector<8x64xf32>
    %422 = arith.addf %418, %421 : vector<8x64xf32>
    %c2_245 = arith.constant 2 : index
    %c0_246 = arith.constant 0 : index
    %c0_247 = arith.constant 0 : index
    %423 = vector.load %arg8[%c2_245, %c0_246, %c0_247] : memref<4x128x64xbf16, #tpu.memory_space<vmem>>, vector<1x128x64xbf16>
    %424 = vector.shape_cast %423 : vector<1x128x64xbf16> to vector<128x64xbf16>
    %425 = arith.truncf %405 : vector<8x128xf32> to vector<8x128xbf16>
    %cst_248 = arith.constant dense<0.000000e+00> : vector<8x64xf32>
    %426 = tpu.matmul %425, %424, %cst_248 {dimension_numbers = #tpu.dot_dimension_numbers<[1], [0], [0], [1], [0, 0, 1, 1], [], []>} : vector<8x128xbf16>, vector<128x64xbf16>, vector<8x64xf32> -> vector<8x64xf32>
    %c2_249 = arith.constant 2 : index
    %c0_250 = arith.constant 0 : index
    %c0_251 = arith.constant 0 : index
    %427 = vector.load %arg11[%c2_249, %c0_250, %c0_251] : memref<4x1x64xf32, #tpu.memory_space<vmem>>, vector<1x1x64xf32>
    %428 = vector.shape_cast %427 : vector<1x1x64xf32> to vector<1x64xf32>
    %429 = vector.broadcast %428 : vector<1x64xf32> to vector<8x64xf32>
    %430 = arith.addf %426, %429 : vector<8x64xf32>
    %431 = arith.truncf %414 : vector<8x64xf32> to vector<8x64xbf16>
    %432 = arith.truncf %422 : vector<8x64xf32> to vector<8x64xbf16>
    %cst_252 = arith.constant dense<0.000000e+00> : vector<8x8xf32>
    %433 = tpu.matmul %431, %432, %cst_252 {dimension_numbers = #tpu.dot_dimension_numbers<[1], [1], [0], [0], [0, 0, 1, 0], [], []>} : vector<8x64xbf16>, vector<8x64xbf16>, vector<8x8xf32> -> vector<8x8xf32>
    %cst_253 = arith.constant 1.250000e-01 : f32
    %434 = vector.broadcast %cst_253 : f32 to vector<8x8xf32>
    %435 = arith.mulf %433, %434 : vector<8x8xf32>
    %436 = vector.broadcast %406 : vector<1x8xf32> to vector<8x8xf32>
    %437 = arith.addf %435, %436 : vector<8x8xf32>
    %cst_254 = arith.constant dense<0xFF800000> : vector<8xf32>
    %438 = vector.multi_reduction <maximumf>, %437, %cst_254 [1] : vector<8x8xf32> to vector<8xf32>
    %439 = vector.shape_cast %438 : vector<8xf32> to vector<8x1xf32>
    %440 = vector.broadcast %439 : vector<8x1xf32> to vector<8x8xf32>
    %441 = arith.subf %437, %440 : vector<8x8xf32>
    %442 = math.exp %441 : vector<8x8xf32>
    %cst_255 = arith.constant dense<0.000000e+00> : vector<8xf32>
    %443 = vector.multi_reduction <add>, %442, %cst_255 [1] : vector<8x8xf32> to vector<8xf32>
    %444 = vector.shape_cast %443 : vector<8xf32> to vector<8x1xf32>
    %445 = vector.broadcast %444 : vector<8x1xf32> to vector<8x8xf32>
    %446 = arith.divf %442, %445 : vector<8x8xf32>
    %447 = arith.truncf %446 : vector<8x8xf32> to vector<8x8xbf16>
    %448 = arith.truncf %430 : vector<8x64xf32> to vector<8x64xbf16>
    %cst_256 = arith.constant dense<0.000000e+00> : vector<8x64xf32>
    %449 = tpu.matmul %447, %448, %cst_256 {dimension_numbers = #tpu.dot_dimension_numbers<[1], [0], [0], [1], [0, 0, 1, 1], [], []>} : vector<8x8xbf16>, vector<8x64xbf16>, vector<8x64xf32> -> vector<8x64xf32>
    %c2_257 = arith.constant 2 : index
    %c0_258 = arith.constant 0 : index
    %c0_259 = arith.constant 0 : index
    %450 = vector.load %arg12[%c2_257, %c0_258, %c0_259] : memref<4x64x128xbf16, #tpu.memory_space<vmem>>, vector<1x64x128xbf16>
    %451 = vector.shape_cast %450 : vector<1x64x128xbf16> to vector<64x128xbf16>
    %452 = arith.truncf %449 : vector<8x64xf32> to vector<8x64xbf16>
    %cst_260 = arith.constant dense<0.000000e+00> : vector<8x128xf32>
    %453 = tpu.matmul %452, %451, %cst_260 {dimension_numbers = #tpu.dot_dimension_numbers<[1], [0], [0], [1], [0, 0, 1, 1], [], []>} : vector<8x64xbf16>, vector<64x128xbf16>, vector<8x128xf32> -> vector<8x128xf32>
    %c3_261 = arith.constant 3 : index
    %c0_262 = arith.constant 0 : index
    %c0_263 = arith.constant 0 : index
    %454 = vector.load %arg6[%c3_261, %c0_262, %c0_263] : memref<4x128x64xbf16, #tpu.memory_space<vmem>>, vector<1x128x64xbf16>
    %455 = vector.shape_cast %454 : vector<1x128x64xbf16> to vector<128x64xbf16>
    %456 = arith.truncf %405 : vector<8x128xf32> to vector<8x128xbf16>
    %cst_264 = arith.constant dense<0.000000e+00> : vector<8x64xf32>
    %457 = tpu.matmul %456, %455, %cst_264 {dimension_numbers = #tpu.dot_dimension_numbers<[1], [0], [0], [1], [0, 0, 1, 1], [], []>} : vector<8x128xbf16>, vector<128x64xbf16>, vector<8x64xf32> -> vector<8x64xf32>
    %c3_265 = arith.constant 3 : index
    %c0_266 = arith.constant 0 : index
    %c0_267 = arith.constant 0 : index
    %458 = vector.load %arg9[%c3_265, %c0_266, %c0_267] : memref<4x1x64xf32, #tpu.memory_space<vmem>>, vector<1x1x64xf32>
    %459 = vector.shape_cast %458 : vector<1x1x64xf32> to vector<1x64xf32>
    %460 = vector.broadcast %459 : vector<1x64xf32> to vector<8x64xf32>
    %461 = arith.addf %457, %460 : vector<8x64xf32>
    %c3_268 = arith.constant 3 : index
    %c0_269 = arith.constant 0 : index
    %c0_270 = arith.constant 0 : index
    %462 = vector.load %arg7[%c3_268, %c0_269, %c0_270] : memref<4x128x64xbf16, #tpu.memory_space<vmem>>, vector<1x128x64xbf16>
    %463 = vector.shape_cast %462 : vector<1x128x64xbf16> to vector<128x64xbf16>
    %464 = arith.truncf %405 : vector<8x128xf32> to vector<8x128xbf16>
    %cst_271 = arith.constant dense<0.000000e+00> : vector<8x64xf32>
    %465 = tpu.matmul %464, %463, %cst_271 {dimension_numbers = #tpu.dot_dimension_numbers<[1], [0], [0], [1], [0, 0, 1, 1], [], []>} : vector<8x128xbf16>, vector<128x64xbf16>, vector<8x64xf32> -> vector<8x64xf32>
    %c3_272 = arith.constant 3 : index
    %c0_273 = arith.constant 0 : index
    %c0_274 = arith.constant 0 : index
    %466 = vector.load %arg10[%c3_272, %c0_273, %c0_274] : memref<4x1x64xf32, #tpu.memory_space<vmem>>, vector<1x1x64xf32>
    %467 = vector.shape_cast %466 : vector<1x1x64xf32> to vector<1x64xf32>
    %468 = vector.broadcast %467 : vector<1x64xf32> to vector<8x64xf32>
    %469 = arith.addf %465, %468 : vector<8x64xf32>
    %c3_275 = arith.constant 3 : index
    %c0_276 = arith.constant 0 : index
    %c0_277 = arith.constant 0 : index
    %470 = vector.load %arg8[%c3_275, %c0_276, %c0_277] : memref<4x128x64xbf16, #tpu.memory_space<vmem>>, vector<1x128x64xbf16>
    %471 = vector.shape_cast %470 : vector<1x128x64xbf16> to vector<128x64xbf16>
    %472 = arith.truncf %405 : vector<8x128xf32> to vector<8x128xbf16>
    %cst_278 = arith.constant dense<0.000000e+00> : vector<8x64xf32>
    %473 = tpu.matmul %472, %471, %cst_278 {dimension_numbers = #tpu.dot_dimension_numbers<[1], [0], [0], [1], [0, 0, 1, 1], [], []>} : vector<8x128xbf16>, vector<128x64xbf16>, vector<8x64xf32> -> vector<8x64xf32>
    %c3_279 = arith.constant 3 : index
    %c0_280 = arith.constant 0 : index
    %c0_281 = arith.constant 0 : index
    %474 = vector.load %arg11[%c3_279, %c0_280, %c0_281] : memref<4x1x64xf32, #tpu.memory_space<vmem>>, vector<1x1x64xf32>
    %475 = vector.shape_cast %474 : vector<1x1x64xf32> to vector<1x64xf32>
    %476 = vector.broadcast %475 : vector<1x64xf32> to vector<8x64xf32>
    %477 = arith.addf %473, %476 : vector<8x64xf32>
    %478 = arith.truncf %461 : vector<8x64xf32> to vector<8x64xbf16>
    %479 = arith.truncf %469 : vector<8x64xf32> to vector<8x64xbf16>
    %cst_282 = arith.constant dense<0.000000e+00> : vector<8x8xf32>
    %480 = tpu.matmul %478, %479, %cst_282 {dimension_numbers = #tpu.dot_dimension_numbers<[1], [1], [0], [0], [0, 0, 1, 0], [], []>} : vector<8x64xbf16>, vector<8x64xbf16>, vector<8x8xf32> -> vector<8x8xf32>
    %cst_283 = arith.constant 1.250000e-01 : f32
    %481 = vector.broadcast %cst_283 : f32 to vector<8x8xf32>
    %482 = arith.mulf %480, %481 : vector<8x8xf32>
    %483 = vector.broadcast %406 : vector<1x8xf32> to vector<8x8xf32>
    %484 = arith.addf %482, %483 : vector<8x8xf32>
    %cst_284 = arith.constant dense<0xFF800000> : vector<8xf32>
    %485 = vector.multi_reduction <maximumf>, %484, %cst_284 [1] : vector<8x8xf32> to vector<8xf32>
    %486 = vector.shape_cast %485 : vector<8xf32> to vector<8x1xf32>
    %487 = vector.broadcast %486 : vector<8x1xf32> to vector<8x8xf32>
    %488 = arith.subf %484, %487 : vector<8x8xf32>
    %489 = math.exp %488 : vector<8x8xf32>
    %cst_285 = arith.constant dense<0.000000e+00> : vector<8xf32>
    %490 = vector.multi_reduction <add>, %489, %cst_285 [1] : vector<8x8xf32> to vector<8xf32>
    %491 = vector.shape_cast %490 : vector<8xf32> to vector<8x1xf32>
    %492 = vector.broadcast %491 : vector<8x1xf32> to vector<8x8xf32>
    %493 = arith.divf %489, %492 : vector<8x8xf32>
    %494 = arith.truncf %493 : vector<8x8xf32> to vector<8x8xbf16>
    %495 = arith.truncf %477 : vector<8x64xf32> to vector<8x64xbf16>
    %cst_286 = arith.constant dense<0.000000e+00> : vector<8x64xf32>
    %496 = tpu.matmul %494, %495, %cst_286 {dimension_numbers = #tpu.dot_dimension_numbers<[1], [0], [0], [1], [0, 0, 1, 1], [], []>} : vector<8x8xbf16>, vector<8x64xbf16>, vector<8x64xf32> -> vector<8x64xf32>
    %c3_287 = arith.constant 3 : index
    %c0_288 = arith.constant 0 : index
    %c0_289 = arith.constant 0 : index
    %497 = vector.load %arg12[%c3_287, %c0_288, %c0_289] : memref<4x64x128xbf16, #tpu.memory_space<vmem>>, vector<1x64x128xbf16>
    %498 = vector.shape_cast %497 : vector<1x64x128xbf16> to vector<64x128xbf16>
    %499 = arith.truncf %496 : vector<8x64xf32> to vector<8x64xbf16>
    %cst_290 = arith.constant dense<0.000000e+00> : vector<8x128xf32>
    %500 = tpu.matmul %499, %498, %cst_290 {dimension_numbers = #tpu.dot_dimension_numbers<[1], [0], [0], [1], [0, 0, 1, 1], [], []>} : vector<8x64xbf16>, vector<64x128xbf16>, vector<8x128xf32> -> vector<8x128xf32>
    %501 = arith.addf %453, %500 : vector<8x128xf32>
    %502 = tpu.concatenate %404, %501 in 0 : vector<8x128xf32>, vector<8x128xf32> -> vector<16x128xf32>
    %c1_291 = arith.constant 1 : index
    %c0_292 = arith.constant 0 : index
    %c0_293 = arith.constant 0 : index
    %503 = vector.load %arg13[%c1_291, %c0_292, %c0_293] : memref<2x1x128xf32, #tpu.memory_space<vmem>>, vector<1x1x128xf32>
    %504 = vector.shape_cast %503 : vector<1x1x128xf32> to vector<1x128xf32>
    %505 = vector.broadcast %504 : vector<1x128xf32> to vector<16x128xf32>
    %506 = arith.addf %502, %505 : vector<16x128xf32>
    %507 = arith.addf %307, %506 : vector<16x128xf32>
    %c1_294 = arith.constant 1 : index
    %c0_295 = arith.constant 0 : index
    %c0_296 = arith.constant 0 : index
    %508 = vector.load %arg14[%c1_294, %c0_295, %c0_296] : memref<2x1x128xf32, #tpu.memory_space<vmem>>, vector<1x1x128xf32>
    %509 = vector.shape_cast %508 : vector<1x1x128xf32> to vector<1x128xf32>
    %c1_297 = arith.constant 1 : index
    %c0_298 = arith.constant 0 : index
    %c0_299 = arith.constant 0 : index
    %510 = vector.load %arg15[%c1_297, %c0_298, %c0_299] : memref<2x1x128xf32, #tpu.memory_space<vmem>>, vector<1x1x128xf32>
    %511 = vector.shape_cast %510 : vector<1x1x128xf32> to vector<1x128xf32>
    %cst_300 = arith.constant dense<0.000000e+00> : vector<16xf32>
    %512 = vector.multi_reduction <add>, %507, %cst_300 [1] : vector<16x128xf32> to vector<16xf32>
    %513 = vector.shape_cast %512 : vector<16xf32> to vector<16x1xf32>
    %cst_301 = arith.constant 1.280000e+02 : f32
    %514 = vector.broadcast %cst_301 : f32 to vector<16x1xf32>
    %515 = arith.divf %513, %514 : vector<16x1xf32>
    %516 = vector.broadcast %515 : vector<16x1xf32> to vector<16x128xf32>
    %517 = arith.subf %507, %516 : vector<16x128xf32>
    %518 = arith.mulf %517, %517 : vector<16x128xf32>
    %cst_302 = arith.constant dense<0.000000e+00> : vector<16xf32>
    %519 = vector.multi_reduction <add>, %518, %cst_302 [1] : vector<16x128xf32> to vector<16xf32>
    %520 = vector.shape_cast %519 : vector<16xf32> to vector<16x1xf32>
    %cst_303 = arith.constant 1.280000e+02 : f32
    %521 = vector.broadcast %cst_303 : f32 to vector<16x1xf32>
    %522 = arith.divf %520, %521 : vector<16x1xf32>
    %523 = vector.broadcast %515 : vector<16x1xf32> to vector<16x128xf32>
    %524 = arith.subf %507, %523 : vector<16x128xf32>
    %cst_304 = arith.constant 9.99999996E-13 : f32
    %525 = vector.broadcast %cst_304 : f32 to vector<16x1xf32>
    %526 = arith.addf %522, %525 : vector<16x1xf32>
    %527 = math.rsqrt %526 : vector<16x1xf32>
    %528 = vector.broadcast %527 : vector<16x1xf32> to vector<16x128xf32>
    %529 = arith.mulf %524, %528 : vector<16x128xf32>
    %530 = vector.broadcast %509 : vector<1x128xf32> to vector<16x128xf32>
    %531 = arith.mulf %529, %530 : vector<16x128xf32>
    %532 = vector.broadcast %511 : vector<1x128xf32> to vector<16x128xf32>
    %533 = arith.addf %531, %532 : vector<16x128xf32>
    %c1_305 = arith.constant 1 : index
    %c0_306 = arith.constant 0 : index
    %c0_307 = arith.constant 0 : index
    %534 = vector.load %arg16[%c1_305, %c0_306, %c0_307] : memref<2x128x512xbf16, #tpu.memory_space<vmem>>, vector<1x128x512xbf16>
    %535 = vector.shape_cast %534 : vector<1x128x512xbf16> to vector<128x512xbf16>
    %536 = arith.truncf %533 : vector<16x128xf32> to vector<16x128xbf16>
    %cst_308 = arith.constant dense<0.000000e+00> : vector<16x512xf32>
    %537 = tpu.matmul %536, %535, %cst_308 {dimension_numbers = #tpu.dot_dimension_numbers<[1], [0], [0], [1], [0, 0, 1, 1], [], []>} : vector<16x128xbf16>, vector<128x512xbf16>, vector<16x512xf32> -> vector<16x512xf32>
    %c1_309 = arith.constant 1 : index
    %c0_310 = arith.constant 0 : index
    %c0_311 = arith.constant 0 : index
    %538 = vector.load %arg17[%c1_309, %c0_310, %c0_311] : memref<2x1x512xf32, #tpu.memory_space<vmem>>, vector<1x1x512xf32>
    %539 = vector.shape_cast %538 : vector<1x1x512xf32> to vector<1x512xf32>
    %540 = vector.broadcast %539 : vector<1x512xf32> to vector<16x512xf32>
    %541 = arith.addf %537, %540 : vector<16x512xf32>
    %542 = arith.mulf %541, %541 : vector<16x512xf32>
    %543 = arith.mulf %541, %542 : vector<16x512xf32>
    %cst_312 = arith.constant 4.471500e-02 : f32
    %544 = vector.broadcast %cst_312 : f32 to vector<16x512xf32>
    %545 = arith.mulf %544, %543 : vector<16x512xf32>
    %546 = arith.addf %541, %545 : vector<16x512xf32>
    %cst_313 = arith.constant 0.797884583 : f32
    %547 = vector.broadcast %cst_313 : f32 to vector<16x512xf32>
    %548 = arith.mulf %547, %546 : vector<16x512xf32>
    %549 = math.tanh %548 : vector<16x512xf32>
    %cst_314 = arith.constant 1.000000e+00 : f32
    %550 = vector.broadcast %cst_314 : f32 to vector<16x512xf32>
    %551 = arith.addf %550, %549 : vector<16x512xf32>
    %cst_315 = arith.constant 5.000000e-01 : f32
    %552 = vector.broadcast %cst_315 : f32 to vector<16x512xf32>
    %553 = arith.mulf %552, %551 : vector<16x512xf32>
    %554 = arith.mulf %541, %553 : vector<16x512xf32>
    %c1_316 = arith.constant 1 : index
    %c0_317 = arith.constant 0 : index
    %c0_318 = arith.constant 0 : index
    %555 = vector.load %arg18[%c1_316, %c0_317, %c0_318] : memref<2x512x128xbf16, #tpu.memory_space<vmem>>, vector<1x512x128xbf16>
    %556 = vector.shape_cast %555 : vector<1x512x128xbf16> to vector<512x128xbf16>
    %557 = arith.truncf %554 : vector<16x512xf32> to vector<16x512xbf16>
    %cst_319 = arith.constant dense<0.000000e+00> : vector<16x128xf32>
    %558 = tpu.matmul %557, %556, %cst_319 {dimension_numbers = #tpu.dot_dimension_numbers<[1], [0], [0], [1], [0, 0, 1, 1], [], []>} : vector<16x512xbf16>, vector<512x128xbf16>, vector<16x128xf32> -> vector<16x128xf32>
    %c1_320 = arith.constant 1 : index
    %c0_321 = arith.constant 0 : index
    %c0_322 = arith.constant 0 : index
    %559 = vector.load %arg19[%c1_320, %c0_321, %c0_322] : memref<2x1x128xf32, #tpu.memory_space<vmem>>, vector<1x1x128xf32>
    %560 = vector.shape_cast %559 : vector<1x1x128xf32> to vector<1x128xf32>
    %561 = vector.broadcast %560 : vector<1x128xf32> to vector<16x128xf32>
    %562 = arith.addf %558, %561 : vector<16x128xf32>
    %563 = arith.addf %533, %562 : vector<16x128xf32>
    %c1_323 = arith.constant 1 : index
    %c0_324 = arith.constant 0 : index
    %c0_325 = arith.constant 0 : index
    %564 = vector.load %arg20[%c1_323, %c0_324, %c0_325] : memref<2x1x128xf32, #tpu.memory_space<vmem>>, vector<1x1x128xf32>
    %565 = vector.shape_cast %564 : vector<1x1x128xf32> to vector<1x128xf32>
    %c1_326 = arith.constant 1 : index
    %c0_327 = arith.constant 0 : index
    %c0_328 = arith.constant 0 : index
    %566 = vector.load %arg21[%c1_326, %c0_327, %c0_328] : memref<2x1x128xf32, #tpu.memory_space<vmem>>, vector<1x1x128xf32>
    %567 = vector.shape_cast %566 : vector<1x1x128xf32> to vector<1x128xf32>
    %cst_329 = arith.constant dense<0.000000e+00> : vector<16xf32>
    %568 = vector.multi_reduction <add>, %563, %cst_329 [1] : vector<16x128xf32> to vector<16xf32>
    %569 = vector.shape_cast %568 : vector<16xf32> to vector<16x1xf32>
    %cst_330 = arith.constant 1.280000e+02 : f32
    %570 = vector.broadcast %cst_330 : f32 to vector<16x1xf32>
    %571 = arith.divf %569, %570 : vector<16x1xf32>
    %572 = vector.broadcast %571 : vector<16x1xf32> to vector<16x128xf32>
    %573 = arith.subf %563, %572 : vector<16x128xf32>
    %574 = arith.mulf %573, %573 : vector<16x128xf32>
    %cst_331 = arith.constant dense<0.000000e+00> : vector<16xf32>
    %575 = vector.multi_reduction <add>, %574, %cst_331 [1] : vector<16x128xf32> to vector<16xf32>
    %576 = vector.shape_cast %575 : vector<16xf32> to vector<16x1xf32>
    %cst_332 = arith.constant 1.280000e+02 : f32
    %577 = vector.broadcast %cst_332 : f32 to vector<16x1xf32>
    %578 = arith.divf %576, %577 : vector<16x1xf32>
    %579 = vector.broadcast %571 : vector<16x1xf32> to vector<16x128xf32>
    %580 = arith.subf %563, %579 : vector<16x128xf32>
    %cst_333 = arith.constant 9.99999996E-13 : f32
    %581 = vector.broadcast %cst_333 : f32 to vector<16x1xf32>
    %582 = arith.addf %578, %581 : vector<16x1xf32>
    %583 = math.rsqrt %582 : vector<16x1xf32>
    %584 = vector.broadcast %583 : vector<16x1xf32> to vector<16x128xf32>
    %585 = arith.mulf %580, %584 : vector<16x128xf32>
    %586 = vector.broadcast %565 : vector<1x128xf32> to vector<16x128xf32>
    %587 = arith.mulf %585, %586 : vector<16x128xf32>
    %588 = vector.broadcast %567 : vector<1x128xf32> to vector<16x128xf32>
    %589 = arith.addf %587, %588 : vector<16x128xf32>
    %590 = vector.extract_strided_slice %589 {offsets = [0, 0], sizes = [1, 128], strides = [1, 1]} : vector<16x128xf32> to vector<1x128xf32>
    %591 = vector.extract_strided_slice %589 {offsets = [8, 0], sizes = [1, 128], strides = [1, 1]} : vector<16x128xf32> to vector<1x128xf32>
    %592 = tpu.concatenate %590, %591 in 0 : vector<1x128xf32>, vector<1x128xf32> -> vector<2x128xf32>
    %c0_334 = arith.constant 0 : index
    %c0_335 = arith.constant 0 : index
    %593 = vector.load %arg22[%c0_334, %c0_335] : memref<128x64xbf16, #tpu.memory_space<vmem>>, vector<128x64xbf16>
    %594 = arith.truncf %592 : vector<2x128xf32> to vector<2x128xbf16>
    %cst_336 = arith.constant dense<0.000000e+00> : vector<2x64xf32>
    %595 = tpu.matmul %594, %593, %cst_336 {dimension_numbers = #tpu.dot_dimension_numbers<[1], [0], [0], [1], [0, 0, 1, 1], [], []>} : vector<2x128xbf16>, vector<128x64xbf16>, vector<2x64xf32> -> vector<2x64xf32>
    %c0_337 = arith.constant 0 : index
    %c0_338 = arith.constant 0 : index
    %596 = vector.load %arg23[%c0_337, %c0_338] : memref<1x64xf32, #tpu.memory_space<vmem>>, vector<1x64xf32>
    %597 = vector.broadcast %596 : vector<1x64xf32> to vector<2x64xf32>
    %598 = arith.addf %595, %597 : vector<2x64xf32>
    %c0_339 = arith.constant 0 : index
    %c0_340 = arith.constant 0 : index
    %599 = vector.load %arg3[%c0_339, %c0_340] : memref<2x64xf32, #tpu.memory_space<vmem>>, vector<2x64xf32>
    %c0_341 = arith.constant 0 : index
    %c0_342 = arith.constant 0 : index
    %600 = vector.load %arg24[%c0_341, %c0_342] : memref<64x64xbf16, #tpu.memory_space<vmem>>, vector<64x64xbf16>
    %601 = arith.truncf %599 : vector<2x64xf32> to vector<2x64xbf16>
    %cst_343 = arith.constant dense<0.000000e+00> : vector<2x64xf32>
    %602 = tpu.matmul %601, %600, %cst_343 {dimension_numbers = #tpu.dot_dimension_numbers<[1], [0], [0], [1], [0, 0, 1, 1], [], []>} : vector<2x64xbf16>, vector<64x64xbf16>, vector<2x64xf32> -> vector<2x64xf32>
    %c0_344 = arith.constant 0 : index
    %c0_345 = arith.constant 0 : index
    %603 = vector.load %arg25[%c0_344, %c0_345] : memref<64x64xbf16, #tpu.memory_space<vmem>>, vector<64x64xbf16>
    %604 = arith.truncf %598 : vector<2x64xf32> to vector<2x64xbf16>
    %cst_346 = arith.constant dense<0.000000e+00> : vector<2x64xf32>
    %605 = tpu.matmul %604, %603, %cst_346 {dimension_numbers = #tpu.dot_dimension_numbers<[1], [0], [0], [1], [0, 0, 1, 1], [], []>} : vector<2x64xbf16>, vector<64x64xbf16>, vector<2x64xf32> -> vector<2x64xf32>
    %606 = arith.addf %602, %605 : vector<2x64xf32>
    %c0_347 = arith.constant 0 : index
    %c0_348 = arith.constant 0 : index
    %607 = vector.load %arg26[%c0_347, %c0_348] : memref<1x64xf32, #tpu.memory_space<vmem>>, vector<1x64xf32>
    %608 = vector.broadcast %607 : vector<1x64xf32> to vector<2x64xf32>
    %609 = arith.addf %606, %608 : vector<2x64xf32>
    %cst_349 = arith.constant 0.000000e+00 : f32
    %610 = vector.broadcast %cst_349 : f32 to vector<2x64xf32>
    %611 = arith.maximumf %609, %610 : vector<2x64xf32>
    %c0_350 = arith.constant 0 : index
    %c0_351 = arith.constant 0 : index
    %612 = vector.load %arg27[%c0_350, %c0_351] : memref<64x10xbf16, #tpu.memory_space<vmem>>, vector<64x10xbf16>
    %613 = arith.truncf %611 : vector<2x64xf32> to vector<2x64xbf16>
    %cst_352 = arith.constant dense<0.000000e+00> : vector<2x10xf32>
    %614 = tpu.matmul %613, %612, %cst_352 {dimension_numbers = #tpu.dot_dimension_numbers<[1], [0], [0], [1], [0, 0, 1, 1], [], []>} : vector<2x64xbf16>, vector<64x10xbf16>, vector<2x10xf32> -> vector<2x10xf32>
    %c0_353 = arith.constant 0 : index
    %c0_354 = arith.constant 0 : index
    %615 = vector.load %arg28[%c0_353, %c0_354] : memref<1x10xf32, #tpu.memory_space<vmem>>, vector<1x10xf32>
    %616 = vector.broadcast %615 : vector<1x10xf32> to vector<2x10xf32>
    %617 = arith.addf %614, %616 : vector<2x10xf32>
    %c0_355 = arith.constant 0 : index
    %c0_356 = arith.constant 0 : index
    %618 = vector.load %arg29[%c0_355, %c0_356] : memref<2x10xf32, #tpu.memory_space<vmem>>, vector<2x10xf32>
    tpu.vector_store %arg29[%c0_355, %c0_356], %617 {strides = array<i32>} : memref<2x10xf32, #tpu.memory_space<vmem>>, vector<2x10xf32>,
    return
  }
  func.func @transform_0(%arg0: i32) -> (i32, i32) {
    %c0_i32 = arith.constant 0 : i32
    %c0_i32_0 = arith.constant 0 : i32
    %c0_i32_1 = arith.constant 0 : i32
    return %c0_i32, %c0_i32_0 : i32, i32
  }
  func.func @transform_1(%arg0: i32) -> (i32, i32) {
    %c0_i32 = arith.constant 0 : i32
    %c0_i32_0 = arith.constant 0 : i32
    %c0_i32_1 = arith.constant 0 : i32
    return %c0_i32, %c0_i32_0 : i32, i32
  }
  func.func @transform_2(%arg0: i32) -> (i32, i32) {
    %c0_i32 = arith.constant 0 : i32
    %c0_i32_0 = arith.constant 0 : i32
    %c0_i32_1 = arith.constant 0 : i32
    return %c0_i32, %c0_i32_0 : i32, i32
  }
  func.func @transform_3(%arg0: i32) -> (i32, i32) {
    %c0_i32 = arith.constant 0 : i32
    %c0_i32_0 = arith.constant 0 : i32
    %c0_i32_1 = arith.constant 0 : i32
    return %c0_i32, %c0_i32_0 : i32, i32
  }
  func.func @transform_4(%arg0: i32) -> (i32, i32) {
    %c0_i32 = arith.constant 0 : i32
    %c0_i32_0 = arith.constant 0 : i32
    %c0_i32_1 = arith.constant 0 : i32
    return %c0_i32, %c0_i32_0 : i32, i32
  }
  func.func @transform_5(%arg0: i32) -> (i32, i32, i32) {
    %c0_i32 = arith.constant 0 : i32
    %c0_i32_0 = arith.constant 0 : i32
    %c0_i32_1 = arith.constant 0 : i32
    %c0_i32_2 = arith.constant 0 : i32
    return %c0_i32, %c0_i32_0, %c0_i32_1 : i32, i32, i32
  }
  func.func @transform_6(%arg0: i32) -> (i32, i32, i32) {
    %c0_i32 = arith.constant 0 : i32
    %c0_i32_0 = arith.constant 0 : i32
    %c0_i32_1 = arith.constant 0 : i32
    %c0_i32_2 = arith.constant 0 : i32
    return %c0_i32, %c0_i32_0, %c0_i32_1 : i32, i32, i32
  }
  func.func @transform_7(%arg0: i32) -> (i32, i32, i32) {
    %c0_i32 = arith.constant 0 : i32
    %c0_i32_0 = arith.constant 0 : i32
    %c0_i32_1 = arith.constant 0 : i32
    %c0_i32_2 = arith.constant 0 : i32
    return %c0_i32, %c0_i32_0, %c0_i32_1 : i32, i32, i32
  }
  func.func @transform_8(%arg0: i32) -> (i32, i32, i32) {
    %c0_i32 = arith.constant 0 : i32
    %c0_i32_0 = arith.constant 0 : i32
    %c0_i32_1 = arith.constant 0 : i32
    %c0_i32_2 = arith.constant 0 : i32
    return %c0_i32, %c0_i32_0, %c0_i32_1 : i32, i32, i32
  }
  func.func @transform_9(%arg0: i32) -> (i32, i32, i32) {
    %c0_i32 = arith.constant 0 : i32
    %c0_i32_0 = arith.constant 0 : i32
    %c0_i32_1 = arith.constant 0 : i32
    %c0_i32_2 = arith.constant 0 : i32
    return %c0_i32, %c0_i32_0, %c0_i32_1 : i32, i32, i32
  }
  func.func @transform_10(%arg0: i32) -> (i32, i32, i32) {
    %c0_i32 = arith.constant 0 : i32
    %c0_i32_0 = arith.constant 0 : i32
    %c0_i32_1 = arith.constant 0 : i32
    %c0_i32_2 = arith.constant 0 : i32
    return %c0_i32, %c0_i32_0, %c0_i32_1 : i32, i32, i32
  }
  func.func @transform_11(%arg0: i32) -> (i32, i32, i32) {
    %c0_i32 = arith.constant 0 : i32
    %c0_i32_0 = arith.constant 0 : i32
    %c0_i32_1 = arith.constant 0 : i32
    %c0_i32_2 = arith.constant 0 : i32
    return %c0_i32, %c0_i32_0, %c0_i32_1 : i32, i32, i32
  }
  func.func @transform_12(%arg0: i32) -> (i32, i32, i32) {
    %c0_i32 = arith.constant 0 : i32
    %c0_i32_0 = arith.constant 0 : i32
    %c0_i32_1 = arith.constant 0 : i32
    %c0_i32_2 = arith.constant 0 : i32
    return %c0_i32, %c0_i32_0, %c0_i32_1 : i32, i32, i32
  }
  func.func @transform_13(%arg0: i32) -> (i32, i32, i32) {
    %c0_i32 = arith.constant 0 : i32
    %c0_i32_0 = arith.constant 0 : i32
    %c0_i32_1 = arith.constant 0 : i32
    %c0_i32_2 = arith.constant 0 : i32
    return %c0_i32, %c0_i32_0, %c0_i32_1 : i32, i32, i32
  }
  func.func @transform_14(%arg0: i32) -> (i32, i32, i32) {
    %c0_i32 = arith.constant 0 : i32
    %c0_i32_0 = arith.constant 0 : i32
    %c0_i32_1 = arith.constant 0 : i32
    %c0_i32_2 = arith.constant 0 : i32
    return %c0_i32, %c0_i32_0, %c0_i32_1 : i32, i32, i32
  }
  func.func @transform_15(%arg0: i32) -> (i32, i32, i32) {
    %c0_i32 = arith.constant 0 : i32
    %c0_i32_0 = arith.constant 0 : i32
    %c0_i32_1 = arith.constant 0 : i32
    %c0_i32_2 = arith.constant 0 : i32
    return %c0_i32, %c0_i32_0, %c0_i32_1 : i32, i32, i32
  }
  func.func @transform_16(%arg0: i32) -> (i32, i32, i32) {
    %c0_i32 = arith.constant 0 : i32
    %c0_i32_0 = arith.constant 0 : i32
    %c0_i32_1 = arith.constant 0 : i32
    %c0_i32_2 = arith.constant 0 : i32
    return %c0_i32, %c0_i32_0, %c0_i32_1 : i32, i32, i32
  }
  func.func @transform_17(%arg0: i32) -> (i32, i32, i32) {
    %c0_i32 = arith.constant 0 : i32
    %c0_i32_0 = arith.constant 0 : i32
    %c0_i32_1 = arith.constant 0 : i32
    %c0_i32_2 = arith.constant 0 : i32
    return %c0_i32, %c0_i32_0, %c0_i32_1 : i32, i32, i32
  }
  func.func @transform_18(%arg0: i32) -> (i32, i32, i32) {
    %c0_i32 = arith.constant 0 : i32
    %c0_i32_0 = arith.constant 0 : i32
    %c0_i32_1 = arith.constant 0 : i32
    %c0_i32_2 = arith.constant 0 : i32
    return %c0_i32, %c0_i32_0, %c0_i32_1 : i32, i32, i32
  }
  func.func @transform_19(%arg0: i32) -> (i32, i32, i32) {
    %c0_i32 = arith.constant 0 : i32
    %c0_i32_0 = arith.constant 0 : i32
    %c0_i32_1 = arith.constant 0 : i32
    %c0_i32_2 = arith.constant 0 : i32
    return %c0_i32, %c0_i32_0, %c0_i32_1 : i32, i32, i32
  }
  func.func @transform_20(%arg0: i32) -> (i32, i32, i32) {
    %c0_i32 = arith.constant 0 : i32
    %c0_i32_0 = arith.constant 0 : i32
    %c0_i32_1 = arith.constant 0 : i32
    %c0_i32_2 = arith.constant 0 : i32
    return %c0_i32, %c0_i32_0, %c0_i32_1 : i32, i32, i32
  }
  func.func @transform_21(%arg0: i32) -> (i32, i32) {
    %c0_i32 = arith.constant 0 : i32
    %c0_i32_0 = arith.constant 0 : i32
    %c0_i32_1 = arith.constant 0 : i32
    return %c0_i32, %c0_i32_0 : i32, i32
  }
  func.func @transform_22(%arg0: i32) -> (i32, i32) {
    %c0_i32 = arith.constant 0 : i32
    %c0_i32_0 = arith.constant 0 : i32
    %c0_i32_1 = arith.constant 0 : i32
    return %c0_i32, %c0_i32_0 : i32, i32
  }
  func.func @transform_23(%arg0: i32) -> (i32, i32) {
    %c0_i32 = arith.constant 0 : i32
    %c0_i32_0 = arith.constant 0 : i32
    %c0_i32_1 = arith.constant 0 : i32
    return %c0_i32, %c0_i32_0 : i32, i32
  }
  func.func @transform_24(%arg0: i32) -> (i32, i32) {
    %c0_i32 = arith.constant 0 : i32
    %c0_i32_0 = arith.constant 0 : i32
    %c0_i32_1 = arith.constant 0 : i32
    return %c0_i32, %c0_i32_0 : i32, i32
  }
  func.func @transform_25(%arg0: i32) -> (i32, i32) {
    %c0_i32 = arith.constant 0 : i32
    %c0_i32_0 = arith.constant 0 : i32
    %c0_i32_1 = arith.constant 0 : i32
    return %c0_i32, %c0_i32_0 : i32, i32
  }
  func.func @transform_26(%arg0: i32) -> (i32, i32) {
    %c0_i32 = arith.constant 0 : i32
    %c0_i32_0 = arith.constant 0 : i32
    %c0_i32_1 = arith.constant 0 : i32
    return %c0_i32, %c0_i32_0 : i32, i32
  }
  func.func @transform_27(%arg0: i32) -> (i32, i32) {
    %c0_i32 = arith.constant 0 : i32
    %c0_i32_0 = arith.constant 0 : i32
    %c0_i32_1 = arith.constant 0 : i32
    return %c0_i32, %c0_i32_0 : i32, i32
  }
  func.func @transform_28(%arg0: i32) -> (i32, i32) {
    %c0_i32 = arith.constant 0 : i32
    %c0_i32_0 = arith.constant 0 : i32
    %c0_i32_1 = arith.constant 0 : i32
    return %c0_i32, %c0_i32_0 : i32, i32
  }
}

</mosaic_0001>

<bundles_post_ra>
// kernel: light_music_genre_classifier.4
= control target key start
LH: loop header
LB: loop body
LE: loop exit
PB: predicated region body
PF: predicated region fallthrough
CT: control target
= control target key end

     0   :  { %vm78_vm0 = vcmask 1043456   ;;  %vm79_vm1 = vcmask 1044480   ;;  %v945_v1 = vmov 65535   ;;  %vm53_vm2 = vcmask 72704   ;;  %s1386_s1 = inlined_call_operand.vmem [shape: bf16[9,16], index: 1, kind: input, shape index: {}]   ;;  %s1387_s0 = inlined_call_operand.vmem [shape: f32[4,128,9], index: 0, kind: input, shape index: {}]   ;;  %s1388_s2 = inlined_call_operand.vmem [shape: f32[1,16], index: 2, kind: input, shape index: {}]   ;;  %s1389_s3 = inlined_call_operand.vmem [shape: f32[128,16], index: 3, kind: output, shape index: {}]  }
   0x1   :  { %v944_v0 = vld [vmem:[%s1386_s1] sm:$0x1f]   ;;  %v80_v2 = vsel %vm78_vm0, 4294967295, %v945_v1  ;;  %v16_v4 = vld [vmem:[%s1387_s0 + $0x8] sm:$0xff]  ;;  %v17_v9 = vld [vmem:[%s1387_s0 + $0x10] sm:$0xff]  ;;  %vm732_vm3 = vcmask 130048  }
   0x2   :  { %v15_v3 = vld [vmem:[%s1387_s0] sm:$0xff]  ;;  %v81_v6 = vsel %vm79_vm1, %v80_v2, 0  ;;  %v764_v8 = vld [vmem:[%s1387_s0 + $0x88] sm:$0xff]  ;;  %v18_v10 = vld [vmem:[%s1387_s0 + $0x18] sm:$0xff] }
   0x3   :  { %v763_v5 = vld [vmem:[%s1387_s0 + $0x80] sm:$0xff]  ;;  %v33_v7 = vpack.c.bf16 %v16_v4, %v15_v3  ;;  %v83_v11 = vand.u32 %v944_v0, %v81_v6  ;;  %v765_v13 = vld [vmem:[%s1387_s0 + $0x90] sm:$0xff]  ;;  %v766_v14 = vld [vmem:[%s1387_s0 + $0x98] sm:$0xff]  ;;  %v34_v19 = vpack.c.bf16 %v18_v10, %v17_v9 }
   0x4   :  { %v215_v12 = vpack.c.bf16 %v764_v8, %v763_v5  ;;  %v19_v15 = vld [vmem:[%s1387_s0 + $0x20] sm:$0xff]  ;;  %v20_v16 = vld [vmem:[%s1387_s0 + $0x28] sm:$0xff]  ;;  %v216_v20 = vpack.c.bf16 %v766_v14, %v765_v13  ;;  %v21_v23 = vld [vmem:[%s1387_s0 + $0x30] sm:$0xff] }
   0x5   :  { %873 = vmatprep.mubr.msk.bf16.mxu0 %vm53_vm2, %v33_v7  ;;  %v767_v17 = vld [vmem:[%s1387_s0 + $0xa0] sm:$0xff]  ;;  %v768_v18 = vld [vmem:[%s1387_s0 + $0xa8] sm:$0xff]  ;;  %871 = vmatprep.subr.bf16.mxu0 %v83_v11  ;;  %v35_v21 = vpack.c.bf16 %v20_v16, %v19_v15  ;;  %v22_v24 = vld [vmem:[%s1387_s0 + $0x38] sm:$0xff] }
   0x6   :  { %889 = vmatprep.subr.bf16.mxu1 %v83_v11  ;;  %872 = vmatpush3.bf16.msra.mxu0 %v83_v11  ;;  %v217_v22 = vpack.c.bf16 %v768_v18, %v767_v17  ;;  %v769_v25 = vld [vmem:[%s1387_s0 + $0xb0] sm:$0xff]  ;;  %v770_v26 = vld [vmem:[%s1387_s0 + $0xb8] sm:$0xff]  ;;  %v23_v27 = vld [vmem:[%s1387_s0 + $0x40] sm:$0xff]  ;;  %v36_v31 = vpack.c.bf16 %v22_v24, %v21_v23 }
   0x7   :  { %890 = vmatpush3.bf16.msra.mxu1 %v83_v11  ;;  %891 = vmatprep.mubr.msk.bf16.mxu1 %vm53_vm2, %v215_v12  ;;  %v24_v28 = vld [vmem:[%s1387_s0 + $0x48] sm:$0xff]  ;;  %v771_v29 = vld [vmem:[%s1387_s0 + $0xc0] sm:$0xff]  ;;  %v218_v32 = vpack.c.bf16 %v770_v26, %v769_v25  ;;  %v25_v35 = vld [vmem:[%s1387_s0 + $0x50] sm:$0xff] }
   0x8   :  { %907 = vmatprep.subr.bf16.mxu0 %v83_v11  ;;  %925 = vmatprep.subr.bf16.mxu1 %v83_v11  ;;  %v772_v30 = vld [vmem:[%s1387_s0 + $0xc8] sm:$0xff]  ;;  %v37_v33 = vpack.c.bf16 %v24_v28, %v23_v27  ;;  %v26_v36 = vld [vmem:[%s1387_s0 + $0x58] sm:$0xff]  ;;  %v773_v37 = vld [vmem:[%s1387_s0 + $0xd0] sm:$0xff] }
   0x9   :  { %874 = vmatmul.mubr.msk.bf16.vlgmr.msra.gmra.mxu0 %vm53_vm2, %v34_v19  ;;  %v219_v34 = vpack.c.bf16 %v772_v30, %v771_v29  ;;  %v774_v38 = vld [vmem:[%s1387_s0 + $0xd8] sm:$0xff]  ;;  %v27_v39 = vld [vmem:[%s1387_s0 + $0x60] sm:$0xff]  ;;  %v28_v40 = vld [vmem:[%s1387_s0 + $0x68] sm:$0xff]  ;;  %v38_v43 = vpack.c.bf16 %v26_v36, %v25_v35 }
   0xa   :  { %892 = vmatmul.mubr.msk.bf16.vlgmr.msra.gmra.mxu1 %vm53_vm2, %v216_v20  ;;  %908 = vmatpush3.bf16.msra.mxu0 %v83_v11  ;;  %v775_v41 = vld [vmem:[%s1387_s0 + $0xe0] sm:$0xff]  ;;  %v776_v42 = vld [vmem:[%s1387_s0 + $0xe8] sm:$0xff]  ;;  %v220_v44 = vpack.c.bf16 %v774_v38, %v773_v37  ;;  %v39_v45 = vpack.c.bf16 %v28_v40, %v27_v39  ;;  %v29_v47 = vld [vmem:[%s1387_s0 + $0x70] sm:$0xff] }
   0xb   :  { %926 = vmatpush3.bf16.msra.mxu1 %v83_v11  ;;  %877 = vmatprep.mubr.msk.bf16.mxu0 %vm53_vm2, %v35_v21  ;;  %v221_v46 = vpack.c.bf16 %v776_v42, %v775_v41  ;;  %v30_v48 = vld [vmem:[%s1387_s0 + $0x78] sm:$0xff]  ;;  %v777_v49 = vld [vmem:[%s1387_s0 + $0xf0] sm:$0xff]  ;;  %v787_v51 = vld [vmem:[%s1387_s0 + $0x100] sm:$0xff] }
   0xc   :  { %895 = vmatprep.mubr.msk.bf16.mxu1 %vm53_vm2, %v217_v22  ;;  %v778_v50 = vld [vmem:[%s1387_s0 + $0xf8] sm:$0xff]  ;;  %v788_v52 = vld [vmem:[%s1387_s0 + $0x108] sm:$0xff]  ;;  %v811_v53 = vld [vmem:[%s1387_s0 + $0x180] sm:$0xff]  ;;  %v40_v55 = vpack.c.bf16 %v30_v48, %v29_v47 }
   0xd   :  { %v812_v54 = vld [vmem:[%s1387_s0 + $0x188] sm:$0xff]  ;;  %v222_v56 = vpack.c.bf16 %v778_v50, %v777_v49  ;;  %v393_v57 = vpack.c.bf16 %v788_v52, %v787_v51  ;;  %v789_v59 = vld [vmem:[%s1387_s0 + $0x110] sm:$0xff]  ;;  %v790_v60 = vld [vmem:[%s1387_s0 + $0x118] sm:$0xff] }
   0xe   :  { %v571_v58 = vpack.c.bf16 %v812_v54, %v811_v53  ;;  %v813_v61 = vld [vmem:[%s1387_s0 + $0x190] sm:$0xff]  ;;  %v814_v62 = vld [vmem:[%s1387_s0 + $0x198] sm:$0xff]  ;;  %v791_v63 = vld [vmem:[%s1387_s0 + $0x120] sm:$0xff]  ;;  %v394_v3 = vpack.c.bf16 %v790_v60, %v789_v59 }
   0xf   :  { %v792_v0 = vld [vmem:[%s1387_s0 + $0x128] sm:$0xff]  ;;  %v815_v1 = vld [vmem:[%s1387_s0 + $0x1a0] sm:$0xff]  ;;  %v572_v4 = vpack.c.bf16 %v814_v62, %v813_v61  ;;  %v793_v7 = vld [vmem:[%s1387_s0 + $0x130] sm:$0xff] }
  0x10   :  { %v816_v2 = vld [vmem:[%s1387_s0 + $0x1a8] sm:$0xff]  ;;  %v395_v5 = vpack.c.bf16 %v792_v0, %v791_v63  ;;  %v794_v8 = vld [vmem:[%s1387_s0 + $0x138] sm:$0xff]  ;;  %v817_v9 = vld [vmem:[%s1387_s0 + $0x1b0] sm:$0xff] }
  0x11   :  { %878 = vmatmul.mubr.msk.bf16.gmra.mxu0 %vm53_vm2, %v36_v31  ;;  %v573_v6 = vpack.c.bf16 %v816_v2, %v815_v1  ;;  %v818_v10 = vld [vmem:[%s1387_s0 + $0x1b8] sm:$0xff]  ;;  %v795_v11 = vld [vmem:[%s1387_s0 + $0x140] sm:$0xff]  ;;  %v796_v12 = vld [vmem:[%s1387_s0 + $0x148] sm:$0xff]  ;;  %v396_v15 = vpack.c.bf16 %v794_v8, %v793_v7 }
  0x12   :  { %896 = vmatmul.mubr.msk.bf16.gmra.mxu1 %vm53_vm2, %v218_v32  ;;  %881 = vmatprep.mubr.msk.bf16.mxu0 %vm53_vm2, %v37_v33  ;;  %v819_v13 = vld [vmem:[%s1387_s0 + $0x1c0] sm:$0xff]  ;;  %v820_v14 = vld [vmem:[%s1387_s0 + $0x1c8] sm:$0xff]  ;;  %v574_v16 = vpack.c.bf16 %v818_v10, %v817_v9  ;;  %v397_v17 = vpack.c.bf16 %v796_v12, %v795_v11  ;;  %v797_v19 = vld [vmem:[%s1387_s0 + $0x150] sm:$0xff] }
  0x13   :  { %899 = vmatprep.mubr.msk.bf16.mxu1 %vm53_vm2, %v219_v34  ;;  %v575_v18 = vpack.c.bf16 %v820_v14, %v819_v13  ;;  %v798_v20 = vld [vmem:[%s1387_s0 + $0x158] sm:$0xff]  ;;  %v821_v21 = vld [vmem:[%s1387_s0 + $0x1d0] sm:$0xff]  ;;  %v799_v23 = vld [vmem:[%s1387_s0 + $0x160] sm:$0xff] }
  0x14   :  { %v822_v22 = vld [vmem:[%s1387_s0 + $0x1d8] sm:$0xff]  ;;  %v800_v24 = vld [vmem:[%s1387_s0 + $0x168] sm:$0xff]  ;;  %v823_v25 = vld [vmem:[%s1387_s0 + $0x1e0] sm:$0xff]  ;;  %v398_v27 = vpack.c.bf16 %v798_v20, %v797_v19 }
  0x15   :  { %v824_v26 = vld [vmem:[%s1387_s0 + $0x1e8] sm:$0xff]  ;;  %v576_v28 = vpack.c.bf16 %v822_v22, %v821_v21  ;;  %v399_v29 = vpack.c.bf16 %v800_v24, %v799_v23  ;;  %v801_v31 = vld [vmem:[%s1387_s0 + $0x170] sm:$0xff]  ;;  %v802_v32 = vld [vmem:[%s1387_s0 + $0x178] sm:$0xff] }
  0x16   :  { %v577_v30 = vpack.c.bf16 %v824_v26, %v823_v25  ;;  %v825_v33 = vld [vmem:[%s1387_s0 + $0x1f0] sm:$0xff]  ;;  %v826_v34 = vld [vmem:[%s1387_s0 + $0x1f8] sm:$0xff]  ;;  %v400_v35 = vpack.c.bf16 %v802_v32, %v801_v31  ;;  %v1196_v51 = vld [vmem:[%s1388_s2] ss:$0 sm:$0xff] }
  0x17   :  { %v578_v36 = vpack.c.bf16 %v826_v34, %v825_v33 }
  0x19   :  { %882 = vmatmul.mubr.msk.bf16.gmra.mxu0 %vm53_vm2, %v38_v43 }
  0x1a   :  { %900 = vmatmul.mubr.msk.bf16.gmra.mxu1 %vm53_vm2, %v220_v44  ;;  %885 = vmatprep.mubr.msk.bf16.mxu0 %vm53_vm2, %v39_v45 }
  0x1b   :  { %903 = vmatprep.mubr.msk.bf16.mxu1 %vm53_vm2, %v221_v46 }
  0x21   :  { %886 = vmatmul.mubr.msk.bf16.gmra.mxu0 %vm53_vm2, %v40_v55 }
  0x22   :  { %904 = vmatmul.mubr.msk.bf16.gmra.mxu1 %vm53_vm2, %v222_v56  ;;  %909 = vmatprep.mubr.msk.bf16.mxu0 %vm53_vm2, %v393_v57 }
  0x23   :  { %927 = vmatprep.mubr.msk.bf16.mxu1 %vm53_vm2, %v571_v58 }
  0x29   :  { %910 = vmatmul.mubr.msk.bf16.vlgmr.msra.gmra.mxu0 %vm53_vm2, %v394_v3 }
  0x2a   :  { %928 = vmatmul.mubr.msk.bf16.vlgmr.msra.gmra.mxu1 %vm53_vm2, %v572_v4  ;;  %913 = vmatprep.mubr.msk.bf16.mxu0 %vm53_vm2, %v395_v5 }
  0x2b   :  { %931 = vmatprep.mubr.msk.bf16.mxu1 %vm53_vm2, %v573_v6 }
  0x31   :  { %914 = vmatmul.mubr.msk.bf16.gmra.mxu0 %vm53_vm2, %v396_v15 }
  0x32   :  { %932 = vmatmul.mubr.msk.bf16.gmra.mxu1 %vm53_vm2, %v574_v16  ;;  %917 = vmatprep.mubr.msk.bf16.mxu0 %vm53_vm2, %v397_v17 }
  0x33   :  { %935 = vmatprep.mubr.msk.bf16.mxu1 %vm53_vm2, %v575_v18 }
  0x39   :  { %918 = vmatmul.mubr.msk.bf16.gmra.mxu0 %vm53_vm2, %v398_v27 }
  0x3a   :  { %936 = vmatmul.mubr.msk.bf16.gmra.mxu1 %vm53_vm2, %v576_v28  ;;  %921 = vmatprep.mubr.msk.bf16.mxu0 %vm53_vm2, %v399_v29 }
  0x3b   :  { %939 = vmatprep.mubr.msk.bf16.mxu1 %vm53_vm2, %v577_v30 }
  0x41   :  { %922 = vmatmul.mubr.msk.bf16.gmra.mxu0 %vm53_vm2, %v400_v35 }
  0x42   :  { %940 = vmatmul.mubr.msk.bf16.gmra.mxu1 %vm53_vm2, %v578_v36 }
  0xc9   :  { %v875_v37 = vpop.f32.mrf.mxu0 }
  0xca   :  { %v893_v38 = vpop.f32.mrf.mxu1  ;;  %v128_v54 = vadd.f32 %v875_v37, %v1196_v51 }
  0xcb   :  { %v119_v39 = vpop.f32.mrf.mxu0  ;;  %v290_v55 = vadd.f32 %v893_v38, %v1196_v51 }
  0xcc   :  { %v281_v40 = vpop.f32.mrf.mxu1  ;;  %v184_v60 = vmax.f32 %v128_v54, 0.0  ;;  %v120_v0 = vadd.f32 %v1196_v51, %v119_v39 }
  0xcd   :  { %v876_v41 = vpop.f32.mrf.mxu0  ;;  %v346_v61 = vmax.f32 %v290_v55, 0.0  ;;  %v282_v1 = vadd.f32 %v1196_v51, %v281_v40 }
  0xce   :  { %v894_v42 = vpop.f32.mrf.mxu1  ;;  %v131_v2 = vadd.f32 %v876_v41, %v1196_v51  ;;  %v182_v13 = vmax.f32 %v120_v0, 0.0 }
  0xcf   :  { %v122_v43 = vpop.f32.mrf.mxu0  ;;  %v293_v3 = vadd.f32 %v894_v42, %v1196_v51  ;;  %v1208_v6 = vmax.f32 %v184_v60, %v346_v61  ;;  %v344_v14 = vmax.f32 %v282_v1, 0.0 }
  0xd0   :  { %v284_v44 = vpop.f32.mrf.mxu1  ;;  %v123_v9 = vadd.f32 %v1196_v51, %v122_v43  ;;  %v185_v15 = vmax.f32 %v131_v2, 0.0 }
  0xd1   :  { %v879_v45 = vpop.f32.mrf.mxu0  ;;  %v285_v10 = vadd.f32 %v1196_v51, %v284_v44  ;;  %v347_v16 = vmax.f32 %v293_v3, 0.0  ;;  %v360_v33 = vmax.f32 %v182_v13, %v344_v14 }
  0xd2   :  { %v897_v46 = vpop.f32.mrf.mxu1  ;;  %v144_v11 = vadd.f32 %v879_v45, %v1196_v51  ;;  %v183_v29 = vmax.f32 %v123_v9, 0.0 }
  0xd3   :  { %v135_v47 = vpop.f32.mrf.mxu0  ;;  %v306_v12 = vadd.f32 %v897_v46, %v1196_v51  ;;  %v345_v30 = vmax.f32 %v285_v10, 0.0  ;;  %v363_v34 = vmax.f32 %v185_v15, %v347_v16 }
  0xd4   :  { %v297_v48 = vpop.f32.mrf.mxu1  ;;  %v136_v19 = vadd.f32 %v1196_v51, %v135_v47  ;;  %v188_v31 = vmax.f32 %v144_v11, 0.0 }
  0xd5   :  { %v880_v49 = vpop.f32.mrf.mxu0  ;;  %v298_v20 = vadd.f32 %v1196_v51, %v297_v48  ;;  %v350_v32 = vmax.f32 %v306_v12, 0.0 }
  0xd6   :  { %v898_v50 = vpop.f32.mrf.mxu1  ;;  %v147_v21 = vadd.f32 %v880_v49, %v1196_v51  ;;  %v186_v39 = vmax.f32 %v136_v19, 0.0  ;;  %v361_v49 = vmax.f32 %v183_v29, %v345_v30 }
  0xd7   :  { %v138_v52 = vpop.f32.mrf.mxu0  ;;  %v309_v22 = vadd.f32 %v898_v50, %v1196_v51  ;;  %v348_v40 = vmax.f32 %v298_v20, 0.0  ;;  %v1240_v50 = vmax.f32 %v188_v31, %v350_v32 }
  0xd8   :  { %v300_v53 = vpop.f32.mrf.mxu1  ;;  %v139_v23 = vadd.f32 %v1196_v51, %v138_v52  ;;  %v189_v41 = vmax.f32 %v147_v21, 0.0 }
  0xd9   :  { %v883_v56 = vpop.f32.mrf.mxu0  ;;  %v301_v24 = vadd.f32 %v1196_v51, %v300_v53  ;;  %v351_v42 = vmax.f32 %v309_v22, 0.0  ;;  %v1246_v60 = vmax.f32 %v186_v39, %v348_v40 }
  0xda   :  { %v901_v57 = vpop.f32.mrf.mxu1  ;;  %v160_v25 = vadd.f32 %v883_v56, %v1196_v51  ;;  %v187_v43 = vmax.f32 %v139_v23, 0.0 }
  0xdb   :  { %v151_v58 = vpop.f32.mrf.mxu0  ;;  %v322_v26 = vadd.f32 %v901_v57, %v1196_v51  ;;  %v349_v44 = vmax.f32 %v301_v24, 0.0  ;;  %v1249_v2 = vmax.f32 %v189_v41, %v351_v42 }
  0xdc   :  { %v313_v59 = vpop.f32.mrf.mxu1  ;;  %v152_v35 = vadd.f32 %v1196_v51, %v151_v58  ;;  %v192_v45 = vmax.f32 %v160_v25, 0.0 }
  0xdd   :  { %v884_v62 = vpop.f32.mrf.mxu0  ;;  %v314_v36 = vadd.f32 %v1196_v51, %v313_v59  ;;  %v354_v46 = vmax.f32 %v322_v26, 0.0  ;;  %v1251_v3 = vmax.f32 %v187_v43, %v349_v44 }
  0xde   :  { %v902_v63 = vpop.f32.mrf.mxu1  ;;  %v190_v54 = vmax.f32 %v152_v35, 0.0  ;;  %v163_v56 = vadd.f32 %v884_v62, %v1196_v51 }
  0xdf   :  { %v1204_v4 = vpop.f32.mrf.mxu0  ;;  %v352_v55 = vmax.f32 %v314_v36, 0.0  ;;  %v325_v57 = vadd.f32 %v902_v63, %v1196_v51  ;;  %v1253_v9 = vmax.f32 %v192_v45, %v354_v46 }
  0xe0   :  { %v1206_v5 = vpop.f32.mrf.mxu1  ;;  %v193_v16 = vmax.f32 %v163_v56, 0.0  ;;  %v1263_v20 = vadd.f32 %v1196_v51, %v1204_v4 }
  0xe1   :  { %v1210_v7 = vpop.f32.mrf.mxu0  ;;  %v1259_v15 = vmax.f32 %v190_v54, %v352_v55  ;;  %v355_v19 = vmax.f32 %v325_v57, 0.0 }
  0xe2   :  { %v1212_v8 = vpop.f32.mrf.mxu1 }
  0xe3   :  { %v1218_v17 = vpop.f32.mrf.mxu0  ;;  %v1275_v40 = vmax.f32 %v193_v16, %v355_v19  ;;  %v338_v41 = vadd.f32 %v1212_v8, %v1196_v51 }
  0xe4   :  { %v1220_v18 = vpop.f32.mrf.mxu1 }
  0xe5   :  { %v1230_v27 = vpop.f32.mrf.mxu0 }
  0xe6   :  { %v1232_v28 = vpop.f32.mrf.mxu1 }
  0xe7   :  { %v1236_v37 = vpop.f32.mrf.mxu0 }
  0xe8   :  { %v1238_v38 = vpop.f32.mrf.mxu1 }
  0xe9   :  { %v911_v47 = vpop.f32.mrf.mxu0 }
  0xea   :  { %v929_v48 = vpop.f32.mrf.mxu1  ;;  %v468_v52 = vadd.f32 %v911_v47, %v1196_v51 }
  0xeb   :  { %v646_v53 = vadd.f32 %v929_v48, %v1196_v51  ;;  %v459_v58 = vpop.f32.mrf.mxu0  ;;  %v191_v48 = vmax.f32 %v1263_v20, 0.0 }
  0xec   :  { %v637_v59 = vpop.f32.mrf.mxu1  ;;  %v524_v61 = vmax.f32 %v468_v52, 0.0  ;;  %v460_v1 = vadd.f32 %v1196_v51, %v459_v58 }
  0xed   :  { %v702_v0 = vmax.f32 %v646_v53, 0.0  ;;  %v638_v10 = vadd.f32 %v1196_v51, %v637_v59  ;;  %v912_v11 = vpop.f32.mrf.mxu0 }
  0xee   :  { %v930_v62 = vpop.f32.mrf.mxu1  ;;  %v540_v63 = vmax.f32 %v1208_v6, %v524_v61  ;;  %v522_v12 = vmax.f32 %v460_v1, 0.0  ;;  %v471_v13 = vadd.f32 %v912_v11, %v1196_v51  ;;  %v317_v6 = vadd.f32 %v1196_v51, %v1206_v5 }
  0xef   :  { %v649_v14 = vadd.f32 %v930_v62, %v1196_v51  ;;  %v462_v21 = vpop.f32.mrf.mxu0  ;;  %v700_v25 = vmax.f32 %v638_v10, 0.0  ;;  %v176_v5 = vadd.f32 %v1210_v7, %v1196_v51 }
  0xf0   :  { %v640_v22 = vpop.f32.mrf.mxu1  ;;  %v718_v23 = vmax.f32 %v540_v63, %v702_v0  ;;  %v538_v24 = vmax.f32 %v360_v33, %v522_v12  ;;  %v525_v26 = vmax.f32 %v471_v13, 0.0  ;;  %v463_v30 = vadd.f32 %v1196_v51, %v462_v21 }
  0xf1   :  { %v703_v29 = vmax.f32 %v649_v14, 0.0  ;;  %v641_v31 = vadd.f32 %v1196_v51, %v640_v22  ;;  %v915_v32 = vpop.f32.mrf.mxu0  ;;  %v353_v59 = vmax.f32 %v317_v6, 0.0  ;;  %v196_v61 = vmax.f32 %v176_v5, 0.0 }
  0xf2   :  { %v933_v35 = vpop.f32.mrf.mxu1  ;;  %735 = vst.msk [vmem:[%s1389_s3 + $0x10] sm:$0xff] %vm732_vm3, %v718_v23  ;;  %v716_v4 = vmax.f32 %v538_v24, %v700_v25  ;;  %v541_v36 = vmax.f32 %v363_v34, %v525_v26  ;;  %v484_v33 = vadd.f32 %v915_v32, %v1196_v51  ;;  %v523_v42 = vmax.f32 %v463_v30, 0.0 }
  0xf3   :  { %v662_v39 = vadd.f32 %v933_v35, %v1196_v51  ;;  %v475_v43 = vpop.f32.mrf.mxu0  ;;  %v701_v7 = vmax.f32 %v641_v31, 0.0  ;;  %v1298_v13 = vadd.f32 %v1196_v51, %v1218_v17  ;;  %v369_v23 = vmax.f32 %v191_v48, %v353_v59 }
  0xf4   :  { %v653_v44 = vpop.f32.mrf.mxu1  ;;  %733 = vst.msk [vmem:[%s1389_s3] sm:$0xff] %vm732_vm3, %v716_v4  ;;  %v719_v34 = vmax.f32 %v541_v36, %v703_v29  ;;  %v528_v45 = vmax.f32 %v484_v33, 0.0  ;;  %v476_v47 = vadd.f32 %v1196_v51, %v475_v43  ;;  %v539_v52 = vmax.f32 %v361_v49, %v523_v42 }
  0xf5   :  { %v706_v46 = vmax.f32 %v662_v39, 0.0  ;;  %v654_v53 = vadd.f32 %v1196_v51, %v653_v44  ;;  %v916_v8 = vpop.f32.mrf.mxu0  ;;  %v358_v49 = vmax.f32 %v338_v41, 0.0  ;;  %v330_v25 = vadd.f32 %v1196_v51, %v1220_v18 }
  0xf6   :  { %v934_v54 = vpop.f32.mrf.mxu1  ;;  %736 = vst.msk [vmem:[%s1389_s3 + $0x18] sm:$0xff] %vm732_vm3, %v719_v34  ;;  %v544_v55 = vmax.f32 %v1240_v50, %v528_v45  ;;  %v526_v56 = vmax.f32 %v476_v47, 0.0  ;;  %v487_v57 = vadd.f32 %v916_v8, %v1196_v51  ;;  %v717_v0 = vmax.f32 %v539_v52, %v701_v7 }
  0xf7   :  { %v665_v58 = vadd.f32 %v934_v54, %v1196_v51  ;;  %v478_v1 = vpop.f32.mrf.mxu0  ;;  %v704_v63 = vmax.f32 %v654_v53, 0.0  ;;  %v374_v24 = vmax.f32 %v196_v61, %v358_v49  ;;  %v179_v35 = vadd.f32 %v1230_v27, %v1196_v51 }
  0xf8   :  { %v656_v10 = vpop.f32.mrf.mxu1  ;;  %v722_v11 = vmax.f32 %v544_v55, %v706_v46  ;;  %v542_v62 = vmax.f32 %v1246_v60, %v526_v56  ;;  %v529_v12 = vmax.f32 %v487_v57, 0.0  ;;  %734 = vst.msk [vmem:[%s1389_s3 + $0x8] sm:$0xff] %vm732_vm3, %v717_v0  ;;  %v479_v14 = vadd.f32 %v1196_v51, %v478_v1 }
  0xf9   :  { %v707_v50 = vmax.f32 %v665_v58, 0.0  ;;  %v657_v16 = vadd.f32 %v1196_v51, %v656_v10  ;;  %v919_v19 = vpop.f32.mrf.mxu0  ;;  %v194_v27 = vmax.f32 %v1298_v13, 0.0  ;;  %v341_v44 = vadd.f32 %v1232_v28, %v1196_v51 }
  0xfa   :  { %v937_v20 = vpop.f32.mrf.mxu1  ;;  %739 = vst.msk [vmem:[%s1389_s3 + $0x30] sm:$0xff] %vm732_vm3, %v722_v11  ;;  %v720_v60 = vmax.f32 %v542_v62, %v704_v63  ;;  %v545_v17 = vmax.f32 %v1249_v2, %v529_v12  ;;  %v500_v21 = vadd.f32 %v919_v19, %v1196_v51  ;;  %v527_v26 = vmax.f32 %v479_v14, 0.0 }
  0xfb   :  { %v678_v22 = vadd.f32 %v937_v20, %v1196_v51  ;;  %v491_v6 = vpop.f32.mrf.mxu0  ;;  %v705_v36 = vmax.f32 %v657_v16, 0.0  ;;  %v359_v59 = vmax.f32 %v341_v44, 0.0  ;;  %v171_v61 = vadd.f32 %v1196_v51, %v1236_v37 }
  0xfc   :  { %v669_v29 = vpop.f32.mrf.mxu1  ;;  %737 = vst.msk [vmem:[%s1389_s3 + $0x20] sm:$0xff] %vm732_vm3, %v720_v60  ;;  %v723_v30 = vmax.f32 %v545_v17, %v707_v50  ;;  %v532_v31 = vmax.f32 %v500_v21, 0.0  ;;  %v492_v32 = vadd.f32 %v1196_v51, %v491_v6  ;;  %v543_v4 = vmax.f32 %v1251_v3, %v527_v26 }
  0xfd   :  { %v710_v2 = vmax.f32 %v678_v22, 0.0  ;;  %v670_v18 = vadd.f32 %v1196_v51, %v669_v29  ;;  %v920_v33 = vpop.f32.mrf.mxu0  ;;  %v356_v3 = vmax.f32 %v330_v25, 0.0  ;;  %v333_v49 = vadd.f32 %v1196_v51, %v1238_v38 }
  0xfe   :  { %v938_v39 = vpop.f32.mrf.mxu1  ;;  %740 = vst.msk [vmem:[%s1389_s3 + $0x38] sm:$0xff] %vm732_vm3, %v723_v30  ;;  %v548_v5 = vmax.f32 %v1253_v9, %v532_v31  ;;  %v530_v41 = vmax.f32 %v492_v32, 0.0  ;;  %v503_v42 = vadd.f32 %v920_v33, %v1196_v51  ;;  %v721_v34 = vmax.f32 %v543_v4, %v705_v36 }
  0xff   :  { %v681_v43 = vadd.f32 %v938_v39, %v1196_v51  ;;  %v494_v45 = vpop.f32.mrf.mxu0  ;;  %v708_v52 = vmax.f32 %v670_v18, 0.0  ;;  %v197_v9 = vmax.f32 %v179_v35, 0.0  ;;  %v372_v12 = vmax.f32 %v194_v27, %v356_v3 }
 0x100   :  { %v672_v46 = vpop.f32.mrf.mxu1  ;;  %v726_v47 = vmax.f32 %v548_v5, %v710_v2  ;;  %v546_v48 = vmax.f32 %v1259_v15, %v530_v41  ;;  %v533_v7 = vmax.f32 %v503_v42, 0.0  ;;  %738 = vst.msk [vmem:[%s1389_s3 + $0x28] sm:$0xff] %vm732_vm3, %v721_v34  ;;  %v495_v8 = vadd.f32 %v1196_v51, %v494_v45 }
 0x101   :  { %v711_v53 = vmax.f32 %v681_v43, 0.0  ;;  %v673_v54 = vadd.f32 %v1196_v51, %v672_v46  ;;  %v923_v28 = vpop.f32.mrf.mxu0  ;;  %v375_v17 = vmax.f32 %v197_v9, %v359_v59  ;;  %v195_v21 = vmax.f32 %v171_v61, 0.0 }
 0x102   :  { %v941_v55 = vpop.f32.mrf.mxu1  ;;  %743 = vst.msk [vmem:[%s1389_s3 + $0x50] sm:$0xff] %vm732_vm3, %v726_v47  ;;  %v724_v15 = vmax.f32 %v546_v48, %v708_v52  ;;  %v549_v56 = vmax.f32 %v1275_v40, %v533_v7  ;;  %v516_v57 = vadd.f32 %v923_v28, %v1196_v51  ;;  %v531_v0 = vmax.f32 %v495_v8, 0.0 }
 0x103   :  { %v694_v58 = vadd.f32 %v941_v55, %v1196_v51  ;;  %v507_v1 = vpop.f32.mrf.mxu0  ;;  %v709_v50 = vmax.f32 %v673_v54, 0.0  ;;  %v357_v22 = vmax.f32 %v333_v49, 0.0 }
 0x104   :  { %v685_v10 = vpop.f32.mrf.mxu1  ;;  %741 = vst.msk [vmem:[%s1389_s3 + $0x40] sm:$0xff] %vm732_vm3, %v724_v15  ;;  %v727_v40 = vmax.f32 %v549_v56, %v711_v53  ;;  %v536_v11 = vmax.f32 %v516_v57, 0.0  ;;  %v508_v63 = vadd.f32 %v1196_v51, %v507_v1  ;;  %v547_v13 = vmax.f32 %v369_v23, %v531_v0 }
 0x105   :  { %v714_v62 = vmax.f32 %v694_v58, 0.0  ;;  %v686_v37 = vadd.f32 %v1196_v51, %v685_v10  ;;  %v924_v14 = vpop.f32.mrf.mxu0  ;;  %v373_v36 = vmax.f32 %v195_v21, %v357_v22 }
 0x106   :  { %v942_v38 = vpop.f32.mrf.mxu1  ;;  %744 = vst.msk [vmem:[%s1389_s3 + $0x58] sm:$0xff] %vm732_vm3, %v727_v40  ;;  %v552_v16 = vmax.f32 %v374_v24, %v536_v11  ;;  %v534_v19 = vmax.f32 %v508_v63, 0.0  ;;  %v519_v20 = vadd.f32 %v924_v14, %v1196_v51  ;;  %v725_v23 = vmax.f32 %v547_v13, %v709_v50 }
 0x107   :  { %v697_v60 = vadd.f32 %v942_v38, %v1196_v51  ;;  %v510_v25 = vpop.f32.mrf.mxu0  ;;  %v712_v30 = vmax.f32 %v686_v37, 0.0 }
 0x108   :  { %v688_v26 = vpop.f32.mrf.mxu1  ;;  %v730_v6 = vmax.f32 %v552_v16, %v714_v62  ;;  %v550_v29 = vmax.f32 %v372_v12, %v534_v19  ;;  %v537_v31 = vmax.f32 %v519_v20, 0.0  ;;  %742 = vst.msk [vmem:[%s1389_s3 + $0x48] sm:$0xff] %vm732_vm3, %v725_v23  ;;  %v511_v24 = vadd.f32 %v1196_v51, %v510_v25 }
 0x109   :  { %v689_v2 = vadd.f32 %v1196_v51, %v688_v26  ;;  %v715_v4 = vmax.f32 %v697_v60, 0.0 }
 0x10a   :  { %747 = vst.msk [vmem:[%s1389_s3 + $0x70] sm:$0xff] %vm732_vm3, %v730_v6  ;;  %v728_v32 = vmax.f32 %v550_v29, %v712_v30  ;;  %v553_v35 = vmax.f32 %v375_v17, %v537_v31  ;;  %v535_v18 = vmax.f32 %v511_v24, 0.0 }
 0x10b   :  { %v713_v5 = vmax.f32 %v689_v2, 0.0 }
 0x10c   :  { %745 = vst.msk [vmem:[%s1389_s3 + $0x60] sm:$0xff] %vm732_vm3, %v728_v32  ;;  %v731_v33 = vmax.f32 %v553_v35, %v715_v4  ;;  %v551_v39 = vmax.f32 %v373_v36, %v535_v18 }
 0x10e   :  { %748 = vst.msk [vmem:[%s1389_s3 + $0x78] sm:$0xff] %vm732_vm3, %v731_v33  ;;  %v729_v51 = vmax.f32 %v551_v39, %v713_v5 }
 0x110   :  { %746 = vst.msk [vmem:[%s1389_s3 + $0x68] sm:$0xff] %vm732_vm3, %v729_v51 }

// kernel: light_music_genre_classifier.5
= control target key start
LH: loop header
LB: loop body
LE: loop exit
PB: predicated region body
PF: predicated region fallthrough
CT: control target
= control target key end

     0   :  { %v455_v0 = vmov 0   ;;  %vm106_vm0 = vcmask 130048   ;;  %vm394_vm1 = vcmask 261120   ;;  %s716_s1 = inlined_call_operand.vmem [shape: bf16[144,32], index: 1, kind: input, shape index: {}]   ;;  %s717_s0 = inlined_call_operand.vmem [shape: f32[4,32,144], index: 0, kind: input, shape index: {}]   ;;  %s718_s2 = inlined_call_operand.vmem [shape: f32[1,32], index: 2, kind: input, shape index: {}]   ;;  %s719_s3 = inlined_call_operand.vmem [shape: f32[32,32], index: 3, kind: output, shape index: {}]  }
   0x1   :  { %113 = vmatprep.subr.bf16.mxu0 %v455_v0  ;;  %185 = vmatprep.subr.bf16.mxu1 %v455_v0  ;;  %v481_v1 = vld [vmem:[%s716_s1 + $0x38] sm:$0xff]   ;;  %v488_v2 = vld [vmem:[%s716_s1 + $0x30] sm:$0xff]   ;;  %v497_v3 = vld [vmem:[%s716_s1 + $0x28] sm:$0xff]  }
   0x2   :  { %114 = vmatpush1.bf16.msra.mxu0 %v481_v1  ;;  %186 = vmatpush1.bf16.msra.mxu1 %v481_v1  ;;  %v16_v4 = vld [vmem:[%s717_s0 + $0x8] sm:$0xff]  ;;  %v18_v5 = vld [vmem:[%s717_s0 + $0x18] sm:$0xff]  ;;  %v515_v7 = vld [vmem:[%s716_s1 + $0x20] sm:$0xff]  }
   0x3   :  { %115 = vmatprep.subr.bf16.mxu0 %v455_v0  ;;  %187 = vmatprep.subr.bf16.mxu1 %v455_v0  ;;  %v416_v6 = vld [vmem:[%s717_s0 + $0x48] sm:$0xff]  ;;  %v42_v8 = vpack.c.bf16 %v18_v5, %v16_v4  ;;  %v418_v9 = vld [vmem:[%s717_s0 + $0x58] sm:$0xff]  ;;  %v538_v12 = vld [vmem:[%s716_s1 + $0x10] sm:$0xff]  }
   0x4   :  { %v176_v10 = vpack.c.bf16 %v418_v9, %v416_v6  ;;  %v529_v11 = vld [vmem:[%s716_s1 + $0x18] sm:$0xff]   ;;  %v547_v13 = vld [vmem:[%s716_s1 + $0x8] sm:$0xff]   ;;  %v556_v14 = vld [vmem:[%s716_s1] sm:$0xff]  }
   0x5   :  { %413 = vmatprep.mubr.msk.bf16.mxu0 %vm106_vm0, %v42_v8  ;;  %v563_v15 = vld [vmem:[%s716_s1 + $0x40] sm:$0xff]   ;;  %v17_v17 = vld [vmem:[%s717_s0 + $0x10] sm:$0xff]  ;;  %v20_v20 = vld [vmem:[%s717_s0 + $0x28] sm:$0xff] }
   0x6   :  { %116 = vmatpush1.bf16.msra.mxu0 %v488_v2  ;;  %188 = vmatpush1.bf16.msra.mxu1 %v488_v2  ;;  %v15_v16 = vld [vmem:[%s717_s0] sm:$0xff]  ;;  %v417_v19 = vld [vmem:[%s717_s0 + $0x50] sm:$0xff]  ;;  %v22_v23 = vld [vmem:[%s717_s0 + $0x38] sm:$0xff] }
   0x7   :  { %117 = vmatprep.subr.bf16.mxu0 %v455_v0  ;;  %189 = vmatprep.subr.bf16.mxu1 %v455_v0  ;;  %v415_v18 = vld [vmem:[%s717_s0 + $0x40] sm:$0xff]  ;;  %v41_v21 = vpack.c.bf16 %v17_v17, %v15_v16  ;;  %v420_v24 = vld [vmem:[%s717_s0 + $0x68] sm:$0xff]  ;;  %v422_v25 = vld [vmem:[%s717_s0 + $0x78] sm:$0xff]  ;;  %v44_v26 = vpack.c.bf16 %v22_v23, %v20_v20 }
   0x8   :  { %423 = vmatprep.mubr.msk.bf16.mxu1 %vm106_vm0, %v176_v10  ;;  %v175_v22 = vpack.c.bf16 %v417_v19, %v415_v18  ;;  %v178_v27 = vpack.c.bf16 %v422_v25, %v420_v24  ;;  %v19_v28 = vld [vmem:[%s717_s0 + $0x20] sm:$0xff]  ;;  %v21_v29 = vld [vmem:[%s717_s0 + $0x30] sm:$0xff]  ;;  %v426_v32 = vld [vmem:[%s717_s0 + $0x88] sm:$0xff] }
   0x9   :  { %v419_v30 = vld [vmem:[%s717_s0 + $0x60] sm:$0xff]  ;;  %v421_v31 = vld [vmem:[%s717_s0 + $0x70] sm:$0xff]  ;;  %v43_v33 = vpack.c.bf16 %v21_v29, %v19_v28  ;;  %v428_v35 = vld [vmem:[%s717_s0 + $0x98] sm:$0xff] }
   0xa   :  { %118 = vmatpush1.bf16.msra.mxu0 %v497_v3  ;;  %190 = vmatpush1.bf16.msra.mxu1 %v497_v3  ;;  %v177_v34 = vpack.c.bf16 %v421_v31, %v419_v30  ;;  %v436_v36 = vld [vmem:[%s717_s0 + $0xc8] sm:$0xff]  ;;  %v438_v37 = vld [vmem:[%s717_s0 + $0xd8] sm:$0xff]  ;;  %v252_v38 = vpack.c.bf16 %v428_v35, %v426_v32  ;;  %v425_v40 = vld [vmem:[%s717_s0 + $0x80] sm:$0xff] }
   0xb   :  { %119 = vmatprep.subr.bf16.mxu0 %v455_v0  ;;  %191 = vmatprep.subr.bf16.mxu1 %v455_v0  ;;  %v328_v39 = vpack.c.bf16 %v438_v37, %v436_v36  ;;  %v427_v41 = vld [vmem:[%s717_s0 + $0x90] sm:$0xff]  ;;  %v435_v42 = vld [vmem:[%s717_s0 + $0xc0] sm:$0xff]  ;;  %v430_v44 = vld [vmem:[%s717_s0 + $0xa8] sm:$0xff] }
   0xc   :  { %v437_v43 = vld [vmem:[%s717_s0 + $0xd0] sm:$0xff]  ;;  %v432_v45 = vld [vmem:[%s717_s0 + $0xb8] sm:$0xff]  ;;  %v440_v46 = vld [vmem:[%s717_s0 + $0xe8] sm:$0xff]  ;;  %v251_v48 = vpack.c.bf16 %v427_v41, %v425_v40 }
   0xd   :  { %v442_v47 = vld [vmem:[%s717_s0 + $0xf8] sm:$0xff]  ;;  %v327_v49 = vpack.c.bf16 %v437_v43, %v435_v42  ;;  %v254_v50 = vpack.c.bf16 %v432_v45, %v430_v44  ;;  %v429_v52 = vld [vmem:[%s717_s0 + $0xa0] sm:$0xff]  ;;  %v431_v53 = vld [vmem:[%s717_s0 + $0xb0] sm:$0xff] }
   0xe   :  { %120 = vmatpush1.bf16.msra.mxu0 %v515_v7  ;;  %192 = vmatpush1.bf16.msra.mxu1 %v515_v7  ;;  %v330_v51 = vpack.c.bf16 %v442_v47, %v440_v46  ;;  %v439_v54 = vld [vmem:[%s717_s0 + $0xe0] sm:$0xff]  ;;  %v441_v55 = vld [vmem:[%s717_s0 + $0xf0] sm:$0xff]  ;;  %v253_v56 = vpack.c.bf16 %v431_v53, %v429_v52 }
   0xf   :  { %121 = vmatprep.subr.bf16.mxu0 %v455_v0  ;;  %193 = vmatprep.subr.bf16.mxu1 %v455_v0  ;;  %v329_v57 = vpack.c.bf16 %v441_v55, %v439_v54  ;;  %v403_v10 = vld [vmem:[%s718_s2] ss:$0 sm:$0xff] }
  0x12   :  { %122 = vmatpush1.bf16.msra.mxu0 %v529_v11  ;;  %194 = vmatpush1.bf16.msra.mxu1 %v529_v11 }
  0x13   :  { %123 = vmatprep.subr.bf16.mxu0 %v455_v0  ;;  %195 = vmatprep.subr.bf16.mxu1 %v455_v0 }
  0x16   :  { %124 = vmatpush1.bf16.msra.mxu0 %v538_v12  ;;  %196 = vmatpush1.bf16.msra.mxu1 %v538_v12 }
  0x17   :  { %125 = vmatprep.subr.bf16.mxu0 %v455_v0  ;;  %197 = vmatprep.subr.bf16.mxu1 %v455_v0 }
  0x1a   :  { %126 = vmatpush1.bf16.msra.mxu0 %v547_v13  ;;  %198 = vmatpush1.bf16.msra.mxu1 %v547_v13 }
  0x1b   :  { %127 = vmatprep.subr.bf16.mxu0 %v455_v0  ;;  %199 = vmatprep.subr.bf16.mxu1 %v455_v0 }
  0x1e   :  { %128 = vmatpush1.bf16.msra.mxu0 %v556_v14  ;;  %200 = vmatpush1.bf16.msra.mxu1 %v556_v14 }
  0x1f   :  { %143 = vmatprep.subr.bf16.mxu0 %v455_v0  ;;  %215 = vmatprep.subr.bf16.mxu1 %v455_v0 }
  0x22   :  { %144 = vmatpush2.bf16.msra.mxu0 %v563_v15  ;;  %216 = vmatpush2.bf16.msra.mxu1 %v563_v15 }
  0x23   :  { %261 = vmatprep.subr.bf16.mxu0 %v455_v0  ;;  %337 = vmatprep.subr.bf16.mxu1 %v455_v0 }
  0x25   :  { %146 = vmatmul.mubr.bf16.vlgmr.msra.gmra.mxu0 %v41_v21  ;;  %218 = vmatmul.mubr.bf16.vlgmr.msra.gmra.mxu1 %v175_v22 }
  0x26   :  { %262 = vmatpush1.bf16.msra.mxu0 %v481_v1  ;;  %338 = vmatpush1.bf16.msra.mxu1 %v481_v1 }
  0x27   :  { %263 = vmatprep.subr.bf16.mxu0 %v455_v0  ;;  %339 = vmatprep.subr.bf16.mxu1 %v455_v0 }
  0x28   :  { %414 = vmatprep.mubr.msk.bf16.mxu0 %vm106_vm0, %v44_v26  ;;  %424 = vmatprep.mubr.msk.bf16.mxu1 %vm106_vm0, %v178_v27 }
  0x2a   :  { %264 = vmatpush1.bf16.msra.mxu0 %v488_v2  ;;  %340 = vmatpush1.bf16.msra.mxu1 %v488_v2 }
  0x2b   :  { %265 = vmatprep.subr.bf16.mxu0 %v455_v0  ;;  %341 = vmatprep.subr.bf16.mxu1 %v455_v0 }
  0x2d   :  { %154 = vmatmul.mubr.bf16.gmra.mxu0 %v43_v33  ;;  %226 = vmatmul.mubr.bf16.gmra.mxu1 %v177_v34 }
  0x2e   :  { %266 = vmatpush1.bf16.msra.mxu0 %v497_v3  ;;  %342 = vmatpush1.bf16.msra.mxu1 %v497_v3 }
  0x2f   :  { %267 = vmatprep.subr.bf16.mxu0 %v455_v0  ;;  %343 = vmatprep.subr.bf16.mxu1 %v455_v0 }
  0x30   :  { %433 = vmatprep.mubr.msk.bf16.mxu0 %vm106_vm0, %v252_v38  ;;  %443 = vmatprep.mubr.msk.bf16.mxu1 %vm106_vm0, %v328_v39 }
  0x32   :  { %268 = vmatpush1.bf16.msra.mxu0 %v515_v7  ;;  %344 = vmatpush1.bf16.msra.mxu1 %v515_v7 }
  0x33   :  { %269 = vmatprep.subr.bf16.mxu0 %v455_v0  ;;  %345 = vmatprep.subr.bf16.mxu1 %v455_v0 }
  0x36   :  { %270 = vmatpush1.bf16.msra.mxu0 %v529_v11  ;;  %346 = vmatpush1.bf16.msra.mxu1 %v529_v11 }
  0x37   :  { %271 = vmatprep.subr.bf16.mxu0 %v455_v0  ;;  %347 = vmatprep.subr.bf16.mxu1 %v455_v0 }
  0x3a   :  { %272 = vmatpush1.bf16.msra.mxu0 %v538_v12  ;;  %348 = vmatpush1.bf16.msra.mxu1 %v538_v12 }
  0x3b   :  { %273 = vmatprep.subr.bf16.mxu0 %v455_v0  ;;  %349 = vmatprep.subr.bf16.mxu1 %v455_v0 }
  0x3e   :  { %274 = vmatpush1.bf16.msra.mxu0 %v547_v13  ;;  %350 = vmatpush1.bf16.msra.mxu1 %v547_v13 }
  0x3f   :  { %275 = vmatprep.subr.bf16.mxu0 %v455_v0  ;;  %351 = vmatprep.subr.bf16.mxu1 %v455_v0 }
  0x42   :  { %276 = vmatpush1.bf16.msra.mxu0 %v556_v14  ;;  %352 = vmatpush1.bf16.msra.mxu1 %v556_v14 }
  0x43   :  { %291 = vmatprep.subr.bf16.mxu0 %v455_v0  ;;  %367 = vmatprep.subr.bf16.mxu1 %v455_v0 }
  0x46   :  { %292 = vmatpush2.bf16.msra.mxu0 %v563_v15  ;;  %368 = vmatpush2.bf16.msra.mxu1 %v563_v15 }
  0x49   :  { %294 = vmatmul.mubr.bf16.vlgmr.msra.gmra.mxu0 %v251_v48  ;;  %370 = vmatmul.mubr.bf16.vlgmr.msra.gmra.mxu1 %v327_v49 }
  0x4a   :  { %434 = vmatprep.mubr.msk.bf16.mxu0 %vm106_vm0, %v254_v50  ;;  %444 = vmatprep.mubr.msk.bf16.mxu1 %vm106_vm0, %v330_v51 }
  0x51   :  { %302 = vmatmul.mubr.bf16.gmra.mxu0 %v253_v56  ;;  %378 = vmatmul.mubr.bf16.gmra.mxu1 %v329_v57 }
  0xe5   :  { %v147_v58 = vpop.f32.mrf.mxu0  ;;  %v219_v59 = vpop.f32.mrf.mxu1 }
  0xe6   :  { %v148_v11 = vadd.f32 %v403_v10, %v147_v58  ;;  %v220_v12 = vadd.f32 %v403_v10, %v219_v59 }
  0xe7   :  { %v149_v60 = vpop.f32.mrf.mxu0  ;;  %v221_v61 = vpop.f32.mrf.mxu1 }
  0xe8   :  { %v162_v13 = vmax.f32 %v148_v11, 0.0  ;;  %v234_v14 = vmax.f32 %v220_v12, 0.0 }
  0xe9   :  { %v150_v62 = vpop.f32.mrf.mxu0  ;;  %v222_v63 = vpop.f32.mrf.mxu1 }
  0xea   :  { %v151_v15 = vadd.f32 %v403_v10, %v150_v62  ;;  %v223_v16 = vadd.f32 %v403_v10, %v222_v63  ;;  %v238_v21 = vmax.f32 %v162_v13, %v234_v14 }
  0xeb   :  { %v152_v0 = vpop.f32.mrf.mxu0  ;;  %v224_v1 = vpop.f32.mrf.mxu1 }
  0xec   :  { %v163_v26 = vmax.f32 %v151_v15, 0.0  ;;  %v235_v27 = vmax.f32 %v223_v16, 0.0 }
  0xed   :  { %v155_v2 = vpop.f32.mrf.mxu0  ;;  %v227_v3 = vpop.f32.mrf.mxu1 }
  0xee   :  { %v156_v22 = vadd.f32 %v403_v10, %v155_v2  ;;  %v228_v23 = vadd.f32 %v403_v10, %v227_v3  ;;  %v239_v40 = vmax.f32 %v163_v26, %v235_v27 }
  0xef   :  { %v157_v4 = vpop.f32.mrf.mxu0  ;;  %v229_v5 = vpop.f32.mrf.mxu1 }
  0xf0   :  { %v164_v35 = vmax.f32 %v156_v22, 0.0  ;;  %v236_v36 = vmax.f32 %v228_v23, 0.0 }
  0xf1   :  { %v158_v6 = vpop.f32.mrf.mxu0  ;;  %v230_v7 = vpop.f32.mrf.mxu1 }
  0xf2   :  { %v159_v37 = vadd.f32 %v403_v10, %v158_v6  ;;  %v231_v41 = vadd.f32 %v403_v10, %v230_v7  ;;  %v240_v50 = vmax.f32 %v164_v35, %v236_v36 }
  0xf3   :  { %v160_v8 = vpop.f32.mrf.mxu0  ;;  %v232_v9 = vpop.f32.mrf.mxu1 }
  0xf4   :  { %v165_v51 = vmax.f32 %v159_v37, 0.0  ;;  %v237_v54 = vmax.f32 %v231_v41, 0.0 }
  0xf6   :  { %v241_v1 = vmax.f32 %v165_v51, %v237_v54 }
 0x109   :  { %v295_v17 = vpop.f32.mrf.mxu0  ;;  %v371_v18 = vpop.f32.mrf.mxu1 }
 0x10a   :  { %v296_v19 = vadd.f32 %v403_v10, %v295_v17  ;;  %v372_v20 = vadd.f32 %v403_v10, %v371_v18 }
 0x10b   :  { %v297_v24 = vpop.f32.mrf.mxu0  ;;  %v373_v25 = vpop.f32.mrf.mxu1 }
 0x10c   :  { %v310_v28 = vmax.f32 %v296_v19, 0.0  ;;  %v386_v29 = vmax.f32 %v372_v20, 0.0 }
 0x10d   :  { %v298_v30 = vpop.f32.mrf.mxu0  ;;  %v374_v31 = vpop.f32.mrf.mxu1 }
 0x10e   :  { %v314_v32 = vmax.f32 %v238_v21, %v310_v28  ;;  %v299_v33 = vadd.f32 %v403_v10, %v298_v30  ;;  %v375_v34 = vadd.f32 %v403_v10, %v374_v31 }
 0x10f   :  { %v300_v38 = vpop.f32.mrf.mxu0  ;;  %v376_v39 = vpop.f32.mrf.mxu1 }
 0x110   :  { %v390_v42 = vmax.f32 %v314_v32, %v386_v29  ;;  %v311_v43 = vmax.f32 %v299_v33, 0.0  ;;  %v387_v47 = vmax.f32 %v375_v34, 0.0 }
 0x111   :  { %v303_v44 = vpop.f32.mrf.mxu0  ;;  %v379_v45 = vpop.f32.mrf.mxu1 }
 0x112   :  { %395 = vst.msk [vmem:[%s719_s3] sm:$0xff] %vm394_vm1, %v390_v42  ;;  %v315_v46 = vmax.f32 %v239_v40, %v311_v43  ;;  %v304_v48 = vadd.f32 %v403_v10, %v303_v44  ;;  %v380_v49 = vadd.f32 %v403_v10, %v379_v45 }
 0x113   :  { %v305_v52 = vpop.f32.mrf.mxu0  ;;  %v381_v53 = vpop.f32.mrf.mxu1 }
 0x114   :  { %v391_v55 = vmax.f32 %v315_v46, %v387_v47  ;;  %v312_v56 = vmax.f32 %v304_v48, 0.0  ;;  %v388_v57 = vmax.f32 %v380_v49, 0.0 }
 0x115   :  { %v306_v58 = vpop.f32.mrf.mxu0  ;;  %v382_v59 = vpop.f32.mrf.mxu1 }
 0x116   :  { %396 = vst.msk [vmem:[%s719_s3 + $0x8] sm:$0xff] %vm394_vm1, %v391_v55  ;;  %v316_v60 = vmax.f32 %v240_v50, %v312_v56  ;;  %v307_v61 = vadd.f32 %v403_v10, %v306_v58  ;;  %v383_v62 = vadd.f32 %v403_v10, %v382_v59 }
 0x117   :  { %v308_v63 = vpop.f32.mrf.mxu0  ;;  %v384_v0 = vpop.f32.mrf.mxu1 }
 0x118   :  { %v392_v2 = vmax.f32 %v316_v60, %v388_v57  ;;  %v313_v3 = vmax.f32 %v307_v61, 0.0  ;;  %v389_v5 = vmax.f32 %v383_v62, 0.0 }
 0x11a   :  { %397 = vst.msk [vmem:[%s719_s3 + $0x10] sm:$0xff] %vm394_vm1, %v392_v2  ;;  %v317_v4 = vmax.f32 %v241_v1, %v313_v3 }
 0x11c   :  { %v393_v6 = vmax.f32 %v317_v4, %v389_v5 }
 0x11e   :  { %398 = vst.msk [vmem:[%s719_s3 + $0x18] sm:$0xff] %vm394_vm1, %v393_v6 }

// kernel: light_music_genre_classifier.6
= control target key start
LH: loop header
LB: loop body
LE: loop exit
PB: predicated region body
PF: predicated region fallthrough
CT: control target
= control target key end

     0   :  { %vm184_vm0 = vcmask 261120   ;;  %vm293_vm1 = vcmask 523264   ;;  %vm315_vm2 = vcmask 1040384   ;;  %vm317_vm3 = vcmask 517120   ;;  %s522_s1 = inlined_call_operand.vmem [shape: bf16[288,64], index: 1, kind: input, shape index: {}]   ;;  %s523_s0 = inlined_call_operand.vmem [shape: f32[32,288], index: 0, kind: input, shape index: {}]   ;;  %s524_s2 = inlined_call_operand.vmem [shape: f32[1,64], index: 2, kind: input, shape index: {}]   ;;  %s525_s3 = inlined_call_operand.vmem [shape: f32[2,64], index: 3, kind: output, shape index: {}]  }
   0x1   :  { %v384_v0 = vld [vmem:[%s522_s1 + $0x78] sm:$0xff]   ;;  %v386_v2 = vld [vmem:[%s522_s1 + $0x70] sm:$0xff]   ;;  %v388_v4 = vld [vmem:[%s522_s1 + $0x68] sm:$0xff]  }
   0x2   :  { %v385_v1 = vld [vmem:[%s522_s1 + $0x38] sm:$0xff]   ;;  %344 = vmatprep.subr.bf16.mxu0 %v384_v0  ;;  %v387_v3 = vld [vmem:[%s522_s1 + $0x30] sm:$0xff]   ;;  %v389_v5 = vld [vmem:[%s522_s1 + $0x28] sm:$0xff]  }
   0x3   :  { %345 = vmatpush3.bf16.msra.mxu0 %v385_v1  ;;  %v390_v6 = vld [vmem:[%s522_s1 + $0x60] sm:$0xff]   ;;  %v392_v8 = vld [vmem:[%s522_s1 + $0x58] sm:$0xff]   ;;  %v399_v10 = vld [vmem:[%s522_s1 + $0x88] sm:$0xff]  }
   0x4   :  { %346 = vmatprep.subr.bf16.mxu0 %v386_v2  ;;  %v391_v7 = vld [vmem:[%s522_s1 + $0x20] sm:$0xff]   ;;  %v393_v9 = vld [vmem:[%s522_s1 + $0x18] sm:$0xff]   ;;  %v394_v11 = vld [vmem:[%s522_s1 + $0x50] sm:$0xff]   ;;  %376 = vmatprep.subr.bf16.mxu1 %v399_v10 }
   0x5   :  { %v16_v12 = vld [vmem:[%s523_s0 + $0x8] sm:$0xff]  ;;  %v19_v13 = vld [vmem:[%s523_s0 + $0x20] sm:$0xff]  ;;  %v395_v14 = vld [vmem:[%s522_s1 + $0x10] sm:$0xff]   ;;  %377 = vmatpush3.bf16.msra.mxu1 %v399_v10 }
   0x6   :  { %v64_v15 = vpack.c.bf16 %v19_v13, %v16_v12  ;;  %v401_v16 = vld [vmem:[%s522_s1 + $0x80] sm:$0xff]   ;;  %v17_v17 = vld [vmem:[%s523_s0 + $0x10] sm:$0xff]  ;;  %v20_v18 = vld [vmem:[%s523_s0 + $0x28] sm:$0xff] }
   0x7   :  { %347 = vmatpush3.bf16.msra.mxu0 %v387_v3  ;;  %v396_v19 = vld [vmem:[%s522_s1 + $0x48] sm:$0xff]   ;;  %v65_v20 = vpack.c.bf16 %v20_v18, %v17_v17  ;;  %v23_v21 = vld [vmem:[%s523_s0 + $0x40] sm:$0xff]  ;;  %v26_v22 = vld [vmem:[%s523_s0 + $0x58] sm:$0xff]  ;;  %378 = vmatprep.subr.bf16.mxu1 %v401_v16 }
   0x8   :  { %348 = vmatprep.subr.bf16.mxu0 %v388_v4  ;;  %223 = vmatprep.mubr.bf16.mxu0 %v64_v15  ;;  %v68_v23 = vpack.c.bf16 %v26_v22, %v23_v21  ;;  %v397_v24 = vld [vmem:[%s522_s1 + $0x8] sm:$0xff]   ;;  %v398_v25 = vld [vmem:[%s522_s1 + $0x40] sm:$0xff]   ;;  %v18_v28 = vld [vmem:[%s523_s0 + $0x18] sm:$0xff] }
   0x9   :  { %379 = vmatpush3.bf16.msra.mxu1 %v401_v16  ;;  %380 = vmatprep.mubr.msk.bf16.mxu1 %vm184_vm0, %v65_v20  ;;  %v400_v26 = vld [vmem:[%s522_s1] sm:$0xff]   ;;  %v22_v29 = vld [vmem:[%s523_s0 + $0x38] sm:$0xff]  ;;  %v25_v30 = vld [vmem:[%s523_s0 + $0x50] sm:$0xff] }
   0xa   :  { %v15_v27 = vld [vmem:[%s523_s0] sm:$0xff]  ;;  %v67_v32 = vpack.c.bf16 %v25_v30, %v22_v29  ;;  %v21_v33 = vld [vmem:[%s523_s0 + $0x30] sm:$0xff]  ;;  %v24_v34 = vld [vmem:[%s523_s0 + $0x48] sm:$0xff] }
   0xb   :  { %349 = vmatpush3.bf16.msra.mxu0 %v389_v5  ;;  %v63_v31 = vpack.c.bf16 %v18_v28, %v15_v27  ;;  %v66_v35 = vpack.c.bf16 %v24_v34, %v21_v33  ;;  %v323_v40 = vld [vmem:[%s524_s2] ss:$0 sm:$0xff] }
   0xc   :  { %350 = vmatprep.subr.bf16.mxu0 %v390_v6  ;;  %381 = vmatmul.mubr.msk.bf16.vlgmr.msra.gmra.mxu1 %vm184_vm0, %v68_v23 }
   0xf   :  { %351 = vmatpush3.bf16.msra.mxu0 %v391_v7 }
  0x10   :  { %352 = vmatprep.subr.bf16.mxu0 %v392_v8 }
  0x13   :  { %353 = vmatpush3.bf16.msra.mxu0 %v393_v9 }
  0x14   :  { %354 = vmatprep.subr.bf16.mxu0 %v394_v11 }
  0x17   :  { %355 = vmatpush3.bf16.msra.mxu0 %v395_v14 }
  0x18   :  { %356 = vmatprep.subr.bf16.mxu0 %v396_v19 }
  0x1b   :  { %357 = vmatpush3.bf16.msra.mxu0 %v397_v24 }
  0x1c   :  { %358 = vmatprep.subr.bf16.mxu0 %v398_v25 }
  0x1f   :  { %359 = vmatpush3.bf16.msra.mxu0 %v400_v26 }
  0x22   :  { %224 = vmatmul.mubr.bf16.vlgmr.msra.gmra.mxu0 %v63_v31 }
  0x23   :  { %231 = vmatprep.mubr.bf16.mxu0 %v67_v32 }
  0x2a   :  { %232 = vmatmul.mubr.bf16.gmra.mxu0 %v66_v35 }
  0xcc   :  { %v382_v36 = vpop.f32.mrf.mxu1 }
  0xce   :  { %v274_v38 = vpop.f32.mrf.mxu1 }
  0xd0   :  { %v383_v43 = vpop.f32.mrf.mxu1 }
  0xd2   :  { %v277_v49 = vpop.f32.mrf.mxu1 }
  0xe2   :  { %v360_v37 = vpop.f32.mrf.mxu0 }
  0xe4   :  { %v361_v39 = vpop.f32.mrf.mxu0 }
  0xe5   :  { %v362_v41 = vadd.f32 %v361_v39, %v360_v37 }
  0xe6   :  { %v363_v42 = vpop.f32.mrf.mxu0 }
  0xe7   :  { %v226_v44 = vadd.f32 %v362_v41, %v323_v40 }
  0xe8   :  { %v364_v45 = vpop.f32.mrf.mxu0 }
  0xe9   :  { %v365_v46 = vadd.f32 %v364_v45, %v363_v42  ;;  %v275_v47 = vadd.f32 %v274_v38, %v226_v44 }
  0xea   :  { %v366_v48 = vpop.f32.mrf.mxu0 }
  0xeb   :  { %v229_v50 = vadd.f32 %v365_v46, %v323_v40  ;;  %v289_v52 = vmax.f32 %v275_v47, 0.0 }
  0xec   :  { %v367_v51 = vpop.f32.mrf.mxu0 }
  0xed   :  { %v368_v53 = vadd.f32 %v367_v51, %v366_v48  ;;  %v278_v54 = vadd.f32 %v277_v49, %v229_v50  ;;  %v294_v59 = vsel %vm293_vm1, %v289_v52, 0.0 }
  0xee   :  { %v369_v55 = vpop.f32.mrf.mxu0 }
  0xef   :  { %v234_v56 = vadd.f32 %v368_v53, %v323_v40  ;;  %v290_v57 = vmax.f32 %v278_v54, 0.0 }
  0xf0   :  { %v370_v58 = vpop.f32.mrf.mxu0 }
  0xf1   :  { %v283_v60 = vadd.f32 %v382_v36, %v234_v56  ;;  %v295_v61 = vsel %vm293_vm1, %v290_v57, 0.0  ;;  %v371_v62 = vadd.f32 %v370_v58, %v369_v55 }
  0xf2   :  { %v296_v63 = vadd.f32 %v295_v61, %v294_v59 }
  0xf3   :  { %v237_v0 = vadd.f32 %v371_v62, %v323_v40  ;;  %v291_v2 = vmax.f32 %v283_v60, 0.0 }
  0xf4   :  { %v297_v1 = vrot.slane %v296_v63, 4 }
  0xf5   :  { %v286_v3 = vadd.f32 %v383_v43, %v237_v0  ;;  %v305_v7 = vsel %vm293_vm1, %v291_v2, 0.0 }
  0xf6   :  { %v298_v4 = vadd.f32 %v297_v1, %v296_v63 }
  0xf7   :  { %v292_v5 = vmax.f32 %v286_v3, 0.0 }
  0xf8   :  { %v299_v6 = vrot.slane %v298_v4, 2 }
  0xf9   :  { %v306_v8 = vsel %vm293_vm1, %v292_v5, 0.0 }
  0xfa   :  { %v307_v9 = vadd.f32 %v306_v8, %v305_v7  ;;  %v300_v10 = vadd.f32 %v299_v6, %v298_v4 }
  0xfc   :  { %v308_v11 = vrot.slane %v307_v9, 4  ;;  %v301_v13 = vrot.slane %v300_v10, 1 }
  0xfe   :  { %v309_v12 = vadd.f32 %v308_v11, %v307_v9  ;;  %v302_v16 = vadd.f32 %v301_v13, %v300_v10 }
 0x100   :  { %v310_v14 = vrot.slane %v309_v12, 2  ;;  %v304_v19 = vmul.f32 0.0625, %v302_v16 }
 0x102   :  { %v311_v15 = vadd.f32 %v310_v14, %v309_v12 }
 0x104   :  { %v312_v17 = vrot.slane %v311_v15, 1 }
 0x106   :  { %v313_v18 = vadd.f32 %v312_v17, %v311_v15 }
 0x108   :  { %v314_v20 = vmul.f32 0.0625, %v313_v18 }
 0x10a   :  { %v316_v21 = vsel %vm315_vm2, %v304_v19, %v314_v20 }
 0x10b   :  { %318 = vst.msk [vmem:[%s525_s3] sm:$0x3] %vm317_vm3, %v316_v21 }

// kernel: light_music_genre_classifier.7
= control target key start
LH: loop header
LB: loop body
LE: loop exit
PB: predicated region body
PF: predicated region fallthrough
CT: control target
= control target key end

     0   :  { %s9712_s0 = inlined_call_operand.vmem [shape: f32[16,128], index: 0, kind: input, shape index: {}]   ;;  %s9713_s1 = inlined_call_operand.vmem [shape: f32[2,8], index: 1, kind: input, shape index: {}]   ;;  %s9714_s2 = inlined_call_operand.vmem [shape: f32[2,64], index: 2, kind: input, shape index: {}]   ;;  %s9715_s3 = inlined_call_operand.vmem [shape: f32[1,128], index: 3, kind: input, shape index: {}]   ;;  %s9716_s4 = inlined_call_operand.vmem [shape: f32[1,128], index: 4, kind: input, shape index: {}]   ;;  %s9717_s5 = inlined_call_operand.vmem [shape: bf16[4,128,64], index: 5, kind: input, shape index: {}]   ;;  %s9718_s6 = inlined_call_operand.vmem [shape: bf16[4,128,64], index: 6, kind: input, shape index: {}]   ;;  %s9719_s7 = inlined_call_operand.vmem [shape: bf16[4,128,64], index: 7, kind: input, shape index: {}]   ;;  %s9720_s8 = inlined_call_operand.vmem [shape: f32[4,1,64], index: 8, kind: input, shape index: {}]   ;;  %s9721_s9 = inlined_call_operand.vmem [shape: f32[4,1,64], index: 9, kind: input, shape index: {}]   ;;  %s9722_s10 = inlined_call_operand.vmem [shape: f32[4,1,64], index: 10, kind: input, shape index: {}]   ;;  %s9723_s11 = inlined_call_operand.vmem [shape: bf16[4,64,128], index: 11, kind: input, shape index: {}]   ;;  %s9724_s12 = inlined_call_operand.vmem [shape: f32[2,1,128], index: 12, kind: input, shape index: {}]   ;;  %s9725_s13 = inlined_call_operand.vmem [shape: f32[2,1,128], index: 13, kind: input, shape index: {}]   ;;  %s9726_s14 = inlined_call_operand.vmem [shape: f32[2,1,128], index: 14, kind: input, shape index: {}]   ;;  %s9727_s15 = inlined_call_operand.vmem [shape: bf16[2,128,512], index: 15, kind: input, shape index: {}]   ;;  %s9728_s16 = inlined_call_operand.vmem [shape: f32[2,1,512], index: 16, kind: input, shape index: {}]   ;;  %s9729_s17 = inlined_call_operand.vmem [shape: bf16[2,512,128], index: 17, kind: input, shape index: {}]   ;;  %s9730_s18 = inlined_call_operand.vmem [shape: f32[2,1,128], index: 18, kind: input, shape index: {}]   ;;  %s9731_s19 = inlined_call_operand.vmem [shape: f32[2,1,128], index: 19, kind: input, shape index: {}]   ;;  %s9732_s20 = inlined_call_operand.vmem [shape: f32[2,1,128], index: 20, kind: input, shape index: {}]   ;;  %s9733_s21 = inlined_call_operand.vmem [shape: bf16[128,64], index: 21, kind: input, shape index: {}]   ;;  %s9734_s22 = inlined_call_operand.vmem [shape: f32[1,64], index: 22, kind: input, shape index: {}]   ;;  %s9735_s23 = inlined_call_operand.vmem [shape: bf16[64,64], index: 23, kind: input, shape index: {}]   ;;  %s9736_s24 = inlined_call_operand.vmem [shape: bf16[64,64], index: 24, kind: input, shape index: {}]   ;;  %s9737_s25 = inlined_call_operand.vmem [shape: f32[1,64], index: 25, kind: input, shape index: {}]   ;;  %s9738_s26 = inlined_call_operand.vmem [shape: bf16[64,10], index: 26, kind: input, shape index: {}]   ;;  %s9739_s27 = inlined_call_operand.vmem [shape: f32[1,10], index: 27, kind: input, shape index: {}]   ;;  %s9740_s28 = inlined_call_operand.hbm [shape: f32[2,10], index: 28, kind: output, shape index: {}]  }
   0x1   :  { %9780 = sst [smem:[#allocation17_spill]] %s9712_s0 }
   0x2   :  { %9781 = sst [smem:[#allocation18_spill]] %s9713_s1 }
   0x3   :  { %9782 = sst [smem:[#allocation19_spill]] %s9714_s2 }
   0x4   :  { %9783 = sst [smem:[#allocation20_spill]] %s9715_s3 }
   0x5   :  { %9784 = sst [smem:[#allocation21_spill]] %s9716_s4 }
   0x6   :  { %9785 = sst [smem:[#allocation22_spill]] %s9717_s5 }
   0x7   :  { %9786 = sst [smem:[#allocation23_spill]] %s9718_s6 }
   0x8   :  { %9787 = sst [smem:[#allocation24_spill]] %s9719_s7 }
   0x9   :  { %9788 = sst [smem:[#allocation25_spill]] %s9720_s8 }
   0xa   :  { %9789 = sst [smem:[#allocation26_spill]] %s9721_s9 }
   0xb   :  { %9790 = sst [smem:[#allocation27_spill]] %s9722_s10 }
   0xc   :  { %9791 = sst [smem:[#allocation28_spill]] %s9723_s11 }
   0xd   :  { %9792 = sst [smem:[#allocation29_spill]] %s9724_s12 }
   0xe   :  { %9793 = sst [smem:[#allocation30_spill]] %s9737_s25 }
   0xf   :  { %9794 = sst [smem:[#allocation31_spill]] %s9738_s26 }
  0x10   :  { %9795 = sst [smem:[#allocation32_spill]] %s9739_s27 }
  0x11   :  { %9796 = sst [smem:[#allocation33_spill]] %s9740_s28 }
  0x12   :  { %s9797_s9 = sld [smem:[#allocation17_spill]]  ;;  %v9753_v3 = vmov 0.0  }
  0x13   :  { %s9798_s6 = sld [smem:[#allocation22_spill]]  ;;  %6348 = vmatprep.subr.bf16.mxu0 %v9753_v3  ;;  %6368 = vmatprep.subr.bf16.mxu1 %v9753_v3 }
  0x14   :  { %s9799_s11 = sld [smem:[#allocation23_spill]] }
  0x18   :  { %v92_v0 = vld [vmem:[%s9797_s9] sm:$0xff] }
  0x19   :  { %96 = vadd.xlane.f32.xlu0 %v92_v0  ;;  %v7080_v1 = vld [vmem:[%s9798_s6 + $0x38] sm:$0xff]   ;;  %v7082_v4 = vld [vmem:[%s9798_s6 + $0x30] sm:$0xff]  }
  0x1a   :  { %v7081_v2 = vld [vmem:[%s9799_s11 + $0x38] sm:$0xff]   ;;  %v7083_v5 = vld [vmem:[%s9799_s11 + $0x30] sm:$0xff]   ;;  %6349 = vmatpush3.bf16.msra.mxu0 %v7080_v1 }
  0x1b   :  { %6369 = vmatpush3.bf16.msra.mxu1 %v7081_v2  ;;  %6350 = vmatprep.subr.bf16.mxu0 %v9753_v3 }
  0x1c   :  { %6370 = vmatprep.subr.bf16.mxu1 %v9753_v3 }
  0x1e   :  { %6351 = vmatpush3.bf16.msra.mxu0 %v7082_v4 }
  0x1f   :  { %6371 = vmatpush3.bf16.msra.mxu1 %v7083_v5  ;;  %6352 = vmatprep.subr.bf16.mxu0 %v9753_v3 }
  0x20   :  { %6372 = vmatprep.subr.bf16.mxu1 %v9753_v3 }
  0xa2   :  { %v97_v6 = vpop.xlane.xlu0 %96 }
  0xa3   :  { %v101_v7 = vmul.f32 0.0078125, %v97_v6 }
  0xa5   :  { %v103_v8 = vsub.f32 %v92_v0, %v101_v7 }
  0xa7   :  { %v105_v9 = vmul.f32 %v103_v8, %v103_v8 }
  0xa9   :  { %107 = vadd.xlane.f32.xlu0 %v105_v9 }
  0xaa   :  { %33 = vsyncpa [#allocation3], 0  ;;  %v7655_v10 = vld [vmem:[%s9798_s6 + $0x28] sm:$0xff]   ;;  %v7668_v12 = vld [vmem:[%s9798_s6 + $0x20] sm:$0xff]   ;;  %vm7483_vm0 = vmmov 0   ;;  %s9800_s8 = sld [smem:[#allocation20_spill]] }
  0xab   :  { %v7660_v11 = vld [vmem:[%s9799_s11 + $0x28] sm:$0xff]   ;;  %6353 = vmatpush3.bf16.msra.mxu0 %v7655_v10  ;;  %v7674_v13 = vld [vmem:[%s9799_s11 + $0x20] sm:$0xff]   ;;  %v7682_v14 = vld [vmem:[%s9798_s6 + $0x18] sm:$0xff]   ;;  %6364 = vmatprep.mubr.msk.bf16.mxu0 %vm7483_vm0, %v9753_v3  ;;  %s9801_s3 = sld [smem:[#allocation21_spill]]  ;;  %vm471_vm1 = vcmask 523264   ;;  %vm541_vm2 = vcmask 1043456  }
  0xac   :  { %6373 = vmatpush3.bf16.msra.mxu1 %v7660_v11  ;;  %6354 = vmatprep.subr.bf16.mxu0 %v9753_v3  ;;  %v7688_v15 = vld [vmem:[%s9799_s11 + $0x18] sm:$0xff]   ;;  %v7696_v16 = vld [vmem:[%s9798_s6 + $0x10] sm:$0xff]   ;;  %v7710_v18 = vld [vmem:[%s9798_s6 + $0x8] sm:$0xff]   ;;  %s9803_s29 = sld [smem:[#allocation24_spill]]  ;;  %vm524_vm3 = vcmask 64512   ;;  %vm4977_vm4 = vcmask 1040384  }
  0xad   :  { %6374 = vmatprep.subr.bf16.mxu1 %v9753_v3  ;;  %v7702_v17 = vld [vmem:[%s9799_s11 + $0x10] sm:$0xff]   ;;  %v7716_v19 = vld [vmem:[%s9799_s11 + $0x8] sm:$0xff]   ;;  %v7724_v20 = vld [vmem:[%s9798_s6] sm:$0xff]   ;;  %6384 = vmatprep.mubr.msk.bf16.mxu1 %vm7483_vm0, %v9753_v3  ;;  %s9804_s0 = sld [smem:[#allocation26_spill]]  ;;  %vm5336_vm5 = vcmask 74752  }
  0xae   :  { %v7730_v21 = vld [vmem:[%s9799_s11] sm:$0xff]   ;;  %v7822_v40 = vld [vmem:[%s9799_s11 + $0x78] sm:$0xff]   ;;  %v7830_v41 = vld [vmem:[%s9799_s11 + $0x70] sm:$0xff]   ;;  %s9805_s12 = sld [smem:[#allocation25_spill]] }
  0xaf   :  { %6355 = vmatpush3.bf16.msra.mxu0 %v7668_v12  ;;  %v7839_v42 = vld [vmem:[%s9799_s11 + $0x68] sm:$0xff]   ;;  %v7846_v43 = vld [vmem:[%s9799_s11 + $0x60] sm:$0xff]   ;;  %v7853_v44 = vld [vmem:[%s9799_s11 + $0x58] sm:$0xff]   ;;  %s9812_s30 = sld [smem:[#allocation28_spill]] }
  0xb0   :  { %6375 = vmatpush3.bf16.msra.mxu1 %v7674_v13  ;;  %6356 = vmatprep.subr.bf16.mxu0 %v9753_v3  ;;  %v7743_v26 = vld [vmem:[%s9800_s8] ss:$0 sm:$0xff]  ;;  %v7860_v45 = vld [vmem:[%s9799_s11 + $0x50] sm:$0xff]   ;;  %v7867_v46 = vld [vmem:[%s9799_s11 + $0x48] sm:$0xff]   ;;  %s9806_s8 = sld [smem:[#allocation27_spill]] }
  0xb1   :  { %6376 = vmatprep.subr.bf16.mxu1 %v9753_v3  ;;  %v7748_v28 = vld [vmem:[%s9801_s3] ss:$0 sm:$0xff]  ;;  %s9809_s3 = sld [smem:[#allocation18_spill]] }
  0xb2   :  { %v7757_v31 = vld [vmem:[%s9803_s29 + $0x38] sm:$0xff]   ;;  %v7769_v33 = vld [vmem:[%s9803_s29 + $0x30] sm:$0xff]   ;;  %v7780_v34 = vld [vmem:[%s9803_s29 + $0x28] sm:$0xff]   ;;  %s9828_s4 = sld [smem:[#allocation29_spill]] }
  0xb3   :  { %6357 = vmatpush3.bf16.msra.mxu0 %v7682_v14  ;;  %v7787_v35 = vld [vmem:[%s9803_s29 + $0x20] sm:$0xff]   ;;  %v7794_v36 = vld [vmem:[%s9803_s29 + $0x18] sm:$0xff]   ;;  %v7801_v37 = vld [vmem:[%s9803_s29 + $0x10] sm:$0xff]  }
  0xb4   :  { %6377 = vmatpush3.bf16.msra.mxu1 %v7688_v15  ;;  %6358 = vmatprep.subr.bf16.mxu0 %v9753_v3  ;;  %v7808_v38 = vld [vmem:[%s9803_s29 + $0x8] sm:$0xff]   ;;  %v7815_v39 = vld [vmem:[%s9803_s29] sm:$0xff]  }
  0xb5   :  { %6378 = vmatprep.subr.bf16.mxu1 %v9753_v3  ;;  %v7874_v47 = vld [vmem:[%s9799_s11 + $0x40] sm:$0xff]  }
  0xb6   :  { %v7885_v48 = vld [vmem:[%s9804_s0] ss:$0 sm:$0xff] }
  0xb7   :  { %6359 = vmatpush3.bf16.msra.mxu0 %v7696_v16  ;;  %v7891_v55 = vld [vmem:[%s9805_s12] ss:$0 sm:$0xff] }
  0xb8   :  { %6379 = vmatpush3.bf16.msra.mxu1 %v7702_v17  ;;  %6360 = vmatprep.subr.bf16.mxu0 %v9753_v3  ;;  %v7902_v63 = vld [vmem:[%s9806_s8] ss:$0 sm:$0xff] }
  0xb9   :  { %6380 = vmatprep.subr.bf16.mxu1 %v9753_v3 }
  0xbb   :  { %6361 = vmatpush3.bf16.msra.mxu0 %v7710_v18 }
  0xbc   :  { %6381 = vmatpush3.bf16.msra.mxu1 %v7716_v19  ;;  %6362 = vmatprep.subr.bf16.mxu0 %v9753_v3 }
  0xbd   :  { %6382 = vmatprep.subr.bf16.mxu1 %v9753_v3 }
  0xbf   :  { %6363 = vmatpush3.bf16.msra.mxu0 %v7724_v20 }
  0xc0   :  { %6383 = vmatpush3.bf16.msra.mxu1 %v7730_v21  ;;  %6388 = vmatprep.subr.bf16.mxu0 %v9753_v3 }
  0xc1   :  { %6408 = vmatprep.subr.bf16.mxu1 %v9753_v3 }
 0x132   :  { %v108_v22 = vpop.xlane.xlu0 %107 }
 0x133   :  { %v111_v23 = vmul.f32 0.0078125, %v108_v22 }
 0x135   :  { %v113_v24 = vadd.f32 1e-12, %v111_v23 }
 0x137   :  { %7372 = vrsqrt.f32 %v113_v24  ;;  %v519_v24 = vlaneseq }
 0x144   :  { %v7373_v25 = vpop.eup %7372 }
 0x145   :  { %v117_v27 = vmul.f32 %v7373_v25, %v103_v8  ;;  %v7909_v25 = vshrl.u32 %v519_v24, 7  ;;  %v7973_v24 = vld [vmem:[%s9798_s6 + $0x48] sm:$0xff]  }
 0x147   :  { %v125_v29 = vmul.f32 %v7743_v26, %v117_v27  ;;  %9807 = vst [vmem:[#allocation6_spill] sm:$0xff] %v7909_v25  ;;  %v7912_v27 = vsub.s32 0, %v7909_v25 }
 0x149   :  { %v7752_v30 = vadd.f32 %v7748_v28, %v125_v29  ;;  %9808 = vst [vmem:[#allocation7_spill] sm:$0xff] %v7912_v27  ;;  %v7917_v29 = vld [vmem:[%s9809_s3] sm:$0x3] }
 0x14b   :  { %9802 = vst [vmem:[#allocation5_spill] sm:$0xff] %v7752_v30  ;;  %v7761_v32 = vpack.c.bf16 %v7752_v30, %v7752_v30 }
 0x14d   :  { %6365 = vmatmul.mubr.bf16.vlgmr.msra.gmra.mxu0 %v7761_v32  ;;  %6385 = vmatmul.mubr.bf16.vlgmr.msra.gmra.mxu1 %v7761_v32 }
 0x14e   :  { %6389 = vmatpush3.bf16.msra.mxu0 %v7757_v31  ;;  %6404 = vmatprep.mubr.msk.bf16.mxu0 %vm7483_vm0, %v9753_v3 }
 0x14f   :  { %6390 = vmatprep.subr.bf16.mxu0 %v9753_v3  ;;  %6410 = vmatprep.mubr.msk.bf16.mxu1 %vm7483_vm0, %v9753_v3 }
 0x152   :  { %6391 = vmatpush3.bf16.msra.mxu0 %v7769_v33 }
 0x153   :  { %6392 = vmatprep.subr.bf16.mxu0 %v9753_v3 }
 0x156   :  { %6393 = vmatpush3.bf16.msra.mxu0 %v7780_v34 }
 0x157   :  { %6394 = vmatprep.subr.bf16.mxu0 %v9753_v3 }
 0x15a   :  { %6395 = vmatpush3.bf16.msra.mxu0 %v7787_v35 }
 0x15b   :  { %6396 = vmatprep.subr.bf16.mxu0 %v9753_v3 }
 0x15e   :  { %6397 = vmatpush3.bf16.msra.mxu0 %v7794_v36 }
 0x15f   :  { %6398 = vmatprep.subr.bf16.mxu0 %v9753_v3 }
 0x162   :  { %6399 = vmatpush3.bf16.msra.mxu0 %v7801_v37 }
 0x163   :  { %6400 = vmatprep.subr.bf16.mxu0 %v9753_v3 }
 0x166   :  { %6401 = vmatpush3.bf16.msra.mxu0 %v7808_v38 }
 0x167   :  { %6402 = vmatprep.subr.bf16.mxu0 %v9753_v3 }
 0x16a   :  { %6403 = vmatpush3.bf16.msra.mxu0 %v7815_v39 }
 0x16b   :  { %6440 = vmatprep.subr.bf16.mxu0 %v9753_v3 }
 0x16d   :  { %6405 = vmatmul.mubr.bf16.vlgmr.msra.gmra.mxu0 %v7761_v32 }
 0x16e   :  { %6441 = vmatpush3.bf16.msra.mxu0 %v7822_v40  ;;  %6456 = vmatprep.mubr.msk.bf16.mxu0 %vm7483_vm0, %v9753_v3 }
 0x16f   :  { %6442 = vmatprep.subr.bf16.mxu0 %v9753_v3 }
 0x172   :  { %6443 = vmatpush3.bf16.msra.mxu0 %v7830_v41 }
 0x173   :  { %6444 = vmatprep.subr.bf16.mxu0 %v9753_v3 }
 0x176   :  { %6445 = vmatpush3.bf16.msra.mxu0 %v7839_v42 }
 0x177   :  { %6446 = vmatprep.subr.bf16.mxu0 %v9753_v3 }
 0x17a   :  { %6447 = vmatpush3.bf16.msra.mxu0 %v7846_v43 }
 0x17b   :  { %6448 = vmatprep.subr.bf16.mxu0 %v9753_v3 }
 0x17e   :  { %6449 = vmatpush3.bf16.msra.mxu0 %v7853_v44 }
 0x17f   :  { %6450 = vmatprep.subr.bf16.mxu0 %v9753_v3 }
 0x182   :  { %6451 = vmatpush3.bf16.msra.mxu0 %v7860_v45 }
 0x183   :  { %6452 = vmatprep.subr.bf16.mxu0 %v9753_v3 }
 0x186   :  { %6453 = vmatpush3.bf16.msra.mxu0 %v7867_v46 }
 0x187   :  { %6454 = vmatprep.subr.bf16.mxu0 %v9753_v3 }
 0x18a   :  { %6455 = vmatpush3.bf16.msra.mxu0 %v7874_v47 }
 0x18b   :  { %6486 = vmatprep.subr.bf16.mxu0 %v9753_v3 }
 0x18d   :  { %6457 = vmatmul.mubr.bf16.vlgmr.msra.gmra.mxu0 %v7761_v32 }
 0x18e   :  { %6488 = vmatprep.mubr.msk.bf16.mxu0 %vm7483_vm0, %v9753_v3 }
 0x20d   :  { %v241_v49 = vpop.f32.mrf.mxu0  ;;  %v352_v50 = vpop.f32.mrf.mxu1 }
 0x20e   :  { %v353_v51 = vadd.f32 %v7885_v48, %v352_v50  ;;  %v242_v61 = vadd.f32 %v7891_v55, %v241_v49  ;;  %v7921_v49 = vrot.slane %v7917_v29, %v7912_v27 }
 0x20f   :  { %v6366_v52 = vpop.f32.mrf.mxu0  ;;  %v6386_v53 = vpop.f32.mrf.mxu1 }
 0x210   :  { %v470_v54 = vpack.c.bf16 %v353_v51, %v353_v51  ;;  %v469_v62 = vpack.c.bf16 %v242_v61, %v242_v61  ;;  %9810 = vst [vmem:[#allocation8_spill] sm:$0xff] %v7921_v49 }
 0x211   :  { %v244_v56 = vpop.f32.mrf.mxu0  ;;  %v355_v57 = vpop.f32.mrf.mxu1 }
 0x212   :  { %v476_v58 = vsel %vm471_vm1, %v470_v54, 0 }
 0x213   :  { %v6367_v59 = vpop.f32.mrf.mxu0  ;;  %v6387_v60 = vpop.f32.mrf.mxu1  ;;  %6409 = vmatpush3.bf16.xpose.msra.mxu1 %v476_v58 }
 0x214   :  { %6414 = vmatprep.subr.bf16.mxu1 %v9753_v3 }
 0x21a   :  { %6411 = vmatmul.mubr.msk.bf16.vlgmr.msra.gmra.mxu1 %vm471_vm1, %v469_v62 }
 0x21b   :  { %6416 = vmatprep.mubr.msk.bf16.mxu1 %vm7483_vm0, %v9753_v3 }
 0x22d   :  { %v463_v0 = vpop.f32.mrf.mxu0 }
 0x22e   :  { %v464_v1 = vadd.f32 %v7902_v63, %v463_v0 }
 0x22f   :  { %v6406_v2 = vpop.f32.mrf.mxu0 }
 0x230   :  { %v537_v4 = vpack.c.bf16 %v464_v1, %v464_v1 }
 0x231   :  { %v466_v5 = vpop.f32.mrf.mxu0 }
 0x232   :  { %v543_v6 = vsel %vm541_vm2, %v537_v4, 0  ;;  %v7929_v4 = vld [vmem:[%s9798_s6 + $0x78] sm:$0xff]  }
 0x233   :  { %v6407_v7 = vpop.f32.mrf.mxu0  ;;  %6415 = vmatpush3.bf16.msra.mxu1 %v543_v6  ;;  %v7936_v6 = vld [vmem:[%s9798_s6 + $0x70] sm:$0xff]  }
 0x234   :  { %6420 = vmatprep.subr.bf16.mxu1 %v9753_v3  ;;  %v7945_v7 = vld [vmem:[%s9798_s6 + $0x68] sm:$0xff]  }
 0x24d   :  { %v7907_v8 = vpop.f32.mrf.mxu0 }
 0x24f   :  { %v6458_v9 = vpop.f32.mrf.mxu0 }
 0x250   :  { %v7952_v9 = vld [vmem:[%s9798_s6 + $0x60] sm:$0xff]  }
 0x251   :  { %v817_v22 = vpop.f32.mrf.mxu0 }
 0x252   :  { %v7959_v22 = vld [vmem:[%s9798_s6 + $0x58] sm:$0xff]  }
 0x253   :  { %v6459_v23 = vpop.f32.mrf.mxu0 }
 0x254   :  { %v7966_v23 = vld [vmem:[%s9798_s6 + $0x50] sm:$0xff]  }
 0x2da   :  { %v512_v50 = vpop.f32.mrf.mxu1 }
 0x2db   :  { %v518_v51 = vmul.f32 0.125, %v512_v50  ;;  %v7980_v50 = vld [vmem:[%s9798_s6 + $0x40] sm:$0xff]  }
 0x2dc   :  { %v6412_v52 = vpop.f32.mrf.mxu1 }
 0x2dd   :  { %v523_v53 = vadd.f32 %v7921_v49, %v518_v51  ;;  %v7987_v51 = vld [vmem:[%s9803_s29 + $0x78] sm:$0xff]   ;;  %v7995_v52 = vld [vmem:[%s9803_s29 + $0x70] sm:$0xff]  }
 0x2de   :  { %v515_v54 = vpop.f32.mrf.mxu1 }
 0x2df   :  { %v525_v56 = vsel %vm524_vm3, %v523_v53, -inf  ;;  %v8011_v54 = vld [vmem:[%s9803_s29 + $0x60] sm:$0xff]  }
 0x2e0   :  { %v6413_v57 = vpop.f32.mrf.mxu1  ;;  %526 = vmax.xlane.f32.xlu1 %v525_v56  ;;  %v8018_v56 = vld [vmem:[%s9803_s29 + $0x58] sm:$0xff]  }
 0x2e1   :  { %v8025_v57 = vld [vmem:[%s9803_s29 + $0x50] sm:$0xff]  }
 0x369   :  { %v527_v58 = vpop.xlane.xlu1 %526 }
 0x36a   :  { %v528_v59 = vsub.f32 %v523_v53, %v527_v58  ;;  %v8004_v53 = vld [vmem:[%s9803_s29 + $0x68] sm:$0xff]   ;;  %v8031_v58 = vld [vmem:[%s9804_s0 + $0x1] ss:$0 sm:$0xff] }
 0x36c   :  { %v529_v60 = vmul.f32 1.442695, %v528_v59  ;;  %v8037_v59 = vld [vmem:[%s9803_s29 + $0x48] sm:$0xff]  }
 0x36e   :  { %7374 = vpow2.f32 %v529_v60  ;;  %v815_v60 = vadd.f32 %v8031_v58, %v7907_v8 }
 0x37b   :  { %v7375_v61 = vpop.eup %7374 }
 0x37c   :  { %v531_v62 = vsel %vm524_vm3, %v7375_v61, 0.0 }
 0x37d   :  { %532 = vadd.xlane.f32.xlu1 %v531_v62  ;;  %v934_v62 = vpack.c.bf16 %v815_v60, %v815_v60  ;;  %v8059_v60 = vld [vmem:[%s9805_s12 + $0x1] ss:$0 sm:$0xff] }
 0x37e   :  { %9811 = vst [vmem:[#allocation9_spill] sm:$0xff] %v8059_v60 }
 0x406   :  { %v533_v0 = vpop.xlane.xlu1 %532 }
 0x407   :  { %7376 = vrcp.f32 %v533_v0  ;;  %v939_v0 = vsel %vm471_vm1, %v934_v62, 0 }
 0x414   :  { %v7377_v1 = vpop.eup %7376 }
 0x415   :  { %v535_v2 = vmul.f32 %v7377_v1, %v7375_v61  ;;  %v8046_v61 = vld [vmem:[%s9803_s29 + $0x40] sm:$0xff]  }
 0x417   :  { %v536_v5 = vpack.c.bf16 %v535_v2, %v535_v2 }
 0x419   :  { %6417 = vmatmul.mubr.msk.bf16.vlgmr.msra.gmra.mxu1 %vm524_vm3, %v536_v5 }
 0x41a   :  { %6421 = vmatpush3.bf16.msra.mxu1 %v7929_v4  ;;  %6436 = vmatprep.mubr.msk.bf16.mxu1 %vm7483_vm0, %v9753_v3 }
 0x41b   :  { %6422 = vmatprep.subr.bf16.mxu1 %v9753_v3 }
 0x41e   :  { %6423 = vmatpush3.bf16.msra.mxu1 %v7936_v6 }
 0x41f   :  { %6424 = vmatprep.subr.bf16.mxu1 %v9753_v3 }
 0x422   :  { %6425 = vmatpush3.bf16.msra.mxu1 %v7945_v7 }
 0x423   :  { %6426 = vmatprep.subr.bf16.mxu1 %v9753_v3 }
 0x426   :  { %6427 = vmatpush3.bf16.msra.mxu1 %v7952_v9 }
 0x427   :  { %6428 = vmatprep.subr.bf16.mxu1 %v9753_v3 }
 0x42a   :  { %6429 = vmatpush3.bf16.msra.mxu1 %v7959_v22 }
 0x42b   :  { %6430 = vmatprep.subr.bf16.mxu1 %v9753_v3 }
 0x42e   :  { %6431 = vmatpush3.bf16.msra.mxu1 %v7966_v23 }
 0x42f   :  { %6432 = vmatprep.subr.bf16.mxu1 %v9753_v3 }
 0x432   :  { %6433 = vmatpush3.bf16.msra.mxu1 %v7973_v24 }
 0x433   :  { %6434 = vmatprep.subr.bf16.mxu1 %v9753_v3 }
 0x436   :  { %6435 = vmatpush3.bf16.msra.mxu1 %v7980_v50 }
 0x437   :  { %6460 = vmatprep.subr.bf16.mxu1 %v9753_v3 }
 0x439   :  { %6437 = vmatmul.mubr.bf16.vlgmr.msra.gmra.mxu1 %v7761_v32 }
 0x43a   :  { %6461 = vmatpush3.bf16.msra.mxu1 %v7987_v51  ;;  %6476 = vmatprep.mubr.msk.bf16.mxu1 %vm7483_vm0, %v9753_v3 }
 0x43b   :  { %6462 = vmatprep.subr.bf16.mxu1 %v9753_v3 }
 0x43e   :  { %6463 = vmatpush3.bf16.msra.mxu1 %v7995_v52 }
 0x43f   :  { %6464 = vmatprep.subr.bf16.mxu1 %v9753_v3 }
 0x442   :  { %6465 = vmatpush3.bf16.msra.mxu1 %v8004_v53 }
 0x443   :  { %6466 = vmatprep.subr.bf16.mxu1 %v9753_v3 }
 0x446   :  { %6467 = vmatpush3.bf16.msra.mxu1 %v8011_v54 }
 0x447   :  { %6468 = vmatprep.subr.bf16.mxu1 %v9753_v3 }
 0x44a   :  { %6469 = vmatpush3.bf16.msra.mxu1 %v8018_v56 }
 0x44b   :  { %6470 = vmatprep.subr.bf16.mxu1 %v9753_v3 }
 0x44e   :  { %6471 = vmatpush3.bf16.msra.mxu1 %v8025_v57 }
 0x44f   :  { %6472 = vmatprep.subr.bf16.mxu1 %v9753_v3 }
 0x452   :  { %6473 = vmatpush3.bf16.msra.mxu1 %v8037_v59 }
 0x453   :  { %6474 = vmatprep.subr.bf16.mxu1 %v9753_v3 }
 0x456   :  { %6475 = vmatpush3.bf16.msra.mxu1 %v8046_v61 }
 0x457   :  { %6480 = vmatprep.subr.bf16.mxu1 %v9753_v3 }
 0x459   :  { %6477 = vmatmul.mubr.bf16.vlgmr.msra.gmra.mxu1 %v7761_v32  ;;  %v8065_v32 = vld [vmem:[%s9812_s30 + $0x18] sm:$0xff]  }
 0x45a   :  { %6481 = vmatpush3.bf16.xpose.msra.mxu1 %v939_v0  ;;  %6482 = vmatprep.mubr.msk.bf16.mxu1 %vm7483_vm0, %v9753_v3  ;;  %9813 = vst [vmem:[#allocation10_spill] sm:$0xff] %v8065_v32 }
 0x45b   :  { %6504 = vmatprep.subr.bf16.mxu1 %v9753_v3 }
 0x4d9   :  { %v579_v8 = vpop.f32.mrf.mxu1 }
 0x4db   :  { %v6418_v1 = vpop.f32.mrf.mxu1 }
 0x4dd   :  { %v582_v2 = vpop.f32.mrf.mxu1 }
 0x4de   :  { %v8072_v2 = vld [vmem:[%s9812_s30 + $0x10] sm:$0xff]  }
 0x4df   :  { %v6419_v5 = vpop.f32.mrf.mxu1  ;;  %9814 = vst [vmem:[#allocation11_spill] sm:$0xff] %v8072_v2 }
 0x4e0   :  { %v9815_v5 = vmov 0.0  }
 0x4f9   :  { %v701_v27 = vpop.f32.mrf.mxu1 }
 0x4fa   :  { %v702_v62 = vadd.f32 %v8059_v60, %v701_v27  ;;  %v593_v27 = vpack.c.bf16 %v579_v8, %v579_v8  ;;  %v8107_v8 = vld [vmem:[%s9806_s8 + $0x1] ss:$0 sm:$0xff] }
 0x4fb   :  { %v6438_v30 = vpop.f32.mrf.mxu1  ;;  %9818 = vst [vmem:[#allocation14_spill] sm:$0xff] %v8107_v8 }
 0x4fc   :  { %v933_v0 = vpack.c.bf16 %v702_v62, %v702_v62  ;;  %v8088_v30 = vld [vmem:[%s9812_s30] sm:$0xff]   ;;  %v7456_v62 = vld [vmem:[%s9799_s11 + $0x38] sm:$0xff]  }
 0x4fd   :  { %v704_v3 = vpop.f32.mrf.mxu1  ;;  %9817 = vst [vmem:[#allocation13_spill] sm:$0xff] %v8088_v30 }
 0x4fe   :  { %6483 = vmatmul.mubr.msk.bf16.vlgmr.msra.gmra.mxu1 %vm471_vm1, %v933_v0  ;;  %v8081_v3 = vld [vmem:[%s9812_s30 + $0x8] sm:$0xff]   ;;  %v7457_v0 = vld [vmem:[%s9799_s11 + $0x30] sm:$0xff]  }
 0x4ff   :  { %6505 = vmatpush3.bf16.msra.mxu1 %v8065_v32  ;;  %v6439_v1 = vpop.f32.mrf.mxu1  ;;  %6512 = vmatprep.mubr.msk.bf16.mxu1 %vm7483_vm0, %v9815_v5  ;;  %9816 = vst [vmem:[#allocation12_spill] sm:$0xff] %v8081_v3 }
 0x500   :  { %6506 = vmatprep.subr.bf16.mxu1 %v9815_v5 }
 0x503   :  { %6507 = vmatpush3.bf16.msra.mxu1 %v8072_v2 }
 0x504   :  { %6508 = vmatprep.subr.bf16.mxu1 %v9815_v5 }
 0x507   :  { %6509 = vmatpush3.bf16.msra.mxu1 %v8081_v3 }
 0x508   :  { %6510 = vmatprep.subr.bf16.mxu1 %v9815_v5 }
 0x50b   :  { %6511 = vmatpush3.bf16.msra.mxu1 %v8088_v30 }
 0x50c   :  { %6536 = vmatprep.subr.bf16.mxu1 %v9815_v5 }
 0x50e   :  { %6513 = vmatmul.mubr.msk.bf16.vlgmr.msra.gmra.mxu1 %vm471_vm1, %v593_v27 }
 0x50f   :  { %6537 = vmatpush3.bf16.msra.mxu1 %v7456_v62  ;;  %6552 = vmatprep.mubr.msk.bf16.mxu1 %vm7483_vm0, %v9815_v5 }
 0x510   :  { %6538 = vmatprep.subr.bf16.mxu1 %v9815_v5 }
 0x513   :  { %6539 = vmatpush3.bf16.msra.mxu1 %v7457_v0 }
 0x514   :  { %6540 = vmatprep.subr.bf16.mxu1 %v9815_v5 }
 0x517   :  { %6541 = vmatpush3.bf16.msra.mxu1 %v7660_v11 }
 0x518   :  { %6542 = vmatprep.subr.bf16.mxu1 %v9815_v5 }
 0x519   :  { %v927_v1 = vpop.f32.mrf.mxu1 }
 0x51a   :  { %v928_v27 = vadd.f32 %v8107_v8, %v927_v1 }
 0x51b   :  { %v6478_v62 = vpop.f32.mrf.mxu1  ;;  %6543 = vmatpush3.bf16.msra.mxu1 %v7674_v13 }
 0x51c   :  { %v995_v60 = vpack.c.bf16 %v928_v27, %v928_v27  ;;  %6544 = vmatprep.subr.bf16.mxu1 %v9815_v5 }
 0x51d   :  { %v930_v0 = vpop.f32.mrf.mxu1 }
 0x51e   :  { %v1000_v30 = vsel %vm541_vm2, %v995_v60, 0 }
 0x51f   :  { %v6479_v3 = vpop.f32.mrf.mxu1  ;;  %6487 = vmatpush3.bf16.msra.mxu0 %v1000_v30  ;;  %6545 = vmatpush3.bf16.msra.mxu1 %v7688_v15 }
 0x520   :  { %6546 = vmatprep.subr.bf16.mxu1 %v9815_v5  ;;  %6492 = vmatprep.subr.bf16.mxu0 %v9815_v5 }
 0x523   :  { %6547 = vmatpush3.bf16.msra.mxu1 %v7702_v17 }
 0x524   :  { %6548 = vmatprep.subr.bf16.mxu1 %v9815_v5 }
 0x527   :  { %6549 = vmatpush3.bf16.msra.mxu1 %v7716_v19  ;;  %v93_v19 = vld [vmem:[%s9797_s9 + $0x8] sm:$0xff] }
 0x528   :  { %6550 = vmatprep.subr.bf16.mxu1 %v9815_v5 }
 0x52b   :  { %6551 = vmatpush3.bf16.msra.mxu1 %v7730_v21 }
 0x52c   :  { %6576 = vmatprep.subr.bf16.mxu1 %v9815_v5 }
 0x5be   :  { %v975_v11 = vpop.f32.mrf.mxu1 }
 0x5bf   :  { %v981_v13 = vmul.f32 0.125, %v975_v11 }
 0x5c0   :  { %v6484_v60 = vpop.f32.mrf.mxu1 }
 0x5c1   :  { %v982_v15 = vadd.f32 %v981_v13, %v7921_v49 }
 0x5c2   :  { %v978_v3 = vpop.f32.mrf.mxu1 }
 0x5c3   :  { %v983_v30 = vsel %vm524_vm3, %v982_v15, -inf }
 0x5c4   :  { %984 = vmax.xlane.f32.xlu0 %v983_v30  ;;  %v6485_v17 = vpop.f32.mrf.mxu1 }
 0x5c8   :  { %98 = vadd.xlane.f32.xlu0 %v93_v19 }
 0x5ce   :  { %v8129_v1 = vpop.f32.mrf.mxu1 }
 0x5cf   :  { %9819 = vst [vmem:[#allocation15_spill] sm:$0xff] %v8129_v1 }
 0x5d0   :  { %v6514_v21 = vpop.f32.mrf.mxu1 }
 0x5d2   :  { %v1183_v27 = vpop.f32.mrf.mxu1 }
 0x5d4   :  { %v6515_v62 = vpop.f32.mrf.mxu1 }
 0x64d   :  { %v985_v0 = vpop.xlane.xlu0 %984 }
 0x64e   :  { %v986_v11 = vsub.f32 %v982_v15, %v985_v0  ;;  %v8135_v15 = vld [vmem:[%s9812_s30 + $0x38] sm:$0xff]  }
 0x650   :  { %v987_v60 = vmul.f32 1.442695, %v986_v11 }
 0x651   :  { %v99_v13 = vpop.xlane.xlu0 %98 }
 0x652   :  { %7378 = vpow2.f32 %v987_v60  ;;  %v102_v3 = vmul.f32 0.0078125, %v99_v13 }
 0x654   :  { %v104_v49 = vsub.f32 %v93_v19, %v102_v3  ;;  %v7458_v3 = vld [vmem:[%s9798_s6 + $0x38] sm:$0xff]  }
 0x656   :  { %v106_v17 = vmul.f32 %v104_v49, %v104_v49 }
 0x65f   :  { %v7379_v8 = vpop.eup %7378 }
 0x660   :  { %v989_v30 = vsel %vm524_vm3, %v7379_v8, 0.0 }
 0x661   :  { %990 = vadd.xlane.f32.xlu1 %v989_v30 }
 0x665   :  { %109 = vadd.xlane.f32.xlu1 %v106_v17 }
 0x6ea   :  { %v991_v2 = vpop.xlane.xlu1 %990 }
 0x6eb   :  { %7380 = vrcp.f32 %v991_v2  ;;  %v8142_v2 = vld [vmem:[%s9812_s30 + $0x30] sm:$0xff]  }
 0x6ee   :  { %v110_v32 = vpop.xlane.xlu1 %109 }
 0x6ef   :  { %v112_v1 = vmul.f32 0.0078125, %v110_v32 }
 0x6f1   :  { %v114_v21 = vadd.f32 1e-12, %v112_v1  ;;  %v8151_v1 = vld [vmem:[%s9812_s30 + $0x28] sm:$0xff]  }
 0x6f3   :  { %7382 = vrsqrt.f32 %v114_v21  ;;  %v7459_v21 = vld [vmem:[%s9798_s6 + $0x30] sm:$0xff]  }
 0x6f8   :  { %v7381_v27 = vpop.eup %7380 }
 0x6f9   :  { %v993_v62 = vmul.f32 %v7381_v27, %v7379_v8 }
 0x6fb   :  { %v994_v19 = vpack.c.bf16 %v993_v62, %v993_v62 }
 0x6fd   :  { %6489 = vmatmul.mubr.msk.bf16.vlgmr.msra.gmra.mxu0 %vm524_vm3, %v994_v19 }
 0x6fe   :  { %6493 = vmatpush3.bf16.msra.mxu0 %v8135_v15  ;;  %6500 = vmatprep.mubr.msk.bf16.mxu0 %vm7483_vm0, %v9815_v5 }
 0x6ff   :  { %6494 = vmatprep.subr.bf16.mxu0 %v9815_v5 }
 0x700   :  { %v7383_v32 = vpop.eup %7382 }
 0x701   :  { %v118_v8 = vmul.f32 %v7383_v32, %v104_v49  ;;  %v8162_v49 = vld [vmem:[%s9812_s30 + $0x20] sm:$0xff]  }
 0x702   :  { %6495 = vmatpush3.bf16.msra.mxu0 %v8142_v2 }
 0x703   :  { %v126_v0 = vmul.f32 %v7743_v26, %v118_v8  ;;  %6496 = vmatprep.subr.bf16.mxu0 %v9815_v5 }
 0x705   :  { %v8156_v11 = vadd.f32 %v7748_v28, %v126_v0 }
 0x706   :  { %6497 = vmatpush3.bf16.msra.mxu0 %v8151_v1 }
 0x707   :  { %v8166_v60 = vpack.c.bf16 %v8156_v11, %v8156_v11  ;;  %6498 = vmatprep.subr.bf16.mxu0 %v9815_v5 }
 0x709   :  { %6553 = vmatmul.mubr.bf16.vlgmr.msra.gmra.mxu1 %v8166_v60 }
 0x70a   :  { %6499 = vmatpush3.bf16.msra.mxu0 %v8162_v49  ;;  %6578 = vmatprep.mubr.msk.bf16.mxu1 %vm7483_vm0, %v9815_v5 }
 0x70b   :  { %6516 = vmatprep.subr.bf16.mxu0 %v9815_v5 }
 0x7bd   :  { %v1036_v26 = vpop.f32.mrf.mxu0 }
 0x7be   :  { %v1051_v28 = vpack.c.bf16 %v1036_v26, %v1036_v26 }
 0x7bf   :  { %v6490_v13 = vpop.f32.mrf.mxu0 }
 0x7c0   :  { %6501 = vmatmul.mubr.msk.bf16.vlgmr.msra.gmra.mxu0 %vm471_vm1, %v1051_v28 }
 0x7c1   :  { %6517 = vmatpush3.bf16.msra.mxu0 %v7458_v3  ;;  %v1039_v30 = vpop.f32.mrf.mxu0  ;;  %6532 = vmatprep.mubr.msk.bf16.mxu0 %vm7483_vm0, %v9815_v5 }
 0x7c2   :  { %6518 = vmatprep.subr.bf16.mxu0 %v9815_v5 }
 0x7c3   :  { %v6491_v17 = vpop.f32.mrf.mxu0 }
 0x7c5   :  { %6519 = vmatpush3.bf16.msra.mxu0 %v7459_v21 }
 0x7c6   :  { %6520 = vmatprep.subr.bf16.mxu0 %v9815_v5 }
 0x7c9   :  { %6521 = vmatpush3.bf16.msra.mxu0 %v7655_v10  ;;  %v1261_v27 = vpop.f32.mrf.mxu1 }
 0x7ca   :  { %6522 = vmatprep.subr.bf16.mxu0 %v9815_v5  ;;  %v1262_v62 = vadd.f32 %v7885_v48, %v1261_v27 }
 0x7cb   :  { %v6554_v19 = vpop.f32.mrf.mxu1 }
 0x7cc   :  { %v1308_v32 = vpack.c.bf16 %v1262_v62, %v1262_v62 }
 0x7cd   :  { %6523 = vmatpush3.bf16.msra.mxu0 %v7668_v12  ;;  %v1264_v8 = vpop.f32.mrf.mxu1 }
 0x7ce   :  { %6524 = vmatprep.subr.bf16.mxu0 %v9815_v5  ;;  %v1313_v0 = vsel %vm471_vm1, %v1308_v32, 0 }
 0x7cf   :  { %v6555_v26 = vpop.f32.mrf.mxu1  ;;  %6577 = vmatpush3.bf16.xpose.msra.mxu1 %v1313_v0 }
 0x7d0   :  { %6582 = vmatprep.subr.bf16.mxu1 %v9815_v5 }
 0x7d1   :  { %6525 = vmatpush3.bf16.msra.mxu0 %v7682_v14 }
 0x7d2   :  { %6526 = vmatprep.subr.bf16.mxu0 %v9815_v5 }
 0x7d5   :  { %6527 = vmatpush3.bf16.msra.mxu0 %v7696_v16 }
 0x7d6   :  { %6528 = vmatprep.subr.bf16.mxu0 %v9815_v5 }
 0x7d9   :  { %6529 = vmatpush3.bf16.msra.mxu0 %v7710_v18 }
 0x7da   :  { %6530 = vmatprep.subr.bf16.mxu0 %v9815_v5 }
 0x7dd   :  { %6531 = vmatpush3.bf16.msra.mxu0 %v7724_v20 }
 0x7de   :  { %6556 = vmatprep.subr.bf16.mxu0 %v9815_v5 }
 0x7e0   :  { %6533 = vmatmul.mubr.bf16.vlgmr.msra.gmra.mxu0 %v8166_v60 }
 0x7e1   :  { %6557 = vmatpush3.bf16.msra.mxu0 %v7757_v31  ;;  %6572 = vmatprep.mubr.msk.bf16.mxu0 %vm7483_vm0, %v9815_v5 }
 0x7e2   :  { %6558 = vmatprep.subr.bf16.mxu0 %v9815_v5 }
 0x7e5   :  { %6559 = vmatpush3.bf16.msra.mxu0 %v7769_v33 }
 0x7e6   :  { %6560 = vmatprep.subr.bf16.mxu0 %v9815_v5 }
 0x7e9   :  { %6561 = vmatpush3.bf16.msra.mxu0 %v7780_v34 }
 0x7ea   :  { %6562 = vmatprep.subr.bf16.mxu0 %v9815_v5 }
 0x7ed   :  { %6563 = vmatpush3.bf16.msra.mxu0 %v7787_v35 }
 0x7ee   :  { %6564 = vmatprep.subr.bf16.mxu0 %v9815_v5 }
 0x7f1   :  { %6565 = vmatpush3.bf16.msra.mxu0 %v7794_v36 }
 0x7f2   :  { %6566 = vmatprep.subr.bf16.mxu0 %v9815_v5 }
 0x7f5   :  { %6567 = vmatpush3.bf16.msra.mxu0 %v7801_v37 }
 0x7f6   :  { %6568 = vmatprep.subr.bf16.mxu0 %v9815_v5 }
 0x7f9   :  { %6569 = vmatpush3.bf16.msra.mxu0 %v7808_v38 }
 0x7fa   :  { %6570 = vmatprep.subr.bf16.mxu0 %v9815_v5 }
 0x7fd   :  { %6571 = vmatpush3.bf16.msra.mxu0 %v7815_v39 }
 0x7fe   :  { %6608 = vmatprep.subr.bf16.mxu0 %v9815_v5 }
 0x800   :  { %6573 = vmatmul.mubr.bf16.vlgmr.msra.gmra.mxu0 %v8166_v60 }
 0x801   :  { %6609 = vmatpush3.bf16.msra.mxu0 %v7822_v40  ;;  %6624 = vmatprep.mubr.msk.bf16.mxu0 %vm7483_vm0, %v9815_v5 }
 0x802   :  { %6610 = vmatprep.subr.bf16.mxu0 %v9815_v5 }
 0x805   :  { %6611 = vmatpush3.bf16.msra.mxu0 %v7830_v41 }
 0x806   :  { %6612 = vmatprep.subr.bf16.mxu0 %v9815_v5 }
 0x809   :  { %6613 = vmatpush3.bf16.msra.mxu0 %v7839_v42 }
 0x80a   :  { %6614 = vmatprep.subr.bf16.mxu0 %v9815_v5 }
 0x80d   :  { %6615 = vmatpush3.bf16.msra.mxu0 %v7846_v43 }
 0x80e   :  { %6616 = vmatprep.subr.bf16.mxu0 %v9815_v5 }
 0x811   :  { %6617 = vmatpush3.bf16.msra.mxu0 %v7853_v44 }
 0x812   :  { %6618 = vmatprep.subr.bf16.mxu0 %v9815_v5 }
 0x815   :  { %6619 = vmatpush3.bf16.msra.mxu0 %v7860_v45 }
 0x816   :  { %6620 = vmatprep.subr.bf16.mxu0 %v9815_v5 }
 0x819   :  { %6621 = vmatpush3.bf16.msra.mxu0 %v7867_v46 }
 0x81a   :  { %6622 = vmatprep.subr.bf16.mxu0 %v9815_v5 }
 0x81d   :  { %6623 = vmatpush3.bf16.msra.mxu0 %v7874_v47 }
 0x81e   :  { %6648 = vmatprep.subr.bf16.mxu0 %v9815_v5 }
 0x820   :  { %6625 = vmatmul.mubr.bf16.vlgmr.msra.gmra.mxu0 %v8166_v60 }
 0x821   :  { %6650 = vmatprep.mubr.msk.bf16.mxu0 %vm7483_vm0, %v9815_v5 }
 0x880   :  { %v8241_v10 = vpop.f32.mrf.mxu0 }
 0x882   :  { %v6502_v12 = vpop.f32.mrf.mxu0 }
 0x884   :  { %v1116_v14 = vpop.f32.mrf.mxu0 }
 0x886   :  { %v6503_v16 = vpop.f32.mrf.mxu0 }
 0x887   :  { %v9826_v16 = vld [vmem:[#allocation14_spill] sm:$0xff] }
 0x8a0   :  { %v1221_v18 = vpop.f32.mrf.mxu0 }
 0x8a1   :  { %v1222_v20 = vadd.f32 %v7891_v55, %v1221_v18 }
 0x8a2   :  { %v6534_v31 = vpop.f32.mrf.mxu0 }
 0x8a3   :  { %v1307_v33 = vpack.c.bf16 %v1222_v20, %v1222_v20 }
 0x8a4   :  { %v1224_v34 = vpop.f32.mrf.mxu0 }
 0x8a5   :  { %6579 = vmatmul.mubr.msk.bf16.vlgmr.msra.gmra.mxu1 %vm471_vm1, %v1307_v33 }
 0x8a6   :  { %v6535_v35 = vpop.f32.mrf.mxu0  ;;  %6584 = vmatprep.mubr.msk.bf16.mxu1 %vm7483_vm0, %v9815_v5 }
 0x8c0   :  { %v1301_v36 = vpop.f32.mrf.mxu0 }
 0x8c1   :  { %v1302_v37 = vadd.f32 %v7902_v63, %v1301_v36  ;;  %v8254_v63 = vsub.s32 1, %v7909_v25 }
 0x8c2   :  { %v6574_v38 = vpop.f32.mrf.mxu0 }
 0x8c3   :  { %v1373_v39 = vpack.c.bf16 %v1302_v37, %v1302_v37  ;;  %9820 = vst [vmem:[#allocation16_spill] sm:$0xff] %v8254_v63  ;;  %v8258_v28 = vrot.slane %v7917_v29, %v8254_v63 }
 0x8c4   :  { %v1304_v40 = vpop.f32.mrf.mxu0 }
 0x8c5   :  { %v1378_v41 = vsel %vm541_vm2, %v1373_v39, 0  ;;  %v9827_v40 = vld [vmem:[#allocation15_spill] sm:$0xff] }
 0x8c6   :  { %v6575_v42 = vpop.f32.mrf.mxu0  ;;  %6583 = vmatpush3.bf16.msra.mxu1 %v1378_v41  ;;  %v1181_v41 = vadd.f32 %v9827_v40, %v8241_v10  ;;  %v7160_v40 = vld [vmem:[%s9727_s15 + $0x60] ss:$16 sps:$4 sm:$0xff]  }
 0x8c7   :  { %6588 = vmatprep.subr.bf16.mxu1 %v9815_v5 }
 0x8e0   :  { %v1495_v43 = vpop.f32.mrf.mxu0 }
 0x8e1   :  { %v1496_v44 = vadd.f32 %v8031_v58, %v1495_v43  ;;  %v5487_v43 = vld [vmem:[%s9828_s4] ss:$0 sm:$0xff] }
 0x8e2   :  { %v6626_v45 = vpop.f32.mrf.mxu0 }
 0x8e3   :  { %v1542_v46 = vpack.c.bf16 %v1496_v44, %v1496_v44 }
 0x8e4   :  { %v1498_v47 = vpop.f32.mrf.mxu0 }
 0x8e5   :  { %v1547_v48 = vsel %vm471_vm1, %v1542_v46, 0  ;;  %v1744_v47 = vadd.f32 %v5487_v43, %v1181_v41  ;;  %v7163_v41 = vld [vmem:[%s9727_s15 + $0x68] ss:$16 sps:$4 sm:$0xff]  }
 0x8e6   :  { %v6627_v55 = vpop.f32.mrf.mxu0  ;;  %6649 = vmatpush3.bf16.xpose.msra.mxu0 %v1547_v48 }
 0x8e7   :  { %6654 = vmatprep.subr.bf16.mxu0 %v9815_v5 }
 0x965   :  { %v1349_v13 = vpop.f32.mrf.mxu1 }
 0x966   :  { %v1355_v3 = vmul.f32 0.125, %v1349_v13 }
 0x967   :  { %v6580_v30 = vpop.f32.mrf.mxu1 }
 0x968   :  { %v1360_v58 = vadd.f32 %v8258_v28, %v1355_v3  ;;  %v9829_v3 = vld [vmem:[#allocation5_spill] sm:$0xff] }
 0x969   :  { %v1352_v17 = vpop.f32.mrf.mxu1  ;;  %v1746_v30 = vadd.f32 %v1744_v47, %v9829_v3  ;;  %v7174_v47 = vld [vmem:[%s9727_s15 + $0x24] ss:$16 sps:$4 sm:$0xff]  }
 0x96a   :  { %v1361_v21 = vsel %vm524_vm3, %v1360_v58, -inf  ;;  %v7180_v3 = vld [vmem:[%s9727_s15 + $0x4] ss:$16 sps:$4 sm:$0xff]  }
 0x96b   :  { %1362 = vmax.xlane.f32.xlu0 %v1361_v21  ;;  %v6581_v27 = vpop.f32.mrf.mxu1 }
 0x9f4   :  { %v1363_v62 = vpop.xlane.xlu0 %1362 }
 0x9f5   :  { %v1364_v19 = vsub.f32 %v1360_v58, %v1363_v62 }
 0x9f7   :  { %v1365_v32 = vmul.f32 1.442695, %v1364_v19 }
 0x9f9   :  { %7384 = vpow2.f32 %v1365_v32 }
 0xa06   :  { %v7385_v8 = vpop.eup %7384 }
 0xa07   :  { %v1367_v0 = vsel %vm524_vm3, %v7385_v8, 0.0 }
 0xa08   :  { %1368 = vadd.xlane.f32.xlu1 %v1367_v0 }
 0xa91   :  { %v1369_v29 = vpop.xlane.xlu1 %1368 }
 0xa92   :  { %7386 = vrcp.f32 %v1369_v29 }
 0xa9f   :  { %v7387_v26 = vpop.eup %7386 }
 0xaa0   :  { %v1371_v12 = vmul.f32 %v7387_v26, %v7385_v8 }
 0xaa2   :  { %v1372_v14 = vpack.c.bf16 %v1371_v12, %v1371_v12 }
 0xaa4   :  { %6585 = vmatmul.mubr.msk.bf16.vlgmr.msra.gmra.mxu1 %vm524_vm3, %v1372_v14 }
 0xaa5   :  { %6589 = vmatpush3.bf16.msra.mxu1 %v7929_v4  ;;  %6604 = vmatprep.mubr.msk.bf16.mxu1 %vm7483_vm0, %v9815_v5  ;;  %v9821_v4 = vld [vmem:[#allocation10_spill] sm:$0xff] }
 0xaa6   :  { %6590 = vmatprep.subr.bf16.mxu1 %v9815_v5 }
 0xaa9   :  { %6591 = vmatpush3.bf16.msra.mxu1 %v7936_v6  ;;  %v9822_v6 = vld [vmem:[#allocation11_spill] sm:$0xff] }
 0xaaa   :  { %6592 = vmatprep.subr.bf16.mxu1 %v9815_v5 }
 0xaad   :  { %6593 = vmatpush3.bf16.msra.mxu1 %v7945_v7  ;;  %v9823_v7 = vld [vmem:[#allocation12_spill] sm:$0xff] }
 0xaae   :  { %6594 = vmatprep.subr.bf16.mxu1 %v9815_v5 }
 0xab1   :  { %6595 = vmatpush3.bf16.msra.mxu1 %v7952_v9  ;;  %v9824_v9 = vld [vmem:[#allocation13_spill] sm:$0xff] }
 0xab2   :  { %6596 = vmatprep.subr.bf16.mxu1 %v9815_v5 }
 0xab5   :  { %6597 = vmatpush3.bf16.msra.mxu1 %v7959_v22 }
 0xab6   :  { %6598 = vmatprep.subr.bf16.mxu1 %v9815_v5 }
 0xab9   :  { %6599 = vmatpush3.bf16.msra.mxu1 %v7966_v23 }
 0xaba   :  { %6600 = vmatprep.subr.bf16.mxu1 %v9815_v5 }
 0xabd   :  { %6601 = vmatpush3.bf16.msra.mxu1 %v7973_v24 }
 0xabe   :  { %6602 = vmatprep.subr.bf16.mxu1 %v9815_v5 }
 0xac1   :  { %6603 = vmatpush3.bf16.msra.mxu1 %v7980_v50 }
 0xac2   :  { %6628 = vmatprep.subr.bf16.mxu1 %v9815_v5 }
 0xac4   :  { %6605 = vmatmul.mubr.bf16.vlgmr.msra.gmra.mxu1 %v8166_v60 }
 0xac5   :  { %6629 = vmatpush3.bf16.msra.mxu1 %v7987_v51  ;;  %6644 = vmatprep.mubr.msk.bf16.mxu1 %vm7483_vm0, %v9815_v5 }
 0xac6   :  { %6630 = vmatprep.subr.bf16.mxu1 %v9815_v5 }
 0xac9   :  { %6631 = vmatpush3.bf16.msra.mxu1 %v7995_v52 }
 0xaca   :  { %6632 = vmatprep.subr.bf16.mxu1 %v9815_v5 }
 0xacd   :  { %6633 = vmatpush3.bf16.msra.mxu1 %v8004_v53  ;;  %v9825_v53 = vld [vmem:[#allocation9_spill] sm:$0xff] }
 0xace   :  { %6634 = vmatprep.subr.bf16.mxu1 %v9815_v5 }
 0xad1   :  { %6635 = vmatpush3.bf16.msra.mxu1 %v8011_v54 }
 0xad2   :  { %6636 = vmatprep.subr.bf16.mxu1 %v9815_v5 }
 0xad5   :  { %6637 = vmatpush3.bf16.msra.mxu1 %v8018_v56 }
 0xad6   :  { %6638 = vmatprep.subr.bf16.mxu1 %v9815_v5 }
 0xad9   :  { %6639 = vmatpush3.bf16.msra.mxu1 %v8025_v57 }
 0xada   :  { %6640 = vmatprep.subr.bf16.mxu1 %v9815_v5 }
 0xadd   :  { %6641 = vmatpush3.bf16.msra.mxu1 %v8037_v59 }
 0xade   :  { %6642 = vmatprep.subr.bf16.mxu1 %v9815_v5 }
 0xae1   :  { %6643 = vmatpush3.bf16.msra.mxu1 %v8046_v61 }
 0xae2   :  { %6672 = vmatprep.subr.bf16.mxu1 %v9815_v5 }
 0xae4   :  { %6645 = vmatmul.mubr.bf16.vlgmr.msra.gmra.mxu1 %v8166_v60 }
 0xae5   :  { %6673 = vmatpush3.bf16.msra.mxu1 %v9821_v4  ;;  %6680 = vmatprep.mubr.msk.bf16.mxu1 %vm7483_vm0, %v9815_v5 }
 0xae6   :  { %6674 = vmatprep.subr.bf16.mxu1 %v9815_v5 }
 0xae9   :  { %6675 = vmatpush3.bf16.msra.mxu1 %v9822_v6 }
 0xaea   :  { %6676 = vmatprep.subr.bf16.mxu1 %v9815_v5 }
 0xaed   :  { %6677 = vmatpush3.bf16.msra.mxu1 %v9823_v7 }
 0xaee   :  { %6678 = vmatprep.subr.bf16.mxu1 %v9815_v5 }
 0xaf1   :  { %6679 = vmatpush3.bf16.msra.mxu1 %v9824_v9 }
 0xb64   :  { %v1414_v22 = vpop.f32.mrf.mxu1 }
 0xb65   :  { %v1420_v23 = vpack.c.bf16 %v1414_v22, %v1414_v22 }
 0xb66   :  { %v6586_v24 = vpop.f32.mrf.mxu1 }
 0xb67   :  { %6681 = vmatmul.mubr.msk.bf16.vlgmr.msra.gmra.mxu1 %vm471_vm1, %v1420_v23 }
 0xb68   :  { %v1417_v50 = vpop.f32.mrf.mxu1 }
 0xb6a   :  { %v6587_v51 = vpop.f32.mrf.mxu1 }
 0xb84   :  { %v1455_v52 = vpop.f32.mrf.mxu1 }
 0xb85   :  { %v1456_v54 = vadd.f32 %v9825_v53, %v1455_v52  ;;  %v7139_v52 = vld [vmem:[%s9727_s15 + $0xe8] ss:$16 sps:$4 sm:$0xff]   ;;  %v7141_v53 = vld [vmem:[%s9727_s15 + $0xec] ss:$16 sps:$4 sm:$0xff]  }
 0xb86   :  { %v6606_v56 = vpop.f32.mrf.mxu1  ;;  %2046 = vmatprep.subr.bf16.mxu1 %v7141_v53  ;;  %v7193_v53 = vld [vmem:[%s9729_s17 + $0xe8] sm:$0xff]  }
 0xb87   :  { %v1541_v57 = vpack.c.bf16 %v1456_v54, %v1456_v54  ;;  %v7147_v54 = vld [vmem:[%s9727_s15 + $0xcc] ss:$16 sps:$4 sm:$0xff]   ;;  %v7142_v56 = vld [vmem:[%s9727_s15 + $0xc0] ss:$16 sps:$4 sm:$0xff]   ;;  %2047 = vmatpush1.bf16.msra.mxu1 %v7139_v52 }
 0xb88   :  { %v1458_v59 = vpop.f32.mrf.mxu1  ;;  %2048 = vmatprep.subr.bf16.mxu1 %v7147_v54  ;;  %v7192_v52 = vld [vmem:[%s9729_s17 + $0x68] sm:$0xff]  }
 0xb89   :  { %6651 = vmatmul.mubr.msk.bf16.vlgmr.msra.gmra.mxu0 %vm471_vm1, %v1541_v57  ;;  %v7145_v57 = vld [vmem:[%s9727_s15 + $0xc8] ss:$16 sps:$4 sm:$0xff]  }
 0xb8a   :  { %v6607_v61 = vpop.f32.mrf.mxu1  ;;  %6656 = vmatprep.mubr.msk.bf16.mxu0 %vm7483_vm0, %v9815_v5  ;;  %v7195_v54 = vld [vmem:[%s9729_s17 + $0xa8] sm:$0xff]  }
 0xb8b   :  { %2049 = vmatpush1.bf16.msra.mxu1 %v7145_v57  ;;  %v7197_v57 = vld [vmem:[%s9729_s17 + $0xe0] sm:$0xff]  }
 0xba4   :  { %v1535_v60 = vpop.f32.mrf.mxu1 }
 0xba5   :  { %v1536_v18 = vadd.f32 %v9826_v16, %v1535_v60 }
 0xba6   :  { %v6646_v20 = vpop.f32.mrf.mxu1 }
 0xba7   :  { %v1603_v31 = vpack.c.bf16 %v1536_v18, %v1536_v18  ;;  %v7150_v18 = vld [vmem:[%s9727_s15 + $0xa4] ss:$16 sps:$4 sm:$0xff]   ;;  %v7153_v20 = vld [vmem:[%s9727_s15 + $0xac] ss:$16 sps:$4 sm:$0xff]  }
 0xba8   :  { %v1538_v33 = vpop.f32.mrf.mxu1  ;;  %2050 = vmatprep.subr.bf16.mxu1 %v7153_v20  ;;  %v7203_v20 = vld [vmem:[%s9729_s17 + $0x98] sm:$0xff]  }
 0xba9   :  { %v1608_v34 = vsel %vm541_vm2, %v1603_v31, 0  ;;  %v7148_v31 = vld [vmem:[%s9727_s15 + $0xa0] ss:$16 sps:$4 sm:$0xff]   ;;  %v7151_v33 = vld [vmem:[%s9727_s15 + $0xa8] ss:$16 sps:$4 sm:$0xff]  }
 0xbaa   :  { %v6647_v35 = vpop.f32.mrf.mxu1  ;;  %6655 = vmatpush3.bf16.msra.mxu0 %v1608_v34  ;;  %2051 = vmatpush1.bf16.msra.mxu1 %v7151_v33  ;;  %v7154_v34 = vld [vmem:[%s9727_s15 + $0x80] ss:$16 sps:$4 sm:$0xff]  }
 0xbab   :  { %6660 = vmatprep.subr.bf16.mxu0 %v9815_v5  ;;  %v7156_v35 = vld [vmem:[%s9727_s15 + $0x84] ss:$16 sps:$4 sm:$0xff]  }
 0xbac   :  { %v7205_v33 = vld [vmem:[%s9729_s17 + $0xd0] sm:$0xff]  }
 0xc27   :  { %v1731_v36 = vpop.f32.mrf.mxu1 }
 0xc29   :  { %v6682_v37 = vpop.f32.mrf.mxu1 }
 0xc2a   :  { %v7159_v37 = vld [vmem:[%s9727_s15 + $0x8c] ss:$16 sps:$4 sm:$0xff]  }
 0xc2b   :  { %v1734_v38 = vpop.f32.mrf.mxu1  ;;  %2052 = vmatprep.subr.bf16.mxu1 %v7159_v37  ;;  %v7209_v37 = vld [vmem:[%s9729_s17 + $0xc8] sm:$0xff]  }
 0xc2c   :  { %v7162_v38 = vld [vmem:[%s9727_s15 + $0x64] ss:$16 sps:$4 sm:$0xff]  }
 0xc2d   :  { %v6683_v39 = vpop.f32.mrf.mxu1 }
 0xc2e   :  { %v7165_v39 = vld [vmem:[%s9727_s15 + $0x6c] ss:$16 sps:$4 sm:$0xff]  }
 0xc49   :  { %v1583_v42 = vpop.f32.mrf.mxu0 }
 0xc4a   :  { %v1589_v44 = vmul.f32 0.125, %v1583_v42  ;;  %v7168_v42 = vld [vmem:[%s9727_s15 + $0x44] ss:$16 sps:$4 sm:$0xff]  }
 0xc4b   :  { %v6652_v45 = vpop.f32.mrf.mxu0 }
 0xc4c   :  { %v1590_v46 = vadd.f32 %v1589_v44, %v8258_v28  ;;  %v7166_v44 = vld [vmem:[%s9727_s15 + $0x40] ss:$16 sps:$4 sm:$0xff]   ;;  %v9766_v45 = vmov 0  }
 0xc4d   :  { %v1586_v48 = vpop.f32.mrf.mxu0  ;;  %2078 = vmatprep.mubr.bf16.mxu1 %v9766_v45 }
 0xc4e   :  { %v1591_v55 = vsel %vm524_vm3, %v1590_v46, -inf  ;;  %v7177_v48 = vld [vmem:[%s9727_s15 + $0x2c] ss:$16 sps:$4 sm:$0xff]  }
 0xc4f   :  { %1592 = vmax.xlane.f32.xlu0 %v1591_v55  ;;  %v6653_v13 = vpop.f32.mrf.mxu0  ;;  %v7172_v55 = vld [vmem:[%s9727_s15 + $0x20] ss:$16 sps:$4 sm:$0xff]  }
 0xc50   :  { %v7175_v13 = vld [vmem:[%s9727_s15 + $0x28] ss:$16 sps:$4 sm:$0xff]  }
 0xc53   :  { %1750 = vadd.xlane.f32.xlu0 %v1746_v30 }
 0xcd8   :  { %v1593_v58 = vpop.xlane.xlu0 %1592 }
 0xcd9   :  { %v1594_v10 = vsub.f32 %v1590_v46, %v1593_v58  ;;  %v7169_v46 = vld [vmem:[%s9727_s15 + $0x48] ss:$16 sps:$4 sm:$0xff]   ;;  %v7178_v58 = vld [vmem:[%s9727_s15] ss:$16 sps:$4 sm:$0xff]  }
 0xcdb   :  { %v1595_v17 = vmul.f32 1.442695, %v1594_v10  ;;  %v7181_v10 = vld [vmem:[%s9727_s15 + $0x8] ss:$16 sps:$4 sm:$0xff]  }
 0xcdc   :  { %v1751_v21 = vpop.xlane.xlu0 %1750 }
 0xcdd   :  { %7388 = vpow2.f32 %v1595_v17  ;;  %v1754_v27 = vmul.f32 0.0078125, %v1751_v21 }
 0xcdf   :  { %v8327_v62 = vsub.f32 %v1746_v30, %v1754_v27  ;;  %v7183_v30 = vld [vmem:[%s9727_s15 + $0xc] ss:$16 sps:$4 sm:$0xff]  }
 0xce1   :  { %v1758_v19 = vmul.f32 %v8327_v62, %v8327_v62 }
 0xce3   :  { %1760 = vadd.xlane.f32.xlu0 %v1758_v19 }
 0xcea   :  { %v7389_v32 = vpop.eup %7388 }
 0xceb   :  { %v1597_v8 = vsel %vm524_vm3, %v7389_v32, 0.0 }
 0xcec   :  { %1598 = vadd.xlane.f32.xlu1 %v1597_v8 }
 0xd6c   :  { %v1761_v17 = vpop.xlane.xlu0 %1760 }
 0xd6d   :  { %v1764_v21 = vmul.f32 0.0078125, %v1761_v17 }
 0xd6f   :  { %v1766_v27 = vadd.f32 1e-12, %v1764_v21 }
 0xd75   :  { %v1599_v0 = vpop.xlane.xlu1 %1598 }
 0xd76   :  { %7390 = vrcp.f32 %v1599_v0 }
 0xd77   :  { %7392 = vrsqrt.f32 %v1766_v27 }
 0xd83   :  { %v7391_v29 = vpop.eup %7390 }
 0xd84   :  { %v1601_v26 = vmul.f32 %v7391_v29, %v7389_v32  ;;  %v7393_v0 = vpop.eup %7392 }
 0xd85   :  { %v1770_v29 = vmul.f32 %v7393_v0, %v8327_v62 }
 0xd86   :  { %v1602_v12 = vpack.c.bf16 %v1601_v26, %v1601_v26  ;;  %v5488_v26 = vld [vmem:[%s9725_s13] ss:$0 sm:$0xff] }
 0xd88   :  { %6657 = vmatmul.mubr.msk.bf16.vlgmr.msra.gmra.mxu0 %vm524_vm3, %v1602_v12 }
 0xd89   :  { %6661 = vmatpush3.bf16.msra.mxu0 %v8135_v15  ;;  %6668 = vmatprep.mubr.msk.bf16.mxu0 %vm7483_vm0, %v9815_v5 }
 0xd8a   :  { %6662 = vmatprep.subr.bf16.mxu0 %v9815_v5 }
 0xd8d   :  { %6663 = vmatpush3.bf16.msra.mxu0 %v8142_v2 }
 0xd8e   :  { %6664 = vmatprep.subr.bf16.mxu0 %v9815_v5 }
 0xd91   :  { %6665 = vmatpush3.bf16.msra.mxu0 %v8151_v1  ;;  %v7136_v1 = vld [vmem:[%s9727_s15 + $0xe0] ss:$16 sps:$4 sm:$0xff]  }
 0xd92   :  { %6666 = vmatprep.subr.bf16.mxu0 %v9815_v5 }
 0xd95   :  { %6667 = vmatpush3.bf16.msra.mxu0 %v8162_v49  ;;  %v7138_v49 = vld [vmem:[%s9727_s15 + $0xe4] ss:$16 sps:$4 sm:$0xff]  }
 0xd96   :  { %2003 = vmatprep.subr.bf16.mxu0 %v7138_v49  ;;  %v7191_v49 = vld [vmem:[%s9729_s17 + $0xb0] sm:$0xff]  }
 0xe48   :  { %v1644_v14 = vpop.f32.mrf.mxu0 }
 0xe49   :  { %v1650_v4 = vpack.c.bf16 %v1644_v14, %v1644_v14 }
 0xe4a   :  { %v6658_v6 = vpop.f32.mrf.mxu0 }
 0xe4b   :  { %6669 = vmatmul.mubr.msk.bf16.vlgmr.msra.gmra.mxu0 %vm471_vm1, %v1650_v4  ;;  %v1778_v4 = vmul.f32 %v5488_v26, %v1770_v29  ;;  %v5489_v6 = vld [vmem:[%s9726_s14] ss:$0 sm:$0xff] }
 0xe4c   :  { %v1647_v15 = vpop.f32.mrf.mxu0  ;;  %2004 = vmatpush1.bf16.msra.mxu0 %v7136_v1  ;;  %2035 = vmatprep.mubr.bf16.mxu0 %v9766_v45  ;;  %v7190_v1 = vld [vmem:[%s9729_s17 + $0x30] sm:$0xff]   ;;  %v9038_v45 = vld [vmem:[%s9803_s29 + $0xc0] sm:$0xff]  }
 0xe4d   :  { %9835 = vst [vmem:[#allocation13_spill] sm:$0xff] %v9038_v45 }
 0xe4e   :  { %v6659_v7 = vpop.f32.mrf.mxu0 }
 0xe4f   :  { %v8454_v7 = vadd.f32 %v5489_v6, %v1778_v4 }
 0xf0b   :  { %v1688_v9 = vpop.f32.mrf.mxu0 }
 0xf0c   :  { %v1732_v22 = vadd.f32 %v1731_v36, %v1688_v9  ;;  %v7157_v36 = vld [vmem:[%s9727_s15 + $0x88] ss:$16 sps:$4 sm:$0xff]  }
 0xf0d   :  { %v6670_v23 = vpop.f32.mrf.mxu0  ;;  %2053 = vmatpush1.bf16.msra.mxu1 %v7157_v36  ;;  %v7208_v36 = vld [vmem:[%s9729_s17 + $0x48] sm:$0xff]  }
 0xf0e   :  { %v1745_v24 = vadd.f32 %v5487_v43, %v1732_v22  ;;  %2054 = vmatprep.subr.bf16.mxu1 %v7165_v39  ;;  %v7171_v43 = vld [vmem:[%s9727_s15 + $0x4c] ss:$16 sps:$4 sm:$0xff]  }
 0xf0f   :  { %v1691_v2 = vpop.f32.mrf.mxu0  ;;  %v7184_v22 = vld [vmem:[%s9729_s17 + $0x78] sm:$0xff]   ;;  %v7211_v39 = vld [vmem:[%s9729_s17 + $0x88] sm:$0xff]  }
 0xf10   :  { %v1747_v50 = vadd.f32 %v1745_v24, %v8156_v11  ;;  %v7144_v11 = vld [vmem:[%s9727_s15 + $0xc4] ss:$16 sps:$4 sm:$0xff]   ;;  %v7185_v23 = vld [vmem:[%s9729_s17 + $0xf8] sm:$0xff]  }
 0xf11   :  { %v6671_v51 = vpop.f32.mrf.mxu0  ;;  %2005 = vmatprep.subr.bf16.mxu0 %v7144_v11  ;;  %2055 = vmatpush1.bf16.msra.mxu1 %v7163_v41  ;;  %v7186_v24 = vld [vmem:[%s9729_s17 + $0x38] sm:$0xff]   ;;  %v7194_v11 = vld [vmem:[%s9729_s17 + $0x28] sm:$0xff]   ;;  %v7213_v41 = vld [vmem:[%s9729_s17 + $0xc0] sm:$0xff]  }
 0xf12   :  { %1752 = vadd.xlane.f32.xlu1 %v1747_v50  ;;  %2006 = vmatpush1.bf16.msra.mxu0 %v7142_v56  ;;  %v7187_v2 = vld [vmem:[%s9729_s17 + $0xb8] sm:$0xff]   ;;  %v7189_v51 = vld [vmem:[%s9729_s17 + $0xf0] sm:$0xff]   ;;  %v7196_v56 = vld [vmem:[%s9729_s17 + $0x60] sm:$0xff]  }
 0xf13   :  { %2007 = vmatprep.subr.bf16.mxu0 %v7150_v18  ;;  %2056 = vmatprep.subr.bf16.mxu1 %v7171_v43  ;;  %v7202_v18 = vld [vmem:[%s9729_s17 + $0x18] sm:$0xff]   ;;  %v7215_v43 = vld [vmem:[%s9729_s17 + $0x80] sm:$0xff]  }
 0xf15   :  { %2057 = vmatpush1.bf16.msra.mxu1 %v7169_v46  ;;  %v1821_v46 = vld [vmem:[%s9728_s16] sm:$0xf] }
 0xf16   :  { %2008 = vmatpush1.bf16.msra.mxu0 %v7148_v31  ;;  %2058 = vmatprep.subr.bf16.mxu1 %v7177_v48  ;;  %v7204_v31 = vld [vmem:[%s9729_s17 + $0x50] sm:$0xff]  }
 0xf17   :  { %2009 = vmatprep.subr.bf16.mxu0 %v7156_v35  ;;  %v7207_v35 = vld [vmem:[%s9729_s17 + $0x90] sm:$0xff]  }
 0xf18   :  { %v9830_v48 = vld [vmem:[#allocation7_spill] sm:$0xff] }
 0xf19   :  { %2059 = vmatpush1.bf16.msra.mxu1 %v7175_v13 }
 0xf1a   :  { %2010 = vmatpush1.bf16.msra.mxu0 %v7154_v34  ;;  %2060 = vmatprep.subr.bf16.mxu1 %v7183_v30  ;;  %v7206_v34 = vld [vmem:[%s9729_s17 + $0x10] sm:$0xff]  }
 0xf1b   :  { %2011 = vmatprep.subr.bf16.mxu0 %v7162_v38  ;;  %v7210_v38 = vld [vmem:[%s9729_s17 + $0x8] sm:$0xff]  }
 0xf1d   :  { %2061 = vmatpush1.bf16.msra.mxu1 %v7181_v10 }
 0xf1e   :  { %2012 = vmatpush1.bf16.msra.mxu0 %v7160_v40  ;;  %6114 = vmatprep.subr.bf16.mxu1 %v7185_v23  ;;  %v7212_v40 = vld [vmem:[%s9729_s17 + $0x40] sm:$0xff]  }
 0xf1f   :  { %2013 = vmatprep.subr.bf16.mxu0 %v7168_v42  ;;  %v7214_v42 = vld [vmem:[%s9729_s17] sm:$0xff]  }
 0xf22   :  { %2014 = vmatpush1.bf16.msra.mxu0 %v7166_v44  ;;  %v9765_v44 = vsub.s32 2, %v7909_v25 }
 0xf23   :  { %2015 = vmatprep.subr.bf16.mxu0 %v7174_v47  ;;  %v9764_v47 = vsub.s32 3, %v7909_v25  ;;  %v9053_v25 = vld [vmem:[%s9812_s30 + $0x50] sm:$0xff]  }
 0xf24   :  { %v1834_v13 = vrot.slane %v1821_v46, %v9765_v44  ;;  %v9031_v44 = vld [vmem:[%s9803_s29 + $0xc8] sm:$0xff]   ;;  %9837 = vst [vmem:[#allocation14_spill] sm:$0xff] %v9053_v25 }
 0xf25   :  { %v1838_v30 = vrot.slane %v1821_v46, %v9764_v47  ;;  %9834 = vst [vmem:[#allocation12_spill] sm:$0xff] %v9031_v44 }
 0xf26   :  { %2016 = vmatpush1.bf16.msra.mxu0 %v7172_v55  ;;  %v1826_v55 = vrot.slane %v1821_v46, %v9830_v48  ;;  %v9062_v48 = vld [vmem:[%s9812_s30 + $0x48] sm:$0xff]  }
 0xf27   :  { %2017 = vmatprep.subr.bf16.mxu0 %v7180_v3  ;;  %v1830_v3 = vrot.slane %v1821_v46, %v8254_v63  ;;  %v9045_v63 = vld [vmem:[%s9812_s30 + $0x58] sm:$0xff]   ;;  %9838 = vst [vmem:[#allocation15_spill] sm:$0xff] %v9062_v48 }
 0xf28   :  { %9836 = vst [vmem:[#allocation9_spill] sm:$0xff] %v9045_v63 }
 0xf2a   :  { %2018 = vmatpush1.bf16.msra.mxu0 %v7178_v58 }
 0xf2b   :  { %6092 = vmatprep.subr.bf16.mxu0 %v7184_v22 }
 0xf9b   :  { %v1753_v59 = vpop.xlane.xlu1 %1752 }
 0xf9c   :  { %v1755_v61 = vmul.f32 0.0078125, %v1753_v59  ;;  %v7198_v59 = vld [vmem:[%s9729_s17 + $0x20] sm:$0xff]  }
 0xf9e   :  { %v8368_v60 = vsub.f32 %v1747_v50, %v1755_v61  ;;  %v7188_v50 = vld [vmem:[%s9729_s17 + $0x70] sm:$0xff]   ;;  %v7199_v61 = vld [vmem:[%s9729_s17 + $0xa0] sm:$0xff]  }
 0xfa0   :  { %v1759_v16 = vmul.f32 %v8368_v60, %v8368_v60 }
 0xfa2   :  { %1762 = vadd.xlane.f32.xlu1 %v1759_v16  ;;  %v7201_v16 = vld [vmem:[%s9729_s17 + $0xd8] sm:$0xff]  }
0x102b   :  { %v1763_v19 = vpop.xlane.xlu1 %1762 }
0x102c   :  { %v1765_v32 = vmul.f32 0.0078125, %v1763_v19 }
0x102e   :  { %v1767_v8 = vadd.f32 1e-12, %v1765_v32 }
0x1030   :  { %7394 = vrsqrt.f32 %v1767_v8 }
0x103d   :  { %v7395_v12 = vpop.eup %7394 }
0x103e   :  { %v1771_v14 = vmul.f32 %v7395_v12, %v8368_v60  ;;  %v7200_v60 = vld [vmem:[%s9729_s17 + $0x58] sm:$0xff]  }
0x1040   :  { %v1779_v15 = vmul.f32 %v5488_v26, %v1771_v14 }
0x1042   :  { %v8456_v9 = vadd.f32 %v5489_v6, %v1779_v15 }
0x1044   :  { %v1820_v62 = vpack.c.bf16 %v8456_v9, %v8454_v7 }
0x1046   :  { %2036 = vmatmul.mubr.bf16.vlgmr.msra.gmra.mxu0 %v1820_v62  ;;  %2079 = vmatmul.mubr.bf16.vlgmr.msra.gmra.mxu1 %v1820_v62 }
0x1047   :  { %6093 = vmatpush3.bf16.msra.mxu0 %v7186_v24  ;;  %6115 = vmatpush3.bf16.msra.mxu1 %v7187_v2 }
0x1048   :  { %6094 = vmatprep.subr.bf16.mxu0 %v7188_v50  ;;  %6116 = vmatprep.subr.bf16.mxu1 %v7189_v51 }
0x104b   :  { %6095 = vmatpush3.bf16.msra.mxu0 %v7190_v1  ;;  %6117 = vmatpush3.bf16.msra.mxu1 %v7191_v49 }
0x104c   :  { %6096 = vmatprep.subr.bf16.mxu0 %v7192_v52  ;;  %6118 = vmatprep.subr.bf16.mxu1 %v7193_v53 }
0x104f   :  { %6097 = vmatpush3.bf16.msra.mxu0 %v7194_v11  ;;  %6119 = vmatpush3.bf16.msra.mxu1 %v7195_v54 }
0x1050   :  { %6098 = vmatprep.subr.bf16.mxu0 %v7196_v56  ;;  %6120 = vmatprep.subr.bf16.mxu1 %v7197_v57 }
0x1053   :  { %6099 = vmatpush3.bf16.msra.mxu0 %v7198_v59  ;;  %6121 = vmatpush3.bf16.msra.mxu1 %v7199_v61 }
0x1054   :  { %6100 = vmatprep.subr.bf16.mxu0 %v7200_v60  ;;  %6122 = vmatprep.subr.bf16.mxu1 %v7201_v16 }
0x1057   :  { %6101 = vmatpush3.bf16.msra.mxu0 %v7202_v18  ;;  %6123 = vmatpush3.bf16.msra.mxu1 %v7203_v20 }
0x1058   :  { %6102 = vmatprep.subr.bf16.mxu0 %v7204_v31  ;;  %6124 = vmatprep.subr.bf16.mxu1 %v7205_v33 }
0x105b   :  { %6103 = vmatpush3.bf16.msra.mxu0 %v7206_v34  ;;  %6125 = vmatpush3.bf16.msra.mxu1 %v7207_v35 }
0x105c   :  { %6104 = vmatprep.subr.bf16.mxu0 %v7208_v36  ;;  %6126 = vmatprep.subr.bf16.mxu1 %v7209_v37 }
0x105f   :  { %6105 = vmatpush3.bf16.msra.mxu0 %v7210_v38  ;;  %6127 = vmatpush3.bf16.msra.mxu1 %v7211_v39 }
0x1060   :  { %6106 = vmatprep.subr.bf16.mxu0 %v7212_v40  ;;  %6128 = vmatprep.subr.bf16.mxu1 %v7213_v41 }
0x1063   :  { %6107 = vmatpush3.bf16.msra.mxu0 %v7214_v42  ;;  %6129 = vmatpush3.bf16.msra.mxu1 %v7215_v43 }
0x1064   :  { %6684 = vmatprep.subr.bf16.mxu0 %v9815_v5  ;;  %6704 = vmatprep.subr.bf16.mxu1 %v9815_v5 }
0x1106   :  { %v2037_v58 = vpop.f32.mrf.mxu0  ;;  %v2080_v10 = vpop.f32.mrf.mxu1 }
0x1107   :  { %v8569_v17 = vadd.f32 %v2037_v58, %v1826_v55  ;;  %v8571_v21 = vadd.f32 %v2080_v10, %v1834_v13 }
0x1108   :  { %v2039_v27 = vpop.f32.mrf.mxu0  ;;  %v2082_v19 = vpop.f32.mrf.mxu1 }
0x1109   :  { %v2089_v32 = vmul.f32 %v8569_v17, %v8569_v17  ;;  %v2091_v8 = vmul.f32 %v8571_v21, %v8571_v21  ;;  %v8577_v0 = vadd.f32 %v2039_v27, %v1830_v3  ;;  %v8579_v29 = vadd.f32 %v2082_v19, %v1838_v30 }
0x110a   :  { %v2041_v26 = vpop.f32.mrf.mxu0  ;;  %v2084_v12 = vpop.f32.mrf.mxu1 }
0x110b   :  { %v2097_v14 = vmul.f32 %v2089_v32, %v8569_v17  ;;  %v2099_v4 = vmul.f32 %v2091_v8, %v8571_v21  ;;  %v2090_v6 = vmul.f32 %v8577_v0, %v8577_v0  ;;  %v2092_v15 = vmul.f32 %v8579_v29, %v8579_v29 }
0x110c   :  { %v8587_v62 = vadd.f32 %v2041_v26, %v1826_v55  ;;  %v8589_v22 = vadd.f32 %v2084_v12, %v1834_v13  ;;  %v2043_v23 = vpop.f32.mrf.mxu0  ;;  %v2086_v24 = vpop.f32.mrf.mxu1 }
0x110d   :  { %v2105_v2 = vmul.f32 0.044715, %v2097_v14  ;;  %v2107_v50 = vmul.f32 0.044715, %v2099_v4  ;;  %v2098_v51 = vmul.f32 %v2090_v6, %v8577_v0  ;;  %v2100_v1 = vmul.f32 %v2092_v15, %v8579_v29 }
0x110e   :  { %v2093_v49 = vmul.f32 %v8587_v62, %v8587_v62  ;;  %v2095_v52 = vmul.f32 %v8589_v22, %v8589_v22  ;;  %v8597_v53 = vadd.f32 %v2043_v23, %v1830_v3  ;;  %v8599_v11 = vadd.f32 %v2086_v24, %v1838_v30 }
0x110f   :  { %v2113_v54 = vadd.f32 %v2105_v2, %v8569_v17  ;;  %v2115_v56 = vadd.f32 %v2107_v50, %v8571_v21  ;;  %v2106_v57 = vmul.f32 0.044715, %v2098_v51  ;;  %v2108_v59 = vmul.f32 0.044715, %v2100_v1 }
0x1110   :  { %v2101_v61 = vmul.f32 %v2093_v49, %v8587_v62  ;;  %v2103_v60 = vmul.f32 %v2095_v52, %v8589_v22  ;;  %v2094_v16 = vmul.f32 %v8597_v53, %v8597_v53  ;;  %v2096_v18 = vmul.f32 %v8599_v11, %v8599_v11 }
0x1111   :  { %v2121_v20 = vmul.f32 0.7978846, %v2113_v54  ;;  %v2123_v31 = vmul.f32 0.7978846, %v2115_v56  ;;  %v2114_v33 = vadd.f32 %v2106_v57, %v8577_v0  ;;  %v2116_v34 = vadd.f32 %v2108_v59, %v8579_v29 }
0x1112   :  { %v2109_v35 = vmul.f32 0.044715, %v2101_v61  ;;  %v2111_v36 = vmul.f32 0.044715, %v2103_v60  ;;  %v2102_v37 = vmul.f32 %v2094_v16, %v8597_v53  ;;  %v2104_v38 = vmul.f32 %v2096_v18, %v8599_v11 }
0x1113   :  { %7396 = vtanh.f32 %v2121_v20  ;;  %v2122_v39 = vmul.f32 0.7978846, %v2114_v33  ;;  %v2124_v40 = vmul.f32 0.7978846, %v2116_v34 }
0x1114   :  { %7398 = vtanh.f32 %v2123_v31  ;;  %v2117_v41 = vadd.f32 %v2109_v35, %v8587_v62  ;;  %v2119_v42 = vadd.f32 %v2111_v36, %v8589_v22  ;;  %v2110_v43 = vmul.f32 0.044715, %v2102_v37 }
0x1115   :  { %7400 = vtanh.f32 %v2122_v39  ;;  %v2112_v46 = vmul.f32 0.044715, %v2104_v38 }
0x1116   :  { %7402 = vtanh.f32 %v2124_v40  ;;  %v2125_v55 = vmul.f32 0.7978846, %v2117_v41  ;;  %v2127_v13 = vmul.f32 0.7978846, %v2119_v42  ;;  %v2118_v3 = vadd.f32 %v2110_v43, %v8597_v53 }
0x1117   :  { %v2120_v30 = vadd.f32 %v2112_v46, %v8599_v11 }
0x1118   :  { %7404 = vtanh.f32 %v2125_v55  ;;  %v2126_v58 = vmul.f32 0.7978846, %v2118_v3 }
0x1119   :  { %7406 = vtanh.f32 %v2127_v13  ;;  %v2128_v10 = vmul.f32 0.7978846, %v2120_v30 }
0x111a   :  { %7408 = vtanh.f32 %v2126_v58 }
0x111b   :  { %7410 = vtanh.f32 %v2128_v10 }
0x1120   :  { %v7397_v27 = vpop.eup %7396 }
0x1121   :  { %v7399_v19 = vpop.eup %7398  ;;  %v2137_v14 = vadd.f32 1.0, %v7397_v27  ;;  %v8638_v27 = vld [vmem:[%s9798_s6 + $0xb8] sm:$0xff]  }
0x1122   :  { %v7401_v32 = vpop.eup %7400  ;;  %v2139_v15 = vadd.f32 1.0, %v7399_v19  ;;  %v8643_v19 = vld [vmem:[%s9799_s11 + $0xb8] sm:$0xff]  }
0x1123   :  { %v7403_v8 = vpop.eup %7402  ;;  %v2138_v26 = vadd.f32 1.0, %v7401_v32  ;;  %v2145_v52 = vmul.f32 0.5, %v2137_v14  ;;  %v8655_v32 = vld [vmem:[%s9799_s11 + $0xb0] sm:$0xff]  }
0x1124   :  { %v2140_v4 = vadd.f32 1.0, %v7403_v8  ;;  %v2147_v59 = vmul.f32 0.5, %v2139_v15  ;;  %v8679_v15 = vld [vmem:[%s9798_s6 + $0xa0] sm:$0xff]  }
0x1125   :  { %v7405_v12 = vpop.eup %7404  ;;  %v2146_v49 = vmul.f32 0.5, %v2138_v26  ;;  %v2153_v33 = vmul.f32 %v2145_v52, %v8569_v17  ;;  %v8735_v52 = vld [vmem:[%s9798_s6 + $0x80] sm:$0xff]  }
0x1126   :  { %v7407_v6 = vpop.eup %7406  ;;  %v2141_v23 = vadd.f32 1.0, %v7405_v12  ;;  %v2148_v57 = vmul.f32 0.5, %v2140_v4  ;;  %v2155_v36 = vmul.f32 %v2147_v59, %v8571_v21  ;;  %v5522_v21 = vld [vmem:[%s9730_s18] ss:$0 sm:$0xff]  ;;  %v8666_v4 = vld [vmem:[%s9798_s6 + $0xa8] sm:$0xff]  }
0x1127   :  { %v7409_v24 = vpop.eup %7408  ;;  %v2143_v2 = vadd.f32 1.0, %v7407_v6  ;;  %v2154_v20 = vmul.f32 %v2146_v49, %v8577_v0  ;;  %v8671_v6 = vld [vmem:[%s9799_s11 + $0xa8] sm:$0xff]  }
0x1128   :  { %v7411_v50 = vpop.eup %7410  ;;  %v2149_v51 = vmul.f32 0.5, %v2141_v23  ;;  %v2142_v1 = vadd.f32 1.0, %v7409_v24  ;;  %v2156_v34 = vmul.f32 %v2148_v57, %v8579_v29  ;;  %v8685_v23 = vld [vmem:[%s9799_s11 + $0xa0] sm:$0xff]   ;;  %v8693_v24 = vld [vmem:[%s9798_s6 + $0x98] sm:$0xff]   ;;  %v8727_v49 = vld [vmem:[%s9799_s11 + $0x88] sm:$0xff]  }
0x1129   :  { %v2151_v54 = vmul.f32 0.5, %v2143_v2  ;;  %v2144_v56 = vadd.f32 1.0, %v7411_v50  ;;  %v8699_v2 = vld [vmem:[%s9799_s11 + $0x98] sm:$0xff]   ;;  %v8707_v50 = vld [vmem:[%s9798_s6 + $0x90] sm:$0xff]  }
0x112a   :  { %v2150_v61 = vmul.f32 0.5, %v2142_v1  ;;  %v2157_v60 = vmul.f32 %v2149_v51, %v8587_v62  ;;  %v8713_v51 = vld [vmem:[%s9799_s11 + $0x90] sm:$0xff]   ;;  %v8721_v1 = vld [vmem:[%s9798_s6 + $0x88] sm:$0xff]  }
0x112b   :  { %v2152_v16 = vmul.f32 0.5, %v2144_v56  ;;  %v2159_v18 = vmul.f32 %v2151_v54, %v8589_v22  ;;  %v8740_v54 = vld [vmem:[%s9799_s11 + $0x80] sm:$0xff]  }
0x112c   :  { %v2158_v31 = vmul.f32 %v2150_v61, %v8597_v53  ;;  %v2225_v39 = vpack.c.bf16 %v2157_v60, %v2153_v33  ;;  %v8750_v60 = vld [vmem:[%s9731_s19] ss:$0 sm:$0xff]  ;;  %v8764_v33 = vld [vmem:[%s9803_s29 + $0xb8] sm:$0xff]  }
0x112d   :  { %v2160_v35 = vmul.f32 %v2152_v16, %v8599_v11  ;;  %v2227_v62 = vpack.c.bf16 %v2159_v18, %v2155_v36  ;;  %v8755_v18 = vld [vmem:[%s9732_s20] ss:$0 sm:$0xff]  ;;  %v8787_v36 = vld [vmem:[%s9803_s29 + $0xa8] sm:$0xff]  }
0x112e   :  { %v2226_v37 = vpack.c.bf16 %v2158_v31, %v2154_v20 }
0x112f   :  { %v2228_v38 = vpack.c.bf16 %v2160_v35, %v2156_v34  ;;  %v8776_v35 = vld [vmem:[%s9803_s29 + $0xb0] sm:$0xff]  }
0x1130   :  { %2460 = vmatprep.mubr.bf16.mxu0 %v2226_v37  ;;  %v8794_v37 = vld [vmem:[%s9803_s29 + $0xa0] sm:$0xff]  }
0x1131   :  { %2501 = vmatprep.mubr.bf16.mxu1 %v2228_v38  ;;  %2461 = vmatmul.mubr.bf16.vlgmr.msra.gmra.mxu0 %v2225_v39  ;;  %v8801_v38 = vld [vmem:[%s9803_s29 + $0x98] sm:$0xff]   ;;  %v8808_v39 = vld [vmem:[%s9803_s29 + $0x90] sm:$0xff]  }
0x1132   :  { %2502 = vmatmul.mubr.bf16.vlgmr.msra.gmra.mxu1 %v2227_v62  ;;  %6700 = vmatprep.mubr.msk.bf16.mxu0 %vm7483_vm0, %v9815_v5  ;;  %v8815_v62 = vld [vmem:[%s9803_s29 + $0x88] sm:$0xff]  }
0x1133   :  { %6720 = vmatprep.mubr.msk.bf16.mxu1 %vm7483_vm0, %v9815_v5  ;;  %6685 = vmatpush3.bf16.msra.mxu0 %v8638_v27 }
0x1134   :  { %6705 = vmatpush3.bf16.msra.mxu1 %v8643_v19  ;;  %6686 = vmatprep.subr.bf16.mxu0 %v9815_v5 }
0x1135   :  { %6706 = vmatprep.subr.bf16.mxu1 %v9815_v5 }
0x1138   :  { %6707 = vmatpush3.bf16.msra.mxu1 %v8655_v32 }
0x1139   :  { %6708 = vmatprep.subr.bf16.mxu1 %v9815_v5 }
0x113c   :  { %6709 = vmatpush3.bf16.msra.mxu1 %v8671_v6 }
0x113d   :  { %6710 = vmatprep.subr.bf16.mxu1 %v9815_v5 }
0x1140   :  { %6711 = vmatpush3.bf16.msra.mxu1 %v8685_v23 }
0x1141   :  { %6712 = vmatprep.subr.bf16.mxu1 %v9815_v5 }
0x1144   :  { %6713 = vmatpush3.bf16.msra.mxu1 %v8699_v2 }
0x1145   :  { %6714 = vmatprep.subr.bf16.mxu1 %v9815_v5 }
0x1148   :  { %6715 = vmatpush3.bf16.msra.mxu1 %v8713_v51 }
0x1149   :  { %6716 = vmatprep.subr.bf16.mxu1 %v9815_v5 }
0x114c   :  { %6717 = vmatpush3.bf16.msra.mxu1 %v8727_v49 }
0x114d   :  { %6718 = vmatprep.subr.bf16.mxu1 %v9815_v5 }
0x1150   :  { %6719 = vmatpush3.bf16.msra.mxu1 %v8740_v54 }
0x1151   :  { %6744 = vmatprep.subr.bf16.mxu1 %v9815_v5 }
0x11f1   :  { %v6108_v17 = vpop.f32.mrf.mxu0 }
0x11f2   :  { %v6130_v0 = vpop.f32.mrf.mxu1 }
0x11f3   :  { %v6109_v29 = vpop.f32.mrf.mxu0 }
0x11f4   :  { %v6110_v22 = vadd.f32 %v6109_v29, %v6108_v17  ;;  %v6131_v53 = vpop.f32.mrf.mxu1  ;;  %v8822_v17 = vld [vmem:[%s9803_s29 + $0x80] sm:$0xff]   ;;  %v8846_v29 = vld [vmem:[%s9799_s11 + $0xe8] sm:$0xff]  }
0x11f5   :  { %v6111_v11 = vpop.f32.mrf.mxu0  ;;  %v6132_v41 = vadd.f32 %v6131_v53, %v6130_v0  ;;  %v8829_v0 = vld [vmem:[%s9799_s11 + $0xf8] sm:$0xff]  }
0x11f6   :  { %v2463_v40 = vadd.f32 %v6110_v22, %v5522_v21  ;;  %v6133_v42 = vpop.f32.mrf.mxu1  ;;  %v8853_v22 = vld [vmem:[%s9799_s11 + $0xe0] sm:$0xff]   ;;  %v8860_v53 = vld [vmem:[%s9799_s11 + $0xd8] sm:$0xff]  }
0x11f7   :  { %v6112_v43 = vpop.f32.mrf.mxu0 }
0x11f8   :  { %v2504_v46 = vadd.f32 %v6132_v41, %v2463_v40  ;;  %v6113_v55 = vadd.f32 %v6112_v43, %v6111_v11  ;;  %v6134_v13 = vpop.f32.mrf.mxu1  ;;  %v8867_v11 = vld [vmem:[%s9799_s11 + $0xd0] sm:$0xff]   ;;  %v8874_v40 = vld [vmem:[%s9799_s11 + $0xc8] sm:$0xff]   ;;  %v8881_v41 = vld [vmem:[%s9799_s11 + $0xc0] sm:$0xff]  }
0x11f9   :  { %v6135_v30 = vadd.f32 %v6134_v13, %v6133_v42  ;;  %v8892_v42 = vld [vmem:[%s9804_s0 + $0x2] ss:$0 sm:$0xff] }
0x11fa   :  { %v2466_v3 = vadd.f32 %v6113_v55, %v5522_v21  ;;  %v2510_v58 = vadd.f32 %v2504_v46, %v8454_v7  ;;  %v8650_v7 = vld [vmem:[%s9798_s6 + $0xb0] sm:$0xff]  }
0x11fb   :  { %6687 = vmatpush3.bf16.msra.mxu0 %v8650_v7  ;;  %v8837_v21 = vld [vmem:[%s9799_s11 + $0xf0] sm:$0xff]  }
0x11fc   :  { %v8633_v10 = vadd.f32 %v6135_v30, %v2466_v3  ;;  %2514 = vadd.xlane.f32.xlu0 %v2510_v58  ;;  %6688 = vmatprep.subr.bf16.mxu0 %v9815_v5 }
0x11ff   :  { %6689 = vmatpush3.bf16.msra.mxu0 %v8666_v4 }
0x1200   :  { %6690 = vmatprep.subr.bf16.mxu0 %v9815_v5 }
0x1203   :  { %6691 = vmatpush3.bf16.msra.mxu0 %v8679_v15 }
0x1204   :  { %6692 = vmatprep.subr.bf16.mxu0 %v9815_v5 }
0x1207   :  { %6693 = vmatpush3.bf16.msra.mxu0 %v8693_v24 }
0x1208   :  { %6694 = vmatprep.subr.bf16.mxu0 %v9815_v5 }
0x120b   :  { %6695 = vmatpush3.bf16.msra.mxu0 %v8707_v50 }
0x120c   :  { %6696 = vmatprep.subr.bf16.mxu0 %v9815_v5 }
0x120f   :  { %6697 = vmatpush3.bf16.msra.mxu0 %v8721_v1 }
0x1210   :  { %6698 = vmatprep.subr.bf16.mxu0 %v9815_v5 }
0x1213   :  { %6699 = vmatpush3.bf16.msra.mxu0 %v8735_v52 }
0x1214   :  { %6724 = vmatprep.subr.bf16.mxu0 %v9815_v5 }
0x1285   :  { %v2515_v8 = vpop.xlane.xlu0 %2514 }
0x1286   :  { %v2518_v26 = vmul.f32 0.0078125, %v2515_v8 }
0x1288   :  { %v2520_v12 = vsub.f32 %v2510_v58, %v2518_v26  ;;  %v8898_v58 = vld [vmem:[%s9805_s12 + $0x2] ss:$0 sm:$0xff] }
0x128a   :  { %v2522_v14 = vmul.f32 %v2520_v12, %v2520_v12 }
0x128c   :  { %2524 = vadd.xlane.f32.xlu1 %v2522_v14 }
0x1315   :  { %v2525_v56 = vpop.xlane.xlu1 %2524 }
0x1316   :  { %v2528_v57 = vmul.f32 0.0078125, %v2525_v56 }
0x1318   :  { %v2530_v59 = vadd.f32 1e-12, %v2528_v57 }
0x131a   :  { %7412 = vrsqrt.f32 %v2530_v59 }
0x1327   :  { %v7413_v61 = vpop.eup %7412 }
0x1328   :  { %v2534_v16 = vmul.f32 %v7413_v61, %v2520_v12  ;;  %v8909_v61 = vld [vmem:[%s9806_s8 + $0x2] ss:$0 sm:$0xff] }
0x132a   :  { %v2542_v20 = vmul.f32 %v8750_v60, %v2534_v16 }
0x132c   :  { %v8759_v31 = vadd.f32 %v8755_v18, %v2542_v20 }
0x132e   :  { %9831 = vst [vmem:[#allocation10_spill] sm:$0xff] %v8759_v31  ;;  %v8768_v34 = vpack.c.bf16 %v8759_v31, %v8759_v31 }
0x1330   :  { %6701 = vmatmul.mubr.bf16.vlgmr.msra.gmra.mxu0 %v8768_v34  ;;  %6721 = vmatmul.mubr.bf16.vlgmr.msra.gmra.mxu1 %v8768_v34 }
0x1331   :  { %6725 = vmatpush3.bf16.msra.mxu0 %v8764_v33  ;;  %6740 = vmatprep.mubr.msk.bf16.mxu0 %vm7483_vm0, %v9815_v5 }
0x1332   :  { %6726 = vmatprep.subr.bf16.mxu0 %v9815_v5  ;;  %6746 = vmatprep.mubr.msk.bf16.mxu1 %vm7483_vm0, %v9815_v5 }
0x1335   :  { %6727 = vmatpush3.bf16.msra.mxu0 %v8776_v35 }
0x1336   :  { %6728 = vmatprep.subr.bf16.mxu0 %v9815_v5 }
0x1339   :  { %6729 = vmatpush3.bf16.msra.mxu0 %v8787_v36 }
0x133a   :  { %6730 = vmatprep.subr.bf16.mxu0 %v9815_v5 }
0x133d   :  { %6731 = vmatpush3.bf16.msra.mxu0 %v8794_v37 }
0x133e   :  { %6732 = vmatprep.subr.bf16.mxu0 %v9815_v5 }
0x1341   :  { %6733 = vmatpush3.bf16.msra.mxu0 %v8801_v38 }
0x1342   :  { %6734 = vmatprep.subr.bf16.mxu0 %v9815_v5 }
0x1345   :  { %6735 = vmatpush3.bf16.msra.mxu0 %v8808_v39 }
0x1346   :  { %6736 = vmatprep.subr.bf16.mxu0 %v9815_v5 }
0x1349   :  { %6737 = vmatpush3.bf16.msra.mxu0 %v8815_v62 }
0x134a   :  { %6738 = vmatprep.subr.bf16.mxu0 %v9815_v5 }
0x134d   :  { %6739 = vmatpush3.bf16.msra.mxu0 %v8822_v17 }
0x134e   :  { %6776 = vmatprep.subr.bf16.mxu0 %v9815_v5 }
0x1350   :  { %6741 = vmatmul.mubr.bf16.vlgmr.msra.gmra.mxu0 %v8768_v34 }
0x1351   :  { %6777 = vmatpush3.bf16.msra.mxu0 %v8829_v0  ;;  %6792 = vmatprep.mubr.msk.bf16.mxu0 %vm7483_vm0, %v9815_v5 }
0x1352   :  { %6778 = vmatprep.subr.bf16.mxu0 %v9815_v5 }
0x1355   :  { %6779 = vmatpush3.bf16.msra.mxu0 %v8837_v21 }
0x1356   :  { %6780 = vmatprep.subr.bf16.mxu0 %v9815_v5 }
0x1359   :  { %6781 = vmatpush3.bf16.msra.mxu0 %v8846_v29 }
0x135a   :  { %6782 = vmatprep.subr.bf16.mxu0 %v9815_v5 }
0x135d   :  { %6783 = vmatpush3.bf16.msra.mxu0 %v8853_v22 }
0x135e   :  { %6784 = vmatprep.subr.bf16.mxu0 %v9815_v5 }
0x1361   :  { %6785 = vmatpush3.bf16.msra.mxu0 %v8860_v53 }
0x1362   :  { %6786 = vmatprep.subr.bf16.mxu0 %v9815_v5 }
0x1365   :  { %6787 = vmatpush3.bf16.msra.mxu0 %v8867_v11 }
0x1366   :  { %6788 = vmatprep.subr.bf16.mxu0 %v9815_v5 }
0x1369   :  { %6789 = vmatpush3.bf16.msra.mxu0 %v8874_v40 }
0x136a   :  { %6790 = vmatprep.subr.bf16.mxu0 %v9815_v5 }
0x136d   :  { %6791 = vmatpush3.bf16.msra.mxu0 %v8881_v41 }
0x136e   :  { %6816 = vmatprep.subr.bf16.mxu0 %v9815_v5 }
0x1370   :  { %6793 = vmatmul.mubr.bf16.vlgmr.msra.gmra.mxu0 %v8768_v34 }
0x1371   :  { %6818 = vmatprep.mubr.msk.bf16.mxu0 %vm7483_vm0, %v9815_v5 }
0x13f0   :  { %v2660_v43 = vpop.f32.mrf.mxu0  ;;  %v2773_v46 = vpop.f32.mrf.mxu1 }
0x13f1   :  { %v2774_v55 = vadd.f32 %v8892_v42, %v2773_v46  ;;  %v2661_v57 = vadd.f32 %v8898_v58, %v2660_v43 }
0x13f2   :  { %v6702_v13 = vpop.f32.mrf.mxu0  ;;  %v6722_v3 = vpop.f32.mrf.mxu1 }
0x13f3   :  { %v2893_v30 = vpack.c.bf16 %v2774_v55, %v2774_v55  ;;  %v2892_v59 = vpack.c.bf16 %v2661_v57, %v2661_v57 }
0x13f4   :  { %v2663_v8 = vpop.f32.mrf.mxu0  ;;  %v2776_v26 = vpop.f32.mrf.mxu1 }
0x13f5   :  { %v2898_v12 = vsel %vm471_vm1, %v2893_v30, 0  ;;  %v8917_v30 = vld [vmem:[%s9804_s0 + $0x3] ss:$0 sm:$0xff] }
0x13f6   :  { %v6703_v14 = vpop.f32.mrf.mxu0  ;;  %v6723_v56 = vpop.f32.mrf.mxu1  ;;  %6745 = vmatpush3.bf16.xpose.msra.mxu1 %v2898_v12 }
0x13f7   :  { %6750 = vmatprep.subr.bf16.mxu1 %v9815_v5 }
0x13fd   :  { %6747 = vmatmul.mubr.msk.bf16.vlgmr.msra.gmra.mxu1 %vm471_vm1, %v2892_v59 }
0x13fe   :  { %6752 = vmatprep.mubr.msk.bf16.mxu1 %vm7483_vm0, %v9815_v5 }
0x1410   :  { %v2886_v16 = vpop.f32.mrf.mxu0 }
0x1411   :  { %v2887_v20 = vadd.f32 %v8909_v61, %v2886_v16 }
0x1412   :  { %v6742_v46 = vpop.f32.mrf.mxu0 }
0x1413   :  { %v2954_v55 = vpack.c.bf16 %v2887_v20, %v2887_v20 }
0x1414   :  { %v2889_v13 = vpop.f32.mrf.mxu0 }
0x1415   :  { %v2959_v43 = vsel %vm541_vm2, %v2954_v55, 0  ;;  %v9832_v55 = vld [vmem:[#allocation8_spill] sm:$0xff] }
0x1416   :  { %v6743_v3 = vpop.f32.mrf.mxu0  ;;  %6751 = vmatpush3.bf16.msra.mxu1 %v2959_v43 }
0x1417   :  { %6756 = vmatprep.subr.bf16.mxu1 %v9815_v5 }
0x1430   :  { %v3231_v8 = vpop.f32.mrf.mxu0 }
0x1431   :  { %v3232_v26 = vadd.f32 %v8917_v30, %v3231_v8 }
0x1432   :  { %v6794_v12 = vpop.f32.mrf.mxu0 }
0x1433   :  { %v3351_v14 = vpack.c.bf16 %v3232_v26, %v3232_v26 }
0x1434   :  { %v3234_v56 = vpop.f32.mrf.mxu0 }
0x1435   :  { %v3356_v57 = vsel %vm471_vm1, %v3351_v14, 0 }
0x1436   :  { %v6795_v59 = vpop.f32.mrf.mxu0  ;;  %6817 = vmatpush3.bf16.xpose.msra.mxu0 %v3356_v57 }
0x1437   :  { %6822 = vmatprep.subr.bf16.mxu0 %v9815_v5 }
0x14bd   :  { %v2934_v16 = vpop.f32.mrf.mxu1 }
0x14be   :  { %v2940_v20 = vmul.f32 0.125, %v2934_v16 }
0x14bf   :  { %v6748_v46 = vpop.f32.mrf.mxu1 }
0x14c0   :  { %v2941_v13 = vadd.f32 %v2940_v20, %v9832_v55  ;;  %v8928_v20 = vld [vmem:[%s9798_s6 + $0xf8] sm:$0xff]  }
0x14c1   :  { %v2937_v43 = vpop.f32.mrf.mxu1 }
0x14c2   :  { %v2942_v3 = vsel %vm524_vm3, %v2941_v13, -inf  ;;  %v8951_v43 = vld [vmem:[%s9798_s6 + $0xe0] sm:$0xff]  }
0x14c3   :  { %2943 = vmax.xlane.f32.xlu0 %v2942_v3  ;;  %v6749_v47 = vpop.f32.mrf.mxu1  ;;  %v8958_v3 = vld [vmem:[%s9798_s6 + $0xd8] sm:$0xff]  }
0x14c4   :  { %v8935_v47 = vld [vmem:[%s9798_s6 + $0xf0] sm:$0xff]  }
0x154c   :  { %v2944_v8 = vpop.xlane.xlu0 %2943 }
0x154d   :  { %v2945_v12 = vsub.f32 %v2941_v13, %v2944_v8  ;;  %v8944_v13 = vld [vmem:[%s9798_s6 + $0xe8] sm:$0xff]   ;;  %v8965_v8 = vld [vmem:[%s9798_s6 + $0xd0] sm:$0xff]  }
0x154f   :  { %v2946_v26 = vmul.f32 1.442695, %v2945_v12  ;;  %v8972_v12 = vld [vmem:[%s9798_s6 + $0xc8] sm:$0xff]  }
0x1551   :  { %7414 = vpow2.f32 %v2946_v26  ;;  %v8979_v26 = vld [vmem:[%s9798_s6 + $0xc0] sm:$0xff]  }
0x155e   :  { %v7415_v56 = vpop.eup %7414 }
0x155f   :  { %v2948_v14 = vsel %vm524_vm3, %v7415_v56, 0.0 }
0x1560   :  { %2949 = vadd.xlane.f32.xlu1 %v2948_v14  ;;  %v8994_v14 = vld [vmem:[%s9803_s29 + $0xf0] sm:$0xff]  }
0x15e9   :  { %v2950_v57 = vpop.xlane.xlu1 %2949 }
0x15ea   :  { %7416 = vrcp.f32 %v2950_v57  ;;  %v9003_v57 = vld [vmem:[%s9803_s29 + $0xe8] sm:$0xff]  }
0x15f7   :  { %v7417_v59 = vpop.eup %7416 }
0x15f8   :  { %v2952_v16 = vmul.f32 %v7417_v59, %v7415_v56  ;;  %v8986_v56 = vld [vmem:[%s9803_s29 + $0xf8] sm:$0xff]   ;;  %v9010_v59 = vld [vmem:[%s9803_s29 + $0xe0] sm:$0xff]  }
0x15fa   :  { %v2953_v46 = vpack.c.bf16 %v2952_v16, %v2952_v16  ;;  %v9017_v16 = vld [vmem:[%s9803_s29 + $0xd8] sm:$0xff]  }
0x15fc   :  { %6753 = vmatmul.mubr.msk.bf16.vlgmr.msra.gmra.mxu1 %vm524_vm3, %v2953_v46  ;;  %v9024_v46 = vld [vmem:[%s9803_s29 + $0xd0] sm:$0xff]   ;;  %s9857_s29 = sld [smem:[#allocation31_spill]] }
0x15fd   :  { %6757 = vmatpush3.bf16.msra.mxu1 %v8928_v20  ;;  %6772 = vmatprep.mubr.msk.bf16.mxu1 %vm7483_vm0, %v9815_v5  ;;  %9833 = vst [vmem:[#allocation11_spill] sm:$0xff] %v9024_v46 }
0x15fe   :  { %6758 = vmatprep.subr.bf16.mxu1 %v9815_v5 }
0x1601   :  { %6759 = vmatpush3.bf16.msra.mxu1 %v8935_v47 }
0x1602   :  { %6760 = vmatprep.subr.bf16.mxu1 %v9815_v5 }
0x1605   :  { %6761 = vmatpush3.bf16.msra.mxu1 %v8944_v13 }
0x1606   :  { %6762 = vmatprep.subr.bf16.mxu1 %v9815_v5 }
0x1609   :  { %6763 = vmatpush3.bf16.msra.mxu1 %v8951_v43 }
0x160a   :  { %6764 = vmatprep.subr.bf16.mxu1 %v9815_v5 }
0x160d   :  { %6765 = vmatpush3.bf16.msra.mxu1 %v8958_v3 }
0x160e   :  { %6766 = vmatprep.subr.bf16.mxu1 %v9815_v5 }
0x1611   :  { %6767 = vmatpush3.bf16.msra.mxu1 %v8965_v8 }
0x1612   :  { %6768 = vmatprep.subr.bf16.mxu1 %v9815_v5 }
0x1615   :  { %6769 = vmatpush3.bf16.msra.mxu1 %v8972_v12 }
0x1616   :  { %6770 = vmatprep.subr.bf16.mxu1 %v9815_v5 }
0x1619   :  { %6771 = vmatpush3.bf16.msra.mxu1 %v8979_v26 }
0x161a   :  { %6796 = vmatprep.subr.bf16.mxu1 %v9815_v5 }
0x161c   :  { %6773 = vmatmul.mubr.bf16.vlgmr.msra.gmra.mxu1 %v8768_v34 }
0x161d   :  { %6797 = vmatpush3.bf16.msra.mxu1 %v8986_v56  ;;  %6812 = vmatprep.mubr.msk.bf16.mxu1 %vm7483_vm0, %v9815_v5 }
0x161e   :  { %6798 = vmatprep.subr.bf16.mxu1 %v9815_v5 }
0x1621   :  { %6799 = vmatpush3.bf16.msra.mxu1 %v8994_v14 }
0x1622   :  { %6800 = vmatprep.subr.bf16.mxu1 %v9815_v5 }
0x1625   :  { %6801 = vmatpush3.bf16.msra.mxu1 %v9003_v57 }
0x1626   :  { %6802 = vmatprep.subr.bf16.mxu1 %v9815_v5 }
0x1629   :  { %6803 = vmatpush3.bf16.msra.mxu1 %v9010_v59 }
0x162a   :  { %6804 = vmatprep.subr.bf16.mxu1 %v9815_v5 }
0x162d   :  { %6805 = vmatpush3.bf16.msra.mxu1 %v9017_v16 }
0x162e   :  { %6806 = vmatprep.subr.bf16.mxu1 %v9815_v5 }
0x1631   :  { %6807 = vmatpush3.bf16.msra.mxu1 %v9024_v46 }
0x1632   :  { %6808 = vmatprep.subr.bf16.mxu1 %v9815_v5 }
0x1635   :  { %6809 = vmatpush3.bf16.msra.mxu1 %v9031_v44 }
0x1636   :  { %6810 = vmatprep.subr.bf16.mxu1 %v9815_v5 }
0x1639   :  { %6811 = vmatpush3.bf16.msra.mxu1 %v9038_v45 }
0x163a   :  { %6840 = vmatprep.subr.bf16.mxu1 %v9815_v5 }
0x163c   :  { %6813 = vmatmul.mubr.bf16.vlgmr.msra.gmra.mxu1 %v8768_v34  ;;  %v9069_v34 = vld [vmem:[%s9812_s30 + $0x40] sm:$0xff]  }
0x163d   :  { %6841 = vmatpush3.bf16.msra.mxu1 %v9045_v63  ;;  %6848 = vmatprep.mubr.msk.bf16.mxu1 %vm7483_vm0, %v9815_v5  ;;  %9839 = vst [vmem:[#allocation5_spill] sm:$0xff] %v9069_v34 }
0x163e   :  { %6842 = vmatprep.subr.bf16.mxu1 %v9815_v5 }
0x1641   :  { %6843 = vmatpush3.bf16.msra.mxu1 %v9053_v25 }
0x1642   :  { %6844 = vmatprep.subr.bf16.mxu1 %v9815_v5 }
0x1645   :  { %6845 = vmatpush3.bf16.msra.mxu1 %v9062_v48 }
0x1646   :  { %6846 = vmatprep.subr.bf16.mxu1 %v9815_v5 }
0x1649   :  { %6847 = vmatpush3.bf16.msra.mxu1 %v9069_v34 }
0x164a   :  { %6872 = vmatprep.subr.bf16.mxu1 %v9815_v5 }
0x16bc   :  { %v2995_v31 = vpop.f32.mrf.mxu1 }
0x16bd   :  { %v3010_v25 = vpack.c.bf16 %v2995_v31, %v2995_v31 }
0x16be   :  { %v6754_v63 = vpop.f32.mrf.mxu1 }
0x16bf   :  { %6849 = vmatmul.mubr.msk.bf16.vlgmr.msra.gmra.mxu1 %vm471_vm1, %v3010_v25  ;;  %v9094_v25 = vld [vmem:[%s9805_s12 + $0x3] ss:$0 sm:$0xff] }
0x16c0   :  { %v2998_v45 = vpop.f32.mrf.mxu1  ;;  %6873 = vmatpush3.bf16.msra.mxu1 %v8643_v19  ;;  %6888 = vmatprep.mubr.msk.bf16.mxu1 %vm7483_vm0, %v9815_v5  ;;  %9840 = vst [vmem:[#allocation8_spill] sm:$0xff] %v9094_v25 }
0x16c1   :  { %6874 = vmatprep.subr.bf16.mxu1 %v9815_v5 }
0x16c2   :  { %v6755_v48 = vpop.f32.mrf.mxu1 }
0x16c4   :  { %6875 = vmatpush3.bf16.msra.mxu1 %v8655_v32 }
0x16c5   :  { %6876 = vmatprep.subr.bf16.mxu1 %v9815_v5 }
0x16c8   :  { %6877 = vmatpush3.bf16.msra.mxu1 %v8671_v6 }
0x16c9   :  { %6878 = vmatprep.subr.bf16.mxu1 %v9815_v5 }
0x16cc   :  { %6879 = vmatpush3.bf16.msra.mxu1 %v8685_v23  ;;  %v9105_v23 = vld [vmem:[%s9806_s8 + $0x3] ss:$0 sm:$0xff] }
0x16cd   :  { %6880 = vmatprep.subr.bf16.mxu1 %v9815_v5 }
0x16d0   :  { %6881 = vmatpush3.bf16.msra.mxu1 %v8699_v2 }
0x16d1   :  { %6882 = vmatprep.subr.bf16.mxu1 %v9815_v5 }
0x16d4   :  { %6883 = vmatpush3.bf16.msra.mxu1 %v8713_v51 }
0x16d5   :  { %6884 = vmatprep.subr.bf16.mxu1 %v9815_v5 }
0x16d8   :  { %6885 = vmatpush3.bf16.msra.mxu1 %v8727_v49 }
0x16d9   :  { %6886 = vmatprep.subr.bf16.mxu1 %v9815_v5 }
0x16dc   :  { %v3118_v63 = vpop.f32.mrf.mxu1  ;;  %6887 = vmatpush3.bf16.msra.mxu1 %v8740_v54 }
0x16dd   :  { %v3119_v45 = vadd.f32 %v9094_v25, %v3118_v63  ;;  %6912 = vmatprep.subr.bf16.mxu1 %v9815_v5 }
0x16de   :  { %v6774_v48 = vpop.f32.mrf.mxu1 }
0x16df   :  { %v3350_v19 = vpack.c.bf16 %v3119_v45, %v3119_v45 }
0x16e0   :  { %v3121_v32 = vpop.f32.mrf.mxu1 }
0x16e1   :  { %6819 = vmatmul.mubr.msk.bf16.vlgmr.msra.gmra.mxu0 %vm471_vm1, %v3350_v19 }
0x16e2   :  { %v6775_v6 = vpop.f32.mrf.mxu1  ;;  %6824 = vmatprep.mubr.msk.bf16.mxu0 %vm7483_vm0, %v9815_v5 }
0x16fc   :  { %v3344_v2 = vpop.f32.mrf.mxu1 }
0x16fd   :  { %v3345_v51 = vadd.f32 %v9105_v23, %v3344_v2 }
0x16fe   :  { %v6814_v49 = vpop.f32.mrf.mxu1 }
0x16ff   :  { %v3412_v54 = vpack.c.bf16 %v3345_v51, %v3345_v51 }
0x1700   :  { %v3347_v31 = vpop.f32.mrf.mxu1 }
0x1701   :  { %v3417_v63 = vsel %vm541_vm2, %v3412_v54, 0  ;;  %v2511_v54 = vadd.f32 %v8633_v10, %v8456_v9 }
0x1702   :  { %v6815_v45 = vpop.f32.mrf.mxu1  ;;  %6823 = vmatpush3.bf16.msra.mxu0 %v3417_v63 }
0x1703   :  { %6828 = vmatprep.subr.bf16.mxu0 %v9815_v5 }
0x177f   :  { %v9110_v48 = vpop.f32.mrf.mxu1 }
0x1781   :  { %v6850_v19 = vpop.f32.mrf.mxu1 }
0x1783   :  { %v3600_v32 = vpop.f32.mrf.mxu1 }
0x1785   :  { %v6851_v6 = vpop.f32.mrf.mxu1 }
0x17a1   :  { %v3392_v25 = vpop.f32.mrf.mxu0 }
0x17a2   :  { %v3398_v34 = vmul.f32 0.125, %v3392_v25 }
0x17a3   :  { %v6820_v44 = vpop.f32.mrf.mxu0 }
0x17a4   :  { %v3399_v46 = vadd.f32 %v3398_v34, %v9832_v55 }
0x17a5   :  { %v3395_v2 = vpop.f32.mrf.mxu0 }
0x17a6   :  { %v3400_v51 = vsel %vm524_vm3, %v3399_v46, -inf }
0x17a7   :  { %3401 = vmax.xlane.f32.xlu0 %v3400_v51  ;;  %v6821_v49 = vpop.f32.mrf.mxu0 }
0x17ab   :  { %2516 = vadd.xlane.f32.xlu0 %v2511_v54 }
0x1830   :  { %v3402_v31 = vpop.xlane.xlu0 %3401 }
0x1831   :  { %v3403_v63 = vsub.f32 %v3399_v46, %v3402_v31  ;;  %v9120_v46 = vld [vmem:[%s9812_s30 + $0x78] sm:$0xff]  }
0x1833   :  { %v3404_v45 = vmul.f32 1.442695, %v3403_v63 }
0x1834   :  { %v2517_v19 = vpop.xlane.xlu0 %2516 }
0x1835   :  { %7418 = vpow2.f32 %v3404_v45  ;;  %v2519_v32 = vmul.f32 0.0078125, %v2517_v19  ;;  %v9136_v19 = vld [vmem:[%s9812_s30 + $0x68] sm:$0xff]  }
0x1837   :  { %v2521_v25 = vsub.f32 %v2511_v54, %v2519_v32  ;;  %v9127_v54 = vld [vmem:[%s9812_s30 + $0x70] sm:$0xff]  }
0x1839   :  { %v2523_v55 = vmul.f32 %v2521_v25, %v2521_v25 }
0x1842   :  { %v7419_v6 = vpop.eup %7418 }
0x1843   :  { %v3406_v44 = vsel %vm524_vm3, %v7419_v6, 0.0 }
0x1844   :  { %3407 = vadd.xlane.f32.xlu1 %v3406_v44 }
0x1848   :  { %2526 = vadd.xlane.f32.xlu1 %v2523_v55 }
0x18cd   :  { %v3408_v34 = vpop.xlane.xlu1 %3407 }
0x18ce   :  { %7420 = vrcp.f32 %v3408_v34 }
0x18d1   :  { %v2527_v2 = vpop.xlane.xlu1 %2526 }
0x18d2   :  { %v2529_v51 = vmul.f32 0.0078125, %v2527_v2 }
0x18d4   :  { %v2531_v49 = vadd.f32 1e-12, %v2529_v51 }
0x18d6   :  { %7422 = vrsqrt.f32 %v2531_v49 }
0x18db   :  { %v7421_v9 = vpop.eup %7420 }
0x18dc   :  { %v3410_v10 = vmul.f32 %v7421_v9, %v7419_v6 }
0x18de   :  { %v3411_v31 = vpack.c.bf16 %v3410_v10, %v3410_v10 }
0x18e0   :  { %6825 = vmatmul.mubr.msk.bf16.vlgmr.msra.gmra.mxu0 %vm524_vm3, %v3411_v31 }
0x18e1   :  { %6829 = vmatpush3.bf16.msra.mxu0 %v9120_v46  ;;  %6836 = vmatprep.mubr.msk.bf16.mxu0 %vm7483_vm0, %v9815_v5 }
0x18e2   :  { %6830 = vmatprep.subr.bf16.mxu0 %v9815_v5 }
0x18e3   :  { %v7423_v63 = vpop.eup %7422 }
0x18e4   :  { %v2535_v45 = vmul.f32 %v7423_v63, %v2521_v25  ;;  %v9147_v25 = vld [vmem:[%s9812_s30 + $0x60] sm:$0xff]   ;;  %s9856_s30 = sld [smem:[#allocation19_spill]] }
0x18e5   :  { %6831 = vmatpush3.bf16.msra.mxu0 %v9127_v54 }
0x18e6   :  { %v2543_v32 = vmul.f32 %v8750_v60, %v2535_v45  ;;  %6832 = vmatprep.subr.bf16.mxu0 %v9815_v5 }
0x18e8   :  { %v9141_v6 = vadd.f32 %v8755_v18, %v2543_v32 }
0x18e9   :  { %6833 = vmatpush3.bf16.msra.mxu0 %v9136_v19 }
0x18ea   :  { %v9151_v44 = vpack.c.bf16 %v9141_v6, %v9141_v6  ;;  %6834 = vmatprep.subr.bf16.mxu0 %v9815_v5 }
0x18ec   :  { %6889 = vmatmul.mubr.bf16.vlgmr.msra.gmra.mxu1 %v9151_v44 }
0x18ed   :  { %6835 = vmatpush3.bf16.msra.mxu0 %v9147_v25  ;;  %6914 = vmatprep.mubr.msk.bf16.mxu1 %vm7483_vm0, %v9815_v5 }
0x18ee   :  { %6852 = vmatprep.subr.bf16.mxu0 %v9815_v5 }
0x19a0   :  { %v3453_v60 = vpop.f32.mrf.mxu0 }
0x19a1   :  { %v3468_v18 = vpack.c.bf16 %v3453_v60, %v3453_v60 }
0x19a2   :  { %v6826_v55 = vpop.f32.mrf.mxu0 }
0x19a3   :  { %6837 = vmatmul.mubr.msk.bf16.vlgmr.msra.gmra.mxu0 %vm471_vm1, %v3468_v18 }
0x19a4   :  { %6853 = vmatpush3.bf16.msra.mxu0 %v8638_v27  ;;  %v3456_v34 = vpop.f32.mrf.mxu0  ;;  %6868 = vmatprep.mubr.msk.bf16.mxu0 %vm7483_vm0, %v9815_v5 }
0x19a5   :  { %6854 = vmatprep.subr.bf16.mxu0 %v9815_v5 }
0x19a6   :  { %v6827_v2 = vpop.f32.mrf.mxu0 }
0x19a8   :  { %6855 = vmatpush3.bf16.msra.mxu0 %v8650_v7 }
0x19a9   :  { %6856 = vmatprep.subr.bf16.mxu0 %v9815_v5 }
0x19ac   :  { %6857 = vmatpush3.bf16.msra.mxu0 %v8666_v4  ;;  %v3678_v51 = vpop.f32.mrf.mxu1 }
0x19ad   :  { %v3679_v49 = vadd.f32 %v8892_v42, %v3678_v51  ;;  %6858 = vmatprep.subr.bf16.mxu0 %v9815_v5 }
0x19ae   :  { %v6890_v9 = vpop.f32.mrf.mxu1 }
0x19af   :  { %v3725_v27 = vpack.c.bf16 %v3679_v49, %v3679_v49 }
0x19b0   :  { %6859 = vmatpush3.bf16.msra.mxu0 %v8679_v15  ;;  %v3681_v10 = vpop.f32.mrf.mxu1 }
0x19b1   :  { %v3730_v31 = vsel %vm471_vm1, %v3725_v27, 0  ;;  %6860 = vmatprep.subr.bf16.mxu0 %v9815_v5 }
0x19b2   :  { %v6891_v63 = vpop.f32.mrf.mxu1  ;;  %6913 = vmatpush3.bf16.xpose.msra.mxu1 %v3730_v31 }
0x19b3   :  { %6918 = vmatprep.subr.bf16.mxu1 %v9815_v5  ;;  %v9849_v63 = vld [vmem:[#allocation8_spill] sm:$0xff] }
0x19b4   :  { %6861 = vmatpush3.bf16.msra.mxu0 %v8693_v24 }
0x19b5   :  { %6862 = vmatprep.subr.bf16.mxu0 %v9815_v5 }
0x19b8   :  { %6863 = vmatpush3.bf16.msra.mxu0 %v8707_v50 }
0x19b9   :  { %6864 = vmatprep.subr.bf16.mxu0 %v9815_v5 }
0x19bc   :  { %6865 = vmatpush3.bf16.msra.mxu0 %v8721_v1 }
0x19bd   :  { %6866 = vmatprep.subr.bf16.mxu0 %v9815_v5 }
0x19c0   :  { %6867 = vmatpush3.bf16.msra.mxu0 %v8735_v52 }
0x19c1   :  { %6892 = vmatprep.subr.bf16.mxu0 %v9815_v5 }
0x19c3   :  { %6869 = vmatmul.mubr.bf16.vlgmr.msra.gmra.mxu0 %v9151_v44 }
0x19c4   :  { %6893 = vmatpush3.bf16.msra.mxu0 %v8764_v33  ;;  %6908 = vmatprep.mubr.msk.bf16.mxu0 %vm7483_vm0, %v9815_v5 }
0x19c5   :  { %6894 = vmatprep.subr.bf16.mxu0 %v9815_v5 }
0x19c8   :  { %6895 = vmatpush3.bf16.msra.mxu0 %v8776_v35 }
0x19c9   :  { %6896 = vmatprep.subr.bf16.mxu0 %v9815_v5 }
0x19cc   :  { %6897 = vmatpush3.bf16.msra.mxu0 %v8787_v36 }
0x19cd   :  { %6898 = vmatprep.subr.bf16.mxu0 %v9815_v5 }
0x19d0   :  { %6899 = vmatpush3.bf16.msra.mxu0 %v8794_v37 }
0x19d1   :  { %6900 = vmatprep.subr.bf16.mxu0 %v9815_v5 }
0x19d4   :  { %6901 = vmatpush3.bf16.msra.mxu0 %v8801_v38 }
0x19d5   :  { %6902 = vmatprep.subr.bf16.mxu0 %v9815_v5 }
0x19d8   :  { %6903 = vmatpush3.bf16.msra.mxu0 %v8808_v39 }
0x19d9   :  { %6904 = vmatprep.subr.bf16.mxu0 %v9815_v5 }
0x19dc   :  { %6905 = vmatpush3.bf16.msra.mxu0 %v8815_v62 }
0x19dd   :  { %6906 = vmatprep.subr.bf16.mxu0 %v9815_v5 }
0x19e0   :  { %6907 = vmatpush3.bf16.msra.mxu0 %v8822_v17 }
0x19e1   :  { %6944 = vmatprep.subr.bf16.mxu0 %v9815_v5 }
0x19e3   :  { %6909 = vmatmul.mubr.bf16.vlgmr.msra.gmra.mxu0 %v9151_v44 }
0x19e4   :  { %6945 = vmatpush3.bf16.msra.mxu0 %v8829_v0  ;;  %6960 = vmatprep.mubr.msk.bf16.mxu0 %vm7483_vm0, %v9815_v5 }
0x19e5   :  { %6946 = vmatprep.subr.bf16.mxu0 %v9815_v5 }
0x19e8   :  { %6947 = vmatpush3.bf16.msra.mxu0 %v8837_v21 }
0x19e9   :  { %6948 = vmatprep.subr.bf16.mxu0 %v9815_v5 }
0x19ec   :  { %6949 = vmatpush3.bf16.msra.mxu0 %v8846_v29 }
0x19ed   :  { %6950 = vmatprep.subr.bf16.mxu0 %v9815_v5 }
0x19f0   :  { %6951 = vmatpush3.bf16.msra.mxu0 %v8853_v22 }
0x19f1   :  { %6952 = vmatprep.subr.bf16.mxu0 %v9815_v5 }
0x19f4   :  { %6953 = vmatpush3.bf16.msra.mxu0 %v8860_v53 }
0x19f5   :  { %6954 = vmatprep.subr.bf16.mxu0 %v9815_v5 }
0x19f8   :  { %6955 = vmatpush3.bf16.msra.mxu0 %v8867_v11 }
0x19f9   :  { %6956 = vmatprep.subr.bf16.mxu0 %v9815_v5 }
0x19fc   :  { %6957 = vmatpush3.bf16.msra.mxu0 %v8874_v40 }
0x19fd   :  { %6958 = vmatprep.subr.bf16.mxu0 %v9815_v5 }
0x1a00   :  { %6959 = vmatpush3.bf16.msra.mxu0 %v8881_v41 }
0x1a01   :  { %6984 = vmatprep.subr.bf16.mxu0 %v9815_v5 }
0x1a03   :  { %6961 = vmatmul.mubr.bf16.vlgmr.msra.gmra.mxu0 %v9151_v44 }
0x1a04   :  { %6986 = vmatprep.mubr.msk.bf16.mxu0 %vm7483_vm0, %v9815_v5 }
0x1a63   :  { %v9222_v7 = vpop.f32.mrf.mxu0 }
0x1a65   :  { %v6838_v4 = vpop.f32.mrf.mxu0 }
0x1a67   :  { %v3533_v15 = vpop.f32.mrf.mxu0 }
0x1a69   :  { %v6839_v24 = vpop.f32.mrf.mxu0 }
0x1a83   :  { %v3638_v50 = vpop.f32.mrf.mxu0 }
0x1a84   :  { %v3639_v1 = vadd.f32 %v8898_v58, %v3638_v50 }
0x1a85   :  { %v6870_v52 = vpop.f32.mrf.mxu0 }
0x1a86   :  { %v3724_v33 = vpack.c.bf16 %v3639_v1, %v3639_v1 }
0x1a87   :  { %v3641_v35 = vpop.f32.mrf.mxu0 }
0x1a88   :  { %6915 = vmatmul.mubr.msk.bf16.vlgmr.msra.gmra.mxu1 %vm471_vm1, %v3724_v33 }
0x1a89   :  { %v6871_v36 = vpop.f32.mrf.mxu0  ;;  %6920 = vmatprep.mubr.msk.bf16.mxu1 %vm7483_vm0, %v9815_v5 }
0x1aa3   :  { %v3718_v37 = vpop.f32.mrf.mxu0 }
0x1aa4   :  { %v3719_v38 = vadd.f32 %v8909_v61, %v3718_v37 }
0x1aa5   :  { %v6910_v39 = vpop.f32.mrf.mxu0 }
0x1aa6   :  { %v3786_v62 = vpack.c.bf16 %v3719_v38, %v3719_v38 }
0x1aa7   :  { %v3721_v17 = vpop.f32.mrf.mxu0 }
0x1aa8   :  { %v3791_v0 = vsel %vm541_vm2, %v3786_v62, 0 }
0x1aa9   :  { %v6911_v21 = vpop.f32.mrf.mxu0  ;;  %6919 = vmatpush3.bf16.msra.mxu1 %v3791_v0 }
0x1aaa   :  { %6924 = vmatprep.subr.bf16.mxu1 %v9815_v5 }
0x1ac3   :  { %v3908_v29 = vpop.f32.mrf.mxu0 }
0x1ac4   :  { %v3909_v22 = vadd.f32 %v8917_v30, %v3908_v29  ;;  %v3598_v29 = vadd.f32 %v9110_v48, %v9222_v7 }
0x1ac5   :  { %v6962_v53 = vpop.f32.mrf.mxu0 }
0x1ac6   :  { %v3955_v11 = vpack.c.bf16 %v3909_v22, %v3909_v22 }
0x1ac7   :  { %v3911_v40 = vpop.f32.mrf.mxu0 }
0x1ac8   :  { %v3960_v41 = vsel %vm471_vm1, %v3955_v11, 0 }
0x1ac9   :  { %v6963_v42 = vpop.f32.mrf.mxu0  ;;  %6985 = vmatpush3.bf16.xpose.msra.mxu0 %v3960_v41 }
0x1aca   :  { %6990 = vmatprep.subr.bf16.mxu0 %v9815_v5 }
0x1b48   :  { %v3766_v58 = vpop.f32.mrf.mxu1 }
0x1b49   :  { %v3772_v61 = vmul.f32 0.125, %v3766_v58 }
0x1b4a   :  { %v6916_v45 = vpop.f32.mrf.mxu1 }
0x1b4b   :  { %v3773_v32 = vadd.f32 %v3772_v61, %v8258_v28  ;;  %v9850_v45 = vld [vmem:[#allocation10_spill] sm:$0xff] }
0x1b4c   :  { %v3769_v60 = vpop.f32.mrf.mxu1 }
0x1b4d   :  { %v3774_v18 = vsel %vm524_vm3, %v3773_v32, -inf }
0x1b4e   :  { %3775 = vmax.xlane.f32.xlu0 %v3774_v18  ;;  %v6917_v55 = vpop.f32.mrf.mxu1 }
0x1bd7   :  { %v3776_v30 = vpop.xlane.xlu0 %3775 }
0x1bd8   :  { %v3777_v34 = vsub.f32 %v3773_v32, %v3776_v30 }
0x1bda   :  { %v3778_v2 = vmul.f32 1.442695, %v3777_v34 }
0x1bdc   :  { %7424 = vpow2.f32 %v3778_v2 }
0x1be9   :  { %v7425_v51 = vpop.eup %7424 }
0x1bea   :  { %v3780_v49 = vsel %vm524_vm3, %v7425_v51, 0.0 }
0x1beb   :  { %3781 = vadd.xlane.f32.xlu1 %v3780_v49 }
0x1c74   :  { %v3782_v9 = vpop.xlane.xlu1 %3781 }
0x1c75   :  { %7426 = vrcp.f32 %v3782_v9 }
0x1c82   :  { %v7427_v27 = vpop.eup %7426 }
0x1c83   :  { %v3784_v10 = vmul.f32 %v7427_v27, %v7425_v51 }
0x1c85   :  { %v3785_v31 = vpack.c.bf16 %v3784_v10, %v3784_v10 }
0x1c87   :  { %6921 = vmatmul.mubr.msk.bf16.vlgmr.msra.gmra.mxu1 %vm524_vm3, %v3785_v31 }
0x1c88   :  { %6925 = vmatpush3.bf16.msra.mxu1 %v8928_v20  ;;  %6940 = vmatprep.mubr.msk.bf16.mxu1 %vm7483_vm0, %v9815_v5  ;;  %v9841_v20 = vld [vmem:[#allocation11_spill] sm:$0xff] }
0x1c89   :  { %6926 = vmatprep.subr.bf16.mxu1 %v9815_v5 }
0x1c8c   :  { %6927 = vmatpush3.bf16.msra.mxu1 %v8935_v47  ;;  %v9842_v47 = vld [vmem:[#allocation12_spill] sm:$0xff] }
0x1c8d   :  { %6928 = vmatprep.subr.bf16.mxu1 %v9815_v5 }
0x1c90   :  { %6929 = vmatpush3.bf16.msra.mxu1 %v8944_v13  ;;  %v9843_v13 = vld [vmem:[#allocation13_spill] sm:$0xff] }
0x1c91   :  { %6930 = vmatprep.subr.bf16.mxu1 %v9815_v5 }
0x1c94   :  { %6931 = vmatpush3.bf16.msra.mxu1 %v8951_v43  ;;  %v9844_v43 = vld [vmem:[#allocation9_spill] sm:$0xff] }
0x1c95   :  { %6932 = vmatprep.subr.bf16.mxu1 %v9815_v5 }
0x1c98   :  { %6933 = vmatpush3.bf16.msra.mxu1 %v8958_v3  ;;  %v9845_v3 = vld [vmem:[#allocation14_spill] sm:$0xff] }
0x1c99   :  { %6934 = vmatprep.subr.bf16.mxu1 %v9815_v5 }
0x1c9c   :  { %6935 = vmatpush3.bf16.msra.mxu1 %v8965_v8  ;;  %v9846_v8 = vld [vmem:[#allocation15_spill] sm:$0xff] }
0x1c9d   :  { %6936 = vmatprep.subr.bf16.mxu1 %v9815_v5 }
0x1ca0   :  { %6937 = vmatpush3.bf16.msra.mxu1 %v8972_v12  ;;  %v9847_v12 = vld [vmem:[#allocation5_spill] sm:$0xff] }
0x1ca1   :  { %6938 = vmatprep.subr.bf16.mxu1 %v9815_v5 }
0x1ca4   :  { %6939 = vmatpush3.bf16.msra.mxu1 %v8979_v26 }
0x1ca5   :  { %6964 = vmatprep.subr.bf16.mxu1 %v9815_v5 }
0x1ca7   :  { %6941 = vmatmul.mubr.bf16.vlgmr.msra.gmra.mxu1 %v9151_v44 }
0x1ca8   :  { %6965 = vmatpush3.bf16.msra.mxu1 %v8986_v56  ;;  %6980 = vmatprep.mubr.msk.bf16.mxu1 %vm7483_vm0, %v9815_v5 }
0x1ca9   :  { %6966 = vmatprep.subr.bf16.mxu1 %v9815_v5 }
0x1cac   :  { %6967 = vmatpush3.bf16.msra.mxu1 %v8994_v14 }
0x1cad   :  { %6968 = vmatprep.subr.bf16.mxu1 %v9815_v5 }
0x1cb0   :  { %6969 = vmatpush3.bf16.msra.mxu1 %v9003_v57 }
0x1cb1   :  { %6970 = vmatprep.subr.bf16.mxu1 %v9815_v5 }
0x1cb4   :  { %6971 = vmatpush3.bf16.msra.mxu1 %v9010_v59  ;;  %v9848_v59 = vmov 0  }
0x1cb5   :  { %6972 = vmatprep.subr.bf16.mxu1 %v9815_v5 }
0x1cb8   :  { %6973 = vmatpush3.bf16.msra.mxu1 %v9017_v16 }
0x1cb9   :  { %6974 = vmatprep.subr.bf16.mxu1 %v9815_v5 }
0x1cbc   :  { %6975 = vmatpush3.bf16.msra.mxu1 %v9841_v20 }
0x1cbd   :  { %6976 = vmatprep.subr.bf16.mxu1 %v9815_v5 }
0x1cc0   :  { %6977 = vmatpush3.bf16.msra.mxu1 %v9842_v47 }
0x1cc1   :  { %6978 = vmatprep.subr.bf16.mxu1 %v9815_v5 }
0x1cc4   :  { %6979 = vmatpush3.bf16.msra.mxu1 %v9843_v13 }
0x1cc5   :  { %7008 = vmatprep.subr.bf16.mxu1 %v9815_v5 }
0x1cc7   :  { %6981 = vmatmul.mubr.bf16.vlgmr.msra.gmra.mxu1 %v9151_v44 }
0x1cc8   :  { %7009 = vmatpush3.bf16.msra.mxu1 %v9844_v43  ;;  %7016 = vmatprep.mubr.msk.bf16.mxu1 %vm7483_vm0, %v9815_v5 }
0x1cc9   :  { %7010 = vmatprep.subr.bf16.mxu1 %v9815_v5 }
0x1ccc   :  { %7011 = vmatpush3.bf16.msra.mxu1 %v9845_v3 }
0x1ccd   :  { %7012 = vmatprep.subr.bf16.mxu1 %v9815_v5 }
0x1cd0   :  { %7013 = vmatpush3.bf16.msra.mxu1 %v9846_v8 }
0x1cd1   :  { %7014 = vmatprep.subr.bf16.mxu1 %v9815_v5 }
0x1cd4   :  { %7015 = vmatpush3.bf16.msra.mxu1 %v9847_v12 }
0x1d47   :  { %v3827_v26 = vpop.f32.mrf.mxu1 }
0x1d48   :  { %v3833_v56 = vpack.c.bf16 %v3827_v26, %v3827_v26  ;;  %v7274_v26 = vld [vmem:[%s9727_s15 + $0x1e4] ss:$16 sps:$4 sm:$0xff]  }
0x1d49   :  { %v6922_v14 = vpop.f32.mrf.mxu1 }
0x1d4a   :  { %7017 = vmatmul.mubr.msk.bf16.vlgmr.msra.gmra.mxu1 %vm471_vm1, %v3833_v56  ;;  %v7275_v56 = vld [vmem:[%s9727_s15 + $0x1e8] ss:$16 sps:$4 sm:$0xff]   ;;  %v7277_v14 = vld [vmem:[%s9727_s15 + $0x1ec] ss:$16 sps:$4 sm:$0xff]  }
0x1d4b   :  { %v3830_v57 = vpop.f32.mrf.mxu1  ;;  %4496 = vmatprep.mubr.bf16.mxu1 %v9848_v59  ;;  %4464 = vmatprep.subr.bf16.mxu1 %v7277_v14  ;;  %v7333_v14 = vld [vmem:[%s9729_s17 + $0x1e0] sm:$0xff]  }
0x1d4c   :  { %v7283_v57 = vld [vmem:[%s9727_s15 + $0x1cc] ss:$16 sps:$4 sm:$0xff]   ;;  %4465 = vmatpush1.bf16.msra.mxu1 %v7275_v56  ;;  %v7332_v56 = vld [vmem:[%s9729_s17 + $0x160] sm:$0xff]  }
0x1d4d   :  { %v6923_v16 = vpop.f32.mrf.mxu1  ;;  %4466 = vmatprep.subr.bf16.mxu1 %v7283_v57  ;;  %v7335_v57 = vld [vmem:[%s9729_s17 + $0x1a0] sm:$0xff]  }
0x1d4e   :  { %v7281_v16 = vld [vmem:[%s9727_s15 + $0x1c8] ss:$16 sps:$4 sm:$0xff]  }
0x1d50   :  { %4467 = vmatpush1.bf16.msra.mxu1 %v7281_v16  ;;  %v7337_v16 = vld [vmem:[%s9729_s17 + $0x1d8] sm:$0xff]  }
0x1d67   :  { %v3868_v44 = vpop.f32.mrf.mxu1 }
0x1d68   :  { %v3869_v4 = vadd.f32 %v9849_v63, %v3868_v44 }
0x1d69   :  { %v6942_v15 = vpop.f32.mrf.mxu1 }
0x1d6a   :  { %v3954_v24 = vpack.c.bf16 %v3869_v4, %v3869_v4 }
0x1d6b   :  { %v3871_v50 = vpop.f32.mrf.mxu1 }
0x1d6c   :  { %6987 = vmatmul.mubr.msk.bf16.vlgmr.msra.gmra.mxu0 %vm471_vm1, %v3954_v24  ;;  %v7286_v24 = vld [vmem:[%s9727_s15 + $0x1a4] ss:$16 sps:$4 sm:$0xff]   ;;  %v7289_v50 = vld [vmem:[%s9727_s15 + $0x1ac] ss:$16 sps:$4 sm:$0xff]  }
0x1d6d   :  { %v6943_v1 = vpop.f32.mrf.mxu1  ;;  %6992 = vmatprep.mubr.msk.bf16.mxu0 %vm7483_vm0, %v9815_v5  ;;  %4468 = vmatprep.subr.bf16.mxu1 %v7289_v50  ;;  %v7343_v50 = vld [vmem:[%s9729_s17 + $0x190] sm:$0xff]  }
0x1d6e   :  { %v7284_v1 = vld [vmem:[%s9727_s15 + $0x1a0] ss:$16 sps:$4 sm:$0xff]  }
0x1d87   :  { %v3948_v52 = vpop.f32.mrf.mxu1 }
0x1d88   :  { %v3949_v33 = vadd.f32 %v9105_v23, %v3948_v52  ;;  %v5750_v23 = vld [vmem:[%s9828_s4 + $0x1] ss:$0 sm:$0xff]  ;;  %v7287_v52 = vld [vmem:[%s9727_s15 + $0x1a8] ss:$16 sps:$4 sm:$0xff]  }
0x1d89   :  { %v6982_v35 = vpop.f32.mrf.mxu1  ;;  %v4158_v41 = vadd.f32 %v5750_v23, %v3598_v29  ;;  %4469 = vmatpush1.bf16.msra.mxu1 %v7287_v52  ;;  %v7302_v29 = vld [vmem:[%s9727_s15 + $0x140] ss:$16 sps:$4 sm:$0xff]   ;;  %v7345_v52 = vld [vmem:[%s9729_s17 + $0x1c8] sm:$0xff]  }
0x1d8a   :  { %v4016_v36 = vpack.c.bf16 %v3949_v33, %v3949_v33  ;;  %v7290_v33 = vld [vmem:[%s9727_s15 + $0x180] ss:$16 sps:$4 sm:$0xff]   ;;  %v7292_v35 = vld [vmem:[%s9727_s15 + $0x184] ss:$16 sps:$4 sm:$0xff]  }
0x1d8b   :  { %v3951_v37 = vpop.f32.mrf.mxu1  ;;  %v4160_v32 = vadd.f32 %v4158_v41, %v9850_v45  ;;  %v7316_v41 = vld [vmem:[%s9727_s15 + $0x104] ss:$16 sps:$4 sm:$0xff]  }
0x1d8c   :  { %v4021_v38 = vsel %vm541_vm2, %v4016_v36, 0  ;;  %v7293_v36 = vld [vmem:[%s9727_s15 + $0x188] ss:$16 sps:$4 sm:$0xff]   ;;  %v7295_v37 = vld [vmem:[%s9727_s15 + $0x18c] ss:$16 sps:$4 sm:$0xff]  }
0x1d8d   :  { %v6983_v39 = vpop.f32.mrf.mxu1  ;;  %6991 = vmatpush3.bf16.msra.mxu0 %v4021_v38  ;;  %v7298_v38 = vld [vmem:[%s9727_s15 + $0x164] ss:$16 sps:$4 sm:$0xff]   ;;  %4470 = vmatprep.subr.bf16.mxu1 %v7295_v37 }
0x1d8e   :  { %6996 = vmatprep.subr.bf16.mxu0 %v9815_v5  ;;  %v7301_v39 = vld [vmem:[%s9727_s15 + $0x16c] ss:$16 sps:$4 sm:$0xff]   ;;  %4471 = vmatpush1.bf16.msra.mxu1 %v7293_v36  ;;  %v7348_v36 = vld [vmem:[%s9729_s17 + $0x140] sm:$0xff]  }
0x1d8f   :  { %4472 = vmatprep.subr.bf16.mxu1 %v7301_v39  ;;  %v7349_v37 = vld [vmem:[%s9729_s17 + $0x1c0] sm:$0xff]  }
0x1d90   :  { %v7351_v39 = vld [vmem:[%s9729_s17 + $0x180] sm:$0xff]  }
0x1e0a   :  { %v4144_v62 = vpop.f32.mrf.mxu1 }
0x1e0c   :  { %v7018_v17 = vpop.f32.mrf.mxu1 }
0x1e0d   :  { %v7299_v17 = vld [vmem:[%s9727_s15 + $0x168] ss:$16 sps:$4 sm:$0xff]  }
0x1e0e   :  { %v4147_v0 = vpop.f32.mrf.mxu1  ;;  %4473 = vmatpush1.bf16.msra.mxu1 %v7299_v17  ;;  %v9851_v17 = vld [vmem:[#allocation7_spill] sm:$0xff] }
0x1e0f   :  { %v7304_v0 = vld [vmem:[%s9727_s15 + $0x144] ss:$16 sps:$4 sm:$0xff]  }
0x1e10   :  { %v7019_v21 = vpop.f32.mrf.mxu1 }
0x1e11   :  { %v7307_v21 = vld [vmem:[%s9727_s15 + $0x14c] ss:$16 sps:$4 sm:$0xff]  }
0x1e12   :  { %4474 = vmatprep.subr.bf16.mxu1 %v7307_v21  ;;  %v9852_v21 = vld [vmem:[#allocation6_spill] sm:$0xff] }
0x1e2c   :  { %v3996_v22 = vpop.f32.mrf.mxu0 }
0x1e2d   :  { %v4002_v53 = vmul.f32 0.125, %v3996_v22  ;;  %v7305_v22 = vld [vmem:[%s9727_s15 + $0x148] ss:$16 sps:$4 sm:$0xff]  }
0x1e2e   :  { %v6988_v11 = vpop.f32.mrf.mxu0  ;;  %4475 = vmatpush1.bf16.msra.mxu1 %v7305_v22 }
0x1e2f   :  { %v4003_v40 = vadd.f32 %v4002_v53, %v8258_v28  ;;  %v7313_v53 = vld [vmem:[%s9727_s15 + $0x12c] ss:$16 sps:$4 sm:$0xff]   ;;  %v7308_v11 = vld [vmem:[%s9727_s15 + $0x120] ss:$16 sps:$4 sm:$0xff]  }
0x1e30   :  { %v3999_v42 = vpop.f32.mrf.mxu0  ;;  %4476 = vmatprep.subr.bf16.mxu1 %v7313_v53 }
0x1e31   :  { %v4004_v58 = vsel %vm524_vm3, %v4003_v40, -inf  ;;  %v7319_v42 = vld [vmem:[%s9727_s15 + $0x10c] ss:$16 sps:$4 sm:$0xff]  }
0x1e32   :  { %4005 = vmax.xlane.f32.xlu0 %v4004_v58  ;;  %v6989_v61 = vpop.f32.mrf.mxu0  ;;  %v7314_v58 = vld [vmem:[%s9727_s15 + $0x100] ss:$16 sps:$4 sm:$0xff]  }
0x1e33   :  { %v7317_v61 = vld [vmem:[%s9727_s15 + $0x108] ss:$16 sps:$4 sm:$0xff]  }
0x1e36   :  { %4166 = vadd.xlane.f32.xlu0 %v4160_v32 }
0x1ebb   :  { %v4006_v60 = vpop.xlane.xlu0 %4005 }
0x1ebc   :  { %v4007_v48 = vsub.f32 %v4003_v40, %v4006_v60  ;;  %v7311_v40 = vld [vmem:[%s9727_s15 + $0x128] ss:$16 sps:$4 sm:$0xff]  }
0x1ebd   :  { %4477 = vmatpush1.bf16.msra.mxu1 %v7311_v40 }
0x1ebe   :  { %v4008_v7 = vmul.f32 1.442695, %v4007_v48  ;;  %4478 = vmatprep.subr.bf16.mxu1 %v7319_v42 }
0x1ebf   :  { %v4167_v18 = vpop.xlane.xlu0 %4166 }
0x1ec0   :  { %7428 = vpow2.f32 %v4008_v7  ;;  %v4170_v55 = vmul.f32 0.0078125, %v4167_v18 }
0x1ec1   :  { %4479 = vmatpush1.bf16.msra.mxu1 %v7317_v61 }
0x1ec2   :  { %v9302_v30 = vsub.f32 %v4160_v32, %v4170_v55 }
0x1ec4   :  { %v4174_v28 = vmul.f32 %v9302_v30, %v9302_v30 }
0x1ec6   :  { %4176 = vadd.xlane.f32.xlu0 %v4174_v28 }
0x1ecd   :  { %v7429_v34 = vpop.eup %7428 }
0x1ece   :  { %v4010_v2 = vsel %vm524_vm3, %v7429_v34, 0.0 }
0x1ecf   :  { %4011 = vadd.xlane.f32.xlu1 %v4010_v2 }
0x1f4f   :  { %v4177_v45 = vpop.xlane.xlu0 %4176 }
0x1f50   :  { %v4180_v32 = vmul.f32 0.0078125, %v4177_v45 }
0x1f52   :  { %v4182_v60 = vadd.f32 1e-12, %v4180_v32 }
0x1f58   :  { %v4012_v51 = vpop.xlane.xlu1 %4011 }
0x1f59   :  { %7430 = vrcp.f32 %v4012_v51 }
0x1f5a   :  { %7432 = vrsqrt.f32 %v4182_v60 }
0x1f66   :  { %v7431_v49 = vpop.eup %7430 }
0x1f67   :  { %v4014_v9 = vmul.f32 %v7431_v49, %v7429_v34  ;;  %v7433_v55 = vpop.eup %7432  ;;  %v5753_v34 = vld [vmem:[%s9725_s13 + $0x1] ss:$0 sm:$0xff] }
0x1f68   :  { %v4186_v28 = vmul.f32 %v7433_v55, %v9302_v30 }
0x1f69   :  { %v4015_v27 = vpack.c.bf16 %v4014_v9, %v4014_v9  ;;  %v5754_v9 = vld [vmem:[%s9726_s14 + $0x1] ss:$0 sm:$0xff] }
0x1f6a   :  { %v4194_v49 = vmul.f32 %v5753_v34, %v4186_v28 }
0x1f6b   :  { %6993 = vmatmul.mubr.msk.bf16.vlgmr.msra.gmra.mxu0 %vm524_vm3, %v4015_v27 }
0x1f6c   :  { %6997 = vmatpush3.bf16.msra.mxu0 %v9120_v46  ;;  %7004 = vmatprep.mubr.msk.bf16.mxu0 %vm7483_vm0, %v9815_v5 }
0x1f6d   :  { %6998 = vmatprep.subr.bf16.mxu0 %v9815_v5 }
0x1f70   :  { %6999 = vmatpush3.bf16.msra.mxu0 %v9127_v54 }
0x1f71   :  { %7000 = vmatprep.subr.bf16.mxu0 %v9815_v5 }
0x1f74   :  { %7001 = vmatpush3.bf16.msra.mxu0 %v9136_v19 }
0x1f75   :  { %7002 = vmatprep.subr.bf16.mxu0 %v9815_v5 }
0x1f78   :  { %7003 = vmatpush3.bf16.msra.mxu0 %v9147_v25  ;;  %v7272_v25 = vld [vmem:[%s9727_s15 + $0x1e0] ss:$16 sps:$4 sm:$0xff]  }
0x1f79   :  { %4421 = vmatprep.subr.bf16.mxu0 %v7274_v26  ;;  %v7331_v26 = vld [vmem:[%s9729_s17 + $0x1a8] sm:$0xff]  }
0x202b   :  { %v4057_v10 = vpop.f32.mrf.mxu0 }
0x202c   :  { %v4063_v31 = vpack.c.bf16 %v4057_v10, %v4057_v10  ;;  %v9428_v10 = vadd.f32 %v5754_v9, %v4194_v49 }
0x202d   :  { %v6994_v20 = vpop.f32.mrf.mxu0 }
0x202e   :  { %7005 = vmatmul.mubr.msk.bf16.vlgmr.msra.gmra.mxu0 %vm471_vm1, %v4063_v31  ;;  %v7320_v20 = vld [vmem:[%s9729_s17 + $0x178] sm:$0xff]  }
0x202f   :  { %v4060_v46 = vpop.f32.mrf.mxu0  ;;  %4453 = vmatprep.mubr.bf16.mxu0 %v9848_v59  ;;  %4422 = vmatpush1.bf16.msra.mxu0 %v7272_v25  ;;  %v7278_v59 = vld [vmem:[%s9727_s15 + $0x1c0] ss:$16 sps:$4 sm:$0xff]   ;;  %v7330_v25 = vld [vmem:[%s9729_s17 + $0x128] sm:$0xff]  }
0x2030   :  { %v7321_v46 = vld [vmem:[%s9729_s17 + $0x1f8] sm:$0xff]  }
0x2031   :  { %v6995_v47 = vpop.f32.mrf.mxu0  ;;  %6302 = vmatprep.subr.bf16.mxu1 %v7321_v46 }
0x2032   :  { %v7322_v47 = vld [vmem:[%s9729_s17 + $0x138] sm:$0xff]  }
0x20ee   :  { %v4101_v13 = vpop.f32.mrf.mxu0 }
0x20ef   :  { %v4145_v43 = vadd.f32 %v4144_v62, %v4101_v13  ;;  %v7296_v62 = vld [vmem:[%s9727_s15 + $0x160] ss:$16 sps:$4 sm:$0xff]   ;;  %v7323_v13 = vld [vmem:[%s9729_s17 + $0x1b8] sm:$0xff]  }
0x20f0   :  { %v7006_v54 = vpop.f32.mrf.mxu0 }
0x20f1   :  { %v4159_v3 = vadd.f32 %v5750_v23, %v4145_v43  ;;  %v7310_v23 = vld [vmem:[%s9727_s15 + $0x124] ss:$16 sps:$4 sm:$0xff]  }
0x20f2   :  { %v4104_v8 = vpop.f32.mrf.mxu0  ;;  %v7324_v43 = vld [vmem:[%s9729_s17 + $0x170] sm:$0xff]  }
0x20f3   :  { %v4161_v19 = vadd.f32 %v4159_v3, %v9141_v6  ;;  %v7280_v6 = vld [vmem:[%s9727_s15 + $0x1c4] ss:$16 sps:$4 sm:$0xff]   ;;  %s9858_s15 = sld [smem:[#allocation30_spill]] }
0x20f4   :  { %v7007_v12 = vpop.f32.mrf.mxu0  ;;  %4423 = vmatprep.subr.bf16.mxu0 %v7280_v6  ;;  %v7325_v54 = vld [vmem:[%s9729_s17 + $0x1f0] sm:$0xff]   ;;  %v7334_v6 = vld [vmem:[%s9729_s17 + $0x120] sm:$0xff]  }
0x20f5   :  { %4168 = vadd.xlane.f32.xlu1 %v4161_v19  ;;  %4424 = vmatpush1.bf16.msra.mxu0 %v7278_v59  ;;  %v7326_v3 = vld [vmem:[%s9729_s17 + $0x130] sm:$0xff]   ;;  %v7329_v12 = vld [vmem:[%s9729_s17 + $0x1e8] sm:$0xff]   ;;  %v7336_v59 = vld [vmem:[%s9729_s17 + $0x158] sm:$0xff]  }
0x20f6   :  { %4425 = vmatprep.subr.bf16.mxu0 %v7286_v24  ;;  %v7327_v8 = vld [vmem:[%s9729_s17 + $0x1b0] sm:$0xff]  }
0x20f7   :  { %v7342_v24 = vld [vmem:[%s9729_s17 + $0x110] sm:$0xff]  }
0x20f9   :  { %4426 = vmatpush1.bf16.msra.mxu0 %v7284_v1  ;;  %v7344_v1 = vld [vmem:[%s9729_s17 + $0x148] sm:$0xff]  }
0x20fa   :  { %4427 = vmatprep.subr.bf16.mxu0 %v7292_v35  ;;  %v7347_v35 = vld [vmem:[%s9729_s17 + $0x188] sm:$0xff]  }
0x20fd   :  { %4428 = vmatpush1.bf16.msra.mxu0 %v7290_v33  ;;  %v7346_v33 = vld [vmem:[%s9729_s17 + $0x108] sm:$0xff]  }
0x20fe   :  { %4429 = vmatprep.subr.bf16.mxu0 %v7298_v38  ;;  %v7350_v38 = vld [vmem:[%s9729_s17 + $0x100] sm:$0xff]  }
0x2101   :  { %4430 = vmatpush1.bf16.msra.mxu0 %v7296_v62  ;;  %v5787_v62 = vld [vmem:[%s9728_s16 + $0x4] sm:$0xf]  ;;  %s9859_s16 = sld [smem:[#allocation32_spill]] }
0x2102   :  { %4431 = vmatprep.subr.bf16.mxu0 %v7304_v0  ;;  %v4244_v0 = vrot.slane %v5787_v62, %v9851_v17 }
0x2105   :  { %4432 = vmatpush1.bf16.msra.mxu0 %v7302_v29  ;;  %v9853_v29 = vsub.s32 2, %v9852_v21 }
0x2106   :  { %4433 = vmatprep.subr.bf16.mxu0 %v7310_v23  ;;  %v9854_v23 = vld [vmem:[#allocation16_spill] sm:$0xff] }
0x2107   :  { %v4252_v22 = vrot.slane %v5787_v62, %v9853_v29  ;;  %v4248_v53 = vrot.slane %v5787_v62, %v9854_v23 }
0x2109   :  { %4434 = vmatpush1.bf16.msra.mxu0 %v7308_v11  ;;  %v9855_v11 = vsub.s32 3, %v9852_v21 }
0x210a   :  { %4435 = vmatprep.subr.bf16.mxu0 %v7316_v41 }
0x210b   :  { %v4256_v40 = vrot.slane %v5787_v62, %v9855_v11 }
0x210d   :  { %4436 = vmatpush1.bf16.msra.mxu0 %v7314_v58 }
0x210e   :  { %6280 = vmatprep.subr.bf16.mxu0 %v7320_v20 }
0x217e   :  { %v4169_v44 = vpop.xlane.xlu1 %4168 }
0x217f   :  { %v4171_v63 = vmul.f32 0.0078125, %v4169_v44  ;;  %v7338_v44 = vld [vmem:[%s9729_s17 + $0x118] sm:$0xff]  }
0x2181   :  { %v9344_v4 = vsub.f32 %v4161_v19, %v4171_v63  ;;  %v7328_v19 = vld [vmem:[%s9729_s17 + $0x168] sm:$0xff]   ;;  %v7339_v63 = vld [vmem:[%s9729_s17 + $0x198] sm:$0xff]  }
0x2183   :  { %v4175_v15 = vmul.f32 %v9344_v4, %v9344_v4 }
0x2185   :  { %4178 = vadd.xlane.f32.xlu1 %v4175_v15  ;;  %v7341_v15 = vld [vmem:[%s9729_s17 + $0x1d0] sm:$0xff]  }
0x220e   :  { %v4179_v48 = vpop.xlane.xlu1 %4178 }
0x220f   :  { %v4181_v7 = vmul.f32 0.0078125, %v4179_v48 }
0x2211   :  { %v4183_v18 = vadd.f32 1e-12, %v4181_v7 }
0x2213   :  { %7434 = vrsqrt.f32 %v4183_v18 }
0x2220   :  { %v7435_v2 = vpop.eup %7434 }
0x2221   :  { %v4187_v51 = vmul.f32 %v7435_v2, %v9344_v4  ;;  %v7340_v4 = vld [vmem:[%s9729_s17 + $0x150] sm:$0xff]   ;;  %s7485_s17 = smov [#allocation2]  }
0x2223   :  { %v4195_v27 = vmul.f32 %v5753_v34, %v4187_v51 }
0x2225   :  { %v9430_v31 = vadd.f32 %v5754_v9, %v4195_v27 }
0x2227   :  { %v4237_v30 = vpack.c.bf16 %v9430_v31, %v9428_v10 }
0x2229   :  { %4454 = vmatmul.mubr.bf16.vlgmr.msra.gmra.mxu0 %v4237_v30  ;;  %4497 = vmatmul.mubr.bf16.vlgmr.msra.gmra.mxu1 %v4237_v30 }
0x222a   :  { %6281 = vmatpush3.bf16.msra.mxu0 %v7322_v47  ;;  %6303 = vmatpush3.bf16.msra.mxu1 %v7323_v13 }
0x222b   :  { %6282 = vmatprep.subr.bf16.mxu0 %v7324_v43  ;;  %6304 = vmatprep.subr.bf16.mxu1 %v7325_v54 }
0x222e   :  { %6283 = vmatpush3.bf16.msra.mxu0 %v7326_v3  ;;  %6305 = vmatpush3.bf16.msra.mxu1 %v7327_v8 }
0x222f   :  { %6284 = vmatprep.subr.bf16.mxu0 %v7328_v19  ;;  %6306 = vmatprep.subr.bf16.mxu1 %v7329_v12 }
0x2232   :  { %6285 = vmatpush3.bf16.msra.mxu0 %v7330_v25  ;;  %6307 = vmatpush3.bf16.msra.mxu1 %v7331_v26 }
0x2233   :  { %6286 = vmatprep.subr.bf16.mxu0 %v7332_v56  ;;  %6308 = vmatprep.subr.bf16.mxu1 %v7333_v14 }
0x2236   :  { %6287 = vmatpush3.bf16.msra.mxu0 %v7334_v6  ;;  %6309 = vmatpush3.bf16.msra.mxu1 %v7335_v57 }
0x2237   :  { %6288 = vmatprep.subr.bf16.mxu0 %v7336_v59  ;;  %6310 = vmatprep.subr.bf16.mxu1 %v7337_v16 }
0x223a   :  { %6289 = vmatpush3.bf16.msra.mxu0 %v7338_v44  ;;  %6311 = vmatpush3.bf16.msra.mxu1 %v7339_v63 }
0x223b   :  { %6290 = vmatprep.subr.bf16.mxu0 %v7340_v4  ;;  %6312 = vmatprep.subr.bf16.mxu1 %v7341_v15 }
0x223e   :  { %6291 = vmatpush3.bf16.msra.mxu0 %v7342_v24  ;;  %6313 = vmatpush3.bf16.msra.mxu1 %v7343_v50 }
0x223f   :  { %6292 = vmatprep.subr.bf16.mxu0 %v7344_v1  ;;  %6314 = vmatprep.subr.bf16.mxu1 %v7345_v52 }
0x2242   :  { %6293 = vmatpush3.bf16.msra.mxu0 %v7346_v33  ;;  %6315 = vmatpush3.bf16.msra.mxu1 %v7347_v35 }
0x2243   :  { %6294 = vmatprep.subr.bf16.mxu0 %v7348_v36  ;;  %6316 = vmatprep.subr.bf16.mxu1 %v7349_v37 }
0x2246   :  { %6295 = vmatpush3.bf16.msra.mxu0 %v7350_v38  ;;  %6317 = vmatpush3.bf16.msra.mxu1 %v7351_v39 }
0x2247   :  { %7020 = vmatprep.subr.bf16.mxu0 %v9815_v5  ;;  %7040 = vmatprep.subr.bf16.mxu1 %v9815_v5 }
0x22e9   :  { %v4455_v41 = vpop.f32.mrf.mxu0  ;;  %v4498_v42 = vpop.f32.mrf.mxu1 }
0x22ea   :  { %v9541_v58 = vadd.f32 %v4455_v41, %v4244_v0  ;;  %v9543_v61 = vadd.f32 %v4498_v42, %v4252_v22 }
0x22eb   :  { %v4457_v45 = vpop.f32.mrf.mxu0  ;;  %v4500_v32 = vpop.f32.mrf.mxu1 }
0x22ec   :  { %v4507_v60 = vmul.f32 %v9541_v58, %v9541_v58  ;;  %v4509_v48 = vmul.f32 %v9543_v61, %v9543_v61  ;;  %v9549_v7 = vadd.f32 %v4457_v45, %v4248_v53  ;;  %v9551_v18 = vadd.f32 %v4500_v32, %v4256_v40 }
0x22ed   :  { %v4459_v55 = vpop.f32.mrf.mxu0  ;;  %v4502_v28 = vpop.f32.mrf.mxu1 }
0x22ee   :  { %v4515_v34 = vmul.f32 %v4507_v60, %v9541_v58  ;;  %v4517_v2 = vmul.f32 %v4509_v48, %v9543_v61  ;;  %v4508_v51 = vmul.f32 %v9549_v7, %v9549_v7  ;;  %v4510_v49 = vmul.f32 %v9551_v18, %v9551_v18 }
0x22ef   :  { %v9559_v9 = vadd.f32 %v4459_v55, %v4244_v0  ;;  %v9561_v27 = vadd.f32 %v4502_v28, %v4252_v22  ;;  %v4461_v30 = vpop.f32.mrf.mxu0  ;;  %v4504_v20 = vpop.f32.mrf.mxu1 }
0x22f0   :  { %v4523_v46 = vmul.f32 0.044715, %v4515_v34  ;;  %v4525_v47 = vmul.f32 0.044715, %v4517_v2  ;;  %v4516_v13 = vmul.f32 %v4508_v51, %v9549_v7  ;;  %v4518_v43 = vmul.f32 %v4510_v49, %v9551_v18 }
0x22f1   :  { %v4511_v54 = vmul.f32 %v9559_v9, %v9559_v9  ;;  %v4513_v3 = vmul.f32 %v9561_v27, %v9561_v27  ;;  %v9569_v8 = vadd.f32 %v4461_v30, %v4248_v53  ;;  %v9571_v19 = vadd.f32 %v4504_v20, %v4256_v40 }
0x22f2   :  { %v4531_v12 = vadd.f32 %v4523_v46, %v9541_v58  ;;  %v4533_v25 = vadd.f32 %v4525_v47, %v9543_v61  ;;  %v4524_v26 = vmul.f32 0.044715, %v4516_v13  ;;  %v4526_v56 = vmul.f32 0.044715, %v4518_v43 }
0x22f3   :  { %v4519_v14 = vmul.f32 %v4511_v54, %v9559_v9  ;;  %v4521_v6 = vmul.f32 %v4513_v3, %v9561_v27  ;;  %v4512_v57 = vmul.f32 %v9569_v8, %v9569_v8  ;;  %v4514_v59 = vmul.f32 %v9571_v19, %v9571_v19 }
0x22f4   :  { %v4539_v16 = vmul.f32 0.7978846, %v4531_v12  ;;  %v4541_v44 = vmul.f32 0.7978846, %v4533_v25  ;;  %v4532_v63 = vadd.f32 %v4524_v26, %v9549_v7  ;;  %v4534_v4 = vadd.f32 %v4526_v56, %v9551_v18 }
0x22f5   :  { %v4527_v15 = vmul.f32 0.044715, %v4519_v14  ;;  %v4529_v24 = vmul.f32 0.044715, %v4521_v6  ;;  %v4520_v50 = vmul.f32 %v4512_v57, %v9569_v8  ;;  %v4522_v1 = vmul.f32 %v4514_v59, %v9571_v19 }
0x22f6   :  { %7436 = vtanh.f32 %v4539_v16  ;;  %v4540_v52 = vmul.f32 0.7978846, %v4532_v63  ;;  %v4542_v33 = vmul.f32 0.7978846, %v4534_v4 }
0x22f7   :  { %7438 = vtanh.f32 %v4541_v44  ;;  %v4535_v35 = vadd.f32 %v4527_v15, %v9559_v9  ;;  %v4537_v36 = vadd.f32 %v4529_v24, %v9561_v27  ;;  %v4528_v37 = vmul.f32 0.044715, %v4520_v50 }
0x22f8   :  { %7440 = vtanh.f32 %v4540_v52  ;;  %v4530_v38 = vmul.f32 0.044715, %v4522_v1 }
0x22f9   :  { %7442 = vtanh.f32 %v4542_v33  ;;  %v4543_v39 = vmul.f32 0.7978846, %v4535_v35  ;;  %v4545_v62 = vmul.f32 0.7978846, %v4537_v36  ;;  %v4536_v17 = vadd.f32 %v4528_v37, %v9569_v8 }
0x22fa   :  { %v4538_v0 = vadd.f32 %v4530_v38, %v9571_v19 }
0x22fb   :  { %7444 = vtanh.f32 %v4543_v39  ;;  %v4544_v21 = vmul.f32 0.7978846, %v4536_v17 }
0x22fc   :  { %7446 = vtanh.f32 %v4545_v62  ;;  %v4546_v29 = vmul.f32 0.7978846, %v4538_v0 }
0x22fd   :  { %7448 = vtanh.f32 %v4544_v21 }
0x22fe   :  { %7450 = vtanh.f32 %v4546_v29 }
0x2303   :  { %v7437_v22 = vpop.eup %7436 }
0x2304   :  { %v7439_v23 = vpop.eup %7438  ;;  %v4555_v42 = vadd.f32 1.0, %v7437_v22 }
0x2305   :  { %v7441_v53 = vpop.eup %7440  ;;  %v4557_v60 = vadd.f32 1.0, %v7439_v23 }
0x2306   :  { %v7443_v11 = vpop.eup %7442  ;;  %v4556_v40 = vadd.f32 1.0, %v7441_v53  ;;  %v4563_v30 = vmul.f32 0.5, %v4555_v42  ;;  %v7352_v53 = vld [vmem:[%s9733_s21 + $0x38] sm:$0xff]   ;;  %v7358_v42 = vld [vmem:[%s9733_s21 + $0x8] sm:$0xff]  }
0x2307   :  { %v4558_v45 = vadd.f32 1.0, %v7443_v11  ;;  %v4565_v13 = vmul.f32 0.5, %v4557_v60  ;;  %v7355_v11 = vld [vmem:[%s9733_s21 + $0x20] sm:$0xff]   ;;  %v7361_v60 = vld [vmem:[%s9736_s24 + $0x10] sm:$0xff]  }
0x2308   :  { %v7445_v41 = vpop.eup %7444  ;;  %v4564_v49 = vmul.f32 0.5, %v4556_v40  ;;  %v4571_v56 = vmul.f32 %v4563_v30, %v9541_v58  ;;  %v7356_v40 = vld [vmem:[%s9733_s21 + $0x18] sm:$0xff]  }
0x2309   :  { %v7447_v32 = vpop.eup %7446  ;;  %v4559_v48 = vadd.f32 1.0, %v7445_v41  ;;  %v4566_v47 = vmul.f32 0.5, %v4558_v45  ;;  %v4573_v57 = vmul.f32 %v4565_v13, %v9543_v61  ;;  %v5885_v61 = vld [vmem:[%s9730_s18 + $0x1] ss:$0 sm:$0xff]  ;;  %v7357_v41 = vld [vmem:[%s9733_s21 + $0x10] sm:$0xff]   ;;  %s5344_s18 = sshll.u32 %s7485_s17, 4  ;;  %s5345_s18 = int_to_ptr.vmem [resolvable:$true] %s5344_s18 }
0x230a   :  { %v7449_v55 = vpop.eup %7448  ;;  %v4561_v28 = vadd.f32 1.0, %v7447_v32  ;;  %v4572_v25 = vmul.f32 %v4564_v49, %v9549_v7  ;;  %v7359_v45 = vld [vmem:[%s9733_s21] sm:$0xff]   ;;  %v7360_v32 = vld [vmem:[%s9736_s24 + $0x18] sm:$0xff]   ;;  %s7460_s8 = scalar_lea.vmem %s5345_s18, 32  ;;  %p7465_p1 = scmp.lt.s32.totalorder %s5345_s18, %s5345_s18 }
0x230b   :  { %v7451_v34 = vpop.eup %7450  ;;  %v4567_v2 = vmul.f32 0.5, %v4559_v48  ;;  %v4560_v51 = vadd.f32 1.0, %v7449_v55  ;;  %v4574_v14 = vmul.f32 %v4566_v47, %v9551_v18  ;;  %v7362_v48 = vld [vmem:[%s9736_s24 + $0x8] sm:$0xff]   ;;  %v5920_v47 = vld [vmem:[%s9731_s19 + $0x1] ss:$0 sm:$0xff]  ;;  %p7461_p0 = scmp.ne.s32.totalorder %s5345_s18, %s7460_s8  ;;  %p7466_p2 = scmp.lt.s32.totalorder %s7460_s8, %s7460_s8 }
0x230c   :  { %v4569_v20 = vmul.f32 0.5, %v4561_v28  ;;  %v4562_v46 = vadd.f32 1.0, %v7451_v34 }
0x230d   :  { %v4568_v43 = vmul.f32 0.5, %v4560_v51  ;;  %v4575_v54 = vmul.f32 %v4567_v2, %v9559_v9  ;;  %p7467_p3 = por %p7466_p2, %p7465_p1 }
0x230e   :  { %v4570_v3 = vmul.f32 0.5, %v4562_v46  ;;  %v4577_v12 = vmul.f32 %v4569_v20, %v9561_v27 }
0x230f   :  { %v4576_v26 = vmul.f32 %v4568_v43, %v9569_v8  ;;  %v4644_v44 = vpack.c.bf16 %v4575_v54, %v4571_v56  ;;  %p7468_p4 = pnand %p7467_p3, %p7461_p0 }
0x2310   :  { %v4578_v6 = vmul.f32 %v4570_v3, %v9571_v19  ;;  %v4646_v63 = vpack.c.bf16 %v4577_v12, %v4573_v57  ;;  %v5921_v3 = vld [vmem:[%s9732_s20 + $0x1] ss:$0 sm:$0xff]  ;;  %v5922_v57 = vld [vmem:[%s9734_s22] ss:$0 sm:$0xff] }
0x2311   :  { %v4645_v59 = vpack.c.bf16 %v4576_v26, %v4572_v25 }
0x2312   :  { %v4647_v16 = vpack.c.bf16 %v4578_v6, %v4574_v14  ;;  %v7363_v6 = vld [vmem:[%s9736_s24] sm:$0xff]  }
0x2313   :  { %4880 = vmatprep.mubr.bf16.mxu0 %v4645_v59 }
0x2314   :  { %4921 = vmatprep.mubr.bf16.mxu1 %v4647_v16  ;;  %4881 = vmatmul.mubr.bf16.vlgmr.msra.gmra.mxu0 %v4644_v44 }
0x2315   :  { %4922 = vmatmul.mubr.bf16.vlgmr.msra.gmra.mxu1 %v4646_v63  ;;  %7036 = vmatprep.mubr.msk.bf16.mxu0 %vm7483_vm0, %v9815_v5  ;;  %v7364_v63 = vld [vmem:[%s9735_s23 + $0x18] sm:$0xff]  }
0x2316   :  { %7048 = vmatprep.mubr.msk.bf16.mxu1 %vm7483_vm0, %v9815_v5  ;;  %7021 = vmatpush3.bf16.msra.mxu0 %v7352_v53 }
0x2317   :  { %7022 = vmatprep.subr.bf16.mxu0 %v9815_v5  ;;  %7041 = vmatpush3.bf16.msra.mxu1 %v7360_v32 }
0x2318   :  { %7042 = vmatprep.subr.bf16.mxu1 %v9815_v5 }
0x231b   :  { %7043 = vmatpush3.bf16.msra.mxu1 %v7361_v60 }
0x231c   :  { %7044 = vmatprep.subr.bf16.mxu1 %v9815_v5 }
0x231f   :  { %7045 = vmatpush3.bf16.msra.mxu1 %v7362_v48 }
0x2320   :  { %7046 = vmatprep.subr.bf16.mxu1 %v9815_v5 }
0x2323   :  { %7047 = vmatpush3.bf16.msra.mxu1 %v7363_v6 }
0x2324   :  { %7052 = vmatprep.subr.bf16.mxu1 %v9815_v5 }
0x23d4   :  { %v6296_v58 = vpop.f32.mrf.mxu0 }
0x23d5   :  { %v6318_v7 = vpop.f32.mrf.mxu1 }
0x23d6   :  { %v6297_v18 = vpop.f32.mrf.mxu0 }
0x23d7   :  { %v6298_v9 = vadd.f32 %v6297_v18, %v6296_v58  ;;  %v6319_v27 = vpop.f32.mrf.mxu1  ;;  %v7365_v18 = vld [vmem:[%s9735_s23 + $0x10] sm:$0xff]  }
0x23d8   :  { %v6299_v8 = vpop.f32.mrf.mxu0  ;;  %v6320_v4 = vadd.f32 %v6319_v27, %v6318_v7  ;;  %v7367_v27 = vld [vmem:[%s9735_s23] sm:$0xff]  }
0x23d9   :  { %v4883_v19 = vadd.f32 %v6298_v9, %v5885_v61  ;;  %v6321_v15 = vpop.f32.mrf.mxu1  ;;  %v7366_v9 = vld [vmem:[%s9735_s23 + $0x8] sm:$0xff]  }
0x23da   :  { %v6300_v24 = vpop.f32.mrf.mxu0 }
0x23db   :  { %v4924_v50 = vadd.f32 %v6320_v4, %v4883_v19  ;;  %v6301_v1 = vadd.f32 %v6300_v24, %v6299_v8  ;;  %v6322_v52 = vpop.f32.mrf.mxu1  ;;  %v5091_v8 = vld [vmem:[%s9856_s30] sm:$0x3]  ;;  %v7368_v4 = vld [vmem:[%s9857_s29 + $0x18] sm:$0xff]   ;;  %v7370_v24 = vld [vmem:[%s9857_s29 + $0x8] sm:$0xff]  }
0x23dc   :  { %v6323_v35 = vadd.f32 %v6322_v52, %v6321_v15  ;;  %v5100_v19 = vpack.c.bf16 %v5091_v8, %v5091_v8  ;;  %v7369_v15 = vld [vmem:[%s9857_s29 + $0x10] sm:$0xff]  }
0x23dd   :  { %v4886_v33 = vadd.f32 %v6301_v1, %v5885_v61  ;;  %v4930_v36 = vadd.f32 %v4924_v50, %v9428_v10  ;;  %v7353_v10 = vld [vmem:[%s9733_s21 + $0x30] sm:$0xff]   ;;  %v7371_v50 = vld [vmem:[%s9857_s29] sm:$0xff]  }
0x23de   :  { %7023 = vmatpush3.bf16.msra.mxu0 %v7353_v10 }
0x23df   :  { %v4927_v37 = vadd.f32 %v6323_v35, %v4886_v33  ;;  %4936 = vadd.xlane.f32.xlu1 %v4930_v36  ;;  %7024 = vmatprep.subr.bf16.mxu0 %v9815_v5 }
0x23e1   :  { %v4931_v38 = vadd.f32 %v4927_v37, %v9430_v31  ;;  %v7354_v31 = vld [vmem:[%s9733_s21 + $0x28] sm:$0xff]   ;;  %v5941_v37 = vld [vmem:[%s9858_s15] ss:$0 sm:$0xff] }
0x23e2   :  { %7025 = vmatpush3.bf16.msra.mxu0 %v7354_v31 }
0x23e3   :  { %4938 = vadd.xlane.f32.xlu0 %v4931_v38  ;;  %7026 = vmatprep.subr.bf16.mxu0 %v9815_v5 }
0x23e6   :  { %7027 = vmatpush3.bf16.msra.mxu0 %v7355_v11 }
0x23e7   :  { %7028 = vmatprep.subr.bf16.mxu0 %v9815_v5 }
0x23ea   :  { %7029 = vmatpush3.bf16.msra.mxu0 %v7356_v40 }
0x23eb   :  { %7030 = vmatprep.subr.bf16.mxu0 %v9815_v5 }
0x23ee   :  { %7031 = vmatpush3.bf16.msra.mxu0 %v7357_v41 }
0x23ef   :  { %7032 = vmatprep.subr.bf16.mxu0 %v9815_v5 }
0x23f2   :  { %7033 = vmatpush3.bf16.msra.mxu0 %v7358_v42 }
0x23f3   :  { %7034 = vmatprep.subr.bf16.mxu0 %v9815_v5 }
0x23f6   :  { %7035 = vmatpush3.bf16.msra.mxu0 %v7359_v45 }
0x23f7   :  { %7064 = vmatprep.subr.bf16.mxu0 %v9815_v5 }
0x2468   :  { %v4937_v39 = vpop.xlane.xlu1 %4936 }
0x2469   :  { %v4940_v62 = vmul.f32 0.0078125, %v4937_v39 }
0x246b   :  { %v4942_v17 = vsub.f32 %v4930_v36, %v4940_v62 }
0x246c   :  { %v4939_v0 = vpop.xlane.xlu0 %4938 }
0x246d   :  { %v4941_v21 = vmul.f32 0.0078125, %v4939_v0  ;;  %v4944_v29 = vmul.f32 %v4942_v17, %v4942_v17 }
0x246f   :  { %v4943_v22 = vsub.f32 %v4931_v38, %v4941_v21  ;;  %4946 = vadd.xlane.f32.xlu1 %v4944_v29  ;;  %v5942_v29 = vld [vmem:[%s9859_s16] ss:$0 sm:$0xff] }
0x2471   :  { %v4945_v23 = vmul.f32 %v4943_v22, %v4943_v22 }
0x2473   :  { %4948 = vadd.xlane.f32.xlu0 %v4945_v23 }
0x24f8   :  { %v4947_v55 = vpop.xlane.xlu1 %4946 }
0x24f9   :  { %v4950_v28 = vmul.f32 0.0078125, %v4947_v55 }
0x24fb   :  { %v4952_v34 = vadd.f32 1e-12, %v4950_v28 }
0x24fc   :  { %v4949_v2 = vpop.xlane.xlu0 %4948 }
0x24fd   :  { %7452 = vrsqrt.f32 %v4952_v34  ;;  %v4951_v51 = vmul.f32 0.0078125, %v4949_v2 }
0x24ff   :  { %v4953_v49 = vadd.f32 1e-12, %v4951_v51 }
0x2501   :  { %7454 = vrsqrt.f32 %v4953_v49 }
0x250a   :  { %v7453_v30 = vpop.eup %7452 }
0x250b   :  { %v4956_v20 = vmul.f32 %v7453_v30, %v4942_v17 }
0x250d   :  { %v4964_v43 = vmul.f32 %v5920_v47, %v4956_v20 }
0x250e   :  { %v7455_v46 = vpop.eup %7454 }
0x250f   :  { %v4957_v13 = vmul.f32 %v7455_v46, %v4943_v22  ;;  %v4972_v25 = vadd.f32 %v5921_v3, %v4964_v43 }
0x2511   :  { %v4965_v54 = vmul.f32 %v5920_v47, %v4957_v13 }
0x2513   :  { %v4973_v12 = vadd.f32 %v5921_v3, %v4965_v54 }
0x2515   :  { %v4975_v26 = vrot.slane %v4973_v12, 7 }
0x2517   :  { %v4978_v56 = vsel %vm4977_vm4, %v4972_v25, %v4975_v26 }
0x2518   :  { %v4995_v14 = vpack.c.bf16 %v4978_v56, %v4978_v56 }
0x251a   :  { %7037 = vmatmul.mubr.bf16.vlgmr.msra.gmra.mxu0 %v4995_v14 }
0x251b   :  { %7072 = vmatprep.mubr.msk.bf16.mxu0 %vm7483_vm0, %v9815_v5  ;;  %7065 = vmatpush3.bf16.msra.mxu0 %v7368_v4 }
0x251c   :  { %7066 = vmatprep.subr.bf16.mxu0 %v9815_v5 }
0x251f   :  { %7067 = vmatpush3.bf16.msra.mxu0 %v7369_v15 }
0x2520   :  { %7068 = vmatprep.subr.bf16.mxu0 %v9815_v5 }
0x2523   :  { %7069 = vmatpush3.bf16.msra.mxu0 %v7370_v24 }
0x2524   :  { %7070 = vmatprep.subr.bf16.mxu0 %v9815_v5 }
0x2527   :  { %7071 = vmatpush3.bf16.msra.mxu0 %v7371_v50 }
0x25da   :  { %v5085_v59 = vpop.f32.mrf.mxu0 }
0x25db   :  { %v5086_v16 = vadd.f32 %v5922_v57, %v5085_v59 }
0x25dc   :  { %v7038_v44 = vpop.f32.mrf.mxu0 }
0x25dd   :  { %v5109_v58 = vpack.c.bf16 %v5086_v16, %v5086_v16 }
0x25de   :  { %v5088_v7 = vpop.f32.mrf.mxu0 }
0x25df   :  { %7049 = vmatmul.mubr.msk.bf16.vlgmr.msra.gmra.mxu1 %vm471_vm1, %v5109_v58 }
0x25e0   :  { %7053 = vmatpush3.bf16.msra.mxu1 %v7364_v63  ;;  %v7039_v61 = vpop.f32.mrf.mxu0  ;;  %7060 = vmatprep.mubr.msk.bf16.mxu1 %vm7483_vm0, %v9815_v5 }
0x25e1   :  { %7054 = vmatprep.subr.bf16.mxu1 %v9815_v5 }
0x25e4   :  { %7055 = vmatpush3.bf16.msra.mxu1 %v7365_v18 }
0x25e5   :  { %7056 = vmatprep.subr.bf16.mxu1 %v9815_v5 }
0x25e8   :  { %7057 = vmatpush3.bf16.msra.mxu1 %v7366_v9 }
0x25e9   :  { %7058 = vmatprep.subr.bf16.mxu1 %v9815_v5 }
0x25ec   :  { %7059 = vmatpush3.bf16.msra.mxu1 %v7367_v27 }
0x25ef   :  { %7061 = vmatmul.mubr.msk.bf16.vlgmr.msra.gmra.mxu1 %vm471_vm1, %v5100_v19 }
0x269f   :  { %v5171_v1 = vpop.f32.mrf.mxu1 }
0x26a1   :  { %v7050_v52 = vpop.f32.mrf.mxu1 }
0x26a3   :  { %v5174_v33 = vpop.f32.mrf.mxu1 }
0x26a5   :  { %v7051_v35 = vpop.f32.mrf.mxu1 }
0x26af   :  { %v5238_v36 = vpop.f32.mrf.mxu1 }
0x26b0   :  { %v5239_v38 = vadd.f32 %v5238_v36, %v5171_v1 }
0x26b1   :  { %v7062_v39 = vpop.f32.mrf.mxu1 }
0x26b2   :  { %v5251_v62 = vadd.f32 %v5941_v37, %v5239_v38 }
0x26b3   :  { %v5241_v17 = vpop.f32.mrf.mxu1 }
0x26b4   :  { %v5252_v0 = vmax.f32 %v5251_v62, 0.0 }
0x26b5   :  { %v7063_v5 = vpop.f32.mrf.mxu1 }
0x26b6   :  { %v5261_v21 = vpack.c.bf16 %v5252_v0, %v5252_v0 }
0x26b8   :  { %7073 = vmatmul.mubr.msk.bf16.vlgmr.msra.gmra.mxu0 %vm471_vm1, %v5261_v21 }
0x2778   :  { %v5330_v22 = vpop.f32.mrf.mxu0 }
0x2779   :  { %v5331_v23 = vadd.f32 %v5942_v29, %v5330_v22 }
0x277a   :  { %v7074_v53 = vpop.f32.mrf.mxu0 }
0x277b   :  { %5337 = vst.msk [vmem:[#allocation2] sm:$0x3] %vm5336_vm5, %v5331_v23 }
0x277c   :  { %v5333_v10 = vpop.f32.mrf.mxu0 }
0x277d   :  { %7471 = shalt.err (!%p7468_p4)
}
0x277e   :  { %s9860_s20 = sld [smem:[#allocation33_spill]]  ;;  %v7075_v31 = vpop.f32.mrf.mxu0 }
0x2784   :  { %5347 = dma.vmem_to_hbm [thread:$0]  %s5345_s18, 32, %s9860_s20, [#allocation3]  }
0x2785   :  { %7480 = dma.done.wait [#allocation3], 32  }
0x2786   :  { %7481 = vsyncadd [#allocation3], 4294967264 }
0x2787   :  { %5351 = vsyncpa [#allocation3], 1 }

</bundles_post_ra>
